<compile_context>
chip_gen: v6e
topology: v6e:2x2x1
jax: 0.10.0
libtpu: 0.0.40
codegen_flags: <defaults>
</compile_context>

<pallas_src>
import numpy as np
import jax
import jax.numpy as jnp
from jax.experimental import pallas as pl
from jax.experimental.pallas import tpu as pltpu


# Static architecture constants (CNN_encoder_simple).
K1_PAD = 32            # conv1 im2col K (3*3*3 = 27), zero-padded to 32
H1_HW = 16             # conv1 output spatial (32x32 -> 16x16, stride 2)
H2_HW = 8              # conv2 output spatial (16x16 -> 8x8, stride 2)
C1 = 16                # conv1 out channels
C2 = 32                # conv2 out channels
FLAT = C2 * H2_HW * H2_HW   # 2048 = fc input dim


# ----------------------------------------------------------------------------
# Pallas kernels
# ----------------------------------------------------------------------------
def _encode_kernel(p1_ref, w1_ref, b1_ref, sel_ref, w2_ref, b2_ref, h2_ref):
    """Per-sample fused conv1+ReLU+conv2+ReLU; h1 stays resident in VMEM."""
    # conv1 as matmul: (256, 32) @ (32, 16) + b1, ReLU.
    h1 = jnp.dot(p1_ref[0], w1_ref[...], preferred_element_type=jnp.float32)
    h1 = jnp.maximum(h1 + b1_ref[...], 0.0)                       # (256, 16)
    # conv2 (k=3, s=2, p=1) as 9 selection-matmul taps (all MXU, no gathers):
    #   z2 += (sel[t] @ h1) @ w2[t]
    acc = jnp.zeros((H2_HW * H2_HW, C2), jnp.float32)
    for t in range(9):
        g = jnp.dot(sel_ref[t], h1, preferred_element_type=jnp.float32)      # (64, 16)
        acc = acc + jnp.dot(g, w2_ref[t], preferred_element_type=jnp.float32)  # (64, 32)
    h2_ref[0] = jnp.maximum(acc + b2_ref[...], 0.0)               # (64, 32)


def encode_batch(p1, w1, b1, sel, w2, b2):
    """p1: (N, 256, 32) im2col patches -> (N, 64, 32) conv2 activations."""
    N = p1.shape[0]
    return pl.pallas_call(
        _encode_kernel,
        out_shape=jax.ShapeDtypeStruct((N, H2_HW * H2_HW, C2), jnp.float32),
        grid=(N,),
        in_specs=[
            pl.BlockSpec((1, H1_HW * H1_HW, K1_PAD), lambda n: (n, 0, 0)),
            pl.BlockSpec(w1.shape, lambda n: (0, 0)),
            pl.BlockSpec(b1.shape, lambda n: (0, 0)),
            pl.BlockSpec(sel.shape, lambda n: (0, 0, 0)),
            pl.BlockSpec(w2.shape, lambda n: (0, 0, 0)),
            pl.BlockSpec(b2.shape, lambda n: (0, 0)),
        ],
        out_specs=pl.BlockSpec((1, H2_HW * H2_HW, C2), lambda n: (n, 0, 0)),
        compiler_params=pltpu.CompilerParams(
            dimension_semantics=("parallel",)),
    )(p1, w1, b1, sel, w2, b2)


def _head_kernel(x_ref, wfc_ref, bfc_ref, wsem_ref, bsem_ref, o_ref):
    """fea = x @ Wfc + bfc ; out = fea @ Wsem + bsem (no activation, as in PyTorch)."""
    fea = jnp.dot(x_ref[...], wfc_ref[...], preferred_element_type=jnp.float32)
    fea = fea + bfc_ref[...]
    out = jnp.dot(fea, wsem_ref[...], preferred_element_type=jnp.float32)
    o_ref[...] = (out + bsem_ref[...]).astype(o_ref.dtype)


def head(flat, wfc, bfc, wsem, bsem, row_tile=128):
    """flat: (N, 2048) -> (N, 512).  Single grid step for small N; row-tiled
    parallel grid (v7x megacore) with zero-pad + slice for large N."""
    N, K = flat.shape
    H = wsem.shape[1]
    tm = N if N <= row_tile else row_tile
    n_pad = (-N) % tm
    if n_pad:
        flat = jnp.pad(flat, ((0, n_pad), (0, 0)))
    Np = N + n_pad
    out = pl.pallas_call(
        _head_kernel,
        out_shape=jax.ShapeDtypeStruct((Np, H), jnp.float32),
        grid=(Np // tm,),
        in_specs=[
            pl.BlockSpec((tm, K), lambda i: (i, 0)),
            pl.BlockSpec(wfc.shape, lambda i: (0, 0)),
            pl.BlockSpec(bfc.shape, lambda i: (0, 0)),
            pl.BlockSpec(wsem.shape, lambda i: (0, 0)),
            pl.BlockSpec(bsem.shape, lambda i: (0, 0)),
        ],
        out_specs=pl.BlockSpec((tm, H), lambda i: (i, 0)),
        compiler_params=pltpu.CompilerParams(
            dimension_semantics=("parallel",)),
    )(flat, wfc, bfc, wsem, bsem)
    return out[:N] if n_pad else out


# ----------------------------------------------------------------------------
# Plain-JAX glue (pure indexing / reshape, runs once per forward)
# ----------------------------------------------------------------------------
def nearest_resize_nhwc(x, out_h, out_w):
    """F.interpolate(mode='nearest') semantics: src = floor(dst * in/out)."""
    _, H, W, _ = x.shape
    rows = (jnp.arange(out_h) * H) // out_h
    cols = (jnp.arange(out_w) * W) // out_w
    return x[:, rows][:, :, cols]


def im2col_conv1(x_nhwc):
    """NHWC 32x32x3 -> (N, 256, 32) patches, column order (kh, kw, cin), K zero-padded."""
    N, H, W, C = x_nhwc.shape
    k, stride, pad = 3, 2, 1
    xp = jnp.pad(x_nhwc, ((0, 0), (pad, pad), (pad, pad), (0, 0)))
    Ho = (H + 2 * pad - k) // stride + 1
    Wo = (W + 2 * pad - k) // stride + 1
    cols = []
    for kh in range(k):
        for kw in range(k):
            cols.append(xp[:, kh:kh + stride * (Ho - 1) + 1:stride,
                           kw:kw + stride * (Wo - 1) + 1:stride, :])
    cols.append(jnp.zeros((N, Ho, Wo, K1_PAD - k * k * C), x_nhwc.dtype))
    patches = jnp.concatenate(cols, axis=-1)          # (N, 16, 16, 32)
    return patches.reshape(N, Ho * Wo, K1_PAD)


# ----------------------------------------------------------------------------
# Parameters: synthetic init in PyTorch layouts, then one-time kernel re-layout
# ----------------------------------------------------------------------------
def init_params(key, num_classes, hidden_size=512):
    ks = jax.random.split(key, 10)

    def w(k, fan_in, shape):
        return (jax.random.normal(k, shape, jnp.float32)
                / jnp.sqrt(jnp.float32(fan_in)))

    return {
        "conv1_w": w(ks[0], 27, (16, 3, 3, 3)),       # (Cout, Cin, kH, kW)
        "conv1_b": w(ks[1], 27, (16,)),
        "conv2_w": w(ks[2], 144, (32, 16, 3, 3)),
        "conv2_b": w(ks[3], 144, (32,)),
        "fc_w":    w(ks[4], FLAT, (hidden_size, FLAT)),   # (out, in)
        "fc_b":    w(ks[5], FLAT, (hidden_size,)),
        "sem_w":   w(ks[6], hidden_size, (hidden_size, hidden_size)),
        "sem_b":   w(ks[7], hidden_size, (hidden_size,)),
        "cls_w":   w(ks[8], hidden_size, (num_classes, hidden_size)),  # unused (name='mycnn')
        "cls_b":   w(ks[9], hidden_size, (num_classes,)),
    }


def _make_conv2_selection():
    """(9, 64, 256) 0/1 matrices: tap (kh,kw) picks h1 rows (2oh+kh-1, 2ow+kw-1),
    with zero rows for padded positions."""
    sel = np.zeros((9, H2_HW * H2_HW, H1_HW * H1_HW), np.float32)
    for kh in range(3):
        for kw in range(3):
            t = kh * 3 + kw
            for oh in range(H2_HW):
                for ow in range(H2_HW):
                    ih, iw = 2 * oh + kh - 1, 2 * ow + kw - 1
                    if 0 <= ih < H1_HW and 0 <= iw < H1_HW:
                        sel[t, oh * H2_HW + ow, ih * H1_HW + iw] = 1.0
    return jnp.asarray(sel)


def prepare_params(params):
    """One-time re-layout of PyTorch-style weights into kernel layouts."""
    # conv1: (16,3,3,3) -> (27,16) rows ordered (kh,kw,cin), zero-padded to 32 rows.
    w1 = jnp.transpose(params["conv1_w"], (2, 3, 1, 0)).reshape(27, C1)
    w1 = jnp.pad(w1, ((0, K1_PAD - 27), (0, 0)))
    # conv2: (32,16,3,3) -> per-tap (9,16,32), tap = kh*3+kw.
    w2 = jnp.transpose(params["conv2_w"], (2, 3, 1, 0)).reshape(9, C1, C2)
    # fc: PyTorch flattens NCHW => input index c*64 + p.  Our conv kernel emits
    # (p, c), so pre-permute rows to p*32 + c (folds the flatten transpose).
    wfc = params["fc_w"].T.reshape(C2, H2_HW * H2_HW, -1)       # (32, 64, 512) [c, p, j]
    wfc = jnp.transpose(wfc, (1, 0, 2)).reshape(FLAT, -1)       # (2048, 512)  [p*32+c, j]
    return {
        "w1": w1, "b1": params["conv1_b"].reshape(1, C1),
        "w2": w2, "b2": params["conv2_b"].reshape(1, C2),
        "sel": _make_conv2_selection(),
        "wfc": wfc, "bfc": params["fc_b"].reshape(1, -1),
        "wsem": params["sem_w"].T, "bsem": params["sem_b"].reshape(1, -1),
    }


# ----------------------------------------------------------------------------
# AECLS forward (default name='mycnn' path: semantic_branch(encoder(x)))
# ----------------------------------------------------------------------------
@jax.jit
def aecls_forward(prep, x_nchw):
    N = x_nchw.shape[0]
    x = jnp.transpose(x_nchw, (0, 2, 3, 1))            # NCHW -> NHWC (tiny)
    x = nearest_resize_nhwc(x, 32, 32)                 # F.interpolate(size=(32,32))
    p1 = im2col_conv1(x)                               # (N, 256, 32)
    h2 = encode_batch(p1, prep["w1"], prep["b1"], prep["sel"],
                      prep["w2"], prep["b2"])          # (N, 64, 32)
    flat = h2.reshape(N, FLAT)                         # contiguous reshape (free)
    return head(flat, prep["wfc"], prep["bfc"], prep["wsem"], prep["bsem"])


if __name__ == "__main__":
    key = jax.random.PRNGKey(0)
    pkey, xkey = jax.random.split(key)
    params = init_params(pkey, num_classes=10, hidden_size=512)
    prep = prepare_params(params)                      # one-time weight re-layout
    x = jax.random.normal(xkey, (2, 3, 16, 16), jnp.float32)   # NCHW, like PyTorch
    out = aecls_forward(prep, x)
    out = jax.block_until_ready(out)
    assert out.shape == (2, 512), out.shape
    assert bool(jnp.all(jnp.isfinite(out)))
    print("KERNEL_OK")
</pallas_src>

<mosaic_0001>
module attributes {stable_mosaic.version = 11 : i64} {
  func.func @_encode_kernel(%arg0: i32, %arg1: memref<1x256x32xf32, #tpu.memory_space<vmem>>, %arg2: memref<32x16xf32, #tpu.memory_space<vmem>>, %arg3: memref<1x16xf32, #tpu.memory_space<vmem>>, %arg4: memref<9x64x256xf32, #tpu.memory_space<vmem>>, %arg5: memref<9x16x32xf32, #tpu.memory_space<vmem>>, %arg6: memref<1x32xf32, #tpu.memory_space<vmem>>, %arg7: memref<1x64x32xf32, #tpu.memory_space<vmem>>) attributes {dimension_semantics = [#tpu.dimension_semantics<parallel>], iteration_bounds = array<i64: 2>, scalar_prefetch = 0 : i64, scratch_operands = 0 : i64, tpu.core_type = #tpu.core_type<tc>, window_params = [{transform_indices = @transform_0, window_bounds = array<i64: 1, 256, 32>}, {pipeline_mode = #tpu.pipeline_mode<synchronous>, transform_indices = @transform_1, window_bounds = array<i64: 32, 16>}, {pipeline_mode = #tpu.pipeline_mode<synchronous>, transform_indices = @transform_2, window_bounds = array<i64: 1, 16>}, {pipeline_mode = #tpu.pipeline_mode<synchronous>, transform_indices = @transform_3, window_bounds = array<i64: 9, 64, 256>}, {pipeline_mode = #tpu.pipeline_mode<synchronous>, transform_indices = @transform_4, window_bounds = array<i64: 9, 16, 32>}, {pipeline_mode = #tpu.pipeline_mode<synchronous>, transform_indices = @transform_5, window_bounds = array<i64: 1, 32>}, {transform_indices = @transform_6, window_bounds = array<i64: 1, 64, 32>}]} {
    %c0 = arith.constant 0 : index
    %c0_0 = arith.constant 0 : index
    %c0_1 = arith.constant 0 : index
    %0 = vector.load %arg1[%c0, %c0_0, %c0_1] : memref<1x256x32xf32, #tpu.memory_space<vmem>>, vector<1x256x32xf32>
    %1 = vector.shape_cast %0 : vector<1x256x32xf32> to vector<256x32xf32>
    %c0_2 = arith.constant 0 : index
    %c0_3 = arith.constant 0 : index
    %2 = vector.load %arg2[%c0_2, %c0_3] : memref<32x16xf32, #tpu.memory_space<vmem>>, vector<32x16xf32>
    %cst = arith.constant dense<0.000000e+00> : vector<256x16xf32>
    %3 = tpu.matmul %1, %2, %cst {dimension_numbers = #tpu.dot_dimension_numbers<[1], [0], [0], [1], [0, 0, 1, 1], [], []>} : vector<256x32xf32>, vector<32x16xf32>, vector<256x16xf32> -> vector<256x16xf32>
    %c0_4 = arith.constant 0 : index
    %c0_5 = arith.constant 0 : index
    %4 = vector.load %arg3[%c0_4, %c0_5] : memref<1x16xf32, #tpu.memory_space<vmem>>, vector<1x16xf32>
    %5 = vector.broadcast %4 : vector<1x16xf32> to vector<256x16xf32>
    %6 = arith.addf %3, %5 : vector<256x16xf32>
    %cst_6 = arith.constant 0.000000e+00 : f32
    %7 = vector.broadcast %cst_6 : f32 to vector<256x16xf32>
    %8 = arith.maximumf %6, %7 : vector<256x16xf32>
    %cst_7 = arith.constant 0.000000e+00 : f32
    %9 = vector.broadcast %cst_7 : f32 to vector<64x32xf32>
    %c0_8 = arith.constant 0 : index
    %c0_9 = arith.constant 0 : index
    %c0_10 = arith.constant 0 : index
    %10 = vector.load %arg4[%c0_8, %c0_9, %c0_10] : memref<9x64x256xf32, #tpu.memory_space<vmem>>, vector<1x64x256xf32>
    %11 = vector.shape_cast %10 : vector<1x64x256xf32> to vector<64x256xf32>
    %cst_11 = arith.constant dense<0.000000e+00> : vector<64x16xf32>
    %12 = tpu.matmul %11, %8, %cst_11 {dimension_numbers = #tpu.dot_dimension_numbers<[1], [0], [0], [1], [0, 0, 1, 1], [], []>} : vector<64x256xf32>, vector<256x16xf32>, vector<64x16xf32> -> vector<64x16xf32>
    %c0_12 = arith.constant 0 : index
    %c0_13 = arith.constant 0 : index
    %c0_14 = arith.constant 0 : index
    %13 = vector.load %arg5[%c0_12, %c0_13, %c0_14] : memref<9x16x32xf32, #tpu.memory_space<vmem>>, vector<1x16x32xf32>
    %14 = vector.shape_cast %13 : vector<1x16x32xf32> to vector<16x32xf32>
    %cst_15 = arith.constant dense<0.000000e+00> : vector<64x32xf32>
    %15 = tpu.matmul %12, %14, %cst_15 {dimension_numbers = #tpu.dot_dimension_numbers<[1], [0], [0], [1], [0, 0, 1, 1], [], []>} : vector<64x16xf32>, vector<16x32xf32>, vector<64x32xf32> -> vector<64x32xf32>
    %16 = arith.addf %9, %15 : vector<64x32xf32>
    %c1 = arith.constant 1 : index
    %c0_16 = arith.constant 0 : index
    %c0_17 = arith.constant 0 : index
    %17 = vector.load %arg4[%c1, %c0_16, %c0_17] : memref<9x64x256xf32, #tpu.memory_space<vmem>>, vector<1x64x256xf32>
    %18 = vector.shape_cast %17 : vector<1x64x256xf32> to vector<64x256xf32>
    %cst_18 = arith.constant dense<0.000000e+00> : vector<64x16xf32>
    %19 = tpu.matmul %18, %8, %cst_18 {dimension_numbers = #tpu.dot_dimension_numbers<[1], [0], [0], [1], [0, 0, 1, 1], [], []>} : vector<64x256xf32>, vector<256x16xf32>, vector<64x16xf32> -> vector<64x16xf32>
    %c1_19 = arith.constant 1 : index
    %c0_20 = arith.constant 0 : index
    %c0_21 = arith.constant 0 : index
    %20 = vector.load %arg5[%c1_19, %c0_20, %c0_21] : memref<9x16x32xf32, #tpu.memory_space<vmem>>, vector<1x16x32xf32>
    %21 = vector.shape_cast %20 : vector<1x16x32xf32> to vector<16x32xf32>
    %cst_22 = arith.constant dense<0.000000e+00> : vector<64x32xf32>
    %22 = tpu.matmul %19, %21, %cst_22 {dimension_numbers = #tpu.dot_dimension_numbers<[1], [0], [0], [1], [0, 0, 1, 1], [], []>} : vector<64x16xf32>, vector<16x32xf32>, vector<64x32xf32> -> vector<64x32xf32>
    %23 = arith.addf %16, %22 : vector<64x32xf32>
    %c2 = arith.constant 2 : index
    %c0_23 = arith.constant 0 : index
    %c0_24 = arith.constant 0 : index
    %24 = vector.load %arg4[%c2, %c0_23, %c0_24] : memref<9x64x256xf32, #tpu.memory_space<vmem>>, vector<1x64x256xf32>
    %25 = vector.shape_cast %24 : vector<1x64x256xf32> to vector<64x256xf32>
    %cst_25 = arith.constant dense<0.000000e+00> : vector<64x16xf32>
    %26 = tpu.matmul %25, %8, %cst_25 {dimension_numbers = #tpu.dot_dimension_numbers<[1], [0], [0], [1], [0, 0, 1, 1], [], []>} : vector<64x256xf32>, vector<256x16xf32>, vector<64x16xf32> -> vector<64x16xf32>
    %c2_26 = arith.constant 2 : index
    %c0_27 = arith.constant 0 : index
    %c0_28 = arith.constant 0 : index
    %27 = vector.load %arg5[%c2_26, %c0_27, %c0_28] : memref<9x16x32xf32, #tpu.memory_space<vmem>>, vector<1x16x32xf32>
    %28 = vector.shape_cast %27 : vector<1x16x32xf32> to vector<16x32xf32>
    %cst_29 = arith.constant dense<0.000000e+00> : vector<64x32xf32>
    %29 = tpu.matmul %26, %28, %cst_29 {dimension_numbers = #tpu.dot_dimension_numbers<[1], [0], [0], [1], [0, 0, 1, 1], [], []>} : vector<64x16xf32>, vector<16x32xf32>, vector<64x32xf32> -> vector<64x32xf32>
    %30 = arith.addf %23, %29 : vector<64x32xf32>
    %c3 = arith.constant 3 : index
    %c0_30 = arith.constant 0 : index
    %c0_31 = arith.constant 0 : index
    %31 = vector.load %arg4[%c3, %c0_30, %c0_31] : memref<9x64x256xf32, #tpu.memory_space<vmem>>, vector<1x64x256xf32>
    %32 = vector.shape_cast %31 : vector<1x64x256xf32> to vector<64x256xf32>
    %cst_32 = arith.constant dense<0.000000e+00> : vector<64x16xf32>
    %33 = tpu.matmul %32, %8, %cst_32 {dimension_numbers = #tpu.dot_dimension_numbers<[1], [0], [0], [1], [0, 0, 1, 1], [], []>} : vector<64x256xf32>, vector<256x16xf32>, vector<64x16xf32> -> vector<64x16xf32>
    %c3_33 = arith.constant 3 : index
    %c0_34 = arith.constant 0 : index
    %c0_35 = arith.constant 0 : index
    %34 = vector.load %arg5[%c3_33, %c0_34, %c0_35] : memref<9x16x32xf32, #tpu.memory_space<vmem>>, vector<1x16x32xf32>
    %35 = vector.shape_cast %34 : vector<1x16x32xf32> to vector<16x32xf32>
    %cst_36 = arith.constant dense<0.000000e+00> : vector<64x32xf32>
    %36 = tpu.matmul %33, %35, %cst_36 {dimension_numbers = #tpu.dot_dimension_numbers<[1], [0], [0], [1], [0, 0, 1, 1], [], []>} : vector<64x16xf32>, vector<16x32xf32>, vector<64x32xf32> -> vector<64x32xf32>
    %37 = arith.addf %30, %36 : vector<64x32xf32>
    %c4 = arith.constant 4 : index
    %c0_37 = arith.constant 0 : index
    %c0_38 = arith.constant 0 : index
    %38 = vector.load %arg4[%c4, %c0_37, %c0_38] : memref<9x64x256xf32, #tpu.memory_space<vmem>>, vector<1x64x256xf32>
    %39 = vector.shape_cast %38 : vector<1x64x256xf32> to vector<64x256xf32>
    %cst_39 = arith.constant dense<0.000000e+00> : vector<64x16xf32>
    %40 = tpu.matmul %39, %8, %cst_39 {dimension_numbers = #tpu.dot_dimension_numbers<[1], [0], [0], [1], [0, 0, 1, 1], [], []>} : vector<64x256xf32>, vector<256x16xf32>, vector<64x16xf32> -> vector<64x16xf32>
    %c4_40 = arith.constant 4 : index
    %c0_41 = arith.constant 0 : index
    %c0_42 = arith.constant 0 : index
    %41 = vector.load %arg5[%c4_40, %c0_41, %c0_42] : memref<9x16x32xf32, #tpu.memory_space<vmem>>, vector<1x16x32xf32>
    %42 = vector.shape_cast %41 : vector<1x16x32xf32> to vector<16x32xf32>
    %cst_43 = arith.constant dense<0.000000e+00> : vector<64x32xf32>
    %43 = tpu.matmul %40, %42, %cst_43 {dimension_numbers = #tpu.dot_dimension_numbers<[1], [0], [0], [1], [0, 0, 1, 1], [], []>} : vector<64x16xf32>, vector<16x32xf32>, vector<64x32xf32> -> vector<64x32xf32>
    %44 = arith.addf %37, %43 : vector<64x32xf32>
    %c5 = arith.constant 5 : index
    %c0_44 = arith.constant 0 : index
    %c0_45 = arith.constant 0 : index
    %45 = vector.load %arg4[%c5, %c0_44, %c0_45] : memref<9x64x256xf32, #tpu.memory_space<vmem>>, vector<1x64x256xf32>
    %46 = vector.shape_cast %45 : vector<1x64x256xf32> to vector<64x256xf32>
    %cst_46 = arith.constant dense<0.000000e+00> : vector<64x16xf32>
    %47 = tpu.matmul %46, %8, %cst_46 {dimension_numbers = #tpu.dot_dimension_numbers<[1], [0], [0], [1], [0, 0, 1, 1], [], []>} : vector<64x256xf32>, vector<256x16xf32>, vector<64x16xf32> -> vector<64x16xf32>
    %c5_47 = arith.constant 5 : index
    %c0_48 = arith.constant 0 : index
    %c0_49 = arith.constant 0 : index
    %48 = vector.load %arg5[%c5_47, %c0_48, %c0_49] : memref<9x16x32xf32, #tpu.memory_space<vmem>>, vector<1x16x32xf32>
    %49 = vector.shape_cast %48 : vector<1x16x32xf32> to vector<16x32xf32>
    %cst_50 = arith.constant dense<0.000000e+00> : vector<64x32xf32>
    %50 = tpu.matmul %47, %49, %cst_50 {dimension_numbers = #tpu.dot_dimension_numbers<[1], [0], [0], [1], [0, 0, 1, 1], [], []>} : vector<64x16xf32>, vector<16x32xf32>, vector<64x32xf32> -> vector<64x32xf32>
    %51 = arith.addf %44, %50 : vector<64x32xf32>
    %c6 = arith.constant 6 : index
    %c0_51 = arith.constant 0 : index
    %c0_52 = arith.constant 0 : index
    %52 = vector.load %arg4[%c6, %c0_51, %c0_52] : memref<9x64x256xf32, #tpu.memory_space<vmem>>, vector<1x64x256xf32>
    %53 = vector.shape_cast %52 : vector<1x64x256xf32> to vector<64x256xf32>
    %cst_53 = arith.constant dense<0.000000e+00> : vector<64x16xf32>
    %54 = tpu.matmul %53, %8, %cst_53 {dimension_numbers = #tpu.dot_dimension_numbers<[1], [0], [0], [1], [0, 0, 1, 1], [], []>} : vector<64x256xf32>, vector<256x16xf32>, vector<64x16xf32> -> vector<64x16xf32>
    %c6_54 = arith.constant 6 : index
    %c0_55 = arith.constant 0 : index
    %c0_56 = arith.constant 0 : index
    %55 = vector.load %arg5[%c6_54, %c0_55, %c0_56] : memref<9x16x32xf32, #tpu.memory_space<vmem>>, vector<1x16x32xf32>
    %56 = vector.shape_cast %55 : vector<1x16x32xf32> to vector<16x32xf32>
    %cst_57 = arith.constant dense<0.000000e+00> : vector<64x32xf32>
    %57 = tpu.matmul %54, %56, %cst_57 {dimension_numbers = #tpu.dot_dimension_numbers<[1], [0], [0], [1], [0, 0, 1, 1], [], []>} : vector<64x16xf32>, vector<16x32xf32>, vector<64x32xf32> -> vector<64x32xf32>
    %58 = arith.addf %51, %57 : vector<64x32xf32>
    %c7 = arith.constant 7 : index
    %c0_58 = arith.constant 0 : index
    %c0_59 = arith.constant 0 : index
    %59 = vector.load %arg4[%c7, %c0_58, %c0_59] : memref<9x64x256xf32, #tpu.memory_space<vmem>>, vector<1x64x256xf32>
    %60 = vector.shape_cast %59 : vector<1x64x256xf32> to vector<64x256xf32>
    %cst_60 = arith.constant dense<0.000000e+00> : vector<64x16xf32>
    %61 = tpu.matmul %60, %8, %cst_60 {dimension_numbers = #tpu.dot_dimension_numbers<[1], [0], [0], [1], [0, 0, 1, 1], [], []>} : vector<64x256xf32>, vector<256x16xf32>, vector<64x16xf32> -> vector<64x16xf32>
    %c7_61 = arith.constant 7 : index
    %c0_62 = arith.constant 0 : index
    %c0_63 = arith.constant 0 : index
    %62 = vector.load %arg5[%c7_61, %c0_62, %c0_63] : memref<9x16x32xf32, #tpu.memory_space<vmem>>, vector<1x16x32xf32>
    %63 = vector.shape_cast %62 : vector<1x16x32xf32> to vector<16x32xf32>
    %cst_64 = arith.constant dense<0.000000e+00> : vector<64x32xf32>
    %64 = tpu.matmul %61, %63, %cst_64 {dimension_numbers = #tpu.dot_dimension_numbers<[1], [0], [0], [1], [0, 0, 1, 1], [], []>} : vector<64x16xf32>, vector<16x32xf32>, vector<64x32xf32> -> vector<64x32xf32>
    %65 = arith.addf %58, %64 : vector<64x32xf32>
    %c8 = arith.constant 8 : index
    %c0_65 = arith.constant 0 : index
    %c0_66 = arith.constant 0 : index
    %66 = vector.load %arg4[%c8, %c0_65, %c0_66] : memref<9x64x256xf32, #tpu.memory_space<vmem>>, vector<1x64x256xf32>
    %67 = vector.shape_cast %66 : vector<1x64x256xf32> to vector<64x256xf32>
    %cst_67 = arith.constant dense<0.000000e+00> : vector<64x16xf32>
    %68 = tpu.matmul %67, %8, %cst_67 {dimension_numbers = #tpu.dot_dimension_numbers<[1], [0], [0], [1], [0, 0, 1, 1], [], []>} : vector<64x256xf32>, vector<256x16xf32>, vector<64x16xf32> -> vector<64x16xf32>
    %c8_68 = arith.constant 8 : index
    %c0_69 = arith.constant 0 : index
    %c0_70 = arith.constant 0 : index
    %69 = vector.load %arg5[%c8_68, %c0_69, %c0_70] : memref<9x16x32xf32, #tpu.memory_space<vmem>>, vector<1x16x32xf32>
    %70 = vector.shape_cast %69 : vector<1x16x32xf32> to vector<16x32xf32>
    %cst_71 = arith.constant dense<0.000000e+00> : vector<64x32xf32>
    %71 = tpu.matmul %68, %70, %cst_71 {dimension_numbers = #tpu.dot_dimension_numbers<[1], [0], [0], [1], [0, 0, 1, 1], [], []>} : vector<64x16xf32>, vector<16x32xf32>, vector<64x32xf32> -> vector<64x32xf32>
    %72 = arith.addf %65, %71 : vector<64x32xf32>
    %c0_72 = arith.constant 0 : index
    %c0_73 = arith.constant 0 : index
    %73 = vector.load %arg6[%c0_72, %c0_73] : memref<1x32xf32, #tpu.memory_space<vmem>>, vector<1x32xf32>
    %74 = vector.broadcast %73 : vector<1x32xf32> to vector<64x32xf32>
    %75 = arith.addf %72, %74 : vector<64x32xf32>
    %cst_74 = arith.constant 0.000000e+00 : f32
    %76 = vector.broadcast %cst_74 : f32 to vector<64x32xf32>
    %77 = arith.maximumf %75, %76 : vector<64x32xf32>
    %c0_75 = arith.constant 0 : index
    %c0_76 = arith.constant 0 : index
    %c0_77 = arith.constant 0 : index
    %78 = vector.load %arg7[%c0_75, %c0_76, %c0_77] : memref<1x64x32xf32, #tpu.memory_space<vmem>>, vector<1x64x32xf32>
    %79 = vector.shape_cast %78 : vector<1x64x32xf32> to vector<64x32xf32>
    %80 = vector.shape_cast %77 : vector<64x32xf32> to vector<1x64x32xf32>
    tpu.vector_store %arg7[%c0_75, %c0_76, %c0_77], %80 {strides = array<i32>} : memref<1x64x32xf32, #tpu.memory_space<vmem>>, vector<1x64x32xf32>,
    return
  }
  func.func @transform_0(%arg0: i32) -> (i32, i32, i32) {
    %c0_i32 = arith.constant 0 : i32
    %c0_i32_0 = arith.constant 0 : i32
    %c0_i32_1 = arith.constant 0 : i32
    return %arg0, %c0_i32, %c0_i32_0 : i32, i32, i32
  }
  func.func @transform_1(%arg0: i32) -> (i32, i32) {
    %c0_i32 = arith.constant 0 : i32
    %c0_i32_0 = arith.constant 0 : i32
    %c0_i32_1 = arith.constant 0 : i32
    return %c0_i32, %c0_i32_0 : i32, i32
  }
  func.func @transform_2(%arg0: i32) -> (i32, i32) {
    %c0_i32 = arith.constant 0 : i32
    %c0_i32_0 = arith.constant 0 : i32
    %c0_i32_1 = arith.constant 0 : i32
    return %c0_i32, %c0_i32_0 : i32, i32
  }
  func.func @transform_3(%arg0: i32) -> (i32, i32, i32) {
    %c0_i32 = arith.constant 0 : i32
    %c0_i32_0 = arith.constant 0 : i32
    %c0_i32_1 = arith.constant 0 : i32
    %c0_i32_2 = arith.constant 0 : i32
    return %c0_i32, %c0_i32_0, %c0_i32_1 : i32, i32, i32
  }
  func.func @transform_4(%arg0: i32) -> (i32, i32, i32) {
    %c0_i32 = arith.constant 0 : i32
    %c0_i32_0 = arith.constant 0 : i32
    %c0_i32_1 = arith.constant 0 : i32
    %c0_i32_2 = arith.constant 0 : i32
    return %c0_i32, %c0_i32_0, %c0_i32_1 : i32, i32, i32
  }
  func.func @transform_5(%arg0: i32) -> (i32, i32) {
    %c0_i32 = arith.constant 0 : i32
    %c0_i32_0 = arith.constant 0 : i32
    %c0_i32_1 = arith.constant 0 : i32
    return %c0_i32, %c0_i32_0 : i32, i32
  }
  func.func @transform_6(%arg0: i32) -> (i32, i32, i32) {
    %c0_i32 = arith.constant 0 : i32
    %c0_i32_0 = arith.constant 0 : i32
    %c0_i32_1 = arith.constant 0 : i32
    return %arg0, %c0_i32, %c0_i32_0 : i32, i32, i32
  }
}

module attributes {stable_mosaic.version = 11 : i64} {
  func.func @_head_kernel(%arg0: i32, %arg1: memref<2x2048xf32, #tpu.memory_space<vmem>>, %arg2: memref<2048x512xf32, #tpu.memory_space<vmem>>, %arg3: memref<1x512xf32, #tpu.memory_space<vmem>>, %arg4: memref<512x512xf32, #tpu.memory_space<vmem>>, %arg5: memref<1x512xf32, #tpu.memory_space<vmem>>, %arg6: memref<2x512xf32, #tpu.memory_space<vmem>>) attributes {dimension_semantics = [#tpu.dimension_semantics<parallel>], iteration_bounds = array<i64: 1>, scalar_prefetch = 0 : i64, scratch_operands = 0 : i64, tpu.core_type = #tpu.core_type<tc>, window_params = [{transform_indices = @transform_0, window_bounds = array<i64: 2, 2048>}, {pipeline_mode = #tpu.pipeline_mode<synchronous>, transform_indices = @transform_1, window_bounds = array<i64: 2048, 512>}, {pipeline_mode = #tpu.pipeline_mode<synchronous>, transform_indices = @transform_2, window_bounds = array<i64: 1, 512>}, {pipeline_mode = #tpu.pipeline_mode<synchronous>, transform_indices = @transform_3, window_bounds = array<i64: 512, 512>}, {pipeline_mode = #tpu.pipeline_mode<synchronous>, transform_indices = @transform_4, window_bounds = array<i64: 1, 512>}, {transform_indices = @transform_5, window_bounds = array<i64: 2, 512>}]} {
    %c0 = arith.constant 0 : index
    %c0_0 = arith.constant 0 : index
    %0 = vector.load %arg1[%c0, %c0_0] : memref<2x2048xf32, #tpu.memory_space<vmem>>, vector<2x2048xf32>
    %c0_1 = arith.constant 0 : index
    %c0_2 = arith.constant 0 : index
    %1 = vector.load %arg2[%c0_1, %c0_2] : memref<2048x512xf32, #tpu.memory_space<vmem>>, vector<2048x512xf32>
    %cst = arith.constant dense<0.000000e+00> : vector<2x512xf32>
    %2 = tpu.matmul %0, %1, %cst {dimension_numbers = #tpu.dot_dimension_numbers<[1], [0], [0], [1], [0, 0, 1, 1], [], []>} : vector<2x2048xf32>, vector<2048x512xf32>, vector<2x512xf32> -> vector<2x512xf32>
    %c0_3 = arith.constant 0 : index
    %c0_4 = arith.constant 0 : index
    %3 = vector.load %arg3[%c0_3, %c0_4] : memref<1x512xf32, #tpu.memory_space<vmem>>, vector<1x512xf32>
    %4 = vector.broadcast %3 : vector<1x512xf32> to vector<2x512xf32>
    %5 = arith.addf %2, %4 : vector<2x512xf32>
    %c0_5 = arith.constant 0 : index
    %c0_6 = arith.constant 0 : index
    %6 = vector.load %arg4[%c0_5, %c0_6] : memref<512x512xf32, #tpu.memory_space<vmem>>, vector<512x512xf32>
    %cst_7 = arith.constant dense<0.000000e+00> : vector<2x512xf32>
    %7 = tpu.matmul %5, %6, %cst_7 {dimension_numbers = #tpu.dot_dimension_numbers<[1], [0], [0], [1], [0, 0, 1, 1], [], []>} : vector<2x512xf32>, vector<512x512xf32>, vector<2x512xf32> -> vector<2x512xf32>
    %c0_8 = arith.constant 0 : index
    %c0_9 = arith.constant 0 : index
    %8 = vector.load %arg5[%c0_8, %c0_9] : memref<1x512xf32, #tpu.memory_space<vmem>>, vector<1x512xf32>
    %9 = vector.broadcast %8 : vector<1x512xf32> to vector<2x512xf32>
    %10 = arith.addf %7, %9 : vector<2x512xf32>
    %c0_10 = arith.constant 0 : index
    %c0_11 = arith.constant 0 : index
    %11 = vector.load %arg6[%c0_10, %c0_11] : memref<2x512xf32, #tpu.memory_space<vmem>>, vector<2x512xf32>
    tpu.vector_store %arg6[%c0_10, %c0_11], %10 {strides = array<i32>} : memref<2x512xf32, #tpu.memory_space<vmem>>, vector<2x512xf32>,
    return
  }
  func.func @transform_0(%arg0: i32) -> (i32, i32) {
    %c0_i32 = arith.constant 0 : i32
    %c0_i32_0 = arith.constant 0 : i32
    return %arg0, %c0_i32 : i32, i32
  }
  func.func @transform_1(%arg0: i32) -> (i32, i32) {
    %c0_i32 = arith.constant 0 : i32
    %c0_i32_0 = arith.constant 0 : i32
    %c0_i32_1 = arith.constant 0 : i32
    return %c0_i32, %c0_i32_0 : i32, i32
  }
  func.func @transform_2(%arg0: i32) -> (i32, i32) {
    %c0_i32 = arith.constant 0 : i32
    %c0_i32_0 = arith.constant 0 : i32
    %c0_i32_1 = arith.constant 0 : i32
    return %c0_i32, %c0_i32_0 : i32, i32
  }
  func.func @transform_3(%arg0: i32) -> (i32, i32) {
    %c0_i32 = arith.constant 0 : i32
    %c0_i32_0 = arith.constant 0 : i32
    %c0_i32_1 = arith.constant 0 : i32
    return %c0_i32, %c0_i32_0 : i32, i32
  }
  func.func @transform_4(%arg0: i32) -> (i32, i32) {
    %c0_i32 = arith.constant 0 : i32
    %c0_i32_0 = arith.constant 0 : i32
    %c0_i32_1 = arith.constant 0 : i32
    return %c0_i32, %c0_i32_0 : i32, i32
  }
  func.func @transform_5(%arg0: i32) -> (i32, i32) {
    %c0_i32 = arith.constant 0 : i32
    %c0_i32_0 = arith.constant 0 : i32
    return %arg0, %c0_i32 : i32, i32
  }
}

</mosaic_0001>

<bundles_post_ra>
// kernel: aecls_forward.2
= control target key start
LH: loop header
LB: loop body
LE: loop exit
PB: predicated region body
PF: predicated region fallthrough
CT: control target
= control target key end

     0   :  { %s4252_s21 = smov 0   ;;  %s5475_s0 = inlined_call_operand.vmem [shape: f32[2,256,32], index: 0, kind: input, shape index: {}]   ;;  %s5476_s1 = inlined_call_operand.vmem [shape: f32[32,16], index: 1, kind: input, shape index: {}]   ;;  %s5477_s2 = inlined_call_operand.vmem [shape: f32[1,16], index: 2, kind: input, shape index: {}]   ;;  %s5478_s3 = inlined_call_operand.vmem [shape: f32[9,64,256], index: 3, kind: input, shape index: {}]   ;;  %s5479_s4 = inlined_call_operand.vmem [shape: f32[9,16,32], index: 4, kind: input, shape index: {}]   ;;  %s5480_s5 = inlined_call_operand.vmem [shape: f32[1,32], index: 5, kind: input, shape index: {}]   ;;  %s5481_s6 = inlined_call_operand.vmem [shape: f32[2,64,32], index: 6, kind: output, shape index: {}]  }
   0x1 LB: > { %s3076_s22 = sadd.s32 4294967295, %s4215_s21   ;;  %p3080_p0 = scmp.ge.s32.totalorder %s4215_s21, 1  ;;  %s4215_s21 = sphi %s4252_s21, %s16_s21  }
   0x2   : > { %p212_p1 = scmp.lt.s32.totalorder %s4215_s21, 3 }
   0x4   : > { %p213_p2 = pnand %p3080_p0, %p212_p1 }
   0x5   : > { %p242_p3 = scmp.lt.s32.totalorder (!%p213_p2), %s3076_s22, 1 }
   0x6   : > { %216 = sbr.rel (%p213_p2) target bundleno = 1592 (0x638), region = 44 }
   0xb   : > { %v287_v0 = vld [vmem:[%s5476_s1 + $0x18] sm:$0xff]  ;;  %v286_v1 = vld [vmem:[%s5476_s1 + $0x10] sm:$0xff]  ;;  %v285_v2 = vld [vmem:[%s5476_s1 + $0x8] sm:$0xff]  ;;  %s5483_s22 = smov (!%p242_p3, %s3076_s22), 1  ;;  %vm295_vm0 = vcmask 261120   ;;  %vm897_vm1 = vcmask 130048  }
   0xc   : > { %3969 = vmatprep.subr.mxu0 %v287_v0  ;;  %v284_v3 = vld [vmem:[%s5476_s1] sm:$0xff]  ;;  %s3337_s7 = sshll.u32 %s5483_s22, 8  ;;  %v650_v36 = vld [vmem:[%s5478_s3 + $0x8] sm:$0xff]  ;;  %s3338_s9 = sshll.u32 %s5483_s22, 6 }
   0xd   : > { %3970 = vmatpush3.msra.mxu0 %v287_v0  ;;  %s4278_s10 = scalar_lea.vmem %s5475_s0, %s3337_s7  ;;  %729 = vmatprep.mubr.f32.mxu1 %v650_v36  ;;  %s5450_s12 = scalar_lea.vmem %s5481_s6, %s3338_s9 }
   0xe   : > { %3971 = vmatprep.subr.mxu0 %v286_v1  ;;  %v252_v4 = vld [vmem:[%s4278_s10] sm:$0xff]  ;;  %v253_v5 = vld [vmem:[%s4278_s10 + $0x8] sm:$0xff]  ;;  %v254_v6 = vld [vmem:[%s4278_s10 + $0x10] sm:$0xff] }
   0xf   : > { %3972 = vmatpush3.msra.mxu0 %v286_v1  ;;  %3977 = vmatprep.mubr.msk.f32.mxu0 %vm295_vm0, %v252_v4  ;;  %v255_v7 = vld [vmem:[%s4278_s10 + $0x18] sm:$0xff]  ;;  %v256_v8 = vld [vmem:[%s4278_s10 + $0x20] sm:$0xff]  ;;  %v257_v9 = vld [vmem:[%s4278_s10 + $0x28] sm:$0xff] }
  0x10   : > { %3973 = vmatprep.subr.mxu0 %v285_v2  ;;  %v258_v10 = vld [vmem:[%s4278_s10 + $0x30] sm:$0xff]  ;;  %v259_v11 = vld [vmem:[%s4278_s10 + $0x38] sm:$0xff]  ;;  %v260_v12 = vld [vmem:[%s4278_s10 + $0x40] sm:$0xff] }
  0x11   : > { %3974 = vmatpush3.msra.mxu0 %v285_v2  ;;  %v261_v13 = vld [vmem:[%s4278_s10 + $0x48] sm:$0xff]  ;;  %v262_v14 = vld [vmem:[%s4278_s10 + $0x50] sm:$0xff]  ;;  %v263_v15 = vld [vmem:[%s4278_s10 + $0x58] sm:$0xff] }
  0x12   : > { %3975 = vmatprep.subr.mxu0 %v284_v3  ;;  %v264_v16 = vld [vmem:[%s4278_s10 + $0x60] sm:$0xff]  ;;  %v265_v17 = vld [vmem:[%s4278_s10 + $0x68] sm:$0xff]  ;;  %v266_v18 = vld [vmem:[%s4278_s10 + $0x70] sm:$0xff] }
  0x13   : > { %3976 = vmatpush3.msra.mxu0 %v284_v3  ;;  %v267_v19 = vld [vmem:[%s4278_s10 + $0x78] sm:$0xff]  ;;  %v268_v20 = vld [vmem:[%s4278_s10 + $0x80] sm:$0xff]  ;;  %v269_v21 = vld [vmem:[%s4278_s10 + $0x88] sm:$0xff] }
  0x14   : > { %3978 = vmatmul.mubr.msk.f32.vlgmr.msra.gmra.mxu0 %vm295_vm0, %v253_v5  ;;  %v270_v22 = vld [vmem:[%s4278_s10 + $0x90] sm:$0xff]  ;;  %v271_v23 = vld [vmem:[%s4278_s10 + $0x98] sm:$0xff]  ;;  %v272_v24 = vld [vmem:[%s4278_s10 + $0xa0] sm:$0xff] }
  0x15   : > { %3980 = vmatprep.mubr.msk.f32.mxu0 %vm295_vm0, %v254_v6  ;;  %v273_v25 = vld [vmem:[%s4278_s10 + $0xa8] sm:$0xff]  ;;  %v274_v26 = vld [vmem:[%s4278_s10 + $0xb0] sm:$0xff]  ;;  %v275_v27 = vld [vmem:[%s4278_s10 + $0xb8] sm:$0xff] }
  0x16   : > { %v276_v28 = vld [vmem:[%s4278_s10 + $0xc0] sm:$0xff]  ;;  %v277_v29 = vld [vmem:[%s4278_s10 + $0xc8] sm:$0xff]  ;;  %v278_v30 = vld [vmem:[%s4278_s10 + $0xd0] sm:$0xff] }
  0x17   : > { %v279_v31 = vld [vmem:[%s4278_s10 + $0xd8] sm:$0xff]  ;;  %v280_v32 = vld [vmem:[%s4278_s10 + $0xe0] sm:$0xff]  ;;  %v281_v33 = vld [vmem:[%s4278_s10 + $0xe8] sm:$0xff] }
  0x18   : > { %3981 = vmatmul.mubr.msk.f32.gmra.mxu0 %vm295_vm0, %v255_v7  ;;  %v282_v34 = vld [vmem:[%s4278_s10 + $0xf0] sm:$0xff]  ;;  %v283_v35 = vld [vmem:[%s4278_s10 + $0xf8] sm:$0xff]  ;;  %v4378_v3 = vld [vmem:[%s5477_s2] ss:$0 sm:$0xff] }
  0x19   : > { %3983 = vmatprep.mubr.msk.f32.mxu0 %vm295_vm0, %v256_v8 }
  0x1c   : > { %3984 = vmatmul.mubr.msk.f32.gmra.mxu0 %vm295_vm0, %v257_v9 }
  0x1d   : > { %3986 = vmatprep.mubr.msk.f32.mxu0 %vm295_vm0, %v258_v10 }
  0x20   : > { %3987 = vmatmul.mubr.msk.f32.gmra.mxu0 %vm295_vm0, %v259_v11 }
  0x21   : > { %3989 = vmatprep.mubr.msk.f32.mxu0 %vm295_vm0, %v260_v12 }
  0x24   : > { %3990 = vmatmul.mubr.msk.f32.gmra.mxu0 %vm295_vm0, %v261_v13 }
  0x25   : > { %3992 = vmatprep.mubr.msk.f32.mxu0 %vm295_vm0, %v262_v14 }
  0x28   : > { %3993 = vmatmul.mubr.msk.f32.gmra.mxu0 %vm295_vm0, %v263_v15 }
  0x29   : > { %3995 = vmatprep.mubr.msk.f32.mxu0 %vm295_vm0, %v264_v16 }
  0x2c   : > { %3996 = vmatmul.mubr.msk.f32.gmra.mxu0 %vm295_vm0, %v265_v17 }
  0x2d   : > { %3998 = vmatprep.mubr.msk.f32.mxu0 %vm295_vm0, %v266_v18 }
  0x30   : > { %3999 = vmatmul.mubr.msk.f32.gmra.mxu0 %vm295_vm0, %v267_v19 }
  0x31   : > { %4001 = vmatprep.mubr.msk.f32.mxu0 %vm295_vm0, %v268_v20 }
  0x34   : > { %4002 = vmatmul.mubr.msk.f32.gmra.mxu0 %vm295_vm0, %v269_v21 }
  0x35   : > { %4004 = vmatprep.mubr.msk.f32.mxu0 %vm295_vm0, %v270_v22 }
  0x38   : > { %4005 = vmatmul.mubr.msk.f32.gmra.mxu0 %vm295_vm0, %v271_v23 }
  0x39   : > { %4007 = vmatprep.mubr.msk.f32.mxu0 %vm295_vm0, %v272_v24 }
  0x3c   : > { %4008 = vmatmul.mubr.msk.f32.gmra.mxu0 %vm295_vm0, %v273_v25 }
  0x3d   : > { %4010 = vmatprep.mubr.msk.f32.mxu0 %vm295_vm0, %v274_v26 }
  0x40   : > { %4011 = vmatmul.mubr.msk.f32.gmra.mxu0 %vm295_vm0, %v275_v27 }
  0x41   : > { %4013 = vmatprep.mubr.msk.f32.mxu0 %vm295_vm0, %v276_v28 }
  0x44   : > { %4014 = vmatmul.mubr.msk.f32.gmra.mxu0 %vm295_vm0, %v277_v29 }
  0x45   : > { %4016 = vmatprep.mubr.msk.f32.mxu0 %vm295_vm0, %v278_v30 }
  0x48   : > { %4017 = vmatmul.mubr.msk.f32.gmra.mxu0 %vm295_vm0, %v279_v31 }
  0x49   : > { %4019 = vmatprep.mubr.msk.f32.mxu0 %vm295_vm0, %v280_v32 }
  0x4c   : > { %4020 = vmatmul.mubr.msk.f32.gmra.mxu0 %vm295_vm0, %v281_v33 }
  0x4d   : > { %4022 = vmatprep.mubr.msk.f32.mxu0 %vm295_vm0, %v282_v34 }
  0x50   : > { %4023 = vmatmul.mubr.msk.f32.gmra.mxu0 %vm295_vm0, %v283_v35 }
  0xd4   : > { %v4347_v37 = vpop.f32.mrf.mxu0 }
  0xd6   : > { %v4349_v38 = vpop.f32.mrf.mxu0 }
  0xd8   : > { %v4351_v39 = vpop.f32.mrf.mxu0 }
  0xda   : > { %v4353_v40 = vpop.f32.mrf.mxu0 }
  0xdc   : > { %v4355_v41 = vpop.f32.mrf.mxu0 }
  0xde   : > { %v4357_v42 = vpop.f32.mrf.mxu0 }
  0xe0   : > { %v4359_v43 = vpop.f32.mrf.mxu0 }
  0xe1   : > { %v494_v36 = vadd.f32 %v4359_v43, %v4378_v3 }
  0xe2   : > { %v4361_v44 = vpop.f32.mrf.mxu0 }
  0xe4   : > { %v3991_v45 = vpop.f32.mrf.mxu0 }
  0xe5   : > { %v504_v28 = vadd.f32 %v3991_v45, %v4378_v3 }
  0xe6   : > { %v498_v46 = vpop.f32.mrf.mxu0 }
  0xe7   : > { %v499_v32 = vadd.f32 %v4378_v3, %v498_v46  ;;  %v4436_v45 = vmax.f32 %v504_v28, 0.0  ;;  %v661_v28 = vld [vmem:[%s5478_s3 + $0x60] sm:$0xff] }
  0xe8   : > { %v3994_v47 = vpop.f32.mrf.mxu0 }
  0xe9   : > { %v514_v20 = vadd.f32 %v3994_v47, %v4378_v3 }
  0xea   : > { %v508_v48 = vpop.f32.mrf.mxu0 }
  0xeb   : > { %v509_v24 = vadd.f32 %v4378_v3, %v508_v48  ;;  %v4419_v29 = vmax.f32 %v514_v20, 0.0  ;;  %v489_v48 = vadd.f32 %v4378_v3, %v4361_v44  ;;  %v657_v20 = vld [vmem:[%s5478_s3 + $0x40] sm:$0xff] }
  0xec   : > { %v3997_v49 = vpop.f32.mrf.mxu0 }
  0xed   : > { %v524_v12 = vadd.f32 %v3997_v49, %v4378_v3  ;;  %v4427_v33 = vmax.f32 %v509_v24, 0.0  ;;  %v4445_v49 = vmax.f32 %v499_v32, 0.0  ;;  %v659_v24 = vld [vmem:[%s5478_s3 + $0x50] sm:$0xff] }
  0xee   : > { %v518_v50 = vpop.f32.mrf.mxu0  ;;  %v663_v32 = vld [vmem:[%s5478_s3 + $0x70] sm:$0xff] }
  0xef   : > { %v519_v16 = vadd.f32 %v4378_v3, %v518_v50  ;;  %v4403_v21 = vmax.f32 %v524_v12, 0.0  ;;  %v653_v12 = vld [vmem:[%s5478_s3 + $0x20] sm:$0xff] }
  0xf0   : > { %v4000_v51 = vpop.f32.mrf.mxu0 }
  0xf1   : > { %v534_v4 = vadd.f32 %v4000_v51, %v4378_v3  ;;  %v4411_v25 = vmax.f32 %v519_v16, 0.0  ;;  %v484_v51 = vadd.f32 %v4355_v41, %v4378_v3  ;;  %v655_v16 = vld [vmem:[%s5478_s3 + $0x30] sm:$0xff] }
  0xf2   : > { %v528_v52 = vpop.f32.mrf.mxu0 }
  0xf3   : > { %v529_v7 = vadd.f32 %v4378_v3, %v528_v52  ;;  %v4388_v13 = vmax.f32 %v534_v4, 0.0  ;;  %v4455_v52 = vmax.f32 %v494_v36, 0.0  ;;  %v3118_v36 = vld [vmem:[%s5478_s3 + $0x80] sm:$0xff] }
  0xf4   : > { %v4363_v53 = vpop.f32.mrf.mxu0 }
  0xf5   : > { %v4395_v17 = vmax.f32 %v529_v7, 0.0  ;;  %v649_v7 = vld [vmem:[%s5478_s3] sm:$0xff] }
  0xf6   : > { %v4365_v54 = vpop.f32.mrf.mxu0 }
  0xf8   : > { %v4367_v55 = vpop.f32.mrf.mxu0 }
  0xf9   : > { %v554_v41 = vadd.f32 %v4367_v55, %v4378_v3  ;;  %v469_v55 = vadd.f32 %v4378_v3, %v4353_v40  ;;  %v539_v40 = vadd.f32 %v4378_v3, %v4365_v54 }
  0xfa   : > { %v4369_v56 = vpop.f32.mrf.mxu0 }
  0xfb   : > { %v4514_v54 = vmax.f32 %v539_v40, 0.0  ;;  %v3133_v40 = vld [vmem:[%s5478_s3 + $0xf8] sm:$0xff] }
  0xfc   : > { %v4371_v57 = vpop.f32.mrf.mxu0 }
  0xfd   : > { %v564_v43 = vadd.f32 %v4371_v57, %v4378_v3  ;;  %v479_v57 = vadd.f32 %v4378_v3, %v4357_v42  ;;  %v549_v42 = vadd.f32 %v4378_v3, %v4369_v56  ;;  %v464_v56 = vadd.f32 %v4347_v37, %v4378_v3 }
  0xfe   : > { %v4373_v58 = vpop.f32.mrf.mxu0 }
  0xff   : > { %v559_v44 = vadd.f32 %v4378_v3, %v4373_v58  ;;  %v474_v58 = vadd.f32 %v4351_v39, %v4378_v3  ;;  %v544_v39 = vadd.f32 %v4363_v53, %v4378_v3  ;;  %v4500_v4 = vmax.f32 %v549_v42, 0.0  ;;  %v3129_v42 = vld [vmem:[%s5478_s3 + $0xd8] sm:$0xff] }
 0x100   : > { %v4012_v59 = vpop.f32.mrf.mxu0  ;;  %v459_v53 = vadd.f32 %v4378_v3, %v4349_v38  ;;  %v4511_v37 = vmax.f32 %v464_v56, 0.0  ;;  %v3135_v38 = vld [vmem:[%s5479_s4 + $0x18] sm:$0xff]  ;;  %v3130_v56 = vld [vmem:[%s5478_s3 + $0xe0] sm:$0xff] }
 0x101   : > { %v574_v34 = vadd.f32 %v4012_v59, %v4378_v3  ;;  %4025 = vmatprep.subr.mxu0 %v3135_v38 }
 0x102   : > { %v568_v60 = vpop.f32.mrf.mxu0  ;;  %4026 = vmatpush3.msra.mxu0 %v3135_v38  ;;  %v3153_v38 = vld [vmem:[%s5478_s3 + $0x108] sm:$0xff] }
 0x103   : > { %v569_v47 = vadd.f32 %v4378_v3, %v568_v60  ;;  %v4450_v50 = vmax.f32 %v574_v34, 0.0  ;;  %v4465_v60 = vmax.f32 %v489_v48, 0.0  ;;  %v3119_v34 = vld [vmem:[%s5478_s3 + $0x88] sm:$0xff]  ;;  %v3120_v48 = vld [vmem:[%s5478_s3 + $0x90] sm:$0xff] }
 0x104   : > { %v4015_v61 = vpop.f32.mrf.mxu0 }
 0x105   : > { %v584_v26 = vadd.f32 %v4015_v61, %v4378_v3  ;;  %v4460_v59 = vmax.f32 %v569_v47, 0.0  ;;  %v4470_v61 = vmax.f32 %v564_v43, 0.0  ;;  %v3121_v47 = vld [vmem:[%s5478_s3 + $0x98] sm:$0xff]  ;;  %v3123_v43 = vld [vmem:[%s5478_s3 + $0xa8] sm:$0xff] }
 0x106   : > { %v578_v62 = vpop.f32.mrf.mxu0 }
 0x107   : > { %v579_v30 = vadd.f32 %v4378_v3, %v578_v62  ;;  %v4431_v35 = vmax.f32 %v584_v26, 0.0  ;;  %v4475_v62 = vmax.f32 %v484_v51, 0.0  ;;  %v662_v26 = vld [vmem:[%s5478_s3 + $0x68] sm:$0xff]  ;;  %v3122_v51 = vld [vmem:[%s5478_s3 + $0xa0] sm:$0xff] }
 0x108   : > { %v4018_v63 = vpop.f32.mrf.mxu0 }
 0x109   : > { %v594_v18 = vadd.f32 %v4018_v63, %v4378_v3  ;;  %v4440_v46 = vmax.f32 %v579_v30, 0.0  ;;  %v4480_v63 = vmax.f32 %v559_v44, 0.0  ;;  %v664_v30 = vld [vmem:[%s5478_s3 + $0x78] sm:$0xff] }
 0x10a   : > { %v588_v0 = vpop.f32.mrf.mxu0  ;;  %v3125_v44 = vld [vmem:[%s5478_s3 + $0xb8] sm:$0xff] }
 0x10b   : > { %v589_v22 = vadd.f32 %v4378_v3, %v588_v0  ;;  %v4415_v27 = vmax.f32 %v594_v18, 0.0  ;;  %v4485_v0 = vmax.f32 %v479_v57, 0.0  ;;  %v658_v18 = vld [vmem:[%s5478_s3 + $0x48] sm:$0xff]  ;;  %v3124_v57 = vld [vmem:[%s5478_s3 + $0xb0] sm:$0xff] }
 0x10c   : > { %v4021_v1 = vpop.f32.mrf.mxu0 }
 0x10d   : > { %v604_v9 = vadd.f32 %v4021_v1, %v4378_v3  ;;  %v4423_v31 = vmax.f32 %v589_v22, 0.0  ;;  %v4490_v1 = vmax.f32 %v554_v41, 0.0  ;;  %v660_v22 = vld [vmem:[%s5478_s3 + $0x58] sm:$0xff]  ;;  %v3127_v41 = vld [vmem:[%s5478_s3 + $0xc8] sm:$0xff] }
 0x10e   : > { %v598_v2 = vpop.f32.mrf.mxu0 }
 0x10f   : > { %v599_v14 = vadd.f32 %v4378_v3, %v598_v2  ;;  %v4399_v19 = vmax.f32 %v604_v9, 0.0  ;;  %v4495_v2 = vmax.f32 %v474_v58, 0.0  ;;  %v651_v9 = vld [vmem:[%s5478_s3 + $0x10] sm:$0xff]  ;;  %v3126_v58 = vld [vmem:[%s5478_s3 + $0xc0] sm:$0xff] }
 0x110   : > { %v4024_v5 = vpop.f32.mrf.mxu0 }
 0x111   : > { %v614_v6 = vadd.f32 %v4024_v5, %v4378_v3  ;;  %v4407_v23 = vmax.f32 %v599_v14, 0.0  ;;  %v4505_v5 = vmax.f32 %v469_v55, 0.0  ;;  %v656_v14 = vld [vmem:[%s5478_s3 + $0x38] sm:$0xff]  ;;  %v3128_v55 = vld [vmem:[%s5478_s3 + $0xd0] sm:$0xff] }
 0x112   : > { %v608_v8 = vpop.f32.mrf.mxu0 }
 0x113   : > { %v4384_v10 = vmax.f32 %v614_v6, 0.0  ;;  %v609_v11 = vadd.f32 %v4378_v3, %v608_v8  ;;  %v4508_v6 = vmax.f32 %v544_v39, 0.0  ;;  %v4520_v3 = vmax.f32 %v459_v53, 0.0  ;;  %v652_v8 = vld [vmem:[%s5478_s3 + $0x18] sm:$0xff]  ;;  %v3131_v39 = vld [vmem:[%s5478_s3 + $0xe8] sm:$0xff]  ;;  %v3132_v53 = vld [vmem:[%s5478_s3 + $0xf0] sm:$0xff] }
 0x115   : > { %v4391_v15 = vmax.f32 %v609_v11, 0.0  ;;  %3375 = vmatprep.subr.mxu1 %v4384_v10  ;;  %v654_v11 = vld [vmem:[%s5478_s3 + $0x28] sm:$0xff] }
 0x116   : > { %3376 = vmatpush3.msra.mxu1 %v4388_v13 }
 0x117   : > { %3377 = vmatprep.subr.mxu1 %v4391_v15 }
 0x118   : > { %3378 = vmatpush3.msra.mxu1 %v4395_v17 }
 0x119   : > { %3379 = vmatprep.subr.mxu1 %v4399_v19 }
 0x11a   : > { %3380 = vmatpush3.msra.mxu1 %v4403_v21 }
 0x11b   : > { %3381 = vmatprep.subr.mxu1 %v4407_v23 }
 0x11c   : > { %3382 = vmatpush3.msra.mxu1 %v4411_v25 }
 0x11d   : > { %3383 = vmatprep.subr.mxu1 %v4415_v27 }
 0x11e   : > { %3384 = vmatpush3.msra.mxu1 %v4419_v29 }
 0x11f   : > { %3385 = vmatprep.subr.mxu1 %v4423_v31 }
 0x120   : > { %3386 = vmatpush3.msra.mxu1 %v4427_v33 }
 0x121   : > { %3387 = vmatprep.subr.mxu1 %v4431_v35 }
 0x122   : > { %3388 = vmatpush3.msra.mxu1 %v4436_v45 }
 0x123   : > { %3389 = vmatprep.subr.mxu1 %v4440_v46 }
 0x124   : > { %3390 = vmatpush3.msra.mxu1 %v4445_v49 }
 0x125   : > { %3391 = vmatprep.subr.mxu1 %v4450_v50 }
 0x126   : > { %3392 = vmatpush3.msra.mxu1 %v4455_v52 }
 0x127   : > { %3393 = vmatprep.subr.mxu1 %v4460_v59 }
 0x128   : > { %3394 = vmatpush3.msra.mxu1 %v4465_v60 }
 0x129   : > { %3395 = vmatprep.subr.mxu1 %v4470_v61 }
 0x12a   : > { %3396 = vmatpush3.msra.mxu1 %v4475_v62 }
 0x12b   : > { %3397 = vmatprep.subr.mxu1 %v4480_v63 }
 0x12c   : > { %3398 = vmatpush3.msra.mxu1 %v4485_v0 }
 0x12d   : > { %3399 = vmatprep.subr.mxu1 %v4490_v1 }
 0x12e   : > { %3400 = vmatpush3.msra.mxu1 %v4495_v2 }
 0x12f   : > { %3401 = vmatprep.subr.mxu1 %v4500_v4 }
 0x130   : > { %3402 = vmatpush3.msra.mxu1 %v4505_v5 }
 0x131   : > { %3403 = vmatprep.subr.mxu1 %v4508_v6 }
 0x132   : > { %3404 = vmatpush3.msra.mxu1 %v4511_v37 }
 0x133   : > { %3405 = vmatprep.subr.mxu1 %v4514_v54 }
 0x134   : > { %3406 = vmatpush3.msra.mxu1 %v4520_v3 }
 0x135   : > { %730 = vmatmul.mubr.f32.vlgmr.msra.gmra.mxu1 %v649_v7  ;;  %3431 = vmatprep.subr.mxu1 %v4384_v10  ;;  %v3152_v7 = vld [vmem:[%s5478_s3 + $0x100] sm:$0xff] }
 0x136   : > { %3432 = vmatpush3.msra.mxu1 %v4388_v13  ;;  %734 = vmatprep.mubr.f32.mxu1 %v652_v8  ;;  %v3155_v8 = vld [vmem:[%s5478_s3 + $0x118] sm:$0xff] }
 0x137   : > { %3433 = vmatprep.subr.mxu1 %v4391_v15 }
 0x138   : > { %3434 = vmatpush3.msra.mxu1 %v4395_v17 }
 0x139   : > { %735 = vmatmul.mubr.f32.gmra.mxu1 %v651_v9  ;;  %3435 = vmatprep.subr.mxu1 %v4399_v19  ;;  %v3154_v9 = vld [vmem:[%s5478_s3 + $0x110] sm:$0xff] }
 0x13a   : > { %3436 = vmatpush3.msra.mxu1 %v4403_v21  ;;  %739 = vmatprep.mubr.f32.mxu1 %v654_v11  ;;  %v3157_v11 = vld [vmem:[%s5478_s3 + $0x128] sm:$0xff] }
 0x13b   : > { %3437 = vmatprep.subr.mxu1 %v4407_v23 }
 0x13c   : > { %3438 = vmatpush3.msra.mxu1 %v4411_v25 }
 0x13d   : > { %740 = vmatmul.mubr.f32.gmra.mxu1 %v653_v12  ;;  %3439 = vmatprep.subr.mxu1 %v4415_v27  ;;  %v3156_v12 = vld [vmem:[%s5478_s3 + $0x120] sm:$0xff] }
 0x13e   : > { %3440 = vmatpush3.msra.mxu1 %v4419_v29  ;;  %744 = vmatprep.mubr.f32.mxu1 %v656_v14  ;;  %v3159_v14 = vld [vmem:[%s5478_s3 + $0x138] sm:$0xff] }
 0x13f   : > { %3441 = vmatprep.subr.mxu1 %v4423_v31 }
 0x140   : > { %3442 = vmatpush3.msra.mxu1 %v4427_v33 }
 0x141   : > { %745 = vmatmul.mubr.f32.gmra.mxu1 %v655_v16  ;;  %3443 = vmatprep.subr.mxu1 %v4431_v35  ;;  %v3158_v16 = vld [vmem:[%s5478_s3 + $0x130] sm:$0xff] }
 0x142   : > { %3444 = vmatpush3.msra.mxu1 %v4436_v45  ;;  %749 = vmatprep.mubr.f32.mxu1 %v658_v18  ;;  %v3161_v18 = vld [vmem:[%s5478_s3 + $0x148] sm:$0xff] }
 0x143   : > { %3445 = vmatprep.subr.mxu1 %v4440_v46 }
 0x144   : > { %3446 = vmatpush3.msra.mxu1 %v4445_v49 }
 0x145   : > { %750 = vmatmul.mubr.f32.gmra.mxu1 %v657_v20  ;;  %3447 = vmatprep.subr.mxu1 %v4450_v50  ;;  %v3160_v20 = vld [vmem:[%s5478_s3 + $0x140] sm:$0xff] }
 0x146   : > { %3448 = vmatpush3.msra.mxu1 %v4455_v52  ;;  %754 = vmatprep.mubr.f32.mxu1 %v660_v22  ;;  %v3163_v22 = vld [vmem:[%s5478_s3 + $0x158] sm:$0xff] }
 0x147   : > { %3449 = vmatprep.subr.mxu1 %v4460_v59 }
 0x148   : > { %3450 = vmatpush3.msra.mxu1 %v4465_v60 }
 0x149   : > { %755 = vmatmul.mubr.f32.gmra.mxu1 %v659_v24  ;;  %3451 = vmatprep.subr.mxu1 %v4470_v61  ;;  %v3162_v24 = vld [vmem:[%s5478_s3 + $0x150] sm:$0xff] }
 0x14a   : > { %3452 = vmatpush3.msra.mxu1 %v4475_v62  ;;  %759 = vmatprep.mubr.f32.mxu1 %v662_v26  ;;  %v3165_v26 = vld [vmem:[%s5478_s3 + $0x168] sm:$0xff] }
 0x14b   : > { %3453 = vmatprep.subr.mxu1 %v4480_v63 }
 0x14c   : > { %3454 = vmatpush3.msra.mxu1 %v4485_v0 }
 0x14d   : > { %760 = vmatmul.mubr.f32.gmra.mxu1 %v661_v28  ;;  %3455 = vmatprep.subr.mxu1 %v4490_v1  ;;  %v3164_v28 = vld [vmem:[%s5478_s3 + $0x160] sm:$0xff] }
 0x14e   : > { %3456 = vmatpush3.msra.mxu1 %v4495_v2  ;;  %764 = vmatprep.mubr.f32.mxu1 %v664_v30  ;;  %v3167_v30 = vld [vmem:[%s5478_s3 + $0x178] sm:$0xff] }
 0x14f   : > { %3457 = vmatprep.subr.mxu1 %v4500_v4 }
 0x150   : > { %3458 = vmatpush3.msra.mxu1 %v4505_v5 }
 0x151   : > { %765 = vmatmul.mubr.f32.gmra.mxu1 %v663_v32  ;;  %3459 = vmatprep.subr.mxu1 %v4508_v6  ;;  %v3134_v32 = vld [vmem:[%s5479_s4 + $0x10] sm:$0xff] }
 0x152   : > { %3460 = vmatpush3.msra.mxu1 %v4511_v37  ;;  %853 = vmatprep.mubr.f32.mxu1 %v3119_v34  ;;  %v3166_v34 = vld [vmem:[%s5478_s3 + $0x170] sm:$0xff] }
 0x153   : > { %3461 = vmatprep.subr.mxu1 %v4514_v54  ;;  %4027 = vmatprep.subr.mxu0 %v3134_v32 }
 0x154   : > { %3462 = vmatpush3.msra.mxu1 %v4520_v3  ;;  %4028 = vmatpush3.msra.mxu0 %v3134_v32 }
 0x155   : > { %854 = vmatmul.mubr.f32.vlgmr.msra.gmra.mxu1 %v3118_v36  ;;  %3507 = vmatprep.subr.mxu1 %v4384_v10  ;;  %v3179_v36 = vld [vmem:[%s5478_s3 + $0x188] sm:$0xff] }
 0x156   : > { %3508 = vmatpush3.msra.mxu1 %v4388_v13  ;;  %858 = vmatprep.mubr.f32.mxu1 %v3121_v47  ;;  %v3178_v47 = vld [vmem:[%s5478_s3 + $0x180] sm:$0xff] }
 0x157   : > { %3509 = vmatprep.subr.mxu1 %v4391_v15 }
 0x158   : > { %3510 = vmatpush3.msra.mxu1 %v4395_v17 }
 0x159   : > { %859 = vmatmul.mubr.f32.gmra.mxu1 %v3120_v48  ;;  %3511 = vmatprep.subr.mxu1 %v4399_v19  ;;  %v3181_v48 = vld [vmem:[%s5478_s3 + $0x198] sm:$0xff] }
 0x15a   : > { %3512 = vmatpush3.msra.mxu1 %v4403_v21  ;;  %863 = vmatprep.mubr.f32.mxu1 %v3123_v43  ;;  %v3180_v43 = vld [vmem:[%s5478_s3 + $0x190] sm:$0xff] }
 0x15b   : > { %3513 = vmatprep.subr.mxu1 %v4407_v23 }
 0x15c   : > { %3514 = vmatpush3.msra.mxu1 %v4411_v25 }
 0x15d   : > { %864 = vmatmul.mubr.f32.gmra.mxu1 %v3122_v51  ;;  %3515 = vmatprep.subr.mxu1 %v4415_v27  ;;  %v3183_v51 = vld [vmem:[%s5478_s3 + $0x1a8] sm:$0xff] }
 0x15e   : > { %3516 = vmatpush3.msra.mxu1 %v4419_v29  ;;  %868 = vmatprep.mubr.f32.mxu1 %v3125_v44  ;;  %v3182_v44 = vld [vmem:[%s5478_s3 + $0x1a0] sm:$0xff] }
 0x15f   : > { %3517 = vmatprep.subr.mxu1 %v4423_v31 }
 0x160   : > { %3518 = vmatpush3.msra.mxu1 %v4427_v33 }
 0x161   : > { %869 = vmatmul.mubr.f32.gmra.mxu1 %v3124_v57  ;;  %3519 = vmatprep.subr.mxu1 %v4431_v35  ;;  %v3185_v57 = vld [vmem:[%s5478_s3 + $0x1b8] sm:$0xff] }
 0x162   : > { %3520 = vmatpush3.msra.mxu1 %v4436_v45  ;;  %873 = vmatprep.mubr.f32.mxu1 %v3127_v41  ;;  %v3184_v41 = vld [vmem:[%s5478_s3 + $0x1b0] sm:$0xff] }
 0x163   : > { %3521 = vmatprep.subr.mxu1 %v4440_v46 }
 0x164   : > { %3522 = vmatpush3.msra.mxu1 %v4445_v49 }
 0x165   : > { %874 = vmatmul.mubr.f32.gmra.mxu1 %v3126_v58  ;;  %3523 = vmatprep.subr.mxu1 %v4450_v50  ;;  %v3187_v58 = vld [vmem:[%s5478_s3 + $0x1c8] sm:$0xff] }
 0x166   : > { %3524 = vmatpush3.msra.mxu1 %v4455_v52  ;;  %878 = vmatprep.mubr.f32.mxu1 %v3129_v42  ;;  %v3186_v42 = vld [vmem:[%s5478_s3 + $0x1c0] sm:$0xff] }
 0x167   : > { %3525 = vmatprep.subr.mxu1 %v4460_v59 }
 0x168   : > { %3526 = vmatpush3.msra.mxu1 %v4465_v60 }
 0x169   : > { %879 = vmatmul.mubr.f32.gmra.mxu1 %v3128_v55  ;;  %3527 = vmatprep.subr.mxu1 %v4470_v61  ;;  %v3189_v55 = vld [vmem:[%s5478_s3 + $0x1d8] sm:$0xff] }
 0x16a   : > { %3528 = vmatpush3.msra.mxu1 %v4475_v62  ;;  %883 = vmatprep.mubr.f32.mxu1 %v3131_v39  ;;  %v3188_v39 = vld [vmem:[%s5478_s3 + $0x1d0] sm:$0xff] }
 0x16b   : > { %3529 = vmatprep.subr.mxu1 %v4480_v63 }
 0x16c   : > { %3530 = vmatpush3.msra.mxu1 %v4485_v0 }
 0x16d   : > { %884 = vmatmul.mubr.f32.gmra.mxu1 %v3130_v56  ;;  %3531 = vmatprep.subr.mxu1 %v4490_v1  ;;  %v3191_v56 = vld [vmem:[%s5478_s3 + $0x1e8] sm:$0xff] }
 0x16e   : > { %3532 = vmatpush3.msra.mxu1 %v4495_v2  ;;  %888 = vmatprep.mubr.f32.mxu1 %v3133_v40  ;;  %v3190_v40 = vld [vmem:[%s5478_s3 + $0x1e0] sm:$0xff] }
 0x16f   : > { %3533 = vmatprep.subr.mxu1 %v4500_v4 }
 0x170   : > { %3534 = vmatpush3.msra.mxu1 %v4505_v5 }
 0x171   : > { %889 = vmatmul.mubr.f32.gmra.mxu1 %v3132_v53  ;;  %3535 = vmatprep.subr.mxu1 %v4508_v6  ;;  %v3193_v53 = vld [vmem:[%s5478_s3 + $0x1f8] sm:$0xff] }
 0x172   : > { %3536 = vmatpush3.msra.mxu1 %v4511_v37  ;;  %1237 = vmatprep.mubr.f32.mxu1 %v3153_v38  ;;  %v3192_v38 = vld [vmem:[%s5478_s3 + $0x1f0] sm:$0xff] }
 0x173   : > { %3537 = vmatprep.subr.mxu1 %v4514_v54 }
 0x174   : > { %3538 = vmatpush3.msra.mxu1 %v4520_v3 }
 0x175   : > { %1238 = vmatmul.mubr.f32.vlgmr.msra.gmra.mxu1 %v3152_v7  ;;  %3573 = vmatprep.subr.mxu1 %v4384_v10  ;;  %v771_v7 = vld [vmem:[%s5479_s4 + $0x8] sm:$0xff] }
 0x176   : > { %3574 = vmatpush3.msra.mxu1 %v4388_v13  ;;  %1242 = vmatprep.mubr.f32.mxu1 %v3155_v8 }
 0x177   : > { %3575 = vmatprep.subr.mxu1 %v4391_v15  ;;  %4041 = vmatprep.subr.mxu0 %v771_v7 }
 0x178   : > { %3576 = vmatpush3.msra.mxu1 %v4395_v17 }
 0x179   : > { %1243 = vmatmul.mubr.f32.gmra.mxu1 %v3154_v9  ;;  %3577 = vmatprep.subr.mxu1 %v4399_v19 }
 0x17a   : > { %3578 = vmatpush3.msra.mxu1 %v4403_v21  ;;  %1247 = vmatprep.mubr.f32.mxu1 %v3157_v11 }
 0x17b   : > { %3579 = vmatprep.subr.mxu1 %v4407_v23 }
 0x17c   : > { %3580 = vmatpush3.msra.mxu1 %v4411_v25 }
 0x17d   : > { %1248 = vmatmul.mubr.f32.gmra.mxu1 %v3156_v12  ;;  %3581 = vmatprep.subr.mxu1 %v4415_v27 }
 0x17e   : > { %3582 = vmatpush3.msra.mxu1 %v4419_v29  ;;  %1252 = vmatprep.mubr.f32.mxu1 %v3159_v14 }
 0x17f   : > { %3583 = vmatprep.subr.mxu1 %v4423_v31 }
 0x180   : > { %3584 = vmatpush3.msra.mxu1 %v4427_v33 }
 0x181   : > { %1253 = vmatmul.mubr.f32.gmra.mxu1 %v3158_v16  ;;  %3585 = vmatprep.subr.mxu1 %v4431_v35 }
 0x182   : > { %3586 = vmatpush3.msra.mxu1 %v4436_v45  ;;  %1257 = vmatprep.mubr.f32.mxu1 %v3161_v18 }
 0x183   : > { %3587 = vmatprep.subr.mxu1 %v4440_v46 }
 0x184   : > { %3588 = vmatpush3.msra.mxu1 %v4445_v49 }
 0x185   : > { %1258 = vmatmul.mubr.f32.gmra.mxu1 %v3160_v20  ;;  %3589 = vmatprep.subr.mxu1 %v4450_v50 }
 0x186   : > { %3590 = vmatpush3.msra.mxu1 %v4455_v52  ;;  %1262 = vmatprep.mubr.f32.mxu1 %v3163_v22 }
 0x187   : > { %3591 = vmatprep.subr.mxu1 %v4460_v59 }
 0x188   : > { %3592 = vmatpush3.msra.mxu1 %v4465_v60 }
 0x189   : > { %1263 = vmatmul.mubr.f32.gmra.mxu1 %v3162_v24  ;;  %3593 = vmatprep.subr.mxu1 %v4470_v61 }
 0x18a   : > { %3594 = vmatpush3.msra.mxu1 %v4475_v62  ;;  %1267 = vmatprep.mubr.f32.mxu1 %v3165_v26 }
 0x18b   : > { %3595 = vmatprep.subr.mxu1 %v4480_v63 }
 0x18c   : > { %3596 = vmatpush3.msra.mxu1 %v4485_v0 }
 0x18d   : > { %1268 = vmatmul.mubr.f32.gmra.mxu1 %v3164_v28  ;;  %3597 = vmatprep.subr.mxu1 %v4490_v1 }
 0x18e   : > { %3598 = vmatpush3.msra.mxu1 %v4495_v2  ;;  %1272 = vmatprep.mubr.f32.mxu1 %v3167_v30 }
 0x18f   : > { %3599 = vmatprep.subr.mxu1 %v4500_v4 }
 0x190   : > { %3600 = vmatpush3.msra.mxu1 %v4505_v5 }
 0x191   : > { %1273 = vmatmul.mubr.f32.gmra.mxu1 %v3166_v34  ;;  %3601 = vmatprep.subr.mxu1 %v4508_v6 }
 0x192   : > { %3602 = vmatpush3.msra.mxu1 %v4511_v37  ;;  %1499 = vmatprep.mubr.f32.mxu1 %v3179_v36 }
 0x193   : > { %3603 = vmatprep.subr.mxu1 %v4514_v54 }
 0x194   : > { %3604 = vmatpush3.msra.mxu1 %v4520_v3 }
 0x195   : > { %1500 = vmatmul.mubr.f32.vlgmr.msra.gmra.mxu1 %v3178_v47 }
 0x196   : > { %1504 = vmatprep.mubr.f32.mxu1 %v3181_v48 }
 0x199   : > { %1505 = vmatmul.mubr.f32.gmra.mxu1 %v3180_v43 }
 0x19a   : > { %1509 = vmatprep.mubr.f32.mxu1 %v3183_v51 }
 0x19d   : > { %1510 = vmatmul.mubr.f32.gmra.mxu1 %v3182_v44 }
 0x19e   : > { %1514 = vmatprep.mubr.f32.mxu1 %v3185_v57 }
 0x1a1   : > { %1515 = vmatmul.mubr.f32.gmra.mxu1 %v3184_v41 }
 0x1a2   : > { %1519 = vmatprep.mubr.f32.mxu1 %v3187_v58  ;;  %v770_v58 = vld [vmem:[%s5479_s4] sm:$0xff] }
 0x1a5   : > { %1520 = vmatmul.mubr.f32.gmra.mxu1 %v3186_v42 }
 0x1a6   : > { %1524 = vmatprep.mubr.f32.mxu1 %v3189_v55  ;;  %v3169_v55 = vld [vmem:[%s5479_s4 + $0x28] sm:$0xff] }
 0x1a9   : > { %1525 = vmatmul.mubr.f32.gmra.mxu1 %v3188_v39 }
 0x1aa   : > { %1529 = vmatprep.mubr.f32.mxu1 %v3191_v56 }
 0x1ad   : > { %1530 = vmatmul.mubr.f32.gmra.mxu1 %v3190_v40 }
 0x1ae   : > { %1534 = vmatprep.mubr.f32.mxu1 %v3193_v53 }
 0x1b1   : > { %1535 = vmatmul.mubr.f32.gmra.mxu1 %v3192_v38 }
 0x1f5   : > { %v3407_v8 = vpop.f32.mrf.mxu1 }
 0x1f7   : > { %v3408_v9 = vpop.f32.mrf.mxu1 }
 0x1f9   : > { %v3410_v11 = vpop.f32.mrf.mxu1 }
 0x1fb   : > { %v3411_v12 = vpop.f32.mrf.mxu1 }
 0x1fd   : > { %v3413_v14 = vpop.f32.mrf.mxu1 }
 0x1ff   : > { %v3414_v16 = vpop.f32.mrf.mxu1 }
 0x201   : > { %v3416_v18 = vpop.f32.mrf.mxu1 }
 0x203   : > { %v3417_v20 = vpop.f32.mrf.mxu1 }
 0x205   : > { %v3419_v22 = vpop.f32.mrf.mxu1 }
 0x207   : > { %v3420_v24 = vpop.f32.mrf.mxu1 }
 0x209   : > { %v4816_v26 = vpop.f32.mrf.mxu1 }
 0x20b   : > { %v4818_v28 = vpop.f32.mrf.mxu1 }
 0x20d   : > { %v4820_v30 = vpop.f32.mrf.mxu1 }
 0x20f   : > { %v4822_v32 = vpop.f32.mrf.mxu1 }
 0x211   : > { %v4824_v34 = vpop.f32.mrf.mxu1 }
 0x213   : > { %v4826_v36 = vpop.f32.mrf.mxu1 }
 0x215   : > { %v3463_v47 = vpop.f32.mrf.mxu1 }
 0x217   : > { %v3464_v48 = vpop.f32.mrf.mxu1 }
 0x218   : > { %v3465_v43 = vadd.f32 %v3464_v48, %v3463_v47 }
 0x219   : > { %v3466_v51 = vpop.f32.mrf.mxu1 }
 0x21a   : > { %4029 = vmatprep.mubr.msk.f32.mxu0 %vm897_vm1, %v3465_v43 }
 0x21b   : > { %v3467_v44 = vpop.f32.mrf.mxu1 }
 0x21c   : > { %v3468_v57 = vadd.f32 %v3467_v44, %v3466_v51 }
 0x21d   : > { %v3469_v41 = vpop.f32.mrf.mxu1 }
 0x21e   : > { %4030 = vmatmul.mubr.msk.f32.vlgmr.msra.gmra.mxu0 %vm897_vm1, %v3468_v57 }
 0x21f   : > { %v3470_v42 = vpop.f32.mrf.mxu1  ;;  %4042 = vmatpush3.msra.mxu0 %v771_v7 }
 0x220   : > { %v3471_v39 = vadd.f32 %v3470_v42, %v3469_v41  ;;  %4043 = vmatprep.subr.mxu0 %v770_v58 }
 0x221   : > { %v3472_v56 = vpop.f32.mrf.mxu1  ;;  %4044 = vmatpush3.msra.mxu0 %v770_v58 }
 0x222   : > { %4032 = vmatprep.mubr.msk.f32.mxu0 %vm897_vm1, %v3471_v39  ;;  %4057 = vmatprep.subr.mxu0 %v3169_v55 }
 0x223   : > { %v3473_v40 = vpop.f32.mrf.mxu1 }
 0x224   : > { %v3474_v53 = vadd.f32 %v3473_v40, %v3472_v56  ;;  %v3409_v56 = vadd.f32 %v3408_v9, %v3407_v8  ;;  %v3195_v8 = vld [vmem:[%s5479_s4 + $0x38] sm:$0xff]  ;;  %v3418_v9 = vadd.f32 %v3417_v20, %v3416_v18  ;;  %v3430_v20 = vadd.f32 %v4826_v36, %v4824_v34 }
 0x225   : > { %v3475_v38 = vpop.f32.mrf.mxu1 }
 0x226   : > { %4033 = vmatmul.mubr.msk.f32.gmra.mxu0 %vm897_vm1, %v3474_v53 }
 0x227   : > { %v3476_v47 = vpop.f32.mrf.mxu1 }
 0x228   : > { %v3477_v48 = vadd.f32 %v3476_v47, %v3475_v38  ;;  %v3412_v38 = vadd.f32 %v3411_v12, %v3410_v11  ;;  %v3415_v47 = vadd.f32 %v3414_v16, %v3413_v14  ;;  %v3424_v14 = vadd.f32 %v4818_v28, %v4816_v26 }
 0x229   : > { %v3478_v43 = vpop.f32.mrf.mxu1  ;;  %v3427_v16 = vadd.f32 %v4822_v32, %v4820_v30  ;;  %v3194_v30 = vld [vmem:[%s5479_s4 + $0x30] sm:$0xff] }
 0x22a   : > { %4035 = vmatprep.mubr.msk.f32.mxu0 %vm897_vm1, %v3477_v48 }
 0x22b   : > { %v3479_v7 = vpop.f32.mrf.mxu1 }
 0x22c   : > { %v3480_v51 = vadd.f32 %v3479_v7, %v3478_v43  ;;  %v3168_v43 = vld [vmem:[%s5479_s4 + $0x20] sm:$0xff] }
 0x22d   : > { %v3481_v44 = vpop.f32.mrf.mxu1 }
 0x22e   : > { %4036 = vmatmul.mubr.msk.f32.gmra.mxu0 %vm897_vm1, %v3480_v51  ;;  %v3421_v51 = vadd.f32 %v3420_v24, %v3419_v22 }
 0x22f   : > { %v3482_v57 = vpop.f32.mrf.mxu1 }
 0x230   : > { %v3483_v41 = vadd.f32 %v3482_v57, %v3481_v44 }
 0x231   : > { %v3484_v58 = vpop.f32.mrf.mxu1 }
 0x232   : > { %4038 = vmatprep.mubr.msk.f32.mxu0 %vm897_vm1, %v3483_v41 }
 0x233   : > { %v3485_v42 = vpop.f32.mrf.mxu1 }
 0x234   : > { %v3486_v39 = vadd.f32 %v3485_v42, %v3484_v58 }
 0x235   : > { %v3539_v40 = vpop.f32.mrf.mxu1 }
 0x236   : > { %4039 = vmatmul.mubr.msk.f32.gmra.mxu0 %vm897_vm1, %v3486_v39 }
 0x237   : > { %4045 = vmatprep.mubr.msk.f32.mxu0 %vm897_vm1, %v3409_v56  ;;  %v3540_v53 = vpop.f32.mrf.mxu1 }
 0x238   : > { %v3541_v22 = vadd.f32 %v3540_v53, %v3539_v40 }
 0x239   : > { %v3542_v48 = vpop.f32.mrf.mxu1 }
 0x23a   : > { %4046 = vmatmul.mubr.msk.f32.vlgmr.msra.gmra.mxu0 %vm897_vm1, %v3412_v38 }
 0x23b   : > { %4048 = vmatprep.mubr.msk.f32.mxu0 %vm897_vm1, %v3415_v47  ;;  %v3543_v7 = vpop.f32.mrf.mxu1  ;;  %4058 = vmatpush3.msra.mxu0 %v3169_v55 }
 0x23c   : > { %4059 = vmatprep.subr.mxu0 %v3168_v43  ;;  %v3544_v26 = vadd.f32 %v3543_v7, %v3542_v48 }
 0x23d   : > { %v3545_v11 = vpop.f32.mrf.mxu1  ;;  %4060 = vmatpush3.msra.mxu0 %v3168_v43 }
 0x23e   : > { %4049 = vmatmul.mubr.msk.f32.gmra.mxu0 %vm897_vm1, %v3418_v9  ;;  %4073 = vmatprep.subr.mxu0 %v3195_v8 }
 0x23f   : > { %4051 = vmatprep.mubr.msk.f32.mxu0 %vm897_vm1, %v3421_v51  ;;  %v3546_v12 = vpop.f32.mrf.mxu1 }
 0x240   : > { %v3547_v28 = vadd.f32 %v3546_v12, %v3545_v11 }
 0x241   : > { %v3548_v55 = vpop.f32.mrf.mxu1 }
 0x242   : > { %4052 = vmatmul.mubr.msk.f32.gmra.mxu0 %vm897_vm1, %v3424_v14 }
 0x243   : > { %4054 = vmatprep.mubr.msk.f32.mxu0 %vm897_vm1, %v3427_v16  ;;  %v3549_v18 = vpop.f32.mrf.mxu1 }
 0x244   : > { %v3550_v34 = vadd.f32 %v3549_v18, %v3548_v55 }
 0x245   : > { %v3551_v24 = vpop.f32.mrf.mxu1 }
 0x246   : > { %4055 = vmatmul.mubr.msk.f32.gmra.mxu0 %vm897_vm1, %v3430_v20 }
 0x247   : > { %v3552_v44 = vpop.f32.mrf.mxu1  ;;  %4061 = vmatprep.mubr.msk.f32.mxu0 %vm897_vm1, %v3541_v22 }
 0x248   : > { %v3553_v36 = vadd.f32 %v3552_v44, %v3551_v24 }
 0x249   : > { %v3554_v57 = vpop.f32.mrf.mxu1 }
 0x24a   : > { %4062 = vmatmul.mubr.msk.f32.vlgmr.msra.gmra.mxu0 %vm897_vm1, %v3544_v26 }
 0x24b   : > { %4074 = vmatpush3.msra.mxu0 %v3195_v8  ;;  %v3555_v32 = vpop.f32.mrf.mxu1  ;;  %4064 = vmatprep.mubr.msk.f32.mxu0 %vm897_vm1, %v3547_v28 }
 0x24c   : > { %4075 = vmatprep.subr.mxu0 %v3194_v30  ;;  %v3556_v42 = vadd.f32 %v3555_v32, %v3554_v57 }
 0x24d   : > { %4076 = vmatpush3.msra.mxu0 %v3194_v30  ;;  %v3557_v41 = vpop.f32.mrf.mxu1 }
 0x24e   : > { %3639 = vmatprep.subr.mxu0 %v4384_v10  ;;  %4065 = vmatmul.mubr.msk.f32.gmra.mxu0 %vm897_vm1, %v3550_v34 }
 0x24f   : > { %v3558_v58 = vpop.f32.mrf.mxu1  ;;  %4067 = vmatprep.mubr.msk.f32.mxu0 %vm897_vm1, %v3553_v36  ;;  %v3205_v36 = vld [vmem:[%s5478_s3 + $0x208] sm:$0xff] }
 0x250   : > { %v3559_v39 = vadd.f32 %v3558_v58, %v3557_v41  ;;  %v3204_v41 = vld [vmem:[%s5478_s3 + $0x200] sm:$0xff]  ;;  %v3207_v58 = vld [vmem:[%s5478_s3 + $0x218] sm:$0xff] }
 0x251   : > { %v3560_v56 = vpop.f32.mrf.mxu1 }
 0x252   : > { %4068 = vmatmul.mubr.msk.f32.gmra.mxu0 %vm897_vm1, %v3556_v42  ;;  %v3206_v42 = vld [vmem:[%s5478_s3 + $0x210] sm:$0xff] }
 0x253   : > { %v3561_v40 = vpop.f32.mrf.mxu1  ;;  %4070 = vmatprep.mubr.msk.f32.mxu0 %vm897_vm1, %v3559_v39  ;;  %v3209_v39 = vld [vmem:[%s5478_s3 + $0x228] sm:$0xff] }
 0x254   : > { %v3562_v53 = vadd.f32 %v3561_v40, %v3560_v56  ;;  %v3208_v56 = vld [vmem:[%s5478_s3 + $0x220] sm:$0xff]  ;;  %v3211_v40 = vld [vmem:[%s5478_s3 + $0x238] sm:$0xff] }
 0x255   : > { %v3605_v38 = vpop.f32.mrf.mxu1 }
 0x256   : > { %4071 = vmatmul.mubr.msk.f32.gmra.mxu0 %vm897_vm1, %v3562_v53  ;;  %v3210_v53 = vld [vmem:[%s5478_s3 + $0x230] sm:$0xff] }
 0x257   : > { %v3606_v47 = vpop.f32.mrf.mxu1 }
 0x258   : > { %v3607_v48 = vadd.f32 %v3606_v47, %v3605_v38  ;;  %v3213_v38 = vld [vmem:[%s5478_s3 + $0x248] sm:$0xff]  ;;  %v3212_v47 = vld [vmem:[%s5478_s3 + $0x240] sm:$0xff] }
 0x259   : > { %v3608_v43 = vpop.f32.mrf.mxu1 }
 0x25a   : > { %4077 = vmatprep.mubr.msk.f32.mxu0 %vm897_vm1, %v3607_v48  ;;  %v3215_v48 = vld [vmem:[%s5478_s3 + $0x258] sm:$0xff] }
 0x25b   : > { %v3609_v7 = vpop.f32.mrf.mxu1 }
 0x25c   : > { %v3610_v8 = vadd.f32 %v3609_v7, %v3608_v43  ;;  %v3214_v43 = vld [vmem:[%s5478_s3 + $0x250] sm:$0xff]  ;;  %v3217_v7 = vld [vmem:[%s5478_s3 + $0x268] sm:$0xff] }
 0x25d   : > { %v3611_v9 = vpop.f32.mrf.mxu1 }
 0x25e   : > { %4078 = vmatmul.mubr.msk.f32.vlgmr.msra.gmra.mxu0 %vm897_vm1, %v3610_v8  ;;  %v3216_v8 = vld [vmem:[%s5478_s3 + $0x260] sm:$0xff] }
 0x25f   : > { %3640 = vmatpush3.msra.mxu0 %v4388_v13  ;;  %v3612_v51 = vpop.f32.mrf.mxu1 }
 0x260   : > { %v3613_v11 = vadd.f32 %v3612_v51, %v3611_v9  ;;  %3641 = vmatprep.subr.mxu0 %v4391_v15  ;;  %v3219_v9 = vld [vmem:[%s5478_s3 + $0x278] sm:$0xff]  ;;  %v3218_v51 = vld [vmem:[%s5478_s3 + $0x270] sm:$0xff] }
 0x261   : > { %3642 = vmatpush3.msra.mxu0 %v4395_v17  ;;  %v3614_v12 = vpop.f32.mrf.mxu1 }
 0x262   : > { %3643 = vmatprep.subr.mxu0 %v4399_v19  ;;  %4080 = vmatprep.mubr.msk.f32.mxu0 %vm897_vm1, %v3613_v11  ;;  %v3231_v11 = vld [vmem:[%s5478_s3 + $0x288] sm:$0xff] }
 0x263   : > { %3644 = vmatpush3.msra.mxu0 %v4403_v21  ;;  %v3615_v14 = vpop.f32.mrf.mxu1 }
 0x264   : > { %v3616_v16 = vadd.f32 %v3615_v14, %v3614_v12  ;;  %3645 = vmatprep.subr.mxu0 %v4407_v23  ;;  %v3230_v12 = vld [vmem:[%s5478_s3 + $0x280] sm:$0xff]  ;;  %v3233_v14 = vld [vmem:[%s5478_s3 + $0x298] sm:$0xff] }
 0x265   : > { %3646 = vmatpush3.msra.mxu0 %v4411_v25  ;;  %v3617_v55 = vpop.f32.mrf.mxu1 }
 0x266   : > { %3647 = vmatprep.subr.mxu0 %v4415_v27  ;;  %4081 = vmatmul.mubr.msk.f32.gmra.mxu0 %vm897_vm1, %v3616_v16  ;;  %v3232_v16 = vld [vmem:[%s5478_s3 + $0x290] sm:$0xff] }
 0x267   : > { %3648 = vmatpush3.msra.mxu0 %v4419_v29  ;;  %v3618_v18 = vpop.f32.mrf.mxu1 }
 0x268   : > { %v3619_v20 = vadd.f32 %v3618_v18, %v3617_v55  ;;  %3649 = vmatprep.subr.mxu0 %v4423_v31  ;;  %v3235_v55 = vld [vmem:[%s5478_s3 + $0x2a8] sm:$0xff]  ;;  %v3234_v18 = vld [vmem:[%s5478_s3 + $0x2a0] sm:$0xff] }
 0x269   : > { %3650 = vmatpush3.msra.mxu0 %v4427_v33  ;;  %v3620_v22 = vpop.f32.mrf.mxu1 }
 0x26a   : > { %3651 = vmatprep.subr.mxu0 %v4431_v35  ;;  %4083 = vmatprep.mubr.msk.f32.mxu0 %vm897_vm1, %v3619_v20  ;;  %v3237_v20 = vld [vmem:[%s5478_s3 + $0x2b8] sm:$0xff] }
 0x26b   : > { %3652 = vmatpush3.msra.mxu0 %v4436_v45  ;;  %v3621_v24 = vpop.f32.mrf.mxu1 }
 0x26c   : > { %v3622_v44 = vadd.f32 %v3621_v24, %v3620_v22  ;;  %3653 = vmatprep.subr.mxu0 %v4440_v46  ;;  %v3236_v22 = vld [vmem:[%s5478_s3 + $0x2b0] sm:$0xff]  ;;  %v3239_v24 = vld [vmem:[%s5478_s3 + $0x2c8] sm:$0xff] }
 0x26d   : > { %3654 = vmatpush3.msra.mxu0 %v4445_v49  ;;  %v3623_v26 = vpop.f32.mrf.mxu1 }
 0x26e   : > { %3655 = vmatprep.subr.mxu0 %v4450_v50  ;;  %4084 = vmatmul.mubr.msk.f32.gmra.mxu0 %vm897_vm1, %v3622_v44  ;;  %v3238_v44 = vld [vmem:[%s5478_s3 + $0x2c0] sm:$0xff] }
 0x26f   : > { %3656 = vmatpush3.msra.mxu0 %v4455_v52  ;;  %v3624_v28 = vpop.f32.mrf.mxu1 }
 0x270   : > { %v3625_v57 = vadd.f32 %v3624_v28, %v3623_v26  ;;  %3657 = vmatprep.subr.mxu0 %v4460_v59  ;;  %v3241_v26 = vld [vmem:[%s5478_s3 + $0x2d8] sm:$0xff]  ;;  %v3240_v28 = vld [vmem:[%s5478_s3 + $0x2d0] sm:$0xff] }
 0x271   : > { %3658 = vmatpush3.msra.mxu0 %v4465_v60  ;;  %v3626_v30 = vpop.f32.mrf.mxu1 }
 0x272   : > { %3659 = vmatprep.subr.mxu0 %v4470_v61  ;;  %4086 = vmatprep.mubr.msk.f32.mxu0 %vm897_vm1, %v3625_v57  ;;  %v3243_v57 = vld [vmem:[%s5478_s3 + $0x2e8] sm:$0xff] }
 0x273   : > { %3660 = vmatpush3.msra.mxu0 %v4475_v62  ;;  %v3627_v32 = vpop.f32.mrf.mxu1 }
 0x274   : > { %v3628_v34 = vadd.f32 %v3627_v32, %v3626_v30  ;;  %3661 = vmatprep.subr.mxu0 %v4480_v63  ;;  %v3242_v30 = vld [vmem:[%s5478_s3 + $0x2e0] sm:$0xff]  ;;  %v3245_v32 = vld [vmem:[%s5478_s3 + $0x2f8] sm:$0xff] }
 0x275   : > { %3662 = vmatpush3.msra.mxu0 %v4485_v0 }
 0x276   : > { %3663 = vmatprep.subr.mxu0 %v4490_v1  ;;  %4087 = vmatmul.mubr.msk.f32.gmra.mxu0 %vm897_vm1, %v3628_v34  ;;  %v3244_v34 = vld [vmem:[%s5478_s3 + $0x2f0] sm:$0xff] }
 0x277   : > { %3664 = vmatpush3.msra.mxu0 %v4495_v2  ;;  %1761 = vmatprep.mubr.f32.mxu0 %v3205_v36  ;;  %v3221_v36 = vld [vmem:[%s5479_s4 + $0x48] sm:$0xff] }
 0x278   : > { %3665 = vmatprep.subr.mxu0 %v4500_v4  ;;  %4089 = vmatprep.subr.mxu1 %v3221_v36 }
 0x279   : > { %3666 = vmatpush3.msra.mxu0 %v4505_v5  ;;  %4090 = vmatpush3.msra.mxu1 %v3221_v36 }
 0x27a   : > { %3667 = vmatprep.subr.mxu0 %v4508_v6 }
 0x27b   : > { %3668 = vmatpush3.msra.mxu0 %v4511_v37 }
 0x27c   : > { %3669 = vmatprep.subr.mxu0 %v4514_v54 }
 0x27d   : > { %3670 = vmatpush3.msra.mxu0 %v4520_v3 }
 0x27e   : > { %1762 = vmatmul.mubr.f32.vlgmr.msra.gmra.mxu0 %v3204_v41  ;;  %3705 = vmatprep.subr.mxu0 %v4384_v10  ;;  %v3220_v41 = vld [vmem:[%s5479_s4 + $0x40] sm:$0xff] }
 0x27f   : > { %3706 = vmatpush3.msra.mxu0 %v4388_v13  ;;  %1766 = vmatprep.mubr.f32.mxu0 %v3207_v58  ;;  %v5050_v58 = vld [vmem:[%s5479_s4 + $0x58] sm:$0xff] }
 0x280   : > { %3707 = vmatprep.subr.mxu0 %v4391_v15  ;;  %4091 = vmatprep.subr.mxu1 %v3220_v41 }
 0x281   : > { %3708 = vmatpush3.msra.mxu0 %v4395_v17  ;;  %4092 = vmatpush3.msra.mxu1 %v3220_v41 }
 0x282   : > { %1767 = vmatmul.mubr.f32.gmra.mxu0 %v3206_v42  ;;  %3709 = vmatprep.subr.mxu0 %v4399_v19 }
 0x283   : > { %3710 = vmatpush3.msra.mxu0 %v4403_v21  ;;  %1771 = vmatprep.mubr.f32.mxu0 %v3209_v39 }
 0x284   : > { %3711 = vmatprep.subr.mxu0 %v4407_v23  ;;  %4105 = vmatprep.subr.mxu1 %v5050_v58 }
 0x285   : > { %3712 = vmatpush3.msra.mxu0 %v4411_v25 }
 0x286   : > { %1772 = vmatmul.mubr.f32.gmra.mxu0 %v3208_v56  ;;  %3713 = vmatprep.subr.mxu0 %v4415_v27 }
 0x287   : > { %3714 = vmatpush3.msra.mxu0 %v4419_v29  ;;  %1776 = vmatprep.mubr.f32.mxu0 %v3211_v40 }
 0x288   : > { %3715 = vmatprep.subr.mxu0 %v4423_v31 }
 0x289   : > { %3716 = vmatpush3.msra.mxu0 %v4427_v33 }
 0x28a   : > { %1777 = vmatmul.mubr.f32.gmra.mxu0 %v3210_v53  ;;  %3717 = vmatprep.subr.mxu0 %v4431_v35 }
 0x28b   : > { %3718 = vmatpush3.msra.mxu0 %v4436_v45  ;;  %1781 = vmatprep.mubr.f32.mxu0 %v3213_v38 }
 0x28c   : > { %3719 = vmatprep.subr.mxu0 %v4440_v46 }
 0x28d   : > { %3720 = vmatpush3.msra.mxu0 %v4445_v49 }
 0x28e   : > { %1782 = vmatmul.mubr.f32.gmra.mxu0 %v3212_v47  ;;  %3721 = vmatprep.subr.mxu0 %v4450_v50 }
 0x28f   : > { %3722 = vmatpush3.msra.mxu0 %v4455_v52  ;;  %1786 = vmatprep.mubr.f32.mxu0 %v3215_v48 }
 0x290   : > { %3723 = vmatprep.subr.mxu0 %v4460_v59 }
 0x291   : > { %3724 = vmatpush3.msra.mxu0 %v4465_v60 }
 0x292   : > { %1787 = vmatmul.mubr.f32.gmra.mxu0 %v3214_v43  ;;  %3725 = vmatprep.subr.mxu0 %v4470_v61 }
 0x293   : > { %3726 = vmatpush3.msra.mxu0 %v4475_v62  ;;  %1791 = vmatprep.mubr.f32.mxu0 %v3217_v7 }
 0x294   : > { %3727 = vmatprep.subr.mxu0 %v4480_v63 }
 0x295   : > { %3728 = vmatpush3.msra.mxu0 %v4485_v0 }
 0x296   : > { %1792 = vmatmul.mubr.f32.gmra.mxu0 %v3216_v8  ;;  %3729 = vmatprep.subr.mxu0 %v4490_v1 }
 0x297   : > { %3730 = vmatpush3.msra.mxu0 %v4495_v2  ;;  %1796 = vmatprep.mubr.f32.mxu0 %v3219_v9 }
 0x298   : > { %3731 = vmatprep.subr.mxu0 %v4500_v4 }
 0x299   : > { %3732 = vmatpush3.msra.mxu0 %v4505_v5 }
 0x29a   : > { %1797 = vmatmul.mubr.f32.gmra.mxu0 %v3218_v51  ;;  %3733 = vmatprep.subr.mxu0 %v4508_v6 }
 0x29b   : > { %3734 = vmatpush3.msra.mxu0 %v4511_v37  ;;  %2023 = vmatprep.mubr.f32.mxu0 %v3231_v11 }
 0x29c   : > { %3735 = vmatprep.subr.mxu0 %v4514_v54 }
 0x29d   : > { %3736 = vmatpush3.msra.mxu0 %v4520_v3 }
 0x29e   : > { %2024 = vmatmul.mubr.f32.vlgmr.msra.gmra.mxu0 %v3230_v12 }
 0x29f   : > { %2028 = vmatprep.mubr.f32.mxu0 %v3233_v14 }
 0x2a2   : > { %2029 = vmatmul.mubr.f32.gmra.mxu0 %v3232_v16 }
 0x2a3   : > { %2033 = vmatprep.mubr.f32.mxu0 %v3235_v55 }
 0x2a6   : > { %2034 = vmatmul.mubr.f32.gmra.mxu0 %v3234_v18 }
 0x2a7   : > { %2038 = vmatprep.mubr.f32.mxu0 %v3237_v20 }
 0x2aa   : > { %2039 = vmatmul.mubr.f32.gmra.mxu0 %v3236_v22 }
 0x2ab   : > { %2043 = vmatprep.mubr.f32.mxu0 %v3239_v24 }
 0x2ae   : > { %2044 = vmatmul.mubr.f32.gmra.mxu0 %v3238_v44 }
 0x2af   : > { %2048 = vmatprep.mubr.f32.mxu0 %v3241_v26 }
 0x2b2   : > { %2049 = vmatmul.mubr.f32.gmra.mxu0 %v3240_v28 }
 0x2b3   : > { %2053 = vmatprep.mubr.f32.mxu0 %v3243_v57 }
 0x2b6   : > { %2054 = vmatmul.mubr.f32.gmra.mxu0 %v3242_v30 }
 0x2b7   : > { %2058 = vmatprep.mubr.f32.mxu0 %v3245_v32 }
 0x2ba   : > { %2059 = vmatmul.mubr.f32.gmra.mxu0 %v3244_v34 }
 0x2de   : > { %v4031_v42 = vpop.f32.mrf.mxu0 }
 0x2e0   : > { %v988_v39 = vpop.f32.mrf.mxu0 }
 0x2e6   : > { %v4034_v56 = vpop.f32.mrf.mxu0 }
 0x2e8   : > { %v998_v40 = vpop.f32.mrf.mxu0 }
 0x2ee   : > { %v4037_v53 = vpop.f32.mrf.mxu0 }
 0x2f0   : > { %v1008_v38 = vpop.f32.mrf.mxu0 }
 0x2f6   : > { %v4040_v47 = vpop.f32.mrf.mxu0 }
 0x2f8   : > { %v1018_v48 = vpop.f32.mrf.mxu0 }
 0x2fa   : > { %v4047_v43 = vpop.f32.mrf.mxu0 }
 0x2fb   : > { %v1123_v7 = vadd.f32 %v4047_v43, %v4031_v42 }
 0x2fc   : > { %v1117_v8 = vpop.f32.mrf.mxu0 }
 0x2fd   : > { %v1118_v9 = vadd.f32 %v1117_v8, %v988_v39 }
 0x2fe   : > { %v4050_v51 = vpop.f32.mrf.mxu0 }
 0x2ff   : > { %v1133_v11 = vadd.f32 %v4050_v51, %v4034_v56 }
 0x300   : > { %v1127_v12 = vpop.f32.mrf.mxu0 }
 0x301   : > { %v1128_v14 = vadd.f32 %v1127_v12, %v998_v40 }
 0x302   : > { %v4053_v16 = vpop.f32.mrf.mxu0 }
 0x303   : > { %v1143_v55 = vadd.f32 %v4053_v16, %v4037_v53 }
 0x304   : > { %v1137_v18 = vpop.f32.mrf.mxu0 }
 0x305   : > { %v1138_v20 = vadd.f32 %v1137_v18, %v1008_v38 }
 0x306   : > { %v4056_v22 = vpop.f32.mrf.mxu0 }
 0x307   : > { %v1153_v24 = vadd.f32 %v4056_v22, %v4040_v47 }
 0x308   : > { %v1147_v44 = vpop.f32.mrf.mxu0 }
 0x309   : > { %v1148_v26 = vadd.f32 %v1147_v44, %v1018_v48 }
 0x30a   : > { %v4063_v28 = vpop.f32.mrf.mxu0 }
 0x30b   : > { %v1411_v57 = vadd.f32 %v4063_v28, %v1123_v7 }
 0x30c   : > { %v1371_v30 = vpop.f32.mrf.mxu0 }
 0x30d   : > { %v1410_v32 = vadd.f32 %v1371_v30, %v1118_v9 }
 0x30e   : > { %v4066_v34 = vpop.f32.mrf.mxu0 }
 0x30f   : > { %v1413_v36 = vadd.f32 %v4066_v34, %v1133_v11 }
 0x310   : > { %v1381_v41 = vpop.f32.mrf.mxu0 }
 0x311   : > { %v1412_v42 = vadd.f32 %v1381_v41, %v1128_v14 }
 0x312   : > { %v4069_v39 = vpop.f32.mrf.mxu0 }
 0x313   : > { %v1415_v56 = vadd.f32 %v4069_v39, %v1143_v55  ;;  %v3246_v39 = vld [vmem:[%s5479_s4 + $0x50] sm:$0xff] }
 0x314   : > { %v1391_v43 = vpop.f32.mrf.mxu0 }
 0x315   : > { %v1414_v40 = vadd.f32 %v1391_v43, %v1138_v20 }
 0x316   : > { %v4072_v8 = vpop.f32.mrf.mxu0 }
 0x317   : > { %v1417_v53 = vadd.f32 %v4072_v8, %v1153_v24 }
 0x318   : > { %v1401_v51 = vpop.f32.mrf.mxu0 }
 0x319   : > { %v1416_v38 = vadd.f32 %v1401_v51, %v1148_v26 }
 0x31e   : > { %v4079_v12 = vpop.f32.mrf.mxu0 }
 0x31f   : > { %v5053_v47 = vadd.f32 %v4079_v12, %v1411_v57 }
 0x320   : > { %v1633_v48 = vpop.f32.mrf.mxu0 }
 0x321   : > { %v5055_v16 = vadd.f32 %v1633_v48, %v1410_v32 }
 0x326   : > { %v4082_v7 = vpop.f32.mrf.mxu0 }
 0x327   : > { %v5057_v9 = vadd.f32 %v4082_v7, %v1413_v36 }
 0x328   : > { %v1643_v11 = vpop.f32.mrf.mxu0 }
 0x329   : > { %v5059_v18 = vadd.f32 %v1643_v11, %v1412_v42 }
 0x32e   : > { %v4085_v14 = vpop.f32.mrf.mxu0 }
 0x32f   : > { %v5061_v55 = vadd.f32 %v4085_v14, %v1415_v56 }
 0x330   : > { %v1653_v20 = vpop.f32.mrf.mxu0 }
 0x331   : > { %v5063_v22 = vadd.f32 %v1653_v20, %v1414_v40 }
 0x336   : > { %v4088_v24 = vpop.f32.mrf.mxu0 }
 0x337   : > { %v5065_v44 = vadd.f32 %v4088_v24, %v1417_v53 }
 0x338   : > { %v1663_v26 = vpop.f32.mrf.mxu0 }
 0x339   : > { %v5067_v28 = vadd.f32 %v1663_v26, %v1416_v38 }
 0x33e   : > { %v3671_v57 = vpop.f32.mrf.mxu0 }
 0x340   : > { %v3672_v30 = vpop.f32.mrf.mxu0 }
 0x341   : > { %v3673_v32 = vadd.f32 %v3672_v30, %v3671_v57 }
 0x342   : > { %v3674_v34 = vpop.f32.mrf.mxu0 }
 0x343   : > { %4093 = vmatprep.mubr.msk.f32.mxu1 %vm897_vm1, %v3673_v32 }
 0x344   : > { %v3675_v36 = vpop.f32.mrf.mxu0 }
 0x345   : > { %v3676_v41 = vadd.f32 %v3675_v36, %v3674_v34 }
 0x346   : > { %v3677_v42 = vpop.f32.mrf.mxu0 }
 0x347   : > { %4094 = vmatmul.mubr.msk.f32.vlgmr.msra.gmra.mxu1 %vm897_vm1, %v3676_v41 }
 0x348   : > { %4106 = vmatpush3.msra.mxu1 %v5050_v58  ;;  %v3678_v56 = vpop.f32.mrf.mxu0 }
 0x349   : > { %v3679_v43 = vadd.f32 %v3678_v56, %v3677_v42  ;;  %4107 = vmatprep.subr.mxu1 %v3246_v39 }
 0x34a   : > { %4108 = vmatpush3.msra.mxu1 %v3246_v39  ;;  %v3680_v40 = vpop.f32.mrf.mxu0 }
 0x34b   : > { %3771 = vmatprep.subr.mxu1 %v4384_v10  ;;  %4096 = vmatprep.mubr.msk.f32.mxu1 %vm897_vm1, %v3679_v43 }
 0x34c   : > { %v3681_v8 = vpop.f32.mrf.mxu0 }
 0x34d   : > { %v3682_v53 = vadd.f32 %v3681_v8, %v3680_v40 }
 0x34e   : > { %v3683_v51 = vpop.f32.mrf.mxu0 }
 0x34f   : > { %4097 = vmatmul.mubr.msk.f32.gmra.mxu1 %vm897_vm1, %v3682_v53 }
 0x350   : > { %v3684_v38 = vpop.f32.mrf.mxu0 }
 0x351   : > { %v3685_v12 = vadd.f32 %v3684_v38, %v3683_v51 }
 0x352   : > { %v3686_v48 = vpop.f32.mrf.mxu0 }
 0x353   : > { %4099 = vmatprep.mubr.msk.f32.mxu1 %vm897_vm1, %v3685_v12 }
 0x354   : > { %v3687_v58 = vpop.f32.mrf.mxu0 }
 0x355   : > { %v3688_v7 = vadd.f32 %v3687_v58, %v3686_v48 }
 0x356   : > { %v3689_v11 = vpop.f32.mrf.mxu0 }
 0x357   : > { %4100 = vmatmul.mubr.msk.f32.gmra.mxu1 %vm897_vm1, %v3688_v7 }
 0x358   : > { %v3690_v14 = vpop.f32.mrf.mxu0 }
 0x359   : > { %v3691_v20 = vadd.f32 %v3690_v14, %v3689_v11 }
 0x35a   : > { %v3692_v24 = vpop.f32.mrf.mxu0 }
 0x35b   : > { %4102 = vmatprep.mubr.msk.f32.mxu1 %vm897_vm1, %v3691_v20 }
 0x35c   : > { %v3693_v26 = vpop.f32.mrf.mxu0 }
 0x35d   : > { %v3694_v57 = vadd.f32 %v3693_v26, %v3692_v24 }
 0x35e   : > { %v3737_v30 = vpop.f32.mrf.mxu0 }
 0x35f   : > { %4103 = vmatmul.mubr.msk.f32.gmra.mxu1 %vm897_vm1, %v3694_v57 }
 0x360   : > { %v3738_v32 = vpop.f32.mrf.mxu0 }
 0x361   : > { %v3739_v34 = vadd.f32 %v3738_v32, %v3737_v30  ;;  %v3257_v30 = vld [vmem:[%s5478_s3 + $0x308] sm:$0xff]  ;;  %v3256_v32 = vld [vmem:[%s5478_s3 + $0x300] sm:$0xff] }
 0x362   : > { %v3740_v36 = vpop.f32.mrf.mxu0 }
 0x363   : > { %4109 = vmatprep.mubr.msk.f32.mxu1 %vm897_vm1, %v3739_v34  ;;  %v3259_v34 = vld [vmem:[%s5478_s3 + $0x318] sm:$0xff] }
 0x364   : > { %v3741_v41 = vpop.f32.mrf.mxu0 }
 0x365   : > { %v3742_v42 = vadd.f32 %v3741_v41, %v3740_v36  ;;  %v3258_v36 = vld [vmem:[%s5478_s3 + $0x310] sm:$0xff]  ;;  %v3261_v41 = vld [vmem:[%s5478_s3 + $0x328] sm:$0xff] }
 0x366   : > { %v3743_v39 = vpop.f32.mrf.mxu0 }
 0x367   : > { %4110 = vmatmul.mubr.msk.f32.vlgmr.msra.gmra.mxu1 %vm897_vm1, %v3742_v42  ;;  %v3260_v42 = vld [vmem:[%s5478_s3 + $0x320] sm:$0xff] }
 0x368   : > { %3772 = vmatpush3.msra.mxu1 %v4388_v13  ;;  %v3744_v56 = vpop.f32.mrf.mxu0 }
 0x369   : > { %v3745_v43 = vadd.f32 %v3744_v56, %v3743_v39  ;;  %3773 = vmatprep.subr.mxu1 %v4391_v15  ;;  %v3263_v39 = vld [vmem:[%s5478_s3 + $0x338] sm:$0xff]  ;;  %v3262_v56 = vld [vmem:[%s5478_s3 + $0x330] sm:$0xff] }
 0x36a   : > { %3774 = vmatpush3.msra.mxu1 %v4395_v17  ;;  %v3746_v40 = vpop.f32.mrf.mxu0 }
 0x36b   : > { %3775 = vmatprep.subr.mxu1 %v4399_v19  ;;  %4112 = vmatprep.mubr.msk.f32.mxu1 %vm897_vm1, %v3745_v43  ;;  %v3265_v43 = vld [vmem:[%s5478_s3 + $0x348] sm:$0xff] }
 0x36c   : > { %3776 = vmatpush3.msra.mxu1 %v4403_v21  ;;  %v3747_v8 = vpop.f32.mrf.mxu0 }
 0x36d   : > { %v3748_v53 = vadd.f32 %v3747_v8, %v3746_v40  ;;  %3777 = vmatprep.subr.mxu1 %v4407_v23  ;;  %v3264_v40 = vld [vmem:[%s5478_s3 + $0x340] sm:$0xff]  ;;  %v3267_v8 = vld [vmem:[%s5478_s3 + $0x358] sm:$0xff] }
 0x36e   : > { %3778 = vmatpush3.msra.mxu1 %v4411_v25  ;;  %v3749_v51 = vpop.f32.mrf.mxu0 }
 0x36f   : > { %3779 = vmatprep.subr.mxu1 %v4415_v27  ;;  %4113 = vmatmul.mubr.msk.f32.gmra.mxu1 %vm897_vm1, %v3748_v53  ;;  %v3266_v53 = vld [vmem:[%s5478_s3 + $0x350] sm:$0xff] }
 0x370   : > { %3780 = vmatpush3.msra.mxu1 %v4419_v29  ;;  %v3750_v38 = vpop.f32.mrf.mxu0 }
 0x371   : > { %v3751_v12 = vadd.f32 %v3750_v38, %v3749_v51  ;;  %3781 = vmatprep.subr.mxu1 %v4423_v31  ;;  %v3269_v51 = vld [vmem:[%s5478_s3 + $0x368] sm:$0xff]  ;;  %v3268_v38 = vld [vmem:[%s5478_s3 + $0x360] sm:$0xff] }
 0x372   : > { %3782 = vmatpush3.msra.mxu1 %v4427_v33  ;;  %v3752_v48 = vpop.f32.mrf.mxu0 }
 0x373   : > { %3783 = vmatprep.subr.mxu1 %v4431_v35  ;;  %4115 = vmatprep.mubr.msk.f32.mxu1 %vm897_vm1, %v3751_v12  ;;  %v3271_v12 = vld [vmem:[%s5478_s3 + $0x378] sm:$0xff] }
 0x374   : > { %3784 = vmatpush3.msra.mxu1 %v4436_v45  ;;  %v3753_v58 = vpop.f32.mrf.mxu0 }
 0x375   : > { %v3754_v7 = vadd.f32 %v3753_v58, %v3752_v48  ;;  %3785 = vmatprep.subr.mxu1 %v4440_v46  ;;  %v3270_v48 = vld [vmem:[%s5478_s3 + $0x370] sm:$0xff]  ;;  %v3283_v58 = vld [vmem:[%s5478_s3 + $0x388] sm:$0xff] }
 0x376   : > { %3786 = vmatpush3.msra.mxu1 %v4445_v49  ;;  %v3755_v11 = vpop.f32.mrf.mxu0 }
 0x377   : > { %3787 = vmatprep.subr.mxu1 %v4450_v50  ;;  %4116 = vmatmul.mubr.msk.f32.gmra.mxu1 %vm897_vm1, %v3754_v7  ;;  %v3282_v7 = vld [vmem:[%s5478_s3 + $0x380] sm:$0xff] }
 0x378   : > { %3788 = vmatpush3.msra.mxu1 %v4455_v52  ;;  %v3756_v14 = vpop.f32.mrf.mxu0 }
 0x379   : > { %v3757_v20 = vadd.f32 %v3756_v14, %v3755_v11  ;;  %3789 = vmatprep.subr.mxu1 %v4460_v59  ;;  %v3285_v11 = vld [vmem:[%s5478_s3 + $0x398] sm:$0xff]  ;;  %v3284_v14 = vld [vmem:[%s5478_s3 + $0x390] sm:$0xff] }
 0x37a   : > { %3790 = vmatpush3.msra.mxu1 %v4465_v60  ;;  %v3758_v24 = vpop.f32.mrf.mxu0 }
 0x37b   : > { %3791 = vmatprep.subr.mxu1 %v4470_v61  ;;  %4118 = vmatprep.mubr.msk.f32.mxu1 %vm897_vm1, %v3757_v20  ;;  %v3287_v20 = vld [vmem:[%s5478_s3 + $0x3a8] sm:$0xff] }
 0x37c   : > { %3792 = vmatpush3.msra.mxu1 %v4475_v62  ;;  %v3759_v26 = vpop.f32.mrf.mxu0 }
 0x37d   : > { %v3760_v57 = vadd.f32 %v3759_v26, %v3758_v24  ;;  %3793 = vmatprep.subr.mxu1 %v4480_v63  ;;  %v3286_v24 = vld [vmem:[%s5478_s3 + $0x3a0] sm:$0xff]  ;;  %v3289_v26 = vld [vmem:[%s5478_s3 + $0x3b8] sm:$0xff] }
 0x37e   : > { %3794 = vmatpush3.msra.mxu1 %v4485_v0 }
 0x37f   : > { %3795 = vmatprep.subr.mxu1 %v4490_v1  ;;  %4119 = vmatmul.mubr.msk.f32.gmra.mxu1 %vm897_vm1, %v3760_v57  ;;  %v3288_v57 = vld [vmem:[%s5478_s3 + $0x3b0] sm:$0xff] }
 0x380   : > { %3796 = vmatpush3.msra.mxu1 %v4495_v2  ;;  %2285 = vmatprep.mubr.f32.mxu1 %v3257_v30  ;;  %v3291_v30 = vld [vmem:[%s5478_s3 + $0x3c8] sm:$0xff] }
 0x381   : > { %3797 = vmatprep.subr.mxu1 %v4500_v4 }
 0x382   : > { %3798 = vmatpush3.msra.mxu1 %v4505_v5 }
 0x383   : > { %3799 = vmatprep.subr.mxu1 %v4508_v6 }
 0x384   : > { %3800 = vmatpush3.msra.mxu1 %v4511_v37 }
 0x385   : > { %3801 = vmatprep.subr.mxu1 %v4514_v54 }
 0x386   : > { %3802 = vmatpush3.msra.mxu1 %v4520_v3 }
 0x387   : > { %2286 = vmatmul.mubr.f32.vlgmr.msra.gmra.mxu1 %v3256_v32  ;;  %3837 = vmatprep.subr.mxu1 %v4384_v10  ;;  %v3290_v32 = vld [vmem:[%s5478_s3 + $0x3c0] sm:$0xff] }
 0x388   : > { %3838 = vmatpush3.msra.mxu1 %v4388_v13  ;;  %2290 = vmatprep.mubr.f32.mxu1 %v3259_v34  ;;  %v3293_v34 = vld [vmem:[%s5478_s3 + $0x3d8] sm:$0xff] }
 0x389   : > { %3839 = vmatprep.subr.mxu1 %v4391_v15 }
 0x38a   : > { %3840 = vmatpush3.msra.mxu1 %v4395_v17 }
 0x38b   : > { %2291 = vmatmul.mubr.f32.gmra.mxu1 %v3258_v36  ;;  %3841 = vmatprep.subr.mxu1 %v4399_v19  ;;  %v3292_v36 = vld [vmem:[%s5478_s3 + $0x3d0] sm:$0xff] }
 0x38c   : > { %3842 = vmatpush3.msra.mxu1 %v4403_v21  ;;  %2295 = vmatprep.mubr.f32.mxu1 %v3261_v41  ;;  %v3295_v41 = vld [vmem:[%s5478_s3 + $0x3e8] sm:$0xff] }
 0x38d   : > { %3843 = vmatprep.subr.mxu1 %v4407_v23 }
 0x38e   : > { %3844 = vmatpush3.msra.mxu1 %v4411_v25 }
 0x38f   : > { %2296 = vmatmul.mubr.f32.gmra.mxu1 %v3260_v42  ;;  %3845 = vmatprep.subr.mxu1 %v4415_v27  ;;  %v3294_v42 = vld [vmem:[%s5478_s3 + $0x3e0] sm:$0xff] }
 0x390   : > { %3846 = vmatpush3.msra.mxu1 %v4419_v29  ;;  %2300 = vmatprep.mubr.f32.mxu1 %v3263_v39  ;;  %v3297_v39 = vld [vmem:[%s5478_s3 + $0x3f8] sm:$0xff] }
 0x391   : > { %3847 = vmatprep.subr.mxu1 %v4423_v31 }
 0x392   : > { %3848 = vmatpush3.msra.mxu1 %v4427_v33 }
 0x393   : > { %2301 = vmatmul.mubr.f32.gmra.mxu1 %v3262_v56  ;;  %3849 = vmatprep.subr.mxu1 %v4431_v35  ;;  %v3296_v56 = vld [vmem:[%s5478_s3 + $0x3f0] sm:$0xff] }
 0x394   : > { %3850 = vmatpush3.msra.mxu1 %v4436_v45  ;;  %2305 = vmatprep.mubr.f32.mxu1 %v3265_v43  ;;  %v3273_v43 = vld [vmem:[%s5479_s4 + $0x68] sm:$0xff] }
 0x395   : > { %3851 = vmatprep.subr.mxu1 %v4440_v46  ;;  %4121 = vmatprep.subr.mxu0 %v3273_v43 }
 0x396   : > { %3852 = vmatpush3.msra.mxu1 %v4445_v49  ;;  %4122 = vmatpush3.msra.mxu0 %v3273_v43 }
 0x397   : > { %2306 = vmatmul.mubr.f32.gmra.mxu1 %v3264_v40  ;;  %3853 = vmatprep.subr.mxu1 %v4450_v50  ;;  %v3272_v40 = vld [vmem:[%s5479_s4 + $0x60] sm:$0xff] }
 0x398   : > { %3854 = vmatpush3.msra.mxu1 %v4455_v52  ;;  %2310 = vmatprep.mubr.f32.mxu1 %v3267_v8  ;;  %v3299_v8 = vld [vmem:[%s5479_s4 + $0x78] sm:$0xff] }
 0x399   : > { %3855 = vmatprep.subr.mxu1 %v4460_v59  ;;  %4123 = vmatprep.subr.mxu0 %v3272_v40 }
 0x39a   : > { %3856 = vmatpush3.msra.mxu1 %v4465_v60  ;;  %4124 = vmatpush3.msra.mxu0 %v3272_v40 }
 0x39b   : > { %2311 = vmatmul.mubr.f32.gmra.mxu1 %v3266_v53  ;;  %3857 = vmatprep.subr.mxu1 %v4470_v61 }
 0x39c   : > { %3858 = vmatpush3.msra.mxu1 %v4475_v62  ;;  %2315 = vmatprep.mubr.f32.mxu1 %v3269_v51 }
 0x39d   : > { %3859 = vmatprep.subr.mxu1 %v4480_v63  ;;  %4137 = vmatprep.subr.mxu0 %v3299_v8 }
 0x39e   : > { %3860 = vmatpush3.msra.mxu1 %v4485_v0 }
 0x39f   : > { %2316 = vmatmul.mubr.f32.gmra.mxu1 %v3268_v38  ;;  %3861 = vmatprep.subr.mxu1 %v4490_v1 }
 0x3a0   : > { %3862 = vmatpush3.msra.mxu1 %v4495_v2  ;;  %2320 = vmatprep.mubr.f32.mxu1 %v3271_v12 }
 0x3a1   : > { %3863 = vmatprep.subr.mxu1 %v4500_v4 }
 0x3a2   : > { %3864 = vmatpush3.msra.mxu1 %v4505_v5 }
 0x3a3   : > { %2321 = vmatmul.mubr.f32.gmra.mxu1 %v3270_v48  ;;  %3865 = vmatprep.subr.mxu1 %v4508_v6 }
 0x3a4   : > { %3866 = vmatpush3.msra.mxu1 %v4511_v37  ;;  %2547 = vmatprep.mubr.f32.mxu1 %v3283_v58 }
 0x3a5   : > { %3867 = vmatprep.subr.mxu1 %v4514_v54 }
 0x3a6   : > { %3868 = vmatpush3.msra.mxu1 %v4520_v3 }
 0x3a7   : > { %2548 = vmatmul.mubr.f32.vlgmr.msra.gmra.mxu1 %v3282_v7  ;;  %4169 = vmatprep.subr.mxu1 %v4384_v10 }
 0x3a8   : > { %4185 = vmatpush3.msra.mxu1 %v4388_v13  ;;  %2552 = vmatprep.mubr.f32.mxu1 %v3285_v11 }
 0x3a9   : > { %4170 = vmatprep.subr.mxu1 %v4391_v15 }
 0x3aa   : > { %4186 = vmatpush3.msra.mxu1 %v4395_v17 }
 0x3ab   : > { %2553 = vmatmul.mubr.f32.gmra.mxu1 %v3284_v14  ;;  %4171 = vmatprep.subr.mxu1 %v4399_v19 }
 0x3ac   : > { %4187 = vmatpush3.msra.mxu1 %v4403_v21  ;;  %2557 = vmatprep.mubr.f32.mxu1 %v3287_v20 }
 0x3ad   : > { %4172 = vmatprep.subr.mxu1 %v4407_v23 }
 0x3ae   : > { %4188 = vmatpush3.msra.mxu1 %v4411_v25 }
 0x3af   : > { %2558 = vmatmul.mubr.f32.gmra.mxu1 %v3286_v24  ;;  %4173 = vmatprep.subr.mxu1 %v4415_v27 }
 0x3b0   : > { %4189 = vmatpush3.msra.mxu1 %v4419_v29  ;;  %2562 = vmatprep.mubr.f32.mxu1 %v3289_v26 }
 0x3b1   : > { %4174 = vmatprep.subr.mxu1 %v4423_v31 }
 0x3b2   : > { %4190 = vmatpush3.msra.mxu1 %v4427_v33 }
 0x3b3   : > { %2563 = vmatmul.mubr.f32.gmra.mxu1 %v3288_v57  ;;  %4175 = vmatprep.subr.mxu1 %v4431_v35 }
 0x3b4   : > { %4191 = vmatpush3.msra.mxu1 %v4436_v45  ;;  %2567 = vmatprep.mubr.f32.mxu1 %v3291_v30 }
 0x3b5   : > { %4176 = vmatprep.subr.mxu1 %v4440_v46 }
 0x3b6   : > { %4192 = vmatpush3.msra.mxu1 %v4445_v49 }
 0x3b7   : > { %2568 = vmatmul.mubr.f32.gmra.mxu1 %v3290_v32  ;;  %4177 = vmatprep.subr.mxu1 %v4450_v50 }
 0x3b8   : > { %4193 = vmatpush3.msra.mxu1 %v4455_v52  ;;  %2572 = vmatprep.mubr.f32.mxu1 %v3293_v34 }
 0x3b9   : > { %4178 = vmatprep.subr.mxu1 %v4460_v59 }
 0x3ba   : > { %4194 = vmatpush3.msra.mxu1 %v4465_v60 }
 0x3bb   : > { %2573 = vmatmul.mubr.f32.gmra.mxu1 %v3292_v36  ;;  %4179 = vmatprep.subr.mxu1 %v4470_v61 }
 0x3bc   : > { %4195 = vmatpush3.msra.mxu1 %v4475_v62  ;;  %2577 = vmatprep.mubr.f32.mxu1 %v3295_v41 }
 0x3bd   : > { %4180 = vmatprep.subr.mxu1 %v4480_v63 }
 0x3be   : > { %4196 = vmatpush3.msra.mxu1 %v4485_v0 }
 0x3bf   : > { %2578 = vmatmul.mubr.f32.gmra.mxu1 %v3294_v42  ;;  %4181 = vmatprep.subr.mxu1 %v4490_v1 }
 0x3c0   : > { %4197 = vmatpush3.msra.mxu1 %v4495_v2  ;;  %2582 = vmatprep.mubr.f32.mxu1 %v3297_v39 }
 0x3c1   : > { %4182 = vmatprep.subr.mxu1 %v4500_v4 }
 0x3c2   : > { %4198 = vmatpush3.msra.mxu1 %v4505_v5 }
 0x3c3   : > { %2583 = vmatmul.mubr.f32.gmra.mxu1 %v3296_v56  ;;  %4183 = vmatprep.subr.mxu1 %v4508_v6 }
 0x3c4   : > { %4199 = vmatpush3.msra.mxu1 %v4511_v37 }
 0x3c5   : > { %4184 = vmatprep.subr.mxu1 %v4514_v54 }
 0x3c6   : > { %4200 = vmatpush3.msra.mxu1 %v4520_v3 }
 0x407   : > { %v4095_v53 = vpop.f32.mrf.mxu1 }
 0x408   : > { %v1935_v51 = vadd.f32 %v4095_v53, %v5053_v47 }
 0x409   : > { %v1895_v38 = vpop.f32.mrf.mxu1 }
 0x40a   : > { %v1934_v12 = vadd.f32 %v1895_v38, %v5055_v16  ;;  %v3323_v16 = vld [vmem:[%s5478_s3 + $0x478] sm:$0xff] }
 0x40b   : > { %2844 = vmatprep.mubr.f32.mxu1 %v3323_v16 }
 0x40f   : > { %v4098_v48 = vpop.f32.mrf.mxu1 }
 0x410   : > { %v1937_v58 = vadd.f32 %v4098_v48, %v5057_v9  ;;  %v3322_v9 = vld [vmem:[%s5478_s3 + $0x470] sm:$0xff] }
 0x411   : > { %v1905_v7 = vpop.f32.mrf.mxu1  ;;  %2845 = vmatmul.mubr.f32.vlgmr.msra.gmra.mxu1 %v3322_v9 }
 0x412   : > { %v1936_v11 = vadd.f32 %v1905_v7, %v5059_v18 }
 0x417   : > { %v4101_v14 = vpop.f32.mrf.mxu1 }
 0x418   : > { %v1939_v20 = vadd.f32 %v4101_v14, %v5061_v55 }
 0x419   : > { %v1915_v24 = vpop.f32.mrf.mxu1 }
 0x41a   : > { %v1938_v26 = vadd.f32 %v1915_v24, %v5063_v22 }
 0x41f   : > { %v4104_v57 = vpop.f32.mrf.mxu1 }
 0x420   : > { %v1941_v30 = vadd.f32 %v4104_v57, %v5065_v44 }
 0x421   : > { %v1925_v32 = vpop.f32.mrf.mxu1 }
 0x422   : > { %v1940_v47 = vadd.f32 %v1925_v32, %v5067_v28 }
 0x427   : > { %v4111_v18 = vpop.f32.mrf.mxu1 }
 0x428   : > { %v5304_v55 = vadd.f32 %v4111_v18, %v1935_v51 }
 0x429   : > { %v2157_v22 = vpop.f32.mrf.mxu1 }
 0x42a   : > { %v5306_v34 = vadd.f32 %v2157_v22, %v1934_v12 }
 0x42f   : > { %v4114_v44 = vpop.f32.mrf.mxu1 }
 0x430   : > { %v5308_v36 = vadd.f32 %v4114_v44, %v1937_v58 }
 0x431   : > { %v2167_v28 = vpop.f32.mrf.mxu1 }
 0x432   : > { %v5310_v41 = vadd.f32 %v2167_v28, %v1936_v11 }
 0x437   : > { %v4117_v42 = vpop.f32.mrf.mxu1 }
 0x438   : > { %v5312_v39 = vadd.f32 %v4117_v42, %v1939_v20  ;;  %v3298_v20 = vld [vmem:[%s5479_s4 + $0x70] sm:$0xff] }
 0x439   : > { %v2177_v56 = vpop.f32.mrf.mxu1 }
 0x43a   : > { %v5314_v43 = vadd.f32 %v2177_v56, %v1938_v26 }
 0x43f   : > { %v4120_v40 = vpop.f32.mrf.mxu1 }
 0x440   : > { %v5316_v53 = vadd.f32 %v4120_v40, %v1941_v30 }
 0x441   : > { %v2187_v51 = vpop.f32.mrf.mxu1 }
 0x442   : > { %v5318_v38 = vadd.f32 %v2187_v51, %v1940_v47 }
 0x447   : > { %v3803_v12 = vpop.f32.mrf.mxu1 }
 0x449   : > { %v3804_v48 = vpop.f32.mrf.mxu1 }
 0x44a   : > { %v3805_v7 = vadd.f32 %v3804_v48, %v3803_v12 }
 0x44b   : > { %v3806_v58 = vpop.f32.mrf.mxu1 }
 0x44c   : > { %4125 = vmatprep.mubr.msk.f32.mxu0 %vm897_vm1, %v3805_v7 }
 0x44d   : > { %v3807_v11 = vpop.f32.mrf.mxu1 }
 0x44e   : > { %v3808_v14 = vadd.f32 %v3807_v11, %v3806_v58 }
 0x44f   : > { %v3809_v24 = vpop.f32.mrf.mxu1 }
 0x450   : > { %4126 = vmatmul.mubr.msk.f32.vlgmr.msra.gmra.mxu0 %vm897_vm1, %v3808_v14 }
 0x451   : > { %4138 = vmatpush3.msra.mxu0 %v3299_v8  ;;  %v3810_v26 = vpop.f32.mrf.mxu1 }
 0x452   : > { %v3811_v57 = vadd.f32 %v3810_v26, %v3809_v24  ;;  %4139 = vmatprep.subr.mxu0 %v3298_v20 }
 0x453   : > { %4140 = vmatpush3.msra.mxu0 %v3298_v20  ;;  %v3812_v30 = vpop.f32.mrf.mxu1 }
 0x454   : > { %3903 = vmatprep.subr.mxu0 %v4384_v10  ;;  %4128 = vmatprep.mubr.msk.f32.mxu0 %vm897_vm1, %v3811_v57 }
 0x455   : > { %v3813_v32 = vpop.f32.mrf.mxu1 }
 0x456   : > { %v3814_v47 = vadd.f32 %v3813_v32, %v3812_v30 }
 0x457   : > { %v3815_v16 = vpop.f32.mrf.mxu1 }
 0x458   : > { %4129 = vmatmul.mubr.msk.f32.gmra.mxu0 %vm897_vm1, %v3814_v47 }
 0x459   : > { %v3816_v9 = vpop.f32.mrf.mxu1 }
 0x45a   : > { %v3817_v18 = vadd.f32 %v3816_v9, %v3815_v16 }
 0x45b   : > { %v3818_v22 = vpop.f32.mrf.mxu1 }
 0x45c   : > { %4131 = vmatprep.mubr.msk.f32.mxu0 %vm897_vm1, %v3817_v18 }
 0x45d   : > { %v3819_v8 = vpop.f32.mrf.mxu1 }
 0x45e   : > { %v3820_v44 = vadd.f32 %v3819_v8, %v3818_v22 }
 0x45f   : > { %v3821_v28 = vpop.f32.mrf.mxu1 }
 0x460   : > { %4132 = vmatmul.mubr.msk.f32.gmra.mxu0 %vm897_vm1, %v3820_v44 }
 0x461   : > { %v3822_v42 = vpop.f32.mrf.mxu1 }
 0x462   : > { %v3823_v56 = vadd.f32 %v3822_v42, %v3821_v28 }
 0x463   : > { %v3824_v10 = vpop.f32.mrf.mxu1 }
 0x464   : > { %4134 = vmatprep.mubr.msk.f32.mxu0 %vm897_vm1, %v3823_v56 }
 0x465   : > { %v3825_v40 = vpop.f32.mrf.mxu1 }
 0x466   : > { %v3826_v51 = vadd.f32 %v3825_v40, %v3824_v10 }
 0x467   : > { %v3869_v12 = vpop.f32.mrf.mxu1 }
 0x468   : > { %4135 = vmatmul.mubr.msk.f32.gmra.mxu0 %vm897_vm1, %v3826_v51 }
 0x469   : > { %v3870_v48 = vpop.f32.mrf.mxu1 }
 0x46a   : > { %v3871_v7 = vadd.f32 %v3870_v48, %v3869_v12 }
 0x46b   : > { %v3872_v58 = vpop.f32.mrf.mxu1 }
 0x46c   : > { %4141 = vmatprep.mubr.msk.f32.mxu0 %vm897_vm1, %v3871_v7 }
 0x46d   : > { %v3873_v11 = vpop.f32.mrf.mxu1 }
 0x46e   : > { %v3874_v14 = vadd.f32 %v3873_v11, %v3872_v58 }
 0x46f   : > { %v3875_v24 = vpop.f32.mrf.mxu1 }
 0x470   : > { %4142 = vmatmul.mubr.msk.f32.vlgmr.msra.gmra.mxu0 %vm897_vm1, %v3874_v14 }
 0x471   : > { %3904 = vmatpush3.msra.mxu0 %v4388_v13  ;;  %v3876_v20 = vpop.f32.mrf.mxu1 }
 0x472   : > { %v3877_v26 = vadd.f32 %v3876_v20, %v3875_v24  ;;  %3905 = vmatprep.subr.mxu0 %v4391_v15 }
 0x473   : > { %3906 = vmatpush3.msra.mxu0 %v4395_v17  ;;  %v3878_v57 = vpop.f32.mrf.mxu1 }
 0x474   : > { %3907 = vmatprep.subr.mxu0 %v4399_v19  ;;  %4144 = vmatprep.mubr.msk.f32.mxu0 %vm897_vm1, %v3877_v26 }
 0x475   : > { %3908 = vmatpush3.msra.mxu0 %v4403_v21  ;;  %v3879_v30 = vpop.f32.mrf.mxu1 }
 0x476   : > { %v3880_v32 = vadd.f32 %v3879_v30, %v3878_v57  ;;  %3909 = vmatprep.subr.mxu0 %v4407_v23 }
 0x477   : > { %3910 = vmatpush3.msra.mxu0 %v4411_v25  ;;  %v3881_v13 = vpop.f32.mrf.mxu1 }
 0x478   : > { %3911 = vmatprep.subr.mxu0 %v4415_v27  ;;  %4145 = vmatmul.mubr.msk.f32.gmra.mxu0 %vm897_vm1, %v3880_v32 }
 0x479   : > { %3912 = vmatpush3.msra.mxu0 %v4419_v29  ;;  %v3882_v15 = vpop.f32.mrf.mxu1 }
 0x47a   : > { %v3883_v17 = vadd.f32 %v3882_v15, %v3881_v13  ;;  %3913 = vmatprep.subr.mxu0 %v4423_v31 }
 0x47b   : > { %3914 = vmatpush3.msra.mxu0 %v4427_v33  ;;  %v3884_v19 = vpop.f32.mrf.mxu1 }
 0x47c   : > { %3915 = vmatprep.subr.mxu0 %v4431_v35  ;;  %4147 = vmatprep.mubr.msk.f32.mxu0 %vm897_vm1, %v3883_v17 }
 0x47d   : > { %3916 = vmatpush3.msra.mxu0 %v4436_v45  ;;  %v3885_v21 = vpop.f32.mrf.mxu1  ;;  %v3309_v45 = vld [vmem:[%s5478_s3 + $0x408] sm:$0xff] }
 0x47e   : > { %v3886_v23 = vadd.f32 %v3885_v21, %v3884_v19  ;;  %3917 = vmatprep.subr.mxu0 %v4440_v46  ;;  %v3308_v46 = vld [vmem:[%s5478_s3 + $0x400] sm:$0xff] }
 0x47f   : > { %3918 = vmatpush3.msra.mxu0 %v4445_v49  ;;  %v3887_v25 = vpop.f32.mrf.mxu1  ;;  %v3311_v49 = vld [vmem:[%s5478_s3 + $0x418] sm:$0xff] }
 0x480   : > { %3919 = vmatprep.subr.mxu0 %v4450_v50  ;;  %4148 = vmatmul.mubr.msk.f32.gmra.mxu0 %vm897_vm1, %v3886_v23  ;;  %v3310_v50 = vld [vmem:[%s5478_s3 + $0x410] sm:$0xff] }
 0x481   : > { %3920 = vmatpush3.msra.mxu0 %v4455_v52  ;;  %v3888_v27 = vpop.f32.mrf.mxu1  ;;  %v3313_v52 = vld [vmem:[%s5478_s3 + $0x428] sm:$0xff] }
 0x482   : > { %v3889_v29 = vadd.f32 %v3888_v27, %v3887_v25  ;;  %3921 = vmatprep.subr.mxu0 %v4460_v59  ;;  %v3312_v59 = vld [vmem:[%s5478_s3 + $0x420] sm:$0xff] }
 0x483   : > { %3922 = vmatpush3.msra.mxu0 %v4465_v60  ;;  %v3890_v31 = vpop.f32.mrf.mxu1  ;;  %v3315_v60 = vld [vmem:[%s5478_s3 + $0x438] sm:$0xff] }
 0x484   : > { %3923 = vmatprep.subr.mxu0 %v4470_v61  ;;  %4150 = vmatprep.mubr.msk.f32.mxu0 %vm897_vm1, %v3889_v29  ;;  %v3314_v61 = vld [vmem:[%s5478_s3 + $0x430] sm:$0xff] }
 0x485   : > { %3924 = vmatpush3.msra.mxu0 %v4475_v62  ;;  %v3891_v33 = vpop.f32.mrf.mxu1  ;;  %v3317_v62 = vld [vmem:[%s5478_s3 + $0x448] sm:$0xff] }
 0x486   : > { %v3892_v35 = vadd.f32 %v3891_v33, %v3890_v31  ;;  %3925 = vmatprep.subr.mxu0 %v4480_v63  ;;  %v3316_v63 = vld [vmem:[%s5478_s3 + $0x440] sm:$0xff] }
 0x487   : > { %3926 = vmatpush3.msra.mxu0 %v4485_v0  ;;  %v3319_v0 = vld [vmem:[%s5478_s3 + $0x458] sm:$0xff] }
 0x488   : > { %3927 = vmatprep.subr.mxu0 %v4490_v1  ;;  %4151 = vmatmul.mubr.msk.f32.gmra.mxu0 %vm897_vm1, %v3892_v35  ;;  %v3318_v1 = vld [vmem:[%s5478_s3 + $0x450] sm:$0xff] }
 0x489   : > { %3928 = vmatpush3.msra.mxu0 %v4495_v2  ;;  %2809 = vmatprep.mubr.f32.mxu0 %v3309_v45  ;;  %v3321_v2 = vld [vmem:[%s5478_s3 + $0x468] sm:$0xff] }
 0x48a   : > { %3929 = vmatprep.subr.mxu0 %v4500_v4  ;;  %v3320_v4 = vld [vmem:[%s5478_s3 + $0x460] sm:$0xff] }
 0x48b   : > { %3930 = vmatpush3.msra.mxu0 %v4505_v5  ;;  %v3325_v5 = vld [vmem:[%s5479_s4 + $0x88] sm:$0xff] }
 0x48c   : > { %3931 = vmatprep.subr.mxu0 %v4508_v6  ;;  %4153 = vmatprep.subr.mxu1 %v3325_v5  ;;  %v3324_v6 = vld [vmem:[%s5479_s4 + $0x80] sm:$0xff] }
 0x48d   : > { %3932 = vmatpush3.msra.mxu0 %v4511_v37  ;;  %4154 = vmatpush3.msra.mxu1 %v3325_v5 }
 0x48e   : > { %3933 = vmatprep.subr.mxu0 %v4514_v54  ;;  %4155 = vmatprep.subr.mxu1 %v3324_v6 }
 0x48f   : > { %3934 = vmatpush3.msra.mxu0 %v4520_v3  ;;  %4156 = vmatpush3.msra.mxu1 %v3324_v6 }
 0x490   : > { %2810 = vmatmul.mubr.f32.vlgmr.msra.gmra.mxu0 %v3308_v46 }
 0x491   : > { %2814 = vmatprep.mubr.f32.mxu0 %v3311_v49 }
 0x494   : > { %2815 = vmatmul.mubr.f32.gmra.mxu0 %v3310_v50 }
 0x495   : > { %2819 = vmatprep.mubr.f32.mxu0 %v3313_v52 }
 0x498   : > { %2820 = vmatmul.mubr.f32.gmra.mxu0 %v3312_v59 }
 0x499   : > { %2824 = vmatprep.mubr.f32.mxu0 %v3315_v60 }
 0x49c   : > { %2825 = vmatmul.mubr.f32.gmra.mxu0 %v3314_v61 }
 0x49d   : > { %2829 = vmatprep.mubr.f32.mxu0 %v3317_v62 }
 0x4a0   : > { %2830 = vmatmul.mubr.f32.gmra.mxu0 %v3316_v63  ;;  %v3334_v63 = vld [vmem:[%s5480_s5] ss:$0 sm:$0xff] }
 0x4a1   : > { %2834 = vmatprep.mubr.f32.mxu0 %v3319_v0 }
 0x4a4   : > { %2835 = vmatmul.mubr.f32.gmra.mxu0 %v3318_v1 }
 0x4a5   : > { %2839 = vmatprep.mubr.f32.mxu0 %v3321_v2 }
 0x4a8   : > { %2840 = vmatmul.mubr.f32.gmra.mxu0 %v3320_v4 }
 0x4d1   : > { %v3956_v45 = vpop.f32.mrf.mxu1 }
 0x4d3   : > { %v3957_v52 = vpop.f32.mrf.mxu1 }
 0x4d4   : > { %v3958_v61 = vadd.f32 %v3957_v52, %v3956_v45 }
 0x510   : > { %v4127_v37 = vpop.f32.mrf.mxu0 }
 0x511   : > { %v2459_v54 = vadd.f32 %v4127_v37, %v5304_v55 }
 0x512   : > { %v2419_v3 = vpop.f32.mrf.mxu0 }
 0x513   : > { %v2458_v47 = vadd.f32 %v2419_v3, %v5306_v34 }
 0x518   : > { %v4130_v16 = vpop.f32.mrf.mxu0 }
 0x519   : > { %v2461_v9 = vadd.f32 %v4130_v16, %v5308_v36 }
 0x51a   : > { %v2429_v18 = vpop.f32.mrf.mxu0 }
 0x51b   : > { %v2460_v22 = vadd.f32 %v2429_v18, %v5310_v41 }
 0x520   : > { %v4133_v8 = vpop.f32.mrf.mxu0 }
 0x521   : > { %v2463_v44 = vadd.f32 %v4133_v8, %v5312_v39 }
 0x522   : > { %v2439_v28 = vpop.f32.mrf.mxu0 }
 0x523   : > { %v2462_v42 = vadd.f32 %v2439_v28, %v5314_v43 }
 0x528   : > { %v4136_v56 = vpop.f32.mrf.mxu0 }
 0x529   : > { %v2465_v10 = vadd.f32 %v4136_v56, %v5316_v53 }
 0x52a   : > { %v2449_v40 = vpop.f32.mrf.mxu0 }
 0x52b   : > { %v2464_v55 = vadd.f32 %v2449_v40, %v5318_v38 }
 0x530   : > { %v4143_v51 = vpop.f32.mrf.mxu0 }
 0x531   : > { %v2721_v34 = vadd.f32 %v4143_v51, %v2459_v54 }
 0x532   : > { %v2681_v12 = vpop.f32.mrf.mxu0 }
 0x533   : > { %v2720_v48 = vadd.f32 %v2681_v12, %v2458_v47 }
 0x538   : > { %v4146_v36 = vpop.f32.mrf.mxu0 }
 0x539   : > { %v2723_v7 = vadd.f32 %v4146_v36, %v2461_v9 }
 0x53a   : > { %v2691_v58 = vpop.f32.mrf.mxu0 }
 0x53b   : > { %v2722_v41 = vadd.f32 %v2691_v58, %v2460_v22 }
 0x540   : > { %v4149_v11 = vpop.f32.mrf.mxu0 }
 0x541   : > { %v5427_v14 = vadd.f32 %v4149_v11, %v2463_v44 }
 0x542   : > { %v2701_v39 = vpop.f32.mrf.mxu0 }
 0x543   : > { %v5429_v24 = vadd.f32 %v2701_v39, %v2462_v42 }
 0x548   : > { %v4152_v43 = vpop.f32.mrf.mxu0 }
 0x549   : > { %v5431_v20 = vadd.f32 %v4152_v43, %v2465_v10 }
 0x54a   : > { %v2711_v53 = vpop.f32.mrf.mxu0 }
 0x54b   : > { %v5433_v26 = vadd.f32 %v2711_v53, %v2464_v55 }
 0x550   : > { %v3935_v38 = vpop.f32.mrf.mxu0 }
 0x552   : > { %v3936_v57 = vpop.f32.mrf.mxu0 }
 0x553   : > { %v3937_v30 = vadd.f32 %v3936_v57, %v3935_v38 }
 0x554   : > { %v3938_v32 = vpop.f32.mrf.mxu0 }
 0x555   : > { %4157 = vmatprep.mubr.msk.f32.mxu1 %vm897_vm1, %v3937_v30 }
 0x556   : > { %v3939_v13 = vpop.f32.mrf.mxu0 }
 0x557   : > { %v3940_v15 = vadd.f32 %v3939_v13, %v3938_v32 }
 0x558   : > { %v3941_v17 = vpop.f32.mrf.mxu0 }
 0x559   : > { %4158 = vmatmul.mubr.msk.f32.vlgmr.msra.gmra.mxu1 %vm897_vm1, %v3940_v15 }
 0x55a   : > { %v3942_v19 = vpop.f32.mrf.mxu0 }
 0x55b   : > { %v3943_v21 = vadd.f32 %v3942_v19, %v3941_v17 }
 0x55c   : > { %v3944_v23 = vpop.f32.mrf.mxu0 }
 0x55d   : > { %4160 = vmatprep.mubr.msk.f32.mxu1 %vm897_vm1, %v3943_v21 }
 0x55e   : > { %v3945_v25 = vpop.f32.mrf.mxu0 }
 0x55f   : > { %v3946_v27 = vadd.f32 %v3945_v25, %v3944_v23 }
 0x560   : > { %v3947_v29 = vpop.f32.mrf.mxu0 }
 0x561   : > { %4161 = vmatmul.mubr.msk.f32.gmra.mxu1 %vm897_vm1, %v3946_v27 }
 0x562   : > { %v3948_v31 = vpop.f32.mrf.mxu0 }
 0x563   : > { %v3949_v33 = vadd.f32 %v3948_v31, %v3947_v29 }
 0x564   : > { %v3950_v35 = vpop.f32.mrf.mxu0 }
 0x565   : > { %4163 = vmatprep.mubr.msk.f32.mxu1 %vm897_vm1, %v3949_v33 }
 0x566   : > { %v3951_v46 = vpop.f32.mrf.mxu0 }
 0x567   : > { %v3952_v49 = vadd.f32 %v3951_v46, %v3950_v35 }
 0x568   : > { %v3953_v50 = vpop.f32.mrf.mxu0 }
 0x569   : > { %4164 = vmatmul.mubr.msk.f32.gmra.mxu1 %vm897_vm1, %v3952_v49 }
 0x56a   : > { %v3954_v59 = vpop.f32.mrf.mxu0 }
 0x56b   : > { %v3955_v60 = vadd.f32 %v3954_v59, %v3953_v50 }
 0x56d   : > { %4166 = vmatprep.mubr.msk.f32.mxu1 %vm897_vm1, %v3955_v60 }
 0x56e   : > { %4167 = vmatmul.mubr.msk.f32.gmra.mxu1 %vm897_vm1, %v3958_v61 }
 0x619   : > { %v4159_v62 = vpop.f32.mrf.mxu1 }
 0x61a   : > { %v2983_v0 = vadd.f32 %v4159_v62, %v2721_v34 }
 0x61b   : > { %v2943_v1 = vpop.f32.mrf.mxu1 }
 0x61c   : > { %v2998_v2 = vadd.f32 %v3334_v63, %v2983_v0  ;;  %v2982_v4 = vadd.f32 %v2943_v1, %v2720_v48 }
 0x61e   : > { %v3006_v5 = vmax.f32 %v2998_v2, 0.0  ;;  %v2997_v6 = vadd.f32 %v3334_v63, %v2982_v4 }
 0x620   : > { %3014 = vst.msk [vmem:[%s5450_s12 + $0x8] sm:$0xff] %vm295_vm0, %v3006_v5  ;;  %v3005_v37 = vmax.f32 %v2997_v6, 0.0 }
 0x621   : > { %v4162_v54 = vpop.f32.mrf.mxu1 }
 0x622   : > { %3013 = vst.msk [vmem:[%s5450_s12] sm:$0xff] %vm295_vm0, %v3005_v37  ;;  %v2985_v3 = vadd.f32 %v4162_v54, %v2723_v7 }
 0x623   : > { %v2953_v47 = vpop.f32.mrf.mxu1 }
 0x624   : > { %v3000_v16 = vadd.f32 %v3334_v63, %v2985_v3  ;;  %v2984_v9 = vadd.f32 %v2953_v47, %v2722_v41 }
 0x626   : > { %v3008_v18 = vmax.f32 %v3000_v16, 0.0  ;;  %v2999_v22 = vadd.f32 %v3334_v63, %v2984_v9 }
 0x628   : > { %3016 = vst.msk [vmem:[%s5450_s12 + $0x18] sm:$0xff] %vm295_vm0, %v3008_v18  ;;  %v3007_v8 = vmax.f32 %v2999_v22, 0.0 }
 0x629   : > { %v4165_v44 = vpop.f32.mrf.mxu1 }
 0x62a   : > { %3015 = vst.msk [vmem:[%s5450_s12 + $0x10] sm:$0xff] %vm295_vm0, %v3007_v8  ;;  %v2987_v28 = vadd.f32 %v4165_v44, %v5427_v14 }
 0x62b   : > { %v2963_v42 = vpop.f32.mrf.mxu1 }
 0x62c   : > { %v3002_v56 = vadd.f32 %v3334_v63, %v2987_v28  ;;  %v2986_v10 = vadd.f32 %v2963_v42, %v5429_v24 }
 0x62e   : > { %v3010_v40 = vmax.f32 %v3002_v56, 0.0  ;;  %v3001_v55 = vadd.f32 %v3334_v63, %v2986_v10  ;;  %v4168_v51 = vpop.f32.mrf.mxu1 }
 0x62f   : > { %v2989_v34 = vadd.f32 %v4168_v51, %v5431_v20 }
 0x630   : > { %3018 = vst.msk [vmem:[%s5450_s12 + $0x28] sm:$0xff] %vm295_vm0, %v3010_v40  ;;  %v3009_v12 = vmax.f32 %v3001_v55, 0.0  ;;  %v2973_v48 = vpop.f32.mrf.mxu1 }
 0x631   : > { %v3004_v36 = vadd.f32 %v3334_v63, %v2989_v34  ;;  %v2988_v7 = vadd.f32 %v2973_v48, %v5433_v26 }
 0x632   : > { %3017 = vst.msk [vmem:[%s5450_s12 + $0x20] sm:$0xff] %vm295_vm0, %v3009_v12 }
 0x633   : > { %v3012_v58 = vmax.f32 %v3004_v36, 0.0  ;;  %v3003_v41 = vadd.f32 %v3334_v63, %v2988_v7 }
 0x635   : > { %3020 = vst.msk [vmem:[%s5450_s12 + $0x38] sm:$0xff] %vm295_vm0, %v3012_v58  ;;  %v3011_v11 = vmax.f32 %v3003_v41, 0.0 }
 0x637   : > { %3019 = vst.msk [vmem:[%s5450_s12 + $0x30] sm:$0xff] %vm295_vm0, %v3011_v11 }
 0x638 PF: > { %s16_s21 = sadd.s32 1, %s4215_s21  }
 0x639   : > { %p13_p4 = scmp.ge.s32.totalorder %s16_s21, 4  }
 0x63b   :  { %15 = sbr.rel (!%p13_p4) target bundleno = 1 (0x1), region = 90 }

// kernel: aecls_forward.3
= control target key start
LH: loop header
LB: loop body
LE: loop exit
PB: predicated region body
PF: predicated region fallthrough
CT: control target
= control target key end

     0   :  { %s6978_s0 = inlined_call_operand.vmem [shape: f32[2,2048], index: 0, kind: input, shape index: {}]   ;;  %s6979_s1 = inlined_call_operand.vmem [shape: f32[2048,512], index: 1, kind: input, shape index: {}]   ;;  %s6980_s2 = inlined_call_operand.vmem [shape: f32[1,512], index: 2, kind: input, shape index: {}]   ;;  %s6981_s3 = inlined_call_operand.vmem [shape: f32[512,512], index: 3, kind: input, shape index: {}]   ;;  %s6982_s4 = inlined_call_operand.vmem [shape: f32[1,512], index: 4, kind: input, shape index: {}]   ;;  %s6983_s5 = inlined_call_operand.hbm [shape: f32[2,512], index: 5, kind: output, shape index: {}]  }
   0x1   :  { %v86_v0 = vld [vmem:[%s6979_s1 + $0x1e8] sm:$0xff]  ;;  %v85_v2 = vld [vmem:[%s6979_s1 + $0x1e0] sm:$0xff] }
   0x2   :  { %v214_v1 = vld [vmem:[%s6979_s1 + $0x5e8] sm:$0xff]  ;;  %1159 = vmatprep.subr.mxu0 %v86_v0  ;;  %v213_v3 = vld [vmem:[%s6979_s1 + $0x5e0] sm:$0xff] }
   0x3   :  { %1230 = vmatprep.subr.mxu1 %v214_v1  ;;  %v82_v4 = vld [vmem:[%s6979_s1 + $0x1c8] sm:$0xff]  ;;  %1160 = vmatpush1.msra.mxu0 %v85_v2  ;;  %v81_v6 = vld [vmem:[%s6979_s1 + $0x1c0] sm:$0xff] }
   0x4   :  { %v210_v5 = vld [vmem:[%s6979_s1 + $0x5c8] sm:$0xff]  ;;  %1231 = vmatpush1.msra.mxu1 %v213_v3  ;;  %v209_v7 = vld [vmem:[%s6979_s1 + $0x5c0] sm:$0xff]  ;;  %1161 = vmatprep.subr.mxu0 %v82_v4 }
   0x5   :  { %v78_v8 = vld [vmem:[%s6979_s1 + $0x1a8] sm:$0xff]  ;;  %1232 = vmatprep.subr.mxu1 %v210_v5  ;;  %v77_v10 = vld [vmem:[%s6979_s1 + $0x1a0] sm:$0xff]  ;;  %1162 = vmatpush1.msra.mxu0 %v81_v6 }
   0x6   :  { %v206_v9 = vld [vmem:[%s6979_s1 + $0x5a8] sm:$0xff]  ;;  %v205_v11 = vld [vmem:[%s6979_s1 + $0x5a0] sm:$0xff]  ;;  %1233 = vmatpush1.msra.mxu1 %v209_v7  ;;  %1163 = vmatprep.subr.mxu0 %v78_v8 }
   0x7   :  { %v74_v12 = vld [vmem:[%s6979_s1 + $0x188] sm:$0xff]  ;;  %1234 = vmatprep.subr.mxu1 %v206_v9  ;;  %v73_v14 = vld [vmem:[%s6979_s1 + $0x180] sm:$0xff]  ;;  %1164 = vmatpush1.msra.mxu0 %v77_v10 }
   0x8   :  { %v202_v13 = vld [vmem:[%s6979_s1 + $0x588] sm:$0xff]  ;;  %v201_v15 = vld [vmem:[%s6979_s1 + $0x580] sm:$0xff]  ;;  %1235 = vmatpush1.msra.mxu1 %v205_v11  ;;  %1165 = vmatprep.subr.mxu0 %v74_v12 }
   0x9   :  { %v70_v16 = vld [vmem:[%s6979_s1 + $0x168] sm:$0xff]  ;;  %1236 = vmatprep.subr.mxu1 %v202_v13  ;;  %v69_v18 = vld [vmem:[%s6979_s1 + $0x160] sm:$0xff]  ;;  %1166 = vmatpush1.msra.mxu0 %v73_v14 }
   0xa   :  { %v198_v17 = vld [vmem:[%s6979_s1 + $0x568] sm:$0xff]  ;;  %v197_v19 = vld [vmem:[%s6979_s1 + $0x560] sm:$0xff]  ;;  %1237 = vmatpush1.msra.mxu1 %v201_v15  ;;  %1167 = vmatprep.subr.mxu0 %v70_v16 }
   0xb   :  { %v66_v20 = vld [vmem:[%s6979_s1 + $0x148] sm:$0xff]  ;;  %1238 = vmatprep.subr.mxu1 %v198_v17  ;;  %v65_v22 = vld [vmem:[%s6979_s1 + $0x140] sm:$0xff]  ;;  %1168 = vmatpush1.msra.mxu0 %v69_v18 }
   0xc   :  { %v194_v21 = vld [vmem:[%s6979_s1 + $0x548] sm:$0xff]  ;;  %v193_v23 = vld [vmem:[%s6979_s1 + $0x540] sm:$0xff]  ;;  %1239 = vmatpush1.msra.mxu1 %v197_v19  ;;  %1169 = vmatprep.subr.mxu0 %v66_v20 }
   0xd   :  { %v62_v24 = vld [vmem:[%s6979_s1 + $0x128] sm:$0xff]  ;;  %1240 = vmatprep.subr.mxu1 %v194_v21  ;;  %v61_v26 = vld [vmem:[%s6979_s1 + $0x120] sm:$0xff]  ;;  %1170 = vmatpush1.msra.mxu0 %v65_v22 }
   0xe   :  { %v190_v25 = vld [vmem:[%s6979_s1 + $0x528] sm:$0xff]  ;;  %v189_v27 = vld [vmem:[%s6979_s1 + $0x520] sm:$0xff]  ;;  %1241 = vmatpush1.msra.mxu1 %v193_v23  ;;  %1171 = vmatprep.subr.mxu0 %v62_v24 }
   0xf   :  { %v58_v28 = vld [vmem:[%s6979_s1 + $0x108] sm:$0xff]  ;;  %1242 = vmatprep.subr.mxu1 %v190_v25  ;;  %v57_v30 = vld [vmem:[%s6979_s1 + $0x100] sm:$0xff]  ;;  %1172 = vmatpush1.msra.mxu0 %v61_v26 }
  0x10   :  { %v186_v29 = vld [vmem:[%s6979_s1 + $0x508] sm:$0xff]  ;;  %v185_v31 = vld [vmem:[%s6979_s1 + $0x500] sm:$0xff]  ;;  %1243 = vmatpush1.msra.mxu1 %v189_v27  ;;  %1173 = vmatprep.subr.mxu0 %v58_v28 }
  0x11   :  { %v54_v32 = vld [vmem:[%s6979_s1 + $0xe8] sm:$0xff]  ;;  %1244 = vmatprep.subr.mxu1 %v186_v29  ;;  %v53_v34 = vld [vmem:[%s6979_s1 + $0xe0] sm:$0xff]  ;;  %1174 = vmatpush1.msra.mxu0 %v57_v30  ;;  %v1051_v30 = vlaneseq }
  0x12   :  { %v182_v33 = vld [vmem:[%s6979_s1 + $0x4e8] sm:$0xff]  ;;  %v181_v35 = vld [vmem:[%s6979_s1 + $0x4e0] sm:$0xff]  ;;  %1245 = vmatpush1.msra.mxu1 %v185_v31  ;;  %1175 = vmatprep.subr.mxu0 %v54_v32  ;;  %v2923_v31 = vmov 1983009808  }
  0x13   :  { %v50_v36 = vld [vmem:[%s6979_s1 + $0xc8] sm:$0xff]  ;;  %1246 = vmatprep.subr.mxu1 %v182_v33  ;;  %v49_v38 = vld [vmem:[%s6979_s1 + $0xc0] sm:$0xff]  ;;  %1176 = vmatpush1.msra.mxu0 %v53_v34  ;;  %v1077_v32 = vunpack.c.l.s4 %v2923_v31 }
  0x14   :  { %v178_v37 = vld [vmem:[%s6979_s1 + $0x4c8] sm:$0xff]  ;;  %v177_v39 = vld [vmem:[%s6979_s1 + $0x4c0] sm:$0xff]  ;;  %1247 = vmatpush1.msra.mxu1 %v181_v35  ;;  %1177 = vmatprep.subr.mxu0 %v50_v36 }
  0x15   :  { %v46_v40 = vld [vmem:[%s6979_s1 + $0xa8] sm:$0xff]  ;;  %1248 = vmatprep.subr.mxu1 %v178_v37  ;;  %v45_v42 = vld [vmem:[%s6979_s1 + $0xa0] sm:$0xff]  ;;  %1178 = vmatpush1.msra.mxu0 %v49_v38 }
  0x16   :  { %v174_v41 = vld [vmem:[%s6979_s1 + $0x4a8] sm:$0xff]  ;;  %v173_v43 = vld [vmem:[%s6979_s1 + $0x4a0] sm:$0xff]  ;;  %1249 = vmatpush1.msra.mxu1 %v177_v39  ;;  %1179 = vmatprep.subr.mxu0 %v46_v40 }
  0x17   :  { %v42_v44 = vld [vmem:[%s6979_s1 + $0x88] sm:$0xff]  ;;  %1250 = vmatprep.subr.mxu1 %v174_v41  ;;  %v41_v46 = vld [vmem:[%s6979_s1 + $0x80] sm:$0xff]  ;;  %1180 = vmatpush1.msra.mxu0 %v45_v42  ;;  %v3261_v41 = vshrl.u32 %v1051_v30, 7  ;;  %v1078_v42 = vunpack.c.0.s8 %v1077_v32 }
  0x18   :  { %v170_v45 = vld [vmem:[%s6979_s1 + $0x488] sm:$0xff]  ;;  %v169_v47 = vld [vmem:[%s6979_s1 + $0x480] sm:$0xff]  ;;  %1251 = vmatpush1.msra.mxu1 %v173_v43  ;;  %1181 = vmatprep.subr.mxu0 %v42_v44 }
  0x19   :  { %v38_v48 = vld [vmem:[%s6979_s1 + $0x68] sm:$0xff]  ;;  %1252 = vmatprep.subr.mxu1 %v170_v45  ;;  %v37_v50 = vld [vmem:[%s6979_s1 + $0x60] sm:$0xff]  ;;  %1182 = vmatpush1.msra.mxu0 %v41_v46 }
  0x1a   :  { %v166_v49 = vld [vmem:[%s6979_s1 + $0x468] sm:$0xff]  ;;  %v165_v51 = vld [vmem:[%s6979_s1 + $0x460] sm:$0xff]  ;;  %1253 = vmatpush1.msra.mxu1 %v169_v47  ;;  %1183 = vmatprep.subr.mxu0 %v38_v48 }
  0x1b   :  { %v34_v52 = vld [vmem:[%s6979_s1 + $0x48] sm:$0xff]  ;;  %1254 = vmatprep.subr.mxu1 %v166_v49  ;;  %v33_v54 = vld [vmem:[%s6979_s1 + $0x40] sm:$0xff]  ;;  %1184 = vmatpush1.msra.mxu0 %v37_v50 }
  0x1c   :  { %v162_v53 = vld [vmem:[%s6979_s1 + $0x448] sm:$0xff]  ;;  %v161_v55 = vld [vmem:[%s6979_s1 + $0x440] sm:$0xff]  ;;  %1255 = vmatpush1.msra.mxu1 %v165_v51  ;;  %1185 = vmatprep.subr.mxu0 %v34_v52  ;;  %v3291_v52 = vsub.s32 %v1078_v42, %v3261_v41 }
  0x1d   :  { %v30_v56 = vld [vmem:[%s6979_s1 + $0x28] sm:$0xff]  ;;  %1256 = vmatprep.subr.mxu1 %v162_v53  ;;  %v29_v58 = vld [vmem:[%s6979_s1 + $0x20] sm:$0xff]  ;;  %1186 = vmatpush1.msra.mxu0 %v33_v54 }
  0x1e   :  { %v158_v57 = vld [vmem:[%s6979_s1 + $0x428] sm:$0xff]  ;;  %v157_v59 = vld [vmem:[%s6979_s1 + $0x420] sm:$0xff]  ;;  %1257 = vmatpush1.msra.mxu1 %v161_v55  ;;  %1187 = vmatprep.subr.mxu0 %v30_v56 }
  0x1f   :  { %v26_v60 = vld [vmem:[%s6979_s1 + $0x8] sm:$0xff]  ;;  %1258 = vmatprep.subr.mxu1 %v158_v57  ;;  %v25_v62 = vld [vmem:[%s6979_s1] sm:$0xff]  ;;  %1188 = vmatpush1.msra.mxu0 %v29_v58 }
  0x20   :  { %v154_v61 = vld [vmem:[%s6979_s1 + $0x408] sm:$0xff]  ;;  %v153_v63 = vld [vmem:[%s6979_s1 + $0x400] sm:$0xff]  ;;  %1259 = vmatpush1.msra.mxu1 %v157_v59  ;;  %1189 = vmatprep.subr.mxu0 %v26_v60 }
  0x21   :  { %v150_v0 = vld [vmem:[%s6979_s1 + $0x3e8] sm:$0xff]  ;;  %1260 = vmatprep.subr.mxu1 %v154_v61  ;;  %v149_v2 = vld [vmem:[%s6979_s1 + $0x3e0] sm:$0xff]  ;;  %1190 = vmatpush1.msra.mxu0 %v25_v62 }
  0x22   :  { %v278_v1 = vld [vmem:[%s6979_s1 + $0x7e8] sm:$0xff]  ;;  %v277_v3 = vld [vmem:[%s6979_s1 + $0x7e0] sm:$0xff]  ;;  %1261 = vmatpush1.msra.mxu1 %v153_v63  ;;  %1191 = vmatprep.subr.mxu0 %v150_v0 }
  0x23   :  { %v146_v4 = vld [vmem:[%s6979_s1 + $0x3c8] sm:$0xff]  ;;  %1262 = vmatprep.subr.mxu1 %v278_v1  ;;  %v145_v6 = vld [vmem:[%s6979_s1 + $0x3c0] sm:$0xff]  ;;  %1192 = vmatpush2.msra.mxu0 %v149_v2 }
  0x24   :  { %v274_v5 = vld [vmem:[%s6979_s1 + $0x7c8] sm:$0xff]  ;;  %v273_v7 = vld [vmem:[%s6979_s1 + $0x7c0] sm:$0xff]  ;;  %1263 = vmatpush2.msra.mxu1 %v277_v3  ;;  %1193 = vmatprep.subr.mxu0 %v146_v4 }
  0x25   :  { %v142_v8 = vld [vmem:[%s6979_s1 + $0x3a8] sm:$0xff]  ;;  %1264 = vmatprep.subr.mxu1 %v274_v5  ;;  %v141_v10 = vld [vmem:[%s6979_s1 + $0x3a0] sm:$0xff]  ;;  %1194 = vmatpush2.msra.mxu0 %v145_v6 }
  0x26   :  { %v270_v9 = vld [vmem:[%s6979_s1 + $0x7a8] sm:$0xff]  ;;  %v269_v11 = vld [vmem:[%s6979_s1 + $0x7a0] sm:$0xff]  ;;  %1265 = vmatpush2.msra.mxu1 %v273_v7  ;;  %1195 = vmatprep.subr.mxu0 %v142_v8 }
  0x27   :  { %v138_v12 = vld [vmem:[%s6979_s1 + $0x388] sm:$0xff]  ;;  %1266 = vmatprep.subr.mxu1 %v270_v9  ;;  %v137_v14 = vld [vmem:[%s6979_s1 + $0x380] sm:$0xff]  ;;  %1196 = vmatpush2.msra.mxu0 %v141_v10 }
  0x28   :  { %v266_v13 = vld [vmem:[%s6979_s1 + $0x788] sm:$0xff]  ;;  %v265_v15 = vld [vmem:[%s6979_s1 + $0x780] sm:$0xff]  ;;  %1267 = vmatpush2.msra.mxu1 %v269_v11  ;;  %1197 = vmatprep.subr.mxu0 %v138_v12 }
  0x29   :  { %v134_v16 = vld [vmem:[%s6979_s1 + $0x368] sm:$0xff]  ;;  %1268 = vmatprep.subr.mxu1 %v266_v13  ;;  %v133_v18 = vld [vmem:[%s6979_s1 + $0x360] sm:$0xff]  ;;  %1198 = vmatpush2.msra.mxu0 %v137_v14 }
  0x2a   :  { %v262_v17 = vld [vmem:[%s6979_s1 + $0x768] sm:$0xff]  ;;  %v261_v19 = vld [vmem:[%s6979_s1 + $0x760] sm:$0xff]  ;;  %1269 = vmatpush2.msra.mxu1 %v265_v15  ;;  %1199 = vmatprep.subr.mxu0 %v134_v16 }
  0x2b   :  { %v130_v20 = vld [vmem:[%s6979_s1 + $0x348] sm:$0xff]  ;;  %1270 = vmatprep.subr.mxu1 %v262_v17  ;;  %v129_v22 = vld [vmem:[%s6979_s1 + $0x340] sm:$0xff]  ;;  %1200 = vmatpush2.msra.mxu0 %v133_v18 }
  0x2c   :  { %v258_v21 = vld [vmem:[%s6979_s1 + $0x748] sm:$0xff]  ;;  %v257_v23 = vld [vmem:[%s6979_s1 + $0x740] sm:$0xff]  ;;  %1271 = vmatpush2.msra.mxu1 %v261_v19  ;;  %1201 = vmatprep.subr.mxu0 %v130_v20 }
  0x2d   :  { %v126_v24 = vld [vmem:[%s6979_s1 + $0x328] sm:$0xff]  ;;  %1272 = vmatprep.subr.mxu1 %v258_v21  ;;  %v125_v26 = vld [vmem:[%s6979_s1 + $0x320] sm:$0xff]  ;;  %1202 = vmatpush2.msra.mxu0 %v129_v22 }
  0x2e   :  { %v254_v25 = vld [vmem:[%s6979_s1 + $0x728] sm:$0xff]  ;;  %v253_v27 = vld [vmem:[%s6979_s1 + $0x720] sm:$0xff]  ;;  %1273 = vmatpush2.msra.mxu1 %v257_v23  ;;  %1203 = vmatprep.subr.mxu0 %v126_v24 }
  0x2f   :  { %v122_v28 = vld [vmem:[%s6979_s1 + $0x308] sm:$0xff]  ;;  %1274 = vmatprep.subr.mxu1 %v254_v25  ;;  %v121_v33 = vld [vmem:[%s6979_s1 + $0x300] sm:$0xff]  ;;  %1204 = vmatpush2.msra.mxu0 %v125_v26 }
  0x30   :  { %v250_v29 = vld [vmem:[%s6979_s1 + $0x708] sm:$0xff]  ;;  %v249_v34 = vld [vmem:[%s6979_s1 + $0x700] sm:$0xff]  ;;  %1275 = vmatpush2.msra.mxu1 %v253_v27  ;;  %1205 = vmatprep.subr.mxu0 %v122_v28 }
  0x31   :  { %v118_v35 = vld [vmem:[%s6979_s1 + $0x2e8] sm:$0xff]  ;;  %1276 = vmatprep.subr.mxu1 %v250_v29  ;;  %v117_v37 = vld [vmem:[%s6979_s1 + $0x2e0] sm:$0xff]  ;;  %1206 = vmatpush2.msra.mxu0 %v121_v33 }
  0x32   :  { %v246_v36 = vld [vmem:[%s6979_s1 + $0x6e8] sm:$0xff]  ;;  %v245_v38 = vld [vmem:[%s6979_s1 + $0x6e0] sm:$0xff]  ;;  %1277 = vmatpush2.msra.mxu1 %v249_v34  ;;  %1207 = vmatprep.subr.mxu0 %v118_v35 }
  0x33   :  { %v114_v39 = vld [vmem:[%s6979_s1 + $0x2c8] sm:$0xff]  ;;  %1278 = vmatprep.subr.mxu1 %v246_v36  ;;  %v113_v43 = vld [vmem:[%s6979_s1 + $0x2c0] sm:$0xff]  ;;  %1208 = vmatpush2.msra.mxu0 %v117_v37 }
  0x34   :  { %v242_v40 = vld [vmem:[%s6979_s1 + $0x6c8] sm:$0xff]  ;;  %v241_v44 = vld [vmem:[%s6979_s1 + $0x6c0] sm:$0xff]  ;;  %1279 = vmatpush2.msra.mxu1 %v245_v38  ;;  %1209 = vmatprep.subr.mxu0 %v114_v39 }
  0x35   :  { %v110_v45 = vld [vmem:[%s6979_s1 + $0x2a8] sm:$0xff]  ;;  %1280 = vmatprep.subr.mxu1 %v242_v40  ;;  %v109_v47 = vld [vmem:[%s6979_s1 + $0x2a0] sm:$0xff]  ;;  %1210 = vmatpush2.msra.mxu0 %v113_v43 }
  0x36   :  { %v238_v46 = vld [vmem:[%s6979_s1 + $0x6a8] sm:$0xff]  ;;  %v237_v48 = vld [vmem:[%s6979_s1 + $0x6a0] sm:$0xff]  ;;  %1281 = vmatpush2.msra.mxu1 %v241_v44  ;;  %1211 = vmatprep.subr.mxu0 %v110_v45 }
  0x37   :  { %v21_v49 = vld [vmem:[%s6978_s0] sm:$0xff]  ;;  %v106_v50 = vld [vmem:[%s6979_s1 + $0x288] sm:$0xff]  ;;  %1282 = vmatprep.subr.mxu1 %v238_v46  ;;  %1212 = vmatpush2.msra.mxu0 %v109_v47 }
  0x38   :  { %v234_v51 = vld [vmem:[%s6979_s1 + $0x688] sm:$0xff]  ;;  %v105_v53 = vld [vmem:[%s6979_s1 + $0x280] sm:$0xff]  ;;  %1283 = vmatpush2.msra.mxu1 %v237_v48  ;;  %v1075_v57 = vcombine.high %v21_v49, %v21_v49  ;;  %1213 = vmatprep.subr.mxu0 %v106_v50  ;;  %v3318_v62 = vrot.slane %v21_v49, %v3291_v52 }
  0x39   :  { %v233_v54 = vld [vmem:[%s6979_s1 + $0x680] sm:$0xff]  ;;  %v102_v55 = vld [vmem:[%s6979_s1 + $0x268] sm:$0xff]  ;;  %1284 = vmatprep.subr.mxu1 %v234_v51  ;;  %1214 = vmatpush2.msra.mxu0 %v105_v53 }
  0x3a   :  { %v230_v56 = vld [vmem:[%s6979_s1 + $0x668] sm:$0xff]  ;;  %v101_v58 = vld [vmem:[%s6979_s1 + $0x260] sm:$0xff]  ;;  %1285 = vmatpush2.msra.mxu1 %v233_v54  ;;  %1215 = vmatprep.subr.mxu0 %v102_v55  ;;  %v3333_v3 = vrot.slane %v1075_v57, %v3291_v52  ;;  %v3349_v8 = vcombine.high %v3318_v62, %v3318_v62 }
  0x3b   :  { %v229_v59 = vld [vmem:[%s6979_s1 + $0x660] sm:$0xff]  ;;  %v98_v60 = vld [vmem:[%s6979_s1 + $0x248] sm:$0xff]  ;;  %1286 = vmatprep.subr.mxu1 %v230_v56  ;;  %1216 = vmatpush2.msra.mxu0 %v101_v58 }
  0x3c   :  { %v226_v61 = vld [vmem:[%s6979_s1 + $0x648] sm:$0xff]  ;;  %v97_v63 = vld [vmem:[%s6979_s1 + $0x240] sm:$0xff]  ;;  %1287 = vmatpush2.msra.mxu1 %v229_v59  ;;  %1217 = vmatprep.subr.mxu0 %v98_v60  ;;  %v3359_v11 = vcombine.high %v3333_v3, %v3333_v3 }
  0x3d   :  { %v225_v0 = vld [vmem:[%s6979_s1 + $0x640] sm:$0xff]  ;;  %v94_v1 = vld [vmem:[%s6979_s1 + $0x228] sm:$0xff]  ;;  %1288 = vmatprep.subr.mxu1 %v226_v61  ;;  %1218 = vmatpush2.msra.mxu0 %v97_v63 }
  0x3e   :  { %v222_v2 = vld [vmem:[%s6979_s1 + $0x628] sm:$0xff]  ;;  %v93_v4 = vld [vmem:[%s6979_s1 + $0x220] sm:$0xff]  ;;  %1289 = vmatpush2.msra.mxu1 %v225_v0  ;;  %1219 = vmatprep.subr.mxu0 %v94_v1 }
  0x3f   :  { %v221_v5 = vld [vmem:[%s6979_s1 + $0x620] sm:$0xff]  ;;  %v90_v6 = vld [vmem:[%s6979_s1 + $0x208] sm:$0xff]  ;;  %1290 = vmatprep.subr.mxu1 %v222_v2  ;;  %1220 = vmatpush2.msra.mxu0 %v93_v4 }
  0x40   :  { %v218_v7 = vld [vmem:[%s6979_s1 + $0x608] sm:$0xff]  ;;  %v89_v9 = vld [vmem:[%s6979_s1 + $0x200] sm:$0xff]  ;;  %1291 = vmatpush2.msra.mxu1 %v221_v5  ;;  %1221 = vmatprep.subr.mxu0 %v90_v6 }
  0x41   :  { %v217_v10 = vld [vmem:[%s6979_s1 + $0x600] sm:$0xff]  ;;  %1292 = vmatprep.subr.mxu1 %v218_v7  ;;  %v342_v12 = vld [vmem:[%s6979_s1 + $0x9e8] sm:$0xff]  ;;  %1222 = vmatpush2.msra.mxu0 %v89_v9 }
  0x42   :  { %1223 = vmatprep.mubr.f32.mxu0 %v3349_v8  ;;  %v470_v13 = vld [vmem:[%s6979_s1 + $0xde8] sm:$0xff]  ;;  %1293 = vmatpush2.msra.mxu1 %v217_v10  ;;  %v341_v14 = vld [vmem:[%s6979_s1 + $0x9e0] sm:$0xff] }
  0x43   :  { %1224 = vmatmul.mubr.f32.vlgmr.msra.gmra.mxu0 %v3318_v62  ;;  %v469_v15 = vld [vmem:[%s6979_s1 + $0xde0] sm:$0xff]  ;;  %1294 = vmatprep.mubr.f32.mxu1 %v3359_v11  ;;  %v338_v16 = vld [vmem:[%s6979_s1 + $0x9c8] sm:$0xff] }
  0x44   :  { %1301 = vmatprep.subr.mxu0 %v342_v12  ;;  %v466_v17 = vld [vmem:[%s6979_s1 + $0xdc8] sm:$0xff]  ;;  %1372 = vmatprep.subr.mxu1 %v470_v13  ;;  %v337_v18 = vld [vmem:[%s6979_s1 + $0x9c0] sm:$0xff] }
  0x45   :  { %1295 = vmatmul.mubr.f32.vlgmr.msra.gmra.mxu1 %v3333_v3  ;;  %v465_v19 = vld [vmem:[%s6979_s1 + $0xdc0] sm:$0xff]  ;;  %1302 = vmatpush1.msra.mxu0 %v341_v14  ;;  %v334_v20 = vld [vmem:[%s6979_s1 + $0x9a8] sm:$0xff] }
  0x46   :  { %1373 = vmatpush1.msra.mxu1 %v469_v15  ;;  %v462_v21 = vld [vmem:[%s6979_s1 + $0xda8] sm:$0xff]  ;;  %1303 = vmatprep.subr.mxu0 %v338_v16  ;;  %v333_v22 = vld [vmem:[%s6979_s1 + $0x9a0] sm:$0xff] }
  0x47   :  { %1374 = vmatprep.subr.mxu1 %v466_v17  ;;  %v461_v23 = vld [vmem:[%s6979_s1 + $0xda0] sm:$0xff]  ;;  %1304 = vmatpush1.msra.mxu0 %v337_v18  ;;  %v330_v24 = vld [vmem:[%s6979_s1 + $0x988] sm:$0xff] }
  0x48   :  { %1375 = vmatpush1.msra.mxu1 %v465_v19  ;;  %v458_v25 = vld [vmem:[%s6979_s1 + $0xd88] sm:$0xff]  ;;  %1305 = vmatprep.subr.mxu0 %v334_v20  ;;  %v329_v26 = vld [vmem:[%s6979_s1 + $0x980] sm:$0xff] }
  0x49   :  { %1376 = vmatprep.subr.mxu1 %v462_v21  ;;  %v457_v27 = vld [vmem:[%s6979_s1 + $0xd80] sm:$0xff]  ;;  %1306 = vmatpush1.msra.mxu0 %v333_v22  ;;  %v326_v28 = vld [vmem:[%s6979_s1 + $0x968] sm:$0xff] }
  0x4a   :  { %1377 = vmatpush1.msra.mxu1 %v461_v23  ;;  %v454_v29 = vld [vmem:[%s6979_s1 + $0xd68] sm:$0xff]  ;;  %1307 = vmatprep.subr.mxu0 %v330_v24  ;;  %v325_v30 = vld [vmem:[%s6979_s1 + $0x960] sm:$0xff] }
  0x4b   :  { %1378 = vmatprep.subr.mxu1 %v458_v25  ;;  %v453_v31 = vld [vmem:[%s6979_s1 + $0xd60] sm:$0xff]  ;;  %1308 = vmatpush1.msra.mxu0 %v329_v26  ;;  %v322_v32 = vld [vmem:[%s6979_s1 + $0x948] sm:$0xff] }
  0x4c   :  { %1379 = vmatpush1.msra.mxu1 %v457_v27  ;;  %v450_v33 = vld [vmem:[%s6979_s1 + $0xd48] sm:$0xff]  ;;  %1309 = vmatprep.subr.mxu0 %v326_v28  ;;  %v321_v34 = vld [vmem:[%s6979_s1 + $0x940] sm:$0xff] }
  0x4d   :  { %1380 = vmatprep.subr.mxu1 %v454_v29  ;;  %v449_v35 = vld [vmem:[%s6979_s1 + $0xd40] sm:$0xff]  ;;  %1310 = vmatpush1.msra.mxu0 %v325_v30  ;;  %v318_v36 = vld [vmem:[%s6979_s1 + $0x928] sm:$0xff] }
  0x4e   :  { %1381 = vmatpush1.msra.mxu1 %v453_v31  ;;  %v446_v37 = vld [vmem:[%s6979_s1 + $0xd28] sm:$0xff]  ;;  %1311 = vmatprep.subr.mxu0 %v322_v32  ;;  %v317_v38 = vld [vmem:[%s6979_s1 + $0x920] sm:$0xff] }
  0x4f   :  { %1382 = vmatprep.subr.mxu1 %v450_v33  ;;  %v445_v39 = vld [vmem:[%s6979_s1 + $0xd20] sm:$0xff]  ;;  %1312 = vmatpush1.msra.mxu0 %v321_v34  ;;  %v314_v40 = vld [vmem:[%s6979_s1 + $0x908] sm:$0xff] }
  0x50   :  { %1383 = vmatpush1.msra.mxu1 %v449_v35  ;;  %v442_v42 = vld [vmem:[%s6979_s1 + $0xd08] sm:$0xff]  ;;  %1313 = vmatprep.subr.mxu0 %v318_v36  ;;  %v313_v43 = vld [vmem:[%s6979_s1 + $0x900] sm:$0xff] }
  0x51   :  { %1384 = vmatprep.subr.mxu1 %v446_v37  ;;  %v441_v44 = vld [vmem:[%s6979_s1 + $0xd00] sm:$0xff]  ;;  %1314 = vmatpush1.msra.mxu0 %v317_v38  ;;  %v310_v45 = vld [vmem:[%s6979_s1 + $0x8e8] sm:$0xff] }
  0x52   :  { %1385 = vmatpush1.msra.mxu1 %v445_v39  ;;  %v438_v46 = vld [vmem:[%s6979_s1 + $0xce8] sm:$0xff]  ;;  %1315 = vmatprep.subr.mxu0 %v314_v40  ;;  %v309_v47 = vld [vmem:[%s6979_s1 + $0x8e0] sm:$0xff] }
  0x53   :  { %1386 = vmatprep.subr.mxu1 %v442_v42  ;;  %v437_v48 = vld [vmem:[%s6979_s1 + $0xce0] sm:$0xff]  ;;  %1316 = vmatpush1.msra.mxu0 %v313_v43  ;;  %v306_v49 = vld [vmem:[%s6979_s1 + $0x8c8] sm:$0xff] }
  0x54   :  { %1387 = vmatpush1.msra.mxu1 %v441_v44  ;;  %v434_v50 = vld [vmem:[%s6979_s1 + $0xcc8] sm:$0xff]  ;;  %1317 = vmatprep.subr.mxu0 %v310_v45  ;;  %v305_v51 = vld [vmem:[%s6979_s1 + $0x8c0] sm:$0xff] }
  0x55   :  { %1388 = vmatprep.subr.mxu1 %v438_v46  ;;  %v433_v53 = vld [vmem:[%s6979_s1 + $0xcc0] sm:$0xff]  ;;  %1318 = vmatpush1.msra.mxu0 %v309_v47  ;;  %v302_v54 = vld [vmem:[%s6979_s1 + $0x8a8] sm:$0xff] }
  0x56   :  { %1389 = vmatpush1.msra.mxu1 %v437_v48  ;;  %v430_v55 = vld [vmem:[%s6979_s1 + $0xca8] sm:$0xff]  ;;  %1319 = vmatprep.subr.mxu0 %v306_v49  ;;  %v301_v56 = vld [vmem:[%s6979_s1 + $0x8a0] sm:$0xff] }
  0x57   :  { %1390 = vmatprep.subr.mxu1 %v434_v50  ;;  %v429_v57 = vld [vmem:[%s6979_s1 + $0xca0] sm:$0xff]  ;;  %1320 = vmatpush1.msra.mxu0 %v305_v51  ;;  %v298_v58 = vld [vmem:[%s6979_s1 + $0x888] sm:$0xff] }
  0x58   :  { %1391 = vmatpush1.msra.mxu1 %v433_v53  ;;  %v426_v59 = vld [vmem:[%s6979_s1 + $0xc88] sm:$0xff]  ;;  %1321 = vmatprep.subr.mxu0 %v302_v54  ;;  %v297_v60 = vld [vmem:[%s6979_s1 + $0x880] sm:$0xff] }
  0x59   :  { %1392 = vmatprep.subr.mxu1 %v430_v55  ;;  %v425_v61 = vld [vmem:[%s6979_s1 + $0xc80] sm:$0xff]  ;;  %1322 = vmatpush1.msra.mxu0 %v301_v56  ;;  %v294_v63 = vld [vmem:[%s6979_s1 + $0x868] sm:$0xff] }
  0x5a   :  { %1393 = vmatpush1.msra.mxu1 %v429_v57  ;;  %v422_v0 = vld [vmem:[%s6979_s1 + $0xc68] sm:$0xff]  ;;  %1323 = vmatprep.subr.mxu0 %v298_v58  ;;  %v293_v1 = vld [vmem:[%s6979_s1 + $0x860] sm:$0xff] }
  0x5b   :  { %1394 = vmatprep.subr.mxu1 %v426_v59  ;;  %v421_v2 = vld [vmem:[%s6979_s1 + $0xc60] sm:$0xff]  ;;  %1324 = vmatpush1.msra.mxu0 %v297_v60  ;;  %v290_v4 = vld [vmem:[%s6979_s1 + $0x848] sm:$0xff] }
  0x5c   :  { %1395 = vmatpush1.msra.mxu1 %v425_v61  ;;  %v418_v5 = vld [vmem:[%s6979_s1 + $0xc48] sm:$0xff]  ;;  %1325 = vmatprep.subr.mxu0 %v294_v63  ;;  %v289_v6 = vld [vmem:[%s6979_s1 + $0x840] sm:$0xff] }
  0x5d   :  { %1396 = vmatprep.subr.mxu1 %v422_v0  ;;  %v417_v7 = vld [vmem:[%s6979_s1 + $0xc40] sm:$0xff]  ;;  %1326 = vmatpush1.msra.mxu0 %v293_v1  ;;  %v286_v9 = vld [vmem:[%s6979_s1 + $0x828] sm:$0xff] }
  0x5e   :  { %1397 = vmatpush1.msra.mxu1 %v421_v2  ;;  %v414_v10 = vld [vmem:[%s6979_s1 + $0xc28] sm:$0xff]  ;;  %1327 = vmatprep.subr.mxu0 %v290_v4  ;;  %v285_v12 = vld [vmem:[%s6979_s1 + $0x820] sm:$0xff] }
  0x5f   :  { %1398 = vmatprep.subr.mxu1 %v418_v5  ;;  %v413_v13 = vld [vmem:[%s6979_s1 + $0xc20] sm:$0xff]  ;;  %1328 = vmatpush1.msra.mxu0 %v289_v6  ;;  %v282_v14 = vld [vmem:[%s6979_s1 + $0x808] sm:$0xff] }
  0x60   :  { %1399 = vmatpush1.msra.mxu1 %v417_v7  ;;  %v410_v15 = vld [vmem:[%s6979_s1 + $0xc08] sm:$0xff]  ;;  %1329 = vmatprep.subr.mxu0 %v286_v9  ;;  %v281_v16 = vld [vmem:[%s6979_s1 + $0x800] sm:$0xff] }
  0x61   :  { %1400 = vmatprep.subr.mxu1 %v414_v10  ;;  %v409_v17 = vld [vmem:[%s6979_s1 + $0xc00] sm:$0xff]  ;;  %1330 = vmatpush1.msra.mxu0 %v285_v12  ;;  %v406_v18 = vld [vmem:[%s6979_s1 + $0xbe8] sm:$0xff] }
  0x62   :  { %1401 = vmatpush1.msra.mxu1 %v413_v13  ;;  %v534_v19 = vld [vmem:[%s6979_s1 + $0xfe8] sm:$0xff]  ;;  %1331 = vmatprep.subr.mxu0 %v282_v14  ;;  %v405_v20 = vld [vmem:[%s6979_s1 + $0xbe0] sm:$0xff] }
  0x63   :  { %1402 = vmatprep.subr.mxu1 %v410_v15  ;;  %v533_v21 = vld [vmem:[%s6979_s1 + $0xfe0] sm:$0xff]  ;;  %1332 = vmatpush1.msra.mxu0 %v281_v16  ;;  %v402_v22 = vld [vmem:[%s6979_s1 + $0xbc8] sm:$0xff] }
  0x64   :  { %1403 = vmatpush1.msra.mxu1 %v409_v17  ;;  %v530_v23 = vld [vmem:[%s6979_s1 + $0xfc8] sm:$0xff]  ;;  %1333 = vmatprep.subr.mxu0 %v406_v18  ;;  %v401_v24 = vld [vmem:[%s6979_s1 + $0xbc0] sm:$0xff] }
  0x65   :  { %1404 = vmatprep.subr.mxu1 %v534_v19  ;;  %v529_v25 = vld [vmem:[%s6979_s1 + $0xfc0] sm:$0xff]  ;;  %1334 = vmatpush2.msra.mxu0 %v405_v20  ;;  %v398_v26 = vld [vmem:[%s6979_s1 + $0xba8] sm:$0xff] }
  0x66   :  { %1405 = vmatpush2.msra.mxu1 %v533_v21  ;;  %v526_v27 = vld [vmem:[%s6979_s1 + $0xfa8] sm:$0xff]  ;;  %1335 = vmatprep.subr.mxu0 %v402_v22  ;;  %v397_v28 = vld [vmem:[%s6979_s1 + $0xba0] sm:$0xff] }
  0x67   :  { %1406 = vmatprep.subr.mxu1 %v530_v23  ;;  %v525_v29 = vld [vmem:[%s6979_s1 + $0xfa0] sm:$0xff]  ;;  %1336 = vmatpush2.msra.mxu0 %v401_v24  ;;  %v394_v30 = vld [vmem:[%s6979_s1 + $0xb88] sm:$0xff] }
  0x68   :  { %1407 = vmatpush2.msra.mxu1 %v529_v25  ;;  %v522_v31 = vld [vmem:[%s6979_s1 + $0xf88] sm:$0xff]  ;;  %1337 = vmatprep.subr.mxu0 %v398_v26  ;;  %v393_v32 = vld [vmem:[%s6979_s1 + $0xb80] sm:$0xff] }
  0x69   :  { %1408 = vmatprep.subr.mxu1 %v526_v27  ;;  %v521_v33 = vld [vmem:[%s6979_s1 + $0xf80] sm:$0xff]  ;;  %1338 = vmatpush2.msra.mxu0 %v397_v28  ;;  %v390_v34 = vld [vmem:[%s6979_s1 + $0xb68] sm:$0xff] }
  0x6a   :  { %1409 = vmatpush2.msra.mxu1 %v525_v29  ;;  %v518_v35 = vld [vmem:[%s6979_s1 + $0xf68] sm:$0xff]  ;;  %1339 = vmatprep.subr.mxu0 %v394_v30  ;;  %v389_v36 = vld [vmem:[%s6979_s1 + $0xb60] sm:$0xff] }
  0x6b   :  { %1410 = vmatprep.subr.mxu1 %v522_v31  ;;  %v517_v37 = vld [vmem:[%s6979_s1 + $0xf60] sm:$0xff]  ;;  %1340 = vmatpush2.msra.mxu0 %v393_v32  ;;  %v386_v38 = vld [vmem:[%s6979_s1 + $0xb48] sm:$0xff] }
  0x6c   :  { %1411 = vmatpush2.msra.mxu1 %v521_v33  ;;  %v514_v39 = vld [vmem:[%s6979_s1 + $0xf48] sm:$0xff]  ;;  %1341 = vmatprep.subr.mxu0 %v390_v34  ;;  %v385_v40 = vld [vmem:[%s6979_s1 + $0xb40] sm:$0xff] }
  0x6d   :  { %1412 = vmatprep.subr.mxu1 %v518_v35  ;;  %v513_v42 = vld [vmem:[%s6979_s1 + $0xf40] sm:$0xff]  ;;  %1342 = vmatpush2.msra.mxu0 %v389_v36  ;;  %v382_v43 = vld [vmem:[%s6979_s1 + $0xb28] sm:$0xff] }
  0x6e   :  { %1413 = vmatpush2.msra.mxu1 %v517_v37  ;;  %v510_v44 = vld [vmem:[%s6979_s1 + $0xf28] sm:$0xff]  ;;  %1343 = vmatprep.subr.mxu0 %v386_v38  ;;  %v381_v45 = vld [vmem:[%s6979_s1 + $0xb20] sm:$0xff] }
  0x6f   :  { %1414 = vmatprep.subr.mxu1 %v514_v39  ;;  %v509_v46 = vld [vmem:[%s6979_s1 + $0xf20] sm:$0xff]  ;;  %1344 = vmatpush2.msra.mxu0 %v385_v40  ;;  %v378_v47 = vld [vmem:[%s6979_s1 + $0xb08] sm:$0xff] }
  0x70   :  { %1415 = vmatpush2.msra.mxu1 %v513_v42  ;;  %v506_v48 = vld [vmem:[%s6979_s1 + $0xf08] sm:$0xff]  ;;  %1345 = vmatprep.subr.mxu0 %v382_v43  ;;  %v377_v49 = vld [vmem:[%s6979_s1 + $0xb00] sm:$0xff] }
  0x71   :  { %1416 = vmatprep.subr.mxu1 %v510_v44  ;;  %v505_v50 = vld [vmem:[%s6979_s1 + $0xf00] sm:$0xff]  ;;  %1346 = vmatpush2.msra.mxu0 %v381_v45  ;;  %v374_v51 = vld [vmem:[%s6979_s1 + $0xae8] sm:$0xff] }
  0x72   :  { %1417 = vmatpush2.msra.mxu1 %v509_v46  ;;  %v502_v53 = vld [vmem:[%s6979_s1 + $0xee8] sm:$0xff]  ;;  %1347 = vmatprep.subr.mxu0 %v378_v47  ;;  %v373_v54 = vld [vmem:[%s6979_s1 + $0xae0] sm:$0xff] }
  0x73   :  { %1418 = vmatprep.subr.mxu1 %v506_v48  ;;  %v501_v55 = vld [vmem:[%s6979_s1 + $0xee0] sm:$0xff]  ;;  %1348 = vmatpush2.msra.mxu0 %v377_v49  ;;  %v370_v56 = vld [vmem:[%s6979_s1 + $0xac8] sm:$0xff] }
  0x74   :  { %1419 = vmatpush2.msra.mxu1 %v505_v50  ;;  %v498_v57 = vld [vmem:[%s6979_s1 + $0xec8] sm:$0xff]  ;;  %1349 = vmatprep.subr.mxu0 %v374_v51  ;;  %v369_v58 = vld [vmem:[%s6979_s1 + $0xac0] sm:$0xff] }
  0x75   :  { %1420 = vmatprep.subr.mxu1 %v502_v53  ;;  %v497_v59 = vld [vmem:[%s6979_s1 + $0xec0] sm:$0xff]  ;;  %1350 = vmatpush2.msra.mxu0 %v373_v54  ;;  %v366_v60 = vld [vmem:[%s6979_s1 + $0xaa8] sm:$0xff] }
  0x76   :  { %1421 = vmatpush2.msra.mxu1 %v501_v55  ;;  %v494_v61 = vld [vmem:[%s6979_s1 + $0xea8] sm:$0xff]  ;;  %1351 = vmatprep.subr.mxu0 %v370_v56  ;;  %v365_v63 = vld [vmem:[%s6979_s1 + $0xaa0] sm:$0xff] }
  0x77   :  { %1422 = vmatprep.subr.mxu1 %v498_v57  ;;  %v493_v0 = vld [vmem:[%s6979_s1 + $0xea0] sm:$0xff]  ;;  %v22_v1 = vld [vmem:[%s6978_s0 + $0x8] sm:$0xff]  ;;  %1352 = vmatpush2.msra.mxu0 %v369_v58 }
  0x78   :  { %1423 = vmatpush2.msra.mxu1 %v497_v59  ;;  %v362_v2 = vld [vmem:[%s6979_s1 + $0xa88] sm:$0xff]  ;;  %1353 = vmatprep.subr.mxu0 %v366_v60  ;;  %v361_v5 = vld [vmem:[%s6979_s1 + $0xa80] sm:$0xff]  ;;  %v1092_v10 = vcombine.high %v22_v1, %v22_v1  ;;  %v3723_v16 = vrot.slane %v22_v1, %v3291_v52 }
  0x79   :  { %v490_v4 = vld [vmem:[%s6979_s1 + $0xe88] sm:$0xff]  ;;  %1424 = vmatprep.subr.mxu1 %v494_v61  ;;  %v489_v6 = vld [vmem:[%s6979_s1 + $0xe80] sm:$0xff]  ;;  %1354 = vmatpush2.msra.mxu0 %v365_v63 }
  0x7a   :  { %1425 = vmatpush2.msra.mxu1 %v493_v0  ;;  %v358_v7 = vld [vmem:[%s6979_s1 + $0xa68] sm:$0xff]  ;;  %1355 = vmatprep.subr.mxu0 %v362_v2  ;;  %v357_v12 = vld [vmem:[%s6979_s1 + $0xa60] sm:$0xff]  ;;  %v3738_v21 = vrot.slane %v1092_v10, %v3291_v52  ;;  %v3754_v26 = vcombine.high %v3723_v16, %v3723_v16 }
  0x7b   :  { %v486_v9 = vld [vmem:[%s6979_s1 + $0xe68] sm:$0xff]  ;;  %1426 = vmatprep.subr.mxu1 %v490_v4  ;;  %v485_v13 = vld [vmem:[%s6979_s1 + $0xe60] sm:$0xff]  ;;  %1356 = vmatpush2.msra.mxu0 %v361_v5 }
  0x7c   :  { %1427 = vmatpush2.msra.mxu1 %v489_v6  ;;  %v354_v14 = vld [vmem:[%s6979_s1 + $0xa48] sm:$0xff]  ;;  %1357 = vmatprep.subr.mxu0 %v358_v7  ;;  %v353_v17 = vld [vmem:[%s6979_s1 + $0xa40] sm:$0xff]  ;;  %v3764_v29 = vcombine.high %v3738_v21, %v3738_v21 }
  0x7d   :  { %v482_v15 = vld [vmem:[%s6979_s1 + $0xe48] sm:$0xff]  ;;  %1428 = vmatprep.subr.mxu1 %v486_v9  ;;  %v481_v18 = vld [vmem:[%s6979_s1 + $0xe40] sm:$0xff]  ;;  %1358 = vmatpush2.msra.mxu0 %v357_v12 }
  0x7e   :  { %1429 = vmatpush2.msra.mxu1 %v485_v13  ;;  %v350_v19 = vld [vmem:[%s6979_s1 + $0xa28] sm:$0xff]  ;;  %1359 = vmatprep.subr.mxu0 %v354_v14  ;;  %v349_v22 = vld [vmem:[%s6979_s1 + $0xa20] sm:$0xff] }
  0x7f   :  { %v478_v20 = vld [vmem:[%s6979_s1 + $0xe28] sm:$0xff]  ;;  %1430 = vmatprep.subr.mxu1 %v482_v15  ;;  %v477_v23 = vld [vmem:[%s6979_s1 + $0xe20] sm:$0xff]  ;;  %1360 = vmatpush2.msra.mxu0 %v353_v17 }
  0x80   :  { %1431 = vmatpush2.msra.mxu1 %v481_v18  ;;  %v346_v24 = vld [vmem:[%s6979_s1 + $0xa08] sm:$0xff]  ;;  %1361 = vmatprep.subr.mxu0 %v350_v19  ;;  %v345_v27 = vld [vmem:[%s6979_s1 + $0xa00] sm:$0xff] }
  0x81   :  { %v474_v25 = vld [vmem:[%s6979_s1 + $0xe08] sm:$0xff]  ;;  %1432 = vmatprep.subr.mxu1 %v478_v20  ;;  %1362 = vmatpush2.msra.mxu0 %v349_v22  ;;  %v473_v28 = vld [vmem:[%s6979_s1 + $0xe00] sm:$0xff] }
  0x82   :  { %1433 = vmatpush2.msra.mxu1 %v477_v23  ;;  %1363 = vmatprep.subr.mxu0 %v346_v24  ;;  %v598_v30 = vld [vmem:[%s6979_s1 + $0x11e8] sm:$0xff]  ;;  %v597_v32 = vld [vmem:[%s6979_s1 + $0x11e0] sm:$0xff] }
  0x83   :  { %1434 = vmatprep.subr.mxu1 %v474_v25  ;;  %1364 = vmatpush2.msra.mxu0 %v345_v27  ;;  %v726_v31 = vld [vmem:[%s6979_s1 + $0x15e8] sm:$0xff]  ;;  %v725_v33 = vld [vmem:[%s6979_s1 + $0x15e0] sm:$0xff] }
  0x84   :  { %1365 = vmatprep.mubr.f32.mxu0 %v3754_v26  ;;  %1435 = vmatpush2.msra.mxu1 %v473_v28  ;;  %v594_v34 = vld [vmem:[%s6979_s1 + $0x11c8] sm:$0xff]  ;;  %v593_v36 = vld [vmem:[%s6979_s1 + $0x11c0] sm:$0xff] }
  0x85   :  { %1366 = vmatmul.mubr.f32.vlgmr.msra.gmra.mxu0 %v3723_v16  ;;  %1436 = vmatprep.mubr.f32.mxu1 %v3764_v29  ;;  %v722_v35 = vld [vmem:[%s6979_s1 + $0x15c8] sm:$0xff]  ;;  %v721_v37 = vld [vmem:[%s6979_s1 + $0x15c0] sm:$0xff] }
  0x86   :  { %1443 = vmatprep.subr.mxu0 %v598_v30  ;;  %1514 = vmatprep.subr.mxu1 %v726_v31  ;;  %v590_v38 = vld [vmem:[%s6979_s1 + $0x11a8] sm:$0xff]  ;;  %v589_v40 = vld [vmem:[%s6979_s1 + $0x11a0] sm:$0xff] }
  0x87   :  { %1437 = vmatmul.mubr.f32.vlgmr.msra.gmra.mxu1 %v3738_v21  ;;  %1444 = vmatpush1.msra.mxu0 %v597_v32  ;;  %v718_v39 = vld [vmem:[%s6979_s1 + $0x15a8] sm:$0xff]  ;;  %v717_v42 = vld [vmem:[%s6979_s1 + $0x15a0] sm:$0xff] }
  0x88   :  { %1515 = vmatpush1.msra.mxu1 %v725_v33  ;;  %1445 = vmatprep.subr.mxu0 %v594_v34  ;;  %v586_v43 = vld [vmem:[%s6979_s1 + $0x1188] sm:$0xff]  ;;  %v585_v45 = vld [vmem:[%s6979_s1 + $0x1180] sm:$0xff] }
  0x89   :  { %1516 = vmatprep.subr.mxu1 %v722_v35  ;;  %1446 = vmatpush1.msra.mxu0 %v593_v36  ;;  %v714_v44 = vld [vmem:[%s6979_s1 + $0x1588] sm:$0xff]  ;;  %v713_v46 = vld [vmem:[%s6979_s1 + $0x1580] sm:$0xff] }
  0x8a   :  { %1517 = vmatpush1.msra.mxu1 %v721_v37  ;;  %1447 = vmatprep.subr.mxu0 %v590_v38  ;;  %v582_v47 = vld [vmem:[%s6979_s1 + $0x1168] sm:$0xff]  ;;  %v581_v49 = vld [vmem:[%s6979_s1 + $0x1160] sm:$0xff] }
  0x8b   :  { %1518 = vmatprep.subr.mxu1 %v718_v39  ;;  %1448 = vmatpush1.msra.mxu0 %v589_v40  ;;  %v710_v48 = vld [vmem:[%s6979_s1 + $0x1568] sm:$0xff]  ;;  %v709_v50 = vld [vmem:[%s6979_s1 + $0x1560] sm:$0xff] }
  0x8c   :  { %1519 = vmatpush1.msra.mxu1 %v717_v42  ;;  %1449 = vmatprep.subr.mxu0 %v586_v43  ;;  %v578_v51 = vld [vmem:[%s6979_s1 + $0x1148] sm:$0xff]  ;;  %v577_v54 = vld [vmem:[%s6979_s1 + $0x1140] sm:$0xff] }
  0x8d   :  { %1520 = vmatprep.subr.mxu1 %v714_v44  ;;  %1450 = vmatpush1.msra.mxu0 %v585_v45  ;;  %v706_v53 = vld [vmem:[%s6979_s1 + $0x1548] sm:$0xff]  ;;  %v705_v55 = vld [vmem:[%s6979_s1 + $0x1540] sm:$0xff] }
  0x8e   :  { %1521 = vmatpush1.msra.mxu1 %v713_v46  ;;  %1451 = vmatprep.subr.mxu0 %v582_v47  ;;  %v574_v56 = vld [vmem:[%s6979_s1 + $0x1128] sm:$0xff]  ;;  %v573_v58 = vld [vmem:[%s6979_s1 + $0x1120] sm:$0xff] }
  0x8f   :  { %1522 = vmatprep.subr.mxu1 %v710_v48  ;;  %1452 = vmatpush1.msra.mxu0 %v581_v49  ;;  %v702_v57 = vld [vmem:[%s6979_s1 + $0x1528] sm:$0xff]  ;;  %v701_v59 = vld [vmem:[%s6979_s1 + $0x1520] sm:$0xff] }
  0x90   :  { %1523 = vmatpush1.msra.mxu1 %v709_v50  ;;  %1453 = vmatprep.subr.mxu0 %v578_v51  ;;  %v570_v60 = vld [vmem:[%s6979_s1 + $0x1108] sm:$0xff]  ;;  %v569_v63 = vld [vmem:[%s6979_s1 + $0x1100] sm:$0xff] }
  0x91   :  { %1524 = vmatprep.subr.mxu1 %v706_v53  ;;  %1454 = vmatpush1.msra.mxu0 %v577_v54  ;;  %v698_v61 = vld [vmem:[%s6979_s1 + $0x1508] sm:$0xff]  ;;  %v697_v0 = vld [vmem:[%s6979_s1 + $0x1500] sm:$0xff] }
  0x92   :  { %1525 = vmatpush1.msra.mxu1 %v705_v55  ;;  %1455 = vmatprep.subr.mxu0 %v574_v56  ;;  %v566_v1 = vld [vmem:[%s6979_s1 + $0x10e8] sm:$0xff]  ;;  %v565_v4 = vld [vmem:[%s6979_s1 + $0x10e0] sm:$0xff] }
  0x93   :  { %1526 = vmatprep.subr.mxu1 %v702_v57  ;;  %1456 = vmatpush1.msra.mxu0 %v573_v58  ;;  %v694_v2 = vld [vmem:[%s6979_s1 + $0x14e8] sm:$0xff]  ;;  %v693_v5 = vld [vmem:[%s6979_s1 + $0x14e0] sm:$0xff] }
  0x94   :  { %1527 = vmatpush1.msra.mxu1 %v701_v59  ;;  %1457 = vmatprep.subr.mxu0 %v570_v60  ;;  %v562_v6 = vld [vmem:[%s6979_s1 + $0x10c8] sm:$0xff]  ;;  %v561_v9 = vld [vmem:[%s6979_s1 + $0x10c0] sm:$0xff] }
  0x95   :  { %1528 = vmatprep.subr.mxu1 %v698_v61  ;;  %1458 = vmatpush1.msra.mxu0 %v569_v63  ;;  %v690_v7 = vld [vmem:[%s6979_s1 + $0x14c8] sm:$0xff]  ;;  %v689_v10 = vld [vmem:[%s6979_s1 + $0x14c0] sm:$0xff] }
  0x96   :  { %1529 = vmatpush1.msra.mxu1 %v697_v0  ;;  %1459 = vmatprep.subr.mxu0 %v566_v1  ;;  %v558_v12 = vld [vmem:[%s6979_s1 + $0x10a8] sm:$0xff]  ;;  %v557_v14 = vld [vmem:[%s6979_s1 + $0x10a0] sm:$0xff] }
  0x97   :  { %1530 = vmatprep.subr.mxu1 %v694_v2  ;;  %1460 = vmatpush1.msra.mxu0 %v565_v4  ;;  %v686_v13 = vld [vmem:[%s6979_s1 + $0x14a8] sm:$0xff]  ;;  %v685_v15 = vld [vmem:[%s6979_s1 + $0x14a0] sm:$0xff] }
  0x98   :  { %1531 = vmatpush1.msra.mxu1 %v693_v5  ;;  %1461 = vmatprep.subr.mxu0 %v562_v6  ;;  %v554_v17 = vld [vmem:[%s6979_s1 + $0x1088] sm:$0xff]  ;;  %v553_v19 = vld [vmem:[%s6979_s1 + $0x1080] sm:$0xff] }
  0x99   :  { %1532 = vmatprep.subr.mxu1 %v690_v7  ;;  %1462 = vmatpush1.msra.mxu0 %v561_v9  ;;  %v682_v18 = vld [vmem:[%s6979_s1 + $0x1488] sm:$0xff]  ;;  %v681_v20 = vld [vmem:[%s6979_s1 + $0x1480] sm:$0xff] }
  0x9a   :  { %1533 = vmatpush1.msra.mxu1 %v689_v10  ;;  %1463 = vmatprep.subr.mxu0 %v558_v12  ;;  %v550_v22 = vld [vmem:[%s6979_s1 + $0x1068] sm:$0xff]  ;;  %v549_v24 = vld [vmem:[%s6979_s1 + $0x1060] sm:$0xff] }
  0x9b   :  { %1534 = vmatprep.subr.mxu1 %v686_v13  ;;  %1464 = vmatpush1.msra.mxu0 %v557_v14  ;;  %v678_v23 = vld [vmem:[%s6979_s1 + $0x1468] sm:$0xff]  ;;  %v677_v25 = vld [vmem:[%s6979_s1 + $0x1460] sm:$0xff] }
  0x9c   :  { %1535 = vmatpush1.msra.mxu1 %v685_v15  ;;  %1465 = vmatprep.subr.mxu0 %v554_v17  ;;  %v546_v27 = vld [vmem:[%s6979_s1 + $0x1048] sm:$0xff]  ;;  %v545_v30 = vld [vmem:[%s6979_s1 + $0x1040] sm:$0xff] }
  0x9d   :  { %1536 = vmatprep.subr.mxu1 %v682_v18  ;;  %1466 = vmatpush1.msra.mxu0 %v553_v19  ;;  %v674_v28 = vld [vmem:[%s6979_s1 + $0x1448] sm:$0xff]  ;;  %v673_v31 = vld [vmem:[%s6979_s1 + $0x1440] sm:$0xff] }
  0x9e   :  { %1537 = vmatpush1.msra.mxu1 %v681_v20  ;;  %1467 = vmatprep.subr.mxu0 %v550_v22  ;;  %v542_v32 = vld [vmem:[%s6979_s1 + $0x1028] sm:$0xff]  ;;  %v541_v34 = vld [vmem:[%s6979_s1 + $0x1020] sm:$0xff] }
  0x9f   :  { %1538 = vmatprep.subr.mxu1 %v678_v23  ;;  %1468 = vmatpush1.msra.mxu0 %v549_v24  ;;  %v670_v33 = vld [vmem:[%s6979_s1 + $0x1428] sm:$0xff]  ;;  %v669_v35 = vld [vmem:[%s6979_s1 + $0x1420] sm:$0xff] }
  0xa0   :  { %1539 = vmatpush1.msra.mxu1 %v677_v25  ;;  %1469 = vmatprep.subr.mxu0 %v546_v27  ;;  %v538_v36 = vld [vmem:[%s6979_s1 + $0x1008] sm:$0xff]  ;;  %v537_v38 = vld [vmem:[%s6979_s1 + $0x1000] sm:$0xff] }
  0xa1   :  { %1540 = vmatprep.subr.mxu1 %v674_v28  ;;  %1470 = vmatpush1.msra.mxu0 %v545_v30  ;;  %v666_v37 = vld [vmem:[%s6979_s1 + $0x1408] sm:$0xff]  ;;  %v665_v39 = vld [vmem:[%s6979_s1 + $0x1400] sm:$0xff]  ;;  %v23_v30 = vld [vmem:[%s6978_s0 + $0x10] sm:$0xff] }
  0xa2   :  { %1541 = vmatpush1.msra.mxu1 %v673_v31  ;;  %1471 = vmatprep.subr.mxu0 %v542_v32  ;;  %v662_v40 = vld [vmem:[%s6979_s1 + $0x13e8] sm:$0xff]  ;;  %v661_v43 = vld [vmem:[%s6979_s1 + $0x13e0] sm:$0xff] }
  0xa3   :  { %1542 = vmatprep.subr.mxu1 %v670_v33  ;;  %1472 = vmatpush1.msra.mxu0 %v541_v34  ;;  %v790_v42 = vld [vmem:[%s6979_s1 + $0x17e8] sm:$0xff]  ;;  %v789_v44 = vld [vmem:[%s6979_s1 + $0x17e0] sm:$0xff] }
  0xa4   :  { %1543 = vmatpush1.msra.mxu1 %v669_v35  ;;  %1473 = vmatprep.subr.mxu0 %v538_v36  ;;  %v658_v45 = vld [vmem:[%s6979_s1 + $0x13c8] sm:$0xff]  ;;  %v657_v47 = vld [vmem:[%s6979_s1 + $0x13c0] sm:$0xff] }
  0xa5   :  { %1544 = vmatprep.subr.mxu1 %v666_v37  ;;  %1474 = vmatpush1.msra.mxu0 %v537_v38  ;;  %v786_v46 = vld [vmem:[%s6979_s1 + $0x17c8] sm:$0xff]  ;;  %v785_v48 = vld [vmem:[%s6979_s1 + $0x17c0] sm:$0xff]  ;;  %v1109_v37 = vcombine.high %v23_v30, %v23_v30 }
  0xa6   :  { %1545 = vmatpush1.msra.mxu1 %v665_v39  ;;  %1475 = vmatprep.subr.mxu0 %v662_v40  ;;  %v654_v49 = vld [vmem:[%s6979_s1 + $0x13a8] sm:$0xff]  ;;  %v653_v51 = vld [vmem:[%s6979_s1 + $0x13a0] sm:$0xff] }
  0xa7   :  { %1546 = vmatprep.subr.mxu1 %v790_v42  ;;  %1476 = vmatpush2.msra.mxu0 %v661_v43  ;;  %v782_v50 = vld [vmem:[%s6979_s1 + $0x17a8] sm:$0xff]  ;;  %v781_v53 = vld [vmem:[%s6979_s1 + $0x17a0] sm:$0xff]  ;;  %v4128_v43 = vrot.slane %v23_v30, %v3291_v52 }
  0xa8   :  { %1547 = vmatpush2.msra.mxu1 %v789_v44  ;;  %1477 = vmatprep.subr.mxu0 %v658_v45  ;;  %v650_v54 = vld [vmem:[%s6979_s1 + $0x1388] sm:$0xff]  ;;  %v649_v56 = vld [vmem:[%s6979_s1 + $0x1380] sm:$0xff] }
  0xa9   :  { %1548 = vmatprep.subr.mxu1 %v786_v46  ;;  %1478 = vmatpush2.msra.mxu0 %v657_v47  ;;  %v778_v55 = vld [vmem:[%s6979_s1 + $0x1788] sm:$0xff]  ;;  %v777_v57 = vld [vmem:[%s6979_s1 + $0x1780] sm:$0xff] }
  0xaa   :  { %1549 = vmatpush2.msra.mxu1 %v785_v48  ;;  %1479 = vmatprep.subr.mxu0 %v654_v49  ;;  %v646_v58 = vld [vmem:[%s6979_s1 + $0x1368] sm:$0xff]  ;;  %v645_v60 = vld [vmem:[%s6979_s1 + $0x1360] sm:$0xff]  ;;  %v4143_v48 = vrot.slane %v1109_v37, %v3291_v52 }
  0xab   :  { %1550 = vmatprep.subr.mxu1 %v782_v50  ;;  %1480 = vmatpush2.msra.mxu0 %v653_v51  ;;  %v774_v59 = vld [vmem:[%s6979_s1 + $0x1768] sm:$0xff]  ;;  %v773_v61 = vld [vmem:[%s6979_s1 + $0x1760] sm:$0xff] }
  0xac   :  { %1551 = vmatpush2.msra.mxu1 %v781_v53  ;;  %1481 = vmatprep.subr.mxu0 %v650_v54  ;;  %v642_v63 = vld [vmem:[%s6979_s1 + $0x1348] sm:$0xff]  ;;  %v641_v1 = vld [vmem:[%s6979_s1 + $0x1340] sm:$0xff]  ;;  %v4159_v54 = vcombine.high %v4128_v43, %v4128_v43 }
  0xad   :  { %1552 = vmatprep.subr.mxu1 %v778_v55  ;;  %1482 = vmatpush2.msra.mxu0 %v649_v56  ;;  %v770_v0 = vld [vmem:[%s6979_s1 + $0x1748] sm:$0xff]  ;;  %v769_v2 = vld [vmem:[%s6979_s1 + $0x1740] sm:$0xff] }
  0xae   :  { %1553 = vmatpush2.msra.mxu1 %v777_v57  ;;  %1483 = vmatprep.subr.mxu0 %v646_v58  ;;  %v638_v4 = vld [vmem:[%s6979_s1 + $0x1328] sm:$0xff]  ;;  %v637_v6 = vld [vmem:[%s6979_s1 + $0x1320] sm:$0xff]  ;;  %v4169_v57 = vcombine.high %v4143_v48, %v4143_v48 }
  0xaf   :  { %1554 = vmatprep.subr.mxu1 %v774_v59  ;;  %1484 = vmatpush2.msra.mxu0 %v645_v60  ;;  %v766_v5 = vld [vmem:[%s6979_s1 + $0x1728] sm:$0xff]  ;;  %v765_v7 = vld [vmem:[%s6979_s1 + $0x1720] sm:$0xff] }
  0xb0   :  { %1555 = vmatpush2.msra.mxu1 %v773_v61  ;;  %1485 = vmatprep.subr.mxu0 %v642_v63  ;;  %v634_v9 = vld [vmem:[%s6979_s1 + $0x1308] sm:$0xff]  ;;  %v633_v12 = vld [vmem:[%s6979_s1 + $0x1300] sm:$0xff] }
  0xb1   :  { %1556 = vmatprep.subr.mxu1 %v770_v0  ;;  %1486 = vmatpush2.msra.mxu0 %v641_v1  ;;  %v762_v10 = vld [vmem:[%s6979_s1 + $0x1708] sm:$0xff]  ;;  %v761_v13 = vld [vmem:[%s6979_s1 + $0x1700] sm:$0xff] }
  0xb2   :  { %1557 = vmatpush2.msra.mxu1 %v769_v2  ;;  %1487 = vmatprep.subr.mxu0 %v638_v4  ;;  %v630_v14 = vld [vmem:[%s6979_s1 + $0x12e8] sm:$0xff]  ;;  %v629_v17 = vld [vmem:[%s6979_s1 + $0x12e0] sm:$0xff] }
  0xb3   :  { %1558 = vmatprep.subr.mxu1 %v766_v5  ;;  %1488 = vmatpush2.msra.mxu0 %v637_v6  ;;  %v758_v15 = vld [vmem:[%s6979_s1 + $0x16e8] sm:$0xff]  ;;  %v757_v18 = vld [vmem:[%s6979_s1 + $0x16e0] sm:$0xff] }
  0xb4   :  { %1559 = vmatpush2.msra.mxu1 %v765_v7  ;;  %1489 = vmatprep.subr.mxu0 %v634_v9  ;;  %v626_v19 = vld [vmem:[%s6979_s1 + $0x12c8] sm:$0xff]  ;;  %v625_v22 = vld [vmem:[%s6979_s1 + $0x12c0] sm:$0xff] }
  0xb5   :  { %1560 = vmatprep.subr.mxu1 %v762_v10  ;;  %1490 = vmatpush2.msra.mxu0 %v633_v12  ;;  %v754_v20 = vld [vmem:[%s6979_s1 + $0x16c8] sm:$0xff]  ;;  %v753_v23 = vld [vmem:[%s6979_s1 + $0x16c0] sm:$0xff] }
  0xb6   :  { %1561 = vmatpush2.msra.mxu1 %v761_v13  ;;  %1491 = vmatprep.subr.mxu0 %v630_v14  ;;  %v622_v24 = vld [vmem:[%s6979_s1 + $0x12a8] sm:$0xff]  ;;  %v621_v27 = vld [vmem:[%s6979_s1 + $0x12a0] sm:$0xff] }
  0xb7   :  { %1562 = vmatprep.subr.mxu1 %v758_v15  ;;  %1492 = vmatpush2.msra.mxu0 %v629_v17  ;;  %v750_v25 = vld [vmem:[%s6979_s1 + $0x16a8] sm:$0xff]  ;;  %v749_v28 = vld [vmem:[%s6979_s1 + $0x16a0] sm:$0xff] }
  0xb8   :  { %1563 = vmatpush2.msra.mxu1 %v757_v18  ;;  %1493 = vmatprep.subr.mxu0 %v626_v19  ;;  %v618_v31 = vld [vmem:[%s6979_s1 + $0x1288] sm:$0xff]  ;;  %v617_v33 = vld [vmem:[%s6979_s1 + $0x1280] sm:$0xff] }
  0xb9   :  { %1564 = vmatprep.subr.mxu1 %v754_v20  ;;  %1494 = vmatpush2.msra.mxu0 %v625_v22  ;;  %v746_v32 = vld [vmem:[%s6979_s1 + $0x1688] sm:$0xff]  ;;  %v745_v34 = vld [vmem:[%s6979_s1 + $0x1680] sm:$0xff] }
  0xba   :  { %1565 = vmatpush2.msra.mxu1 %v753_v23  ;;  %1495 = vmatprep.subr.mxu0 %v622_v24  ;;  %v614_v35 = vld [vmem:[%s6979_s1 + $0x1268] sm:$0xff]  ;;  %v613_v38 = vld [vmem:[%s6979_s1 + $0x1260] sm:$0xff] }
  0xbb   :  { %1566 = vmatprep.subr.mxu1 %v750_v25  ;;  %1496 = vmatpush2.msra.mxu0 %v621_v27  ;;  %v742_v36 = vld [vmem:[%s6979_s1 + $0x1668] sm:$0xff]  ;;  %v741_v39 = vld [vmem:[%s6979_s1 + $0x1660] sm:$0xff] }
  0xbc   :  { %1567 = vmatpush2.msra.mxu1 %v749_v28  ;;  %1497 = vmatprep.subr.mxu0 %v618_v31  ;;  %v610_v40 = vld [vmem:[%s6979_s1 + $0x1248] sm:$0xff]  ;;  %v609_v44 = vld [vmem:[%s6979_s1 + $0x1240] sm:$0xff] }
  0xbd   :  { %1568 = vmatprep.subr.mxu1 %v746_v32  ;;  %1498 = vmatpush2.msra.mxu0 %v617_v33  ;;  %v738_v42 = vld [vmem:[%s6979_s1 + $0x1648] sm:$0xff]  ;;  %v737_v45 = vld [vmem:[%s6979_s1 + $0x1640] sm:$0xff] }
  0xbe   :  { %1569 = vmatpush2.msra.mxu1 %v745_v34  ;;  %1499 = vmatprep.subr.mxu0 %v614_v35  ;;  %v606_v46 = vld [vmem:[%s6979_s1 + $0x1228] sm:$0xff]  ;;  %v605_v49 = vld [vmem:[%s6979_s1 + $0x1220] sm:$0xff] }
  0xbf   :  { %1570 = vmatprep.subr.mxu1 %v742_v36  ;;  %1500 = vmatpush2.msra.mxu0 %v613_v38  ;;  %v734_v47 = vld [vmem:[%s6979_s1 + $0x1628] sm:$0xff]  ;;  %v733_v50 = vld [vmem:[%s6979_s1 + $0x1620] sm:$0xff] }
  0xc0   :  { %1571 = vmatpush2.msra.mxu1 %v741_v39  ;;  %1501 = vmatprep.subr.mxu0 %v610_v40  ;;  %v602_v51 = vld [vmem:[%s6979_s1 + $0x1208] sm:$0xff]  ;;  %v601_v55 = vld [vmem:[%s6979_s1 + $0x1200] sm:$0xff] }
  0xc1   :  { %1572 = vmatprep.subr.mxu1 %v738_v42  ;;  %1502 = vmatpush2.msra.mxu0 %v609_v44  ;;  %v730_v53 = vld [vmem:[%s6979_s1 + $0x1608] sm:$0xff]  ;;  %v729_v56 = vld [vmem:[%s6979_s1 + $0x1600] sm:$0xff] }
  0xc2   :  { %1573 = vmatpush2.msra.mxu1 %v737_v45  ;;  %1503 = vmatprep.subr.mxu0 %v606_v46  ;;  %v854_v58 = vld [vmem:[%s6979_s1 + $0x19e8] sm:$0xff]  ;;  %v853_v60 = vld [vmem:[%s6979_s1 + $0x19e0] sm:$0xff] }
  0xc3   :  { %1574 = vmatprep.subr.mxu1 %v734_v47  ;;  %1504 = vmatpush2.msra.mxu0 %v605_v49  ;;  %v982_v59 = vld [vmem:[%s6979_s1 + $0x1de8] sm:$0xff]  ;;  %v981_v61 = vld [vmem:[%s6979_s1 + $0x1de0] sm:$0xff] }
  0xc4   :  { %1575 = vmatpush2.msra.mxu1 %v733_v50  ;;  %1505 = vmatprep.subr.mxu0 %v602_v51  ;;  %v850_v63 = vld [vmem:[%s6979_s1 + $0x19c8] sm:$0xff]  ;;  %v849_v1 = vld [vmem:[%s6979_s1 + $0x19c0] sm:$0xff] }
  0xc5   :  { %1576 = vmatprep.subr.mxu1 %v730_v53  ;;  %1506 = vmatpush2.msra.mxu0 %v601_v55  ;;  %v978_v0 = vld [vmem:[%s6979_s1 + $0x1dc8] sm:$0xff]  ;;  %v977_v2 = vld [vmem:[%s6979_s1 + $0x1dc0] sm:$0xff] }
  0xc6   :  { %1507 = vmatprep.mubr.f32.mxu0 %v4159_v54  ;;  %1577 = vmatpush2.msra.mxu1 %v729_v56  ;;  %v846_v4 = vld [vmem:[%s6979_s1 + $0x19a8] sm:$0xff]  ;;  %v845_v6 = vld [vmem:[%s6979_s1 + $0x19a0] sm:$0xff] }
  0xc7   :  { %1508 = vmatmul.mubr.f32.vlgmr.msra.gmra.mxu0 %v4128_v43  ;;  %1578 = vmatprep.mubr.f32.mxu1 %v4169_v57  ;;  %v974_v5 = vld [vmem:[%s6979_s1 + $0x1da8] sm:$0xff]  ;;  %v973_v7 = vld [vmem:[%s6979_s1 + $0x1da0] sm:$0xff] }
  0xc8   :  { %1585 = vmatprep.subr.mxu0 %v854_v58  ;;  %1656 = vmatprep.subr.mxu1 %v982_v59  ;;  %v842_v9 = vld [vmem:[%s6979_s1 + $0x1988] sm:$0xff]  ;;  %v841_v12 = vld [vmem:[%s6979_s1 + $0x1980] sm:$0xff] }
  0xc9   :  { %1579 = vmatmul.mubr.f32.vlgmr.msra.gmra.mxu1 %v4143_v48  ;;  %1586 = vmatpush1.msra.mxu0 %v853_v60  ;;  %v970_v10 = vld [vmem:[%s6979_s1 + $0x1d88] sm:$0xff]  ;;  %v969_v13 = vld [vmem:[%s6979_s1 + $0x1d80] sm:$0xff] }
  0xca   :  { %1657 = vmatpush1.msra.mxu1 %v981_v61  ;;  %1587 = vmatprep.subr.mxu0 %v850_v63  ;;  %v838_v14 = vld [vmem:[%s6979_s1 + $0x1968] sm:$0xff]  ;;  %v837_v17 = vld [vmem:[%s6979_s1 + $0x1960] sm:$0xff] }
  0xcb   :  { %1658 = vmatprep.subr.mxu1 %v978_v0  ;;  %1588 = vmatpush1.msra.mxu0 %v849_v1  ;;  %v966_v15 = vld [vmem:[%s6979_s1 + $0x1d68] sm:$0xff]  ;;  %v965_v18 = vld [vmem:[%s6979_s1 + $0x1d60] sm:$0xff] }
  0xcc   :  { %1659 = vmatpush1.msra.mxu1 %v977_v2  ;;  %1589 = vmatprep.subr.mxu0 %v846_v4  ;;  %v834_v19 = vld [vmem:[%s6979_s1 + $0x1948] sm:$0xff]  ;;  %v833_v22 = vld [vmem:[%s6979_s1 + $0x1940] sm:$0xff] }
  0xcd   :  { %1660 = vmatprep.subr.mxu1 %v974_v5  ;;  %1590 = vmatpush1.msra.mxu0 %v845_v6  ;;  %v962_v20 = vld [vmem:[%s6979_s1 + $0x1d48] sm:$0xff]  ;;  %v961_v23 = vld [vmem:[%s6979_s1 + $0x1d40] sm:$0xff] }
  0xce   :  { %1661 = vmatpush1.msra.mxu1 %v973_v7  ;;  %1591 = vmatprep.subr.mxu0 %v842_v9  ;;  %v830_v24 = vld [vmem:[%s6979_s1 + $0x1928] sm:$0xff]  ;;  %v829_v27 = vld [vmem:[%s6979_s1 + $0x1920] sm:$0xff] }
  0xcf   :  { %1662 = vmatprep.subr.mxu1 %v970_v10  ;;  %1592 = vmatpush1.msra.mxu0 %v841_v12  ;;  %v958_v25 = vld [vmem:[%s6979_s1 + $0x1d28] sm:$0xff]  ;;  %v957_v28 = vld [vmem:[%s6979_s1 + $0x1d20] sm:$0xff] }
  0xd0   :  { %1663 = vmatpush1.msra.mxu1 %v969_v13  ;;  %1593 = vmatprep.subr.mxu0 %v838_v14  ;;  %v826_v30 = vld [vmem:[%s6979_s1 + $0x1908] sm:$0xff]  ;;  %v825_v32 = vld [vmem:[%s6979_s1 + $0x1900] sm:$0xff] }
  0xd1   :  { %1664 = vmatprep.subr.mxu1 %v966_v15  ;;  %1594 = vmatpush1.msra.mxu0 %v837_v17  ;;  %v954_v31 = vld [vmem:[%s6979_s1 + $0x1d08] sm:$0xff]  ;;  %v953_v33 = vld [vmem:[%s6979_s1 + $0x1d00] sm:$0xff] }
  0xd2   :  { %1665 = vmatpush1.msra.mxu1 %v965_v18  ;;  %1595 = vmatprep.subr.mxu0 %v834_v19  ;;  %v822_v34 = vld [vmem:[%s6979_s1 + $0x18e8] sm:$0xff]  ;;  %v821_v36 = vld [vmem:[%s6979_s1 + $0x18e0] sm:$0xff] }
  0xd3   :  { %1666 = vmatprep.subr.mxu1 %v962_v20  ;;  %1596 = vmatpush1.msra.mxu0 %v833_v22  ;;  %v950_v35 = vld [vmem:[%s6979_s1 + $0x1ce8] sm:$0xff]  ;;  %v949_v37 = vld [vmem:[%s6979_s1 + $0x1ce0] sm:$0xff] }
  0xd4   :  { %1667 = vmatpush1.msra.mxu1 %v961_v23  ;;  %1597 = vmatprep.subr.mxu0 %v830_v24  ;;  %v818_v38 = vld [vmem:[%s6979_s1 + $0x18c8] sm:$0xff]  ;;  %v817_v40 = vld [vmem:[%s6979_s1 + $0x18c0] sm:$0xff] }
  0xd5   :  { %1668 = vmatprep.subr.mxu1 %v958_v25  ;;  %1598 = vmatpush1.msra.mxu0 %v829_v27  ;;  %v946_v39 = vld [vmem:[%s6979_s1 + $0x1cc8] sm:$0xff]  ;;  %v945_v42 = vld [vmem:[%s6979_s1 + $0x1cc0] sm:$0xff] }
  0xd6   :  { %1669 = vmatpush1.msra.mxu1 %v957_v28  ;;  %1599 = vmatprep.subr.mxu0 %v826_v30  ;;  %v814_v44 = vld [vmem:[%s6979_s1 + $0x18a8] sm:$0xff]  ;;  %v813_v46 = vld [vmem:[%s6979_s1 + $0x18a0] sm:$0xff] }
  0xd7   :  { %1670 = vmatprep.subr.mxu1 %v954_v31  ;;  %1600 = vmatpush1.msra.mxu0 %v825_v32  ;;  %v942_v45 = vld [vmem:[%s6979_s1 + $0x1ca8] sm:$0xff]  ;;  %v941_v47 = vld [vmem:[%s6979_s1 + $0x1ca0] sm:$0xff] }
  0xd8   :  { %1671 = vmatpush1.msra.mxu1 %v953_v33  ;;  %1601 = vmatprep.subr.mxu0 %v822_v34  ;;  %v810_v49 = vld [vmem:[%s6979_s1 + $0x1888] sm:$0xff]  ;;  %v809_v51 = vld [vmem:[%s6979_s1 + $0x1880] sm:$0xff] }
  0xd9   :  { %1672 = vmatprep.subr.mxu1 %v950_v35  ;;  %1602 = vmatpush1.msra.mxu0 %v821_v36  ;;  %v938_v50 = vld [vmem:[%s6979_s1 + $0x1c88] sm:$0xff]  ;;  %v937_v53 = vld [vmem:[%s6979_s1 + $0x1c80] sm:$0xff] }
  0xda   :  { %1673 = vmatpush1.msra.mxu1 %v949_v37  ;;  %1603 = vmatprep.subr.mxu0 %v818_v38  ;;  %v806_v55 = vld [vmem:[%s6979_s1 + $0x1868] sm:$0xff]  ;;  %v805_v58 = vld [vmem:[%s6979_s1 + $0x1860] sm:$0xff] }
  0xdb   :  { %1674 = vmatprep.subr.mxu1 %v946_v39  ;;  %1604 = vmatpush1.msra.mxu0 %v817_v40  ;;  %v934_v56 = vld [vmem:[%s6979_s1 + $0x1c68] sm:$0xff]  ;;  %v933_v59 = vld [vmem:[%s6979_s1 + $0x1c60] sm:$0xff] }
  0xdc   :  { %1675 = vmatpush1.msra.mxu1 %v945_v42  ;;  %1605 = vmatprep.subr.mxu0 %v814_v44  ;;  %v802_v60 = vld [vmem:[%s6979_s1 + $0x1848] sm:$0xff]  ;;  %v801_v63 = vld [vmem:[%s6979_s1 + $0x1840] sm:$0xff] }
  0xdd   :  { %1676 = vmatprep.subr.mxu1 %v942_v45  ;;  %1606 = vmatpush1.msra.mxu0 %v813_v46  ;;  %v930_v61 = vld [vmem:[%s6979_s1 + $0x1c48] sm:$0xff]  ;;  %v929_v0 = vld [vmem:[%s6979_s1 + $0x1c40] sm:$0xff] }
  0xde   :  { %1677 = vmatpush1.msra.mxu1 %v941_v47  ;;  %1607 = vmatprep.subr.mxu0 %v810_v49  ;;  %v798_v1 = vld [vmem:[%s6979_s1 + $0x1828] sm:$0xff]  ;;  %v797_v4 = vld [vmem:[%s6979_s1 + $0x1820] sm:$0xff] }
  0xdf   :  { %1678 = vmatprep.subr.mxu1 %v938_v50  ;;  %1608 = vmatpush1.msra.mxu0 %v809_v51  ;;  %v926_v2 = vld [vmem:[%s6979_s1 + $0x1c28] sm:$0xff]  ;;  %v925_v5 = vld [vmem:[%s6979_s1 + $0x1c20] sm:$0xff] }
  0xe0   :  { %1679 = vmatpush1.msra.mxu1 %v937_v53  ;;  %1609 = vmatprep.subr.mxu0 %v806_v55  ;;  %v794_v6 = vld [vmem:[%s6979_s1 + $0x1808] sm:$0xff]  ;;  %v793_v9 = vld [vmem:[%s6979_s1 + $0x1800] sm:$0xff] }
  0xe1   :  { %1680 = vmatprep.subr.mxu1 %v934_v56  ;;  %1610 = vmatpush1.msra.mxu0 %v805_v58  ;;  %v922_v7 = vld [vmem:[%s6979_s1 + $0x1c08] sm:$0xff]  ;;  %v921_v10 = vld [vmem:[%s6979_s1 + $0x1c00] sm:$0xff] }
  0xe2   :  { %1681 = vmatpush1.msra.mxu1 %v933_v59  ;;  %1611 = vmatprep.subr.mxu0 %v802_v60  ;;  %v918_v12 = vld [vmem:[%s6979_s1 + $0x1be8] sm:$0xff]  ;;  %v917_v14 = vld [vmem:[%s6979_s1 + $0x1be0] sm:$0xff] }
  0xe3   :  { %1682 = vmatprep.subr.mxu1 %v930_v61  ;;  %1612 = vmatpush1.msra.mxu0 %v801_v63  ;;  %v1046_v13 = vld [vmem:[%s6979_s1 + $0x1fe8] sm:$0xff]  ;;  %v1045_v15 = vld [vmem:[%s6979_s1 + $0x1fe0] sm:$0xff] }
  0xe4   :  { %1683 = vmatpush1.msra.mxu1 %v929_v0  ;;  %1613 = vmatprep.subr.mxu0 %v798_v1  ;;  %v914_v17 = vld [vmem:[%s6979_s1 + $0x1bc8] sm:$0xff]  ;;  %v913_v19 = vld [vmem:[%s6979_s1 + $0x1bc0] sm:$0xff] }
  0xe5   :  { %1684 = vmatprep.subr.mxu1 %v926_v2  ;;  %1614 = vmatpush1.msra.mxu0 %v797_v4  ;;  %v1042_v18 = vld [vmem:[%s6979_s1 + $0x1fc8] sm:$0xff]  ;;  %v1041_v20 = vld [vmem:[%s6979_s1 + $0x1fc0] sm:$0xff] }
  0xe6   :  { %1685 = vmatpush1.msra.mxu1 %v925_v5  ;;  %1615 = vmatprep.subr.mxu0 %v794_v6  ;;  %v910_v22 = vld [vmem:[%s6979_s1 + $0x1ba8] sm:$0xff]  ;;  %v909_v24 = vld [vmem:[%s6979_s1 + $0x1ba0] sm:$0xff] }
  0xe7   :  { %1686 = vmatprep.subr.mxu1 %v922_v7  ;;  %1616 = vmatpush1.msra.mxu0 %v793_v9  ;;  %v1038_v23 = vld [vmem:[%s6979_s1 + $0x1fa8] sm:$0xff]  ;;  %v1037_v25 = vld [vmem:[%s6979_s1 + $0x1fa0] sm:$0xff] }
  0xe8   :  { %1687 = vmatpush1.msra.mxu1 %v921_v10  ;;  %1617 = vmatprep.subr.mxu0 %v918_v12  ;;  %v906_v27 = vld [vmem:[%s6979_s1 + $0x1b88] sm:$0xff]  ;;  %v905_v30 = vld [vmem:[%s6979_s1 + $0x1b80] sm:$0xff] }
  0xe9   :  { %1688 = vmatprep.subr.mxu1 %v1046_v13  ;;  %1618 = vmatpush2.msra.mxu0 %v917_v14  ;;  %v1034_v28 = vld [vmem:[%s6979_s1 + $0x1f88] sm:$0xff]  ;;  %v1033_v31 = vld [vmem:[%s6979_s1 + $0x1f80] sm:$0xff] }
  0xea   :  { %1689 = vmatpush2.msra.mxu1 %v1045_v15  ;;  %1619 = vmatprep.subr.mxu0 %v914_v17  ;;  %v902_v32 = vld [vmem:[%s6979_s1 + $0x1b68] sm:$0xff]  ;;  %v901_v34 = vld [vmem:[%s6979_s1 + $0x1b60] sm:$0xff] }
  0xeb   :  { %1690 = vmatprep.subr.mxu1 %v1042_v18  ;;  %1620 = vmatpush2.msra.mxu0 %v913_v19  ;;  %v1030_v33 = vld [vmem:[%s6979_s1 + $0x1f68] sm:$0xff]  ;;  %v1029_v35 = vld [vmem:[%s6979_s1 + $0x1f60] sm:$0xff] }
  0xec   :  { %1691 = vmatpush2.msra.mxu1 %v1041_v20  ;;  %1621 = vmatprep.subr.mxu0 %v910_v22  ;;  %v898_v36 = vld [vmem:[%s6979_s1 + $0x1b48] sm:$0xff]  ;;  %v897_v38 = vld [vmem:[%s6979_s1 + $0x1b40] sm:$0xff] }
  0xed   :  { %1692 = vmatprep.subr.mxu1 %v1038_v23  ;;  %1622 = vmatpush2.msra.mxu0 %v909_v24  ;;  %v1026_v37 = vld [vmem:[%s6979_s1 + $0x1f48] sm:$0xff]  ;;  %v1025_v39 = vld [vmem:[%s6979_s1 + $0x1f40] sm:$0xff] }
  0xee   :  { %1693 = vmatpush2.msra.mxu1 %v1037_v25  ;;  %1623 = vmatprep.subr.mxu0 %v906_v27  ;;  %v894_v40 = vld [vmem:[%s6979_s1 + $0x1b28] sm:$0xff]  ;;  %v893_v44 = vld [vmem:[%s6979_s1 + $0x1b20] sm:$0xff] }
  0xef   :  { %1694 = vmatprep.subr.mxu1 %v1034_v28  ;;  %1624 = vmatpush2.msra.mxu0 %v905_v30  ;;  %v1022_v42 = vld [vmem:[%s6979_s1 + $0x1f28] sm:$0xff]  ;;  %v1021_v45 = vld [vmem:[%s6979_s1 + $0x1f20] sm:$0xff] }
  0xf0   :  { %1695 = vmatpush2.msra.mxu1 %v1033_v31  ;;  %1625 = vmatprep.subr.mxu0 %v902_v32 }
  0xf1   :  { %1696 = vmatprep.subr.mxu1 %v1030_v33  ;;  %1626 = vmatpush2.msra.mxu0 %v901_v34 }
  0xf2   :  { %1697 = vmatpush2.msra.mxu1 %v1029_v35  ;;  %1627 = vmatprep.subr.mxu0 %v898_v36 }
  0xf3   :  { %1698 = vmatprep.subr.mxu1 %v1026_v37 }
  0xf4   :  { %10 = vsyncpa [#allocation3], 0  ;;  %1628 = vmatpush2.msra.mxu0 %v897_v38  ;;  %1699 = vmatpush2.msra.mxu1 %v1025_v39  ;;  %v890_v46 = vld [vmem:[%s6979_s1 + $0x1b08] sm:$0xff]  ;;  %v889_v49 = vld [vmem:[%s6979_s1 + $0x1b00] sm:$0xff]  ;;  %v1053_v7 = vsub.s32 0, %v3261_v41 }
  0xf5   :  { %v1018_v47 = vld [vmem:[%s6979_s1 + $0x1f08] sm:$0xff]  ;;  %1629 = vmatprep.subr.mxu0 %v894_v40  ;;  %1700 = vmatprep.subr.mxu1 %v1022_v42  ;;  %v1017_v50 = vld [vmem:[%s6979_s1 + $0x1f00] sm:$0xff]  ;;  %v24_v4 = vld [vmem:[%s6978_s0 + $0x18] sm:$0xff] }
  0xf6   :  { %1630 = vmatpush2.msra.mxu0 %v893_v44  ;;  %1701 = vmatpush2.msra.mxu1 %v1021_v45  ;;  %v886_v51 = vld [vmem:[%s6979_s1 + $0x1ae8] sm:$0xff]  ;;  %v885_v55 = vld [vmem:[%s6979_s1 + $0x1ae0] sm:$0xff]  ;;  %v1126_v15 = vcombine.high %v24_v4, %v24_v4  ;;  %v4537_v22 = vrot.slane %v24_v4, %v3291_v52  ;;  %v88_v45 = vld [vmem:[%s6979_s1 + $0x1f8] sm:$0xff] }
  0xf7   :  { %v1014_v53 = vld [vmem:[%s6979_s1 + $0x1ee8] sm:$0xff]  ;;  %1631 = vmatprep.subr.mxu0 %v890_v46  ;;  %1702 = vmatprep.subr.mxu1 %v1018_v47  ;;  %v1013_v56 = vld [vmem:[%s6979_s1 + $0x1ee0] sm:$0xff]  ;;  %v216_v46 = vld [vmem:[%s6979_s1 + $0x5f8] sm:$0xff] }
  0xf8   :  { %1632 = vmatpush2.msra.mxu0 %v889_v49  ;;  %1703 = vmatpush2.msra.mxu1 %v1017_v50  ;;  %v882_v58 = vld [vmem:[%s6979_s1 + $0x1ac8] sm:$0xff]  ;;  %v881_v60 = vld [vmem:[%s6979_s1 + $0x1ac0] sm:$0xff]  ;;  %v4554_v30 = vrot.slane %v1126_v15, %v3291_v52  ;;  %v4570_v36 = vcombine.high %v4537_v22, %v4537_v22  ;;  %v87_v47 = vld [vmem:[%s6979_s1 + $0x1f0] sm:$0xff] }
  0xf9   :  { %v1010_v59 = vld [vmem:[%s6979_s1 + $0x1ec8] sm:$0xff]  ;;  %1633 = vmatprep.subr.mxu0 %v886_v51  ;;  %1704 = vmatprep.subr.mxu1 %v1014_v53  ;;  %v1009_v61 = vld [vmem:[%s6979_s1 + $0x1ec0] sm:$0xff]  ;;  %v215_v49 = vld [vmem:[%s6979_s1 + $0x5f0] sm:$0xff] }
  0xfa   :  { %1634 = vmatpush2.msra.mxu0 %v885_v55  ;;  %1705 = vmatpush2.msra.mxu1 %v1013_v56  ;;  %v878_v63 = vld [vmem:[%s6979_s1 + $0x1aa8] sm:$0xff]  ;;  %v877_v1 = vld [vmem:[%s6979_s1 + $0x1aa0] sm:$0xff]  ;;  %v4580_v42 = vcombine.high %v4554_v30, %v4554_v30  ;;  %v84_v50 = vld [vmem:[%s6979_s1 + $0x1d8] sm:$0xff] }
  0xfb   :  { %v1006_v0 = vld [vmem:[%s6979_s1 + $0x1ea8] sm:$0xff]  ;;  %1635 = vmatprep.subr.mxu0 %v882_v58  ;;  %1706 = vmatprep.subr.mxu1 %v1010_v59  ;;  %v1005_v2 = vld [vmem:[%s6979_s1 + $0x1ea0] sm:$0xff]  ;;  %v212_v51 = vld [vmem:[%s6979_s1 + $0x5d8] sm:$0xff] }
  0xfc   :  { %1636 = vmatpush2.msra.mxu0 %v881_v60  ;;  %1707 = vmatpush2.msra.mxu1 %v1009_v61  ;;  %v874_v5 = vld [vmem:[%s6979_s1 + $0x1a88] sm:$0xff]  ;;  %v873_v9 = vld [vmem:[%s6979_s1 + $0x1a80] sm:$0xff]  ;;  %v83_v53 = vld [vmem:[%s6979_s1 + $0x1d0] sm:$0xff] }
  0xfd   :  { %v1002_v6 = vld [vmem:[%s6979_s1 + $0x1e88] sm:$0xff]  ;;  %1637 = vmatprep.subr.mxu0 %v878_v63  ;;  %1708 = vmatprep.subr.mxu1 %v1006_v0  ;;  %v1001_v10 = vld [vmem:[%s6979_s1 + $0x1e80] sm:$0xff]  ;;  %v211_v55 = vld [vmem:[%s6979_s1 + $0x5d0] sm:$0xff] }
  0xfe   :  { %v1049_v12 = vld [vmem:[%s6980_s2] sm:$0xf]  ;;  %1638 = vmatpush2.msra.mxu0 %v877_v1  ;;  %1709 = vmatpush2.msra.mxu1 %v1005_v2  ;;  %v870_v13 = vld [vmem:[%s6979_s1 + $0x1a68] sm:$0xff]  ;;  %v80_v56 = vld [vmem:[%s6979_s1 + $0x1b8] sm:$0xff] }
  0xff   :  { %v998_v14 = vld [vmem:[%s6979_s1 + $0x1e68] sm:$0xff]  ;;  %1639 = vmatprep.subr.mxu0 %v874_v5  ;;  %1710 = vmatprep.subr.mxu1 %v1002_v6  ;;  %v869_v17 = vld [vmem:[%s6979_s1 + $0x1a60] sm:$0xff]  ;;  %v1054_v23 = vrot.slane %v1049_v12, %v1053_v7  ;;  %v208_v58 = vld [vmem:[%s6979_s1 + $0x5b8] sm:$0xff] }
 0x100   :  { %v997_v18 = vld [vmem:[%s6979_s1 + $0x1e60] sm:$0xff]  ;;  %1640 = vmatpush2.msra.mxu0 %v873_v9  ;;  %1711 = vmatpush2.msra.mxu1 %v1001_v10  ;;  %v866_v19 = vld [vmem:[%s6979_s1 + $0x1a48] sm:$0xff]  ;;  %v79_v59 = vld [vmem:[%s6979_s1 + $0x1b0] sm:$0xff] }
 0x101   :  { %v994_v20 = vld [vmem:[%s6979_s1 + $0x1e48] sm:$0xff]  ;;  %1641 = vmatprep.subr.mxu0 %v870_v13  ;;  %1712 = vmatprep.subr.mxu1 %v998_v14  ;;  %v865_v24 = vld [vmem:[%s6979_s1 + $0x1a40] sm:$0xff]  ;;  %v207_v60 = vld [vmem:[%s6979_s1 + $0x5b0] sm:$0xff] }
 0x102   :  { %v993_v25 = vld [vmem:[%s6979_s1 + $0x1e40] sm:$0xff]  ;;  %1642 = vmatpush2.msra.mxu0 %v869_v17  ;;  %1713 = vmatpush2.msra.mxu1 %v997_v18  ;;  %v862_v27 = vld [vmem:[%s6979_s1 + $0x1a28] sm:$0xff]  ;;  %v76_v61 = vld [vmem:[%s6979_s1 + $0x198] sm:$0xff] }
 0x103   :  { %v990_v28 = vld [vmem:[%s6979_s1 + $0x1e28] sm:$0xff]  ;;  %1643 = vmatprep.subr.mxu0 %v866_v19  ;;  %1714 = vmatprep.subr.mxu1 %v994_v20  ;;  %v861_v31 = vld [vmem:[%s6979_s1 + $0x1a20] sm:$0xff]  ;;  %v1225_v33 = vpop.f32.mrf.mxu0  ;;  %v204_v63 = vld [vmem:[%s6979_s1 + $0x598] sm:$0xff] }
 0x104   :  { %v989_v32 = vld [vmem:[%s6979_s1 + $0x1e20] sm:$0xff]  ;;  %1644 = vmatpush2.msra.mxu0 %v865_v24  ;;  %1715 = vmatpush2.msra.mxu1 %v993_v25  ;;  %v858_v34 = vld [vmem:[%s6979_s1 + $0x1a08] sm:$0xff]  ;;  %v1226_v37 = vadd.f32 %v1225_v33, %v1054_v23  ;;  %v75_v0 = vld [vmem:[%s6979_s1 + $0x190] sm:$0xff] }
 0x105   :  { %v986_v35 = vld [vmem:[%s6979_s1 + $0x1e08] sm:$0xff]  ;;  %1645 = vmatprep.subr.mxu0 %v862_v27  ;;  %1716 = vmatprep.subr.mxu1 %v990_v28  ;;  %v857_v38 = vld [vmem:[%s6979_s1 + $0x1a00] sm:$0xff]  ;;  %v1296_v39 = vpop.f32.mrf.mxu1  ;;  %v203_v1 = vld [vmem:[%s6979_s1 + $0x590] sm:$0xff] }
 0x106   :  { %1646 = vmatpush2.msra.mxu0 %v861_v31  ;;  %1717 = vmatpush2.msra.mxu1 %v989_v32  ;;  %v985_v40 = vld [vmem:[%s6979_s1 + $0x1e00] sm:$0xff]  ;;  %v4582_v44 = vadd.f32 %v1296_v39, %v1226_v37  ;;  %v72_v2 = vld [vmem:[%s6979_s1 + $0x178] sm:$0xff]  ;;  %v71_v5 = vld [vmem:[%s6979_s1 + $0x170] sm:$0xff] }
 0x107   :  { %1647 = vmatprep.subr.mxu0 %v858_v34  ;;  %1718 = vmatprep.subr.mxu1 %v986_v35  ;;  %v200_v4 = vld [vmem:[%s6979_s1 + $0x578] sm:$0xff]  ;;  %v199_v6 = vld [vmem:[%s6979_s1 + $0x570] sm:$0xff] }
 0x108   :  { %1648 = vmatpush2.msra.mxu0 %v857_v38  ;;  %1649 = vmatprep.mubr.f32.mxu0 %v4570_v36  ;;  %v68_v9 = vld [vmem:[%s6979_s1 + $0x158] sm:$0xff]  ;;  %v67_v12 = vld [vmem:[%s6979_s1 + $0x150] sm:$0xff] }
 0x109   :  { %1719 = vmatpush2.msra.mxu1 %v985_v40  ;;  %1650 = vmatmul.mubr.f32.vlgmr.msra.gmra.mxu0 %v4537_v22  ;;  %v196_v10 = vld [vmem:[%s6979_s1 + $0x558] sm:$0xff]  ;;  %v195_v13 = vld [vmem:[%s6979_s1 + $0x550] sm:$0xff] }
 0x10a   :  { %1720 = vmatprep.mubr.f32.mxu1 %v4580_v42  ;;  %1727 = vmatprep.subr.mxu0 %v88_v45  ;;  %v64_v14 = vld [vmem:[%s6979_s1 + $0x138] sm:$0xff]  ;;  %v63_v17 = vld [vmem:[%s6979_s1 + $0x130] sm:$0xff] }
 0x10b   :  { %1798 = vmatprep.subr.mxu1 %v216_v46  ;;  %1721 = vmatmul.mubr.f32.vlgmr.msra.gmra.mxu1 %v4554_v30  ;;  %v192_v15 = vld [vmem:[%s6979_s1 + $0x538] sm:$0xff]  ;;  %v191_v18 = vld [vmem:[%s6979_s1 + $0x530] sm:$0xff] }
 0x10c   :  { %1728 = vmatpush1.msra.mxu0 %v87_v47  ;;  %1799 = vmatpush1.msra.mxu1 %v215_v49  ;;  %v60_v19 = vld [vmem:[%s6979_s1 + $0x118] sm:$0xff]  ;;  %v59_v23 = vld [vmem:[%s6979_s1 + $0x110] sm:$0xff] }
 0x10d   :  { %1729 = vmatprep.subr.mxu0 %v84_v50  ;;  %1800 = vmatprep.subr.mxu1 %v212_v51  ;;  %v188_v20 = vld [vmem:[%s6979_s1 + $0x518] sm:$0xff]  ;;  %v187_v24 = vld [vmem:[%s6979_s1 + $0x510] sm:$0xff] }
 0x10e   :  { %1730 = vmatpush1.msra.mxu0 %v83_v53  ;;  %1801 = vmatpush1.msra.mxu1 %v211_v55  ;;  %v56_v25 = vld [vmem:[%s6979_s1 + $0xf8] sm:$0xff]  ;;  %v55_v28 = vld [vmem:[%s6979_s1 + $0xf0] sm:$0xff] }
 0x10f   :  { %1731 = vmatprep.subr.mxu0 %v80_v56  ;;  %1802 = vmatprep.subr.mxu1 %v208_v58  ;;  %v184_v27 = vld [vmem:[%s6979_s1 + $0x4f8] sm:$0xff]  ;;  %v183_v31 = vld [vmem:[%s6979_s1 + $0x4f0] sm:$0xff] }
 0x110   :  { %1732 = vmatpush1.msra.mxu0 %v79_v59  ;;  %1803 = vmatpush1.msra.mxu1 %v207_v60  ;;  %v52_v32 = vld [vmem:[%s6979_s1 + $0xd8] sm:$0xff]  ;;  %v51_v34 = vld [vmem:[%s6979_s1 + $0xd0] sm:$0xff] }
 0x111   :  { %1733 = vmatprep.subr.mxu0 %v76_v61  ;;  %1804 = vmatprep.subr.mxu1 %v204_v63  ;;  %v180_v33 = vld [vmem:[%s6979_s1 + $0x4d8] sm:$0xff]  ;;  %v179_v35 = vld [vmem:[%s6979_s1 + $0x4d0] sm:$0xff] }
 0x112   :  { %1734 = vmatpush1.msra.mxu0 %v75_v0  ;;  %1805 = vmatpush1.msra.mxu1 %v203_v1  ;;  %v48_v37 = vld [vmem:[%s6979_s1 + $0xb8] sm:$0xff]  ;;  %v47_v39 = vld [vmem:[%s6979_s1 + $0xb0] sm:$0xff] }
 0x113   :  { %1735 = vmatprep.subr.mxu0 %v72_v2  ;;  %1806 = vmatprep.subr.mxu1 %v200_v4  ;;  %v176_v38 = vld [vmem:[%s6979_s1 + $0x4b8] sm:$0xff]  ;;  %v175_v40 = vld [vmem:[%s6979_s1 + $0x4b0] sm:$0xff] }
 0x114   :  { %1736 = vmatpush1.msra.mxu0 %v71_v5  ;;  %1807 = vmatpush1.msra.mxu1 %v199_v6  ;;  %v44_v45 = vld [vmem:[%s6979_s1 + $0x98] sm:$0xff]  ;;  %v43_v47 = vld [vmem:[%s6979_s1 + $0x90] sm:$0xff] }
 0x115   :  { %1737 = vmatprep.subr.mxu0 %v68_v9  ;;  %1808 = vmatprep.subr.mxu1 %v196_v10  ;;  %v172_v46 = vld [vmem:[%s6979_s1 + $0x498] sm:$0xff]  ;;  %v171_v49 = vld [vmem:[%s6979_s1 + $0x490] sm:$0xff] }
 0x116   :  { %1738 = vmatpush1.msra.mxu0 %v67_v12  ;;  %1809 = vmatpush1.msra.mxu1 %v195_v13  ;;  %v40_v50 = vld [vmem:[%s6979_s1 + $0x78] sm:$0xff]  ;;  %v39_v53 = vld [vmem:[%s6979_s1 + $0x70] sm:$0xff] }
 0x117   :  { %1739 = vmatprep.subr.mxu0 %v64_v14  ;;  %1810 = vmatprep.subr.mxu1 %v192_v15  ;;  %v168_v51 = vld [vmem:[%s6979_s1 + $0x478] sm:$0xff]  ;;  %v167_v55 = vld [vmem:[%s6979_s1 + $0x470] sm:$0xff] }
 0x118   :  { %1740 = vmatpush1.msra.mxu0 %v63_v17  ;;  %1811 = vmatpush1.msra.mxu1 %v191_v18  ;;  %v36_v56 = vld [vmem:[%s6979_s1 + $0x58] sm:$0xff]  ;;  %v35_v59 = vld [vmem:[%s6979_s1 + $0x50] sm:$0xff] }
 0x119   :  { %1741 = vmatprep.subr.mxu0 %v60_v19  ;;  %1812 = vmatprep.subr.mxu1 %v188_v20  ;;  %v164_v58 = vld [vmem:[%s6979_s1 + $0x458] sm:$0xff]  ;;  %v163_v60 = vld [vmem:[%s6979_s1 + $0x450] sm:$0xff] }
 0x11a   :  { %1742 = vmatpush1.msra.mxu0 %v59_v23  ;;  %1813 = vmatpush1.msra.mxu1 %v187_v24  ;;  %v32_v61 = vld [vmem:[%s6979_s1 + $0x38] sm:$0xff]  ;;  %v31_v0 = vld [vmem:[%s6979_s1 + $0x30] sm:$0xff] }
 0x11b   :  { %1743 = vmatprep.subr.mxu0 %v56_v25  ;;  %1814 = vmatprep.subr.mxu1 %v184_v27  ;;  %v160_v63 = vld [vmem:[%s6979_s1 + $0x438] sm:$0xff]  ;;  %v159_v1 = vld [vmem:[%s6979_s1 + $0x430] sm:$0xff] }
 0x11c   :  { %1744 = vmatpush1.msra.mxu0 %v55_v28  ;;  %1815 = vmatpush1.msra.mxu1 %v183_v31  ;;  %v28_v2 = vld [vmem:[%s6979_s1 + $0x18] sm:$0xff]  ;;  %v27_v5 = vld [vmem:[%s6979_s1 + $0x10] sm:$0xff] }
 0x11d   :  { %1745 = vmatprep.subr.mxu0 %v52_v32  ;;  %1816 = vmatprep.subr.mxu1 %v180_v33  ;;  %v156_v4 = vld [vmem:[%s6979_s1 + $0x418] sm:$0xff]  ;;  %v155_v6 = vld [vmem:[%s6979_s1 + $0x410] sm:$0xff] }
 0x11e   :  { %1746 = vmatpush1.msra.mxu0 %v51_v34  ;;  %1817 = vmatpush1.msra.mxu1 %v179_v35  ;;  %v152_v9 = vld [vmem:[%s6979_s1 + $0x3f8] sm:$0xff]  ;;  %v151_v12 = vld [vmem:[%s6979_s1 + $0x3f0] sm:$0xff] }
 0x11f   :  { %1747 = vmatprep.subr.mxu0 %v48_v37  ;;  %1818 = vmatprep.subr.mxu1 %v176_v38  ;;  %v280_v10 = vld [vmem:[%s6979_s1 + $0x7f8] sm:$0xff]  ;;  %v279_v13 = vld [vmem:[%s6979_s1 + $0x7f0] sm:$0xff] }
 0x120   :  { %1748 = vmatpush1.msra.mxu0 %v47_v39  ;;  %1819 = vmatpush1.msra.mxu1 %v175_v40  ;;  %v148_v14 = vld [vmem:[%s6979_s1 + $0x3d8] sm:$0xff]  ;;  %v147_v17 = vld [vmem:[%s6979_s1 + $0x3d0] sm:$0xff] }
 0x121   :  { %1749 = vmatprep.subr.mxu0 %v44_v45  ;;  %1820 = vmatprep.subr.mxu1 %v172_v46  ;;  %v276_v15 = vld [vmem:[%s6979_s1 + $0x7d8] sm:$0xff]  ;;  %v275_v18 = vld [vmem:[%s6979_s1 + $0x7d0] sm:$0xff] }
 0x122   :  { %1750 = vmatpush1.msra.mxu0 %v43_v47  ;;  %1821 = vmatpush1.msra.mxu1 %v171_v49  ;;  %v144_v19 = vld [vmem:[%s6979_s1 + $0x3b8] sm:$0xff]  ;;  %v143_v23 = vld [vmem:[%s6979_s1 + $0x3b0] sm:$0xff] }
 0x123   :  { %1751 = vmatprep.subr.mxu0 %v40_v50  ;;  %1822 = vmatprep.subr.mxu1 %v168_v51  ;;  %v272_v20 = vld [vmem:[%s6979_s1 + $0x7b8] sm:$0xff]  ;;  %v271_v24 = vld [vmem:[%s6979_s1 + $0x7b0] sm:$0xff] }
 0x124   :  { %1752 = vmatpush1.msra.mxu0 %v39_v53  ;;  %1823 = vmatpush1.msra.mxu1 %v167_v55  ;;  %v140_v25 = vld [vmem:[%s6979_s1 + $0x398] sm:$0xff]  ;;  %v139_v28 = vld [vmem:[%s6979_s1 + $0x390] sm:$0xff] }
 0x125   :  { %1753 = vmatprep.subr.mxu0 %v36_v56  ;;  %1824 = vmatprep.subr.mxu1 %v164_v58  ;;  %v268_v27 = vld [vmem:[%s6979_s1 + $0x798] sm:$0xff]  ;;  %v267_v31 = vld [vmem:[%s6979_s1 + $0x790] sm:$0xff] }
 0x126   :  { %1754 = vmatpush1.msra.mxu0 %v35_v59  ;;  %1825 = vmatpush1.msra.mxu1 %v163_v60  ;;  %v136_v32 = vld [vmem:[%s6979_s1 + $0x378] sm:$0xff]  ;;  %v135_v34 = vld [vmem:[%s6979_s1 + $0x370] sm:$0xff] }
 0x127   :  { %1755 = vmatprep.subr.mxu0 %v32_v61  ;;  %1826 = vmatprep.subr.mxu1 %v160_v63  ;;  %v264_v33 = vld [vmem:[%s6979_s1 + $0x778] sm:$0xff]  ;;  %v263_v35 = vld [vmem:[%s6979_s1 + $0x770] sm:$0xff] }
 0x128   :  { %1756 = vmatpush1.msra.mxu0 %v31_v0  ;;  %1827 = vmatpush1.msra.mxu1 %v159_v1  ;;  %v132_v37 = vld [vmem:[%s6979_s1 + $0x358] sm:$0xff]  ;;  %v131_v39 = vld [vmem:[%s6979_s1 + $0x350] sm:$0xff] }
 0x129   :  { %1757 = vmatprep.subr.mxu0 %v28_v2  ;;  %1828 = vmatprep.subr.mxu1 %v156_v4  ;;  %v260_v38 = vld [vmem:[%s6979_s1 + $0x758] sm:$0xff]  ;;  %v259_v40 = vld [vmem:[%s6979_s1 + $0x750] sm:$0xff] }
 0x12a   :  { %1758 = vmatpush1.msra.mxu0 %v27_v5  ;;  %1829 = vmatpush1.msra.mxu1 %v155_v6  ;;  %v128_v45 = vld [vmem:[%s6979_s1 + $0x338] sm:$0xff]  ;;  %v127_v47 = vld [vmem:[%s6979_s1 + $0x330] sm:$0xff] }
 0x12b   :  { %1759 = vmatprep.subr.mxu0 %v152_v9  ;;  %1830 = vmatprep.subr.mxu1 %v280_v10  ;;  %v256_v46 = vld [vmem:[%s6979_s1 + $0x738] sm:$0xff]  ;;  %v255_v49 = vld [vmem:[%s6979_s1 + $0x730] sm:$0xff] }
 0x12c   :  { %1760 = vmatpush2.msra.mxu0 %v151_v12  ;;  %1831 = vmatpush2.msra.mxu1 %v279_v13  ;;  %v124_v50 = vld [vmem:[%s6979_s1 + $0x318] sm:$0xff]  ;;  %v123_v53 = vld [vmem:[%s6979_s1 + $0x310] sm:$0xff] }
 0x12d   :  { %1761 = vmatprep.subr.mxu0 %v148_v14  ;;  %1832 = vmatprep.subr.mxu1 %v276_v15  ;;  %v252_v51 = vld [vmem:[%s6979_s1 + $0x718] sm:$0xff]  ;;  %v251_v55 = vld [vmem:[%s6979_s1 + $0x710] sm:$0xff] }
 0x12e   :  { %1762 = vmatpush2.msra.mxu0 %v147_v17  ;;  %1833 = vmatpush2.msra.mxu1 %v275_v18  ;;  %v120_v56 = vld [vmem:[%s6979_s1 + $0x2f8] sm:$0xff]  ;;  %v119_v59 = vld [vmem:[%s6979_s1 + $0x2f0] sm:$0xff] }
 0x12f   :  { %1763 = vmatprep.subr.mxu0 %v144_v19  ;;  %1834 = vmatprep.subr.mxu1 %v272_v20  ;;  %v248_v58 = vld [vmem:[%s6979_s1 + $0x6f8] sm:$0xff]  ;;  %v247_v60 = vld [vmem:[%s6979_s1 + $0x6f0] sm:$0xff] }
 0x130   :  { %1764 = vmatpush2.msra.mxu0 %v143_v23  ;;  %1835 = vmatpush2.msra.mxu1 %v271_v24  ;;  %v116_v61 = vld [vmem:[%s6979_s1 + $0x2d8] sm:$0xff]  ;;  %v115_v0 = vld [vmem:[%s6979_s1 + $0x2d0] sm:$0xff]  ;;  %v4942_v23 = vpop.f32.mrf.mxu0 }
 0x131   :  { %1765 = vmatprep.subr.mxu0 %v140_v25  ;;  %1836 = vmatprep.subr.mxu1 %v268_v27  ;;  %v244_v63 = vld [vmem:[%s6979_s1 + $0x6d8] sm:$0xff]  ;;  %v243_v1 = vld [vmem:[%s6979_s1 + $0x6d0] sm:$0xff] }
 0x132   :  { %1766 = vmatpush2.msra.mxu0 %v139_v28  ;;  %1837 = vmatpush2.msra.mxu1 %v267_v31  ;;  %v112_v2 = vld [vmem:[%s6979_s1 + $0x2b8] sm:$0xff]  ;;  %v111_v5 = vld [vmem:[%s6979_s1 + $0x2b0] sm:$0xff]  ;;  %v4956_v31 = vpop.f32.mrf.mxu1 }
 0x133   :  { %1767 = vmatprep.subr.mxu0 %v136_v32  ;;  %1838 = vmatprep.subr.mxu1 %v264_v33  ;;  %v240_v4 = vld [vmem:[%s6979_s1 + $0x6b8] sm:$0xff]  ;;  %v239_v6 = vld [vmem:[%s6979_s1 + $0x6b0] sm:$0xff] }
 0x134   :  { %1768 = vmatpush2.msra.mxu0 %v135_v34  ;;  %1839 = vmatpush2.msra.mxu1 %v263_v35  ;;  %v108_v9 = vld [vmem:[%s6979_s1 + $0x298] sm:$0xff]  ;;  %v107_v12 = vld [vmem:[%s6979_s1 + $0x290] sm:$0xff] }
 0x135   :  { %1769 = vmatprep.subr.mxu0 %v132_v37  ;;  %1840 = vmatprep.subr.mxu1 %v260_v38  ;;  %v236_v10 = vld [vmem:[%s6979_s1 + $0x698] sm:$0xff]  ;;  %v235_v13 = vld [vmem:[%s6979_s1 + $0x690] sm:$0xff] }
 0x136   :  { %1770 = vmatpush2.msra.mxu0 %v131_v39  ;;  %1841 = vmatpush2.msra.mxu1 %v259_v40  ;;  %v104_v14 = vld [vmem:[%s6979_s1 + $0x278] sm:$0xff]  ;;  %v103_v17 = vld [vmem:[%s6979_s1 + $0x270] sm:$0xff] }
 0x137   :  { %1771 = vmatprep.subr.mxu0 %v128_v45  ;;  %1842 = vmatprep.subr.mxu1 %v256_v46  ;;  %v232_v15 = vld [vmem:[%s6979_s1 + $0x678] sm:$0xff]  ;;  %v231_v18 = vld [vmem:[%s6979_s1 + $0x670] sm:$0xff] }
 0x138   :  { %1772 = vmatpush2.msra.mxu0 %v127_v47  ;;  %1843 = vmatpush2.msra.mxu1 %v255_v49  ;;  %v100_v19 = vld [vmem:[%s6979_s1 + $0x258] sm:$0xff]  ;;  %v99_v24 = vld [vmem:[%s6979_s1 + $0x250] sm:$0xff] }
 0x139   :  { %1773 = vmatprep.subr.mxu0 %v124_v50  ;;  %1844 = vmatprep.subr.mxu1 %v252_v51  ;;  %v228_v20 = vld [vmem:[%s6979_s1 + $0x658] sm:$0xff]  ;;  %v227_v25 = vld [vmem:[%s6979_s1 + $0x650] sm:$0xff] }
 0x13a   :  { %1774 = vmatpush2.msra.mxu0 %v123_v53  ;;  %1845 = vmatpush2.msra.mxu1 %v251_v55  ;;  %v96_v27 = vld [vmem:[%s6979_s1 + $0x238] sm:$0xff]  ;;  %v95_v32 = vld [vmem:[%s6979_s1 + $0x230] sm:$0xff] }
 0x13b   :  { %1775 = vmatprep.subr.mxu0 %v120_v56  ;;  %1846 = vmatprep.subr.mxu1 %v248_v58  ;;  %v224_v28 = vld [vmem:[%s6979_s1 + $0x638] sm:$0xff]  ;;  %v223_v33 = vld [vmem:[%s6979_s1 + $0x630] sm:$0xff] }
 0x13c   :  { %1776 = vmatpush2.msra.mxu0 %v119_v59  ;;  %1847 = vmatpush2.msra.mxu1 %v247_v60  ;;  %v92_v35 = vld [vmem:[%s6979_s1 + $0x218] sm:$0xff]  ;;  %v91_v39 = vld [vmem:[%s6979_s1 + $0x210] sm:$0xff] }
 0x13d   :  { %1777 = vmatprep.subr.mxu0 %v116_v61  ;;  %1848 = vmatprep.subr.mxu1 %v244_v63  ;;  %v220_v37 = vld [vmem:[%s6979_s1 + $0x618] sm:$0xff]  ;;  %v219_v45 = vld [vmem:[%s6979_s1 + $0x610] sm:$0xff] }
 0x13e   :  { %1778 = vmatpush2.msra.mxu0 %v115_v0  ;;  %1849 = vmatpush2.msra.mxu1 %v243_v1  ;;  %v472_v47 = vld [vmem:[%s6979_s1 + $0xdf8] sm:$0xff]  ;;  %v343_v49 = vld [vmem:[%s6979_s1 + $0x9f0] sm:$0xff] }
 0x13f   :  { %1779 = vmatprep.subr.mxu0 %v112_v2  ;;  %1850 = vmatprep.subr.mxu1 %v240_v4  ;;  %v471_v50 = vld [vmem:[%s6979_s1 + $0xdf0] sm:$0xff]  ;;  %v468_v51 = vld [vmem:[%s6979_s1 + $0xdd8] sm:$0xff] }
 0x140   :  { %1780 = vmatpush2.msra.mxu0 %v111_v5  ;;  %1851 = vmatpush2.msra.mxu1 %v239_v6  ;;  %v336_v53 = vld [vmem:[%s6979_s1 + $0x9b8] sm:$0xff]  ;;  %v463_v56 = vld [vmem:[%s6979_s1 + $0xdb0] sm:$0xff] }
 0x141   :  { %1781 = vmatprep.subr.mxu0 %v108_v9  ;;  %1852 = vmatprep.subr.mxu1 %v236_v10  ;;  %v464_v55 = vld [vmem:[%s6979_s1 + $0xdb8] sm:$0xff]  ;;  %v331_v60 = vld [vmem:[%s6979_s1 + $0x990] sm:$0xff] }
 0x142   :  { %1782 = vmatpush2.msra.mxu0 %v107_v12  ;;  %1853 = vmatpush2.msra.mxu1 %v235_v13  ;;  %v332_v58 = vld [vmem:[%s6979_s1 + $0x998] sm:$0xff]  ;;  %v459_v61 = vld [vmem:[%s6979_s1 + $0xd90] sm:$0xff] }
 0x143   :  { %1783 = vmatprep.subr.mxu0 %v104_v14  ;;  %1854 = vmatprep.subr.mxu1 %v232_v15  ;;  %v460_v59 = vld [vmem:[%s6979_s1 + $0xd98] sm:$0xff]  ;;  %v327_v1 = vld [vmem:[%s6979_s1 + $0x970] sm:$0xff] }
 0x144   :  { %1784 = vmatpush2.msra.mxu0 %v103_v17  ;;  %1855 = vmatpush2.msra.mxu1 %v231_v18  ;;  %v328_v63 = vld [vmem:[%s6979_s1 + $0x978] sm:$0xff]  ;;  %v455_v2 = vld [vmem:[%s6979_s1 + $0xd70] sm:$0xff] }
 0x145   :  { %1785 = vmatprep.subr.mxu0 %v100_v19  ;;  %1856 = vmatprep.subr.mxu1 %v228_v20  ;;  %v1367_v34 = vpop.f32.mrf.mxu0  ;;  %v456_v0 = vld [vmem:[%s6979_s1 + $0xd78] sm:$0xff]  ;;  %v323_v6 = vld [vmem:[%s6979_s1 + $0x950] sm:$0xff] }
 0x146   :  { %1786 = vmatpush2.msra.mxu0 %v99_v24  ;;  %1857 = vmatpush2.msra.mxu1 %v227_v25  ;;  %v1368_v38 = vadd.f32 %v1367_v34, %v4582_v44  ;;  %v344_v44 = vld [vmem:[%s6979_s1 + $0x9f8] sm:$0xff]  ;;  %v451_v9 = vld [vmem:[%s6979_s1 + $0xd50] sm:$0xff] }
 0x147   :  { %1787 = vmatprep.subr.mxu0 %v96_v27  ;;  %1858 = vmatprep.subr.mxu1 %v224_v28  ;;  %v1438_v40 = vpop.f32.mrf.mxu1  ;;  %v324_v4 = vld [vmem:[%s6979_s1 + $0x958] sm:$0xff]  ;;  %v319_v13 = vld [vmem:[%s6979_s1 + $0x930] sm:$0xff] }
 0x148   :  { %1788 = vmatpush2.msra.mxu0 %v95_v32  ;;  %1859 = vmatpush2.msra.mxu1 %v223_v33  ;;  %v4977_v46 = vadd.f32 %v1438_v40, %v1368_v38  ;;  %v452_v5 = vld [vmem:[%s6979_s1 + $0xd58] sm:$0xff]  ;;  %v447_v14 = vld [vmem:[%s6979_s1 + $0xd30] sm:$0xff] }
 0x149   :  { %1789 = vmatprep.subr.mxu0 %v92_v35  ;;  %1860 = vmatprep.subr.mxu1 %v220_v37  ;;  %v320_v10 = vld [vmem:[%s6979_s1 + $0x938] sm:$0xff]  ;;  %v315_v18 = vld [vmem:[%s6979_s1 + $0x910] sm:$0xff] }
 0x14a   :  { %1790 = vmatpush2.msra.mxu0 %v91_v39  ;;  %1791 = vmatprep.mubr.f32.mxu0 %v3349_v8  ;;  %v340_v8 = vld [vmem:[%s6979_s1 + $0x9d8] sm:$0xff]  ;;  %v443_v19 = vld [vmem:[%s6979_s1 + $0xd10] sm:$0xff] }
 0x14b   :  { %1861 = vmatpush2.msra.mxu1 %v219_v45  ;;  %1792 = vmatmul.mubr.f32.vlgmr.msra.gmra.mxu0 %v3318_v62  ;;  %v339_v62 = vld [vmem:[%s6979_s1 + $0x9d0] sm:$0xff]  ;;  %v448_v12 = vld [vmem:[%s6979_s1 + $0xd38] sm:$0xff] }
 0x14c   :  { %1862 = vmatprep.mubr.f32.mxu1 %v3359_v11  ;;  %1869 = vmatprep.subr.mxu0 %v344_v44  ;;  %v467_v11 = vld [vmem:[%s6979_s1 + $0xdd0] sm:$0xff]  ;;  %v316_v15 = vld [vmem:[%s6979_s1 + $0x918] sm:$0xff] }
 0x14d   :  { %1940 = vmatprep.subr.mxu1 %v472_v47  ;;  %1863 = vmatmul.mubr.f32.vlgmr.msra.gmra.mxu1 %v3333_v3  ;;  %v335_v3 = vld [vmem:[%s6979_s1 + $0x9b0] sm:$0xff]  ;;  %v444_v17 = vld [vmem:[%s6979_s1 + $0xd18] sm:$0xff] }
 0x14e   :  { %1870 = vmatpush1.msra.mxu0 %v343_v49  ;;  %1941 = vmatpush1.msra.mxu1 %v471_v50  ;;  %v312_v20 = vld [vmem:[%s6979_s1 + $0x8f8] sm:$0xff]  ;;  %v311_v25 = vld [vmem:[%s6979_s1 + $0x8f0] sm:$0xff] }
 0x14f   :  { %1871 = vmatprep.subr.mxu0 %v340_v8  ;;  %1942 = vmatprep.subr.mxu1 %v468_v51  ;;  %v440_v24 = vld [vmem:[%s6979_s1 + $0xcf8] sm:$0xff]  ;;  %v439_v27 = vld [vmem:[%s6979_s1 + $0xcf0] sm:$0xff] }
 0x150   :  { %1872 = vmatpush1.msra.mxu0 %v339_v62  ;;  %1943 = vmatpush1.msra.mxu1 %v467_v11  ;;  %v308_v28 = vld [vmem:[%s6979_s1 + $0x8d8] sm:$0xff]  ;;  %v307_v33 = vld [vmem:[%s6979_s1 + $0x8d0] sm:$0xff] }
 0x151   :  { %1873 = vmatprep.subr.mxu0 %v336_v53  ;;  %1944 = vmatprep.subr.mxu1 %v464_v55  ;;  %v436_v32 = vld [vmem:[%s6979_s1 + $0xcd8] sm:$0xff]  ;;  %v435_v34 = vld [vmem:[%s6979_s1 + $0xcd0] sm:$0xff] }
 0x152   :  { %1874 = vmatpush1.msra.mxu0 %v335_v3  ;;  %1945 = vmatpush1.msra.mxu1 %v463_v56  ;;  %v304_v35 = vld [vmem:[%s6979_s1 + $0x8b8] sm:$0xff]  ;;  %v303_v38 = vld [vmem:[%s6979_s1 + $0x8b0] sm:$0xff] }
 0x153   :  { %1875 = vmatprep.subr.mxu0 %v332_v58  ;;  %1946 = vmatprep.subr.mxu1 %v460_v59  ;;  %v432_v37 = vld [vmem:[%s6979_s1 + $0xcb8] sm:$0xff]  ;;  %v431_v39 = vld [vmem:[%s6979_s1 + $0xcb0] sm:$0xff] }
 0x154   :  { %1876 = vmatpush1.msra.mxu0 %v331_v60  ;;  %1947 = vmatpush1.msra.mxu1 %v459_v61  ;;  %v300_v40 = vld [vmem:[%s6979_s1 + $0x898] sm:$0xff]  ;;  %v299_v44 = vld [vmem:[%s6979_s1 + $0x890] sm:$0xff] }
 0x155   :  { %1877 = vmatprep.subr.mxu0 %v328_v63  ;;  %1948 = vmatprep.subr.mxu1 %v456_v0  ;;  %v428_v45 = vld [vmem:[%s6979_s1 + $0xc98] sm:$0xff]  ;;  %v427_v47 = vld [vmem:[%s6979_s1 + $0xc90] sm:$0xff] }
 0x156   :  { %1878 = vmatpush1.msra.mxu0 %v327_v1  ;;  %1949 = vmatpush1.msra.mxu1 %v455_v2  ;;  %v296_v49 = vld [vmem:[%s6979_s1 + $0x878] sm:$0xff]  ;;  %v295_v8 = vld [vmem:[%s6979_s1 + $0x870] sm:$0xff] }
 0x157   :  { %1879 = vmatprep.subr.mxu0 %v324_v4  ;;  %1950 = vmatprep.subr.mxu1 %v452_v5  ;;  %v424_v50 = vld [vmem:[%s6979_s1 + $0xc78] sm:$0xff]  ;;  %v423_v51 = vld [vmem:[%s6979_s1 + $0xc70] sm:$0xff] }
 0x158   :  { %1880 = vmatpush1.msra.mxu0 %v323_v6  ;;  %1951 = vmatpush1.msra.mxu1 %v451_v9  ;;  %v292_v62 = vld [vmem:[%s6979_s1 + $0x858] sm:$0xff]  ;;  %v291_v53 = vld [vmem:[%s6979_s1 + $0x850] sm:$0xff] }
 0x159   :  { %1881 = vmatprep.subr.mxu0 %v320_v10  ;;  %1952 = vmatprep.subr.mxu1 %v448_v12  ;;  %v420_v11 = vld [vmem:[%s6979_s1 + $0xc58] sm:$0xff]  ;;  %v419_v55 = vld [vmem:[%s6979_s1 + $0xc50] sm:$0xff] }
 0x15a   :  { %1882 = vmatpush1.msra.mxu0 %v319_v13  ;;  %1953 = vmatpush1.msra.mxu1 %v447_v14  ;;  %v288_v3 = vld [vmem:[%s6979_s1 + $0x838] sm:$0xff]  ;;  %v287_v58 = vld [vmem:[%s6979_s1 + $0x830] sm:$0xff] }
 0x15b   :  { %1883 = vmatprep.subr.mxu0 %v316_v15  ;;  %1954 = vmatprep.subr.mxu1 %v444_v17  ;;  %v416_v56 = vld [vmem:[%s6979_s1 + $0xc38] sm:$0xff]  ;;  %v415_v59 = vld [vmem:[%s6979_s1 + $0xc30] sm:$0xff] }
 0x15c   :  { %1884 = vmatpush1.msra.mxu0 %v315_v18  ;;  %1955 = vmatpush1.msra.mxu1 %v443_v19  ;;  %v284_v60 = vld [vmem:[%s6979_s1 + $0x818] sm:$0xff]  ;;  %v283_v63 = vld [vmem:[%s6979_s1 + $0x810] sm:$0xff] }
 0x15d   :  { %1885 = vmatprep.subr.mxu0 %v312_v20  ;;  %1956 = vmatprep.subr.mxu1 %v440_v24  ;;  %v412_v61 = vld [vmem:[%s6979_s1 + $0xc18] sm:$0xff]  ;;  %v411_v0 = vld [vmem:[%s6979_s1 + $0xc10] sm:$0xff] }
 0x15e   :  { %1886 = vmatpush1.msra.mxu0 %v311_v25  ;;  %1957 = vmatpush1.msra.mxu1 %v439_v27  ;;  %v408_v1 = vld [vmem:[%s6979_s1 + $0xbf8] sm:$0xff]  ;;  %v407_v4 = vld [vmem:[%s6979_s1 + $0xbf0] sm:$0xff] }
 0x15f   :  { %1887 = vmatprep.subr.mxu0 %v308_v28  ;;  %1958 = vmatprep.subr.mxu1 %v436_v32  ;;  %v536_v2 = vld [vmem:[%s6979_s1 + $0xff8] sm:$0xff]  ;;  %v535_v5 = vld [vmem:[%s6979_s1 + $0xff0] sm:$0xff] }
 0x160   :  { %1888 = vmatpush1.msra.mxu0 %v307_v33  ;;  %1959 = vmatpush1.msra.mxu1 %v435_v34  ;;  %v404_v6 = vld [vmem:[%s6979_s1 + $0xbd8] sm:$0xff]  ;;  %v403_v10 = vld [vmem:[%s6979_s1 + $0xbd0] sm:$0xff] }
 0x161   :  { %1889 = vmatprep.subr.mxu0 %v304_v35  ;;  %1960 = vmatprep.subr.mxu1 %v432_v37  ;;  %v532_v9 = vld [vmem:[%s6979_s1 + $0xfd8] sm:$0xff]  ;;  %v531_v12 = vld [vmem:[%s6979_s1 + $0xfd0] sm:$0xff] }
 0x162   :  { %1890 = vmatpush1.msra.mxu0 %v303_v38  ;;  %1961 = vmatpush1.msra.mxu1 %v431_v39  ;;  %v400_v13 = vld [vmem:[%s6979_s1 + $0xbb8] sm:$0xff]  ;;  %v399_v15 = vld [vmem:[%s6979_s1 + $0xbb0] sm:$0xff] }
 0x163   :  { %1891 = vmatprep.subr.mxu0 %v300_v40  ;;  %1962 = vmatprep.subr.mxu1 %v428_v45  ;;  %v528_v14 = vld [vmem:[%s6979_s1 + $0xfb8] sm:$0xff]  ;;  %v527_v17 = vld [vmem:[%s6979_s1 + $0xfb0] sm:$0xff] }
 0x164   :  { %1892 = vmatpush1.msra.mxu0 %v299_v44  ;;  %1963 = vmatpush1.msra.mxu1 %v427_v47  ;;  %v396_v18 = vld [vmem:[%s6979_s1 + $0xb98] sm:$0xff]  ;;  %v395_v20 = vld [vmem:[%s6979_s1 + $0xb90] sm:$0xff] }
 0x165   :  { %1893 = vmatprep.subr.mxu0 %v296_v49  ;;  %1964 = vmatprep.subr.mxu1 %v424_v50  ;;  %v524_v19 = vld [vmem:[%s6979_s1 + $0xf98] sm:$0xff]  ;;  %v523_v24 = vld [vmem:[%s6979_s1 + $0xf90] sm:$0xff] }
 0x166   :  { %1894 = vmatpush1.msra.mxu0 %v295_v8  ;;  %1965 = vmatpush1.msra.mxu1 %v423_v51  ;;  %v392_v25 = vld [vmem:[%s6979_s1 + $0xb78] sm:$0xff]  ;;  %v391_v28 = vld [vmem:[%s6979_s1 + $0xb70] sm:$0xff] }
 0x167   :  { %1895 = vmatprep.subr.mxu0 %v292_v62  ;;  %1966 = vmatprep.subr.mxu1 %v420_v11  ;;  %v520_v27 = vld [vmem:[%s6979_s1 + $0xf78] sm:$0xff]  ;;  %v519_v32 = vld [vmem:[%s6979_s1 + $0xf70] sm:$0xff] }
 0x168   :  { %1896 = vmatpush1.msra.mxu0 %v291_v53  ;;  %1967 = vmatpush1.msra.mxu1 %v419_v55  ;;  %v388_v33 = vld [vmem:[%s6979_s1 + $0xb58] sm:$0xff]  ;;  %v387_v35 = vld [vmem:[%s6979_s1 + $0xb50] sm:$0xff] }
 0x169   :  { %1897 = vmatprep.subr.mxu0 %v288_v3  ;;  %1968 = vmatprep.subr.mxu1 %v416_v56  ;;  %v516_v34 = vld [vmem:[%s6979_s1 + $0xf58] sm:$0xff]  ;;  %v515_v37 = vld [vmem:[%s6979_s1 + $0xf50] sm:$0xff] }
 0x16a   :  { %1898 = vmatpush1.msra.mxu0 %v287_v58  ;;  %1969 = vmatpush1.msra.mxu1 %v415_v59  ;;  %v384_v38 = vld [vmem:[%s6979_s1 + $0xb38] sm:$0xff]  ;;  %v383_v40 = vld [vmem:[%s6979_s1 + $0xb30] sm:$0xff] }
 0x16b   :  { %1899 = vmatprep.subr.mxu0 %v284_v60  ;;  %1970 = vmatprep.subr.mxu1 %v412_v61  ;;  %v512_v39 = vld [vmem:[%s6979_s1 + $0xf38] sm:$0xff]  ;;  %v511_v45 = vld [vmem:[%s6979_s1 + $0xf30] sm:$0xff] }
 0x16c   :  { %1900 = vmatpush1.msra.mxu0 %v283_v63  ;;  %1971 = vmatpush1.msra.mxu1 %v411_v0  ;;  %v380_v44 = vld [vmem:[%s6979_s1 + $0xb18] sm:$0xff]  ;;  %v379_v49 = vld [vmem:[%s6979_s1 + $0xb10] sm:$0xff] }
 0x16d   :  { %1901 = vmatprep.subr.mxu0 %v408_v1  ;;  %1972 = vmatprep.subr.mxu1 %v536_v2  ;;  %v508_v47 = vld [vmem:[%s6979_s1 + $0xf18] sm:$0xff]  ;;  %v507_v50 = vld [vmem:[%s6979_s1 + $0xf10] sm:$0xff] }
 0x16e   :  { %1902 = vmatpush2.msra.mxu0 %v407_v4  ;;  %1973 = vmatpush2.msra.mxu1 %v535_v5  ;;  %v376_v8 = vld [vmem:[%s6979_s1 + $0xaf8] sm:$0xff]  ;;  %v375_v62 = vld [vmem:[%s6979_s1 + $0xaf0] sm:$0xff] }
 0x16f   :  { %1903 = vmatprep.subr.mxu0 %v404_v6  ;;  %1974 = vmatprep.subr.mxu1 %v532_v9  ;;  %v504_v51 = vld [vmem:[%s6979_s1 + $0xef8] sm:$0xff]  ;;  %v503_v11 = vld [vmem:[%s6979_s1 + $0xef0] sm:$0xff] }
 0x170   :  { %1904 = vmatpush2.msra.mxu0 %v403_v10  ;;  %1975 = vmatpush2.msra.mxu1 %v531_v12  ;;  %v372_v53 = vld [vmem:[%s6979_s1 + $0xad8] sm:$0xff]  ;;  %v371_v3 = vld [vmem:[%s6979_s1 + $0xad0] sm:$0xff] }
 0x171   :  { %1905 = vmatprep.subr.mxu0 %v400_v13  ;;  %1976 = vmatprep.subr.mxu1 %v528_v14  ;;  %v500_v55 = vld [vmem:[%s6979_s1 + $0xed8] sm:$0xff]  ;;  %v499_v56 = vld [vmem:[%s6979_s1 + $0xed0] sm:$0xff]  ;;  %v5337_v13 = vpop.f32.mrf.mxu0 }
 0x172   :  { %1906 = vmatpush2.msra.mxu0 %v399_v15  ;;  %1977 = vmatpush2.msra.mxu1 %v527_v17  ;;  %v368_v58 = vld [vmem:[%s6979_s1 + $0xab8] sm:$0xff]  ;;  %v367_v60 = vld [vmem:[%s6979_s1 + $0xab0] sm:$0xff] }
 0x173   :  { %1907 = vmatprep.subr.mxu0 %v396_v18  ;;  %1978 = vmatprep.subr.mxu1 %v524_v19  ;;  %v496_v59 = vld [vmem:[%s6979_s1 + $0xeb8] sm:$0xff]  ;;  %v495_v61 = vld [vmem:[%s6979_s1 + $0xeb0] sm:$0xff]  ;;  %v5351_v19 = vpop.f32.mrf.mxu1 }
 0x174   :  { %1908 = vmatpush2.msra.mxu0 %v395_v20  ;;  %1979 = vmatpush2.msra.mxu1 %v523_v24  ;;  %v364_v63 = vld [vmem:[%s6979_s1 + $0xa98] sm:$0xff]  ;;  %v363_v1 = vld [vmem:[%s6979_s1 + $0xa90] sm:$0xff] }
 0x175   :  { %1909 = vmatprep.subr.mxu0 %v392_v25  ;;  %1980 = vmatprep.subr.mxu1 %v520_v27  ;;  %v492_v0 = vld [vmem:[%s6979_s1 + $0xe98] sm:$0xff]  ;;  %v491_v2 = vld [vmem:[%s6979_s1 + $0xe90] sm:$0xff] }
 0x176   :  { %1910 = vmatpush2.msra.mxu0 %v391_v28  ;;  %1981 = vmatpush2.msra.mxu1 %v519_v32  ;;  %v360_v4 = vld [vmem:[%s6979_s1 + $0xa78] sm:$0xff]  ;;  %v359_v6 = vld [vmem:[%s6979_s1 + $0xa70] sm:$0xff] }
 0x177   :  { %1911 = vmatprep.subr.mxu0 %v388_v33  ;;  %1982 = vmatprep.subr.mxu1 %v516_v34  ;;  %v488_v5 = vld [vmem:[%s6979_s1 + $0xe78] sm:$0xff]  ;;  %v487_v9 = vld [vmem:[%s6979_s1 + $0xe70] sm:$0xff] }
 0x178   :  { %1912 = vmatpush2.msra.mxu0 %v387_v35  ;;  %1983 = vmatpush2.msra.mxu1 %v515_v37  ;;  %v356_v10 = vld [vmem:[%s6979_s1 + $0xa58] sm:$0xff]  ;;  %v355_v14 = vld [vmem:[%s6979_s1 + $0xa50] sm:$0xff] }
 0x179   :  { %1913 = vmatprep.subr.mxu0 %v384_v38  ;;  %1984 = vmatprep.subr.mxu1 %v512_v39  ;;  %v484_v12 = vld [vmem:[%s6979_s1 + $0xe58] sm:$0xff]  ;;  %v483_v15 = vld [vmem:[%s6979_s1 + $0xe50] sm:$0xff] }
 0x17a   :  { %1914 = vmatpush2.msra.mxu0 %v383_v40  ;;  %1985 = vmatpush2.msra.mxu1 %v511_v45  ;;  %v352_v17 = vld [vmem:[%s6979_s1 + $0xa38] sm:$0xff]  ;;  %v351_v20 = vld [vmem:[%s6979_s1 + $0xa30] sm:$0xff] }
 0x17b   :  { %1915 = vmatprep.subr.mxu0 %v380_v44  ;;  %1986 = vmatprep.subr.mxu1 %v508_v47  ;;  %v480_v18 = vld [vmem:[%s6979_s1 + $0xe38] sm:$0xff]  ;;  %v479_v24 = vld [vmem:[%s6979_s1 + $0xe30] sm:$0xff] }
 0x17c   :  { %1916 = vmatpush2.msra.mxu0 %v379_v49  ;;  %1987 = vmatpush2.msra.mxu1 %v507_v50  ;;  %v348_v27 = vld [vmem:[%s6979_s1 + $0xa18] sm:$0xff]  ;;  %v347_v33 = vld [vmem:[%s6979_s1 + $0xa10] sm:$0xff] }
 0x17d   :  { %1917 = vmatprep.subr.mxu0 %v376_v8  ;;  %1988 = vmatprep.subr.mxu1 %v504_v51  ;;  %v476_v28 = vld [vmem:[%s6979_s1 + $0xe18] sm:$0xff]  ;;  %v475_v35 = vld [vmem:[%s6979_s1 + $0xe10] sm:$0xff] }
 0x17e   :  { %1918 = vmatpush2.msra.mxu0 %v375_v62  ;;  %1989 = vmatpush2.msra.mxu1 %v503_v11  ;;  %v728_v38 = vld [vmem:[%s6979_s1 + $0x15f8] sm:$0xff]  ;;  %v599_v39 = vld [vmem:[%s6979_s1 + $0x11f0] sm:$0xff] }
 0x17f   :  { %1919 = vmatprep.subr.mxu0 %v372_v53  ;;  %1990 = vmatprep.subr.mxu1 %v500_v55  ;;  %v727_v40 = vld [vmem:[%s6979_s1 + $0x15f0] sm:$0xff]  ;;  %v724_v45 = vld [vmem:[%s6979_s1 + $0x15d8] sm:$0xff] }
 0x180   :  { %1920 = vmatpush2.msra.mxu0 %v371_v3  ;;  %1991 = vmatpush2.msra.mxu1 %v499_v56  ;;  %v592_v44 = vld [vmem:[%s6979_s1 + $0x11b8] sm:$0xff]  ;;  %v719_v49 = vld [vmem:[%s6979_s1 + $0x15b0] sm:$0xff] }
 0x181   :  { %1921 = vmatprep.subr.mxu0 %v368_v58  ;;  %1992 = vmatprep.subr.mxu1 %v496_v59  ;;  %v720_v47 = vld [vmem:[%s6979_s1 + $0x15b8] sm:$0xff]  ;;  %v587_v51 = vld [vmem:[%s6979_s1 + $0x1190] sm:$0xff] }
 0x182   :  { %1922 = vmatpush2.msra.mxu0 %v367_v60  ;;  %1993 = vmatpush2.msra.mxu1 %v495_v61  ;;  %v588_v50 = vld [vmem:[%s6979_s1 + $0x1198] sm:$0xff]  ;;  %v715_v62 = vld [vmem:[%s6979_s1 + $0x1590] sm:$0xff] }
 0x183   :  { %1923 = vmatprep.subr.mxu0 %v364_v63  ;;  %1994 = vmatprep.subr.mxu1 %v492_v0  ;;  %v716_v8 = vld [vmem:[%s6979_s1 + $0x1598] sm:$0xff]  ;;  %v583_v55 = vld [vmem:[%s6979_s1 + $0x1170] sm:$0xff] }
 0x184   :  { %1924 = vmatpush2.msra.mxu0 %v363_v1  ;;  %1995 = vmatpush2.msra.mxu1 %v491_v2  ;;  %v584_v11 = vld [vmem:[%s6979_s1 + $0x1178] sm:$0xff]  ;;  %v711_v3 = vld [vmem:[%s6979_s1 + $0x1570] sm:$0xff] }
 0x185   :  { %1925 = vmatprep.subr.mxu0 %v360_v4  ;;  %1996 = vmatprep.subr.mxu1 %v488_v5  ;;  %v712_v53 = vld [vmem:[%s6979_s1 + $0x1578] sm:$0xff]  ;;  %v579_v59 = vld [vmem:[%s6979_s1 + $0x1150] sm:$0xff] }
 0x186   :  { %1926 = vmatpush2.msra.mxu0 %v359_v6  ;;  %1997 = vmatpush2.msra.mxu1 %v487_v9  ;;  %v580_v56 = vld [vmem:[%s6979_s1 + $0x1158] sm:$0xff]  ;;  %v707_v60 = vld [vmem:[%s6979_s1 + $0x1550] sm:$0xff] }
 0x187   :  { %1927 = vmatprep.subr.mxu0 %v356_v10  ;;  %1998 = vmatprep.subr.mxu1 %v484_v12  ;;  %v1509_v25 = vpop.f32.mrf.mxu0  ;;  %v708_v58 = vld [vmem:[%s6979_s1 + $0x1558] sm:$0xff]  ;;  %v575_v0 = vld [vmem:[%s6979_s1 + $0x1130] sm:$0xff] }
 0x188   :  { %1928 = vmatpush2.msra.mxu0 %v355_v14  ;;  %1999 = vmatpush2.msra.mxu1 %v483_v15  ;;  %v1510_v32 = vadd.f32 %v1509_v25, %v4977_v46  ;;  %v600_v46 = vld [vmem:[%s6979_s1 + $0x11f8] sm:$0xff]  ;;  %v703_v1 = vld [vmem:[%s6979_s1 + $0x1530] sm:$0xff] }
 0x189   :  { %1929 = vmatprep.subr.mxu0 %v352_v17  ;;  %2000 = vmatprep.subr.mxu1 %v480_v18  ;;  %v1580_v34 = vpop.f32.mrf.mxu1  ;;  %v576_v61 = vld [vmem:[%s6979_s1 + $0x1138] sm:$0xff]  ;;  %v571_v5 = vld [vmem:[%s6979_s1 + $0x1110] sm:$0xff] }
 0x18a   :  { %1930 = vmatpush2.msra.mxu0 %v351_v20  ;;  %2001 = vmatpush2.msra.mxu1 %v479_v24  ;;  %v5372_v37 = vadd.f32 %v1580_v34, %v1510_v32  ;;  %v704_v63 = vld [vmem:[%s6979_s1 + $0x1538] sm:$0xff]  ;;  %v699_v6 = vld [vmem:[%s6979_s1 + $0x1510] sm:$0xff] }
 0x18b   :  { %1931 = vmatprep.subr.mxu0 %v348_v27  ;;  %2002 = vmatprep.subr.mxu1 %v476_v28  ;;  %v572_v2 = vld [vmem:[%s6979_s1 + $0x1118] sm:$0xff]  ;;  %v567_v12 = vld [vmem:[%s6979_s1 + $0x10f0] sm:$0xff] }
 0x18c   :  { %1932 = vmatpush2.msra.mxu0 %v347_v33  ;;  %1933 = vmatprep.mubr.f32.mxu0 %v3754_v26  ;;  %v596_v26 = vld [vmem:[%s6979_s1 + $0x11d8] sm:$0xff]  ;;  %v695_v14 = vld [vmem:[%s6979_s1 + $0x14f0] sm:$0xff] }
 0x18d   :  { %2003 = vmatpush2.msra.mxu1 %v475_v35  ;;  %1934 = vmatmul.mubr.f32.vlgmr.msra.gmra.mxu0 %v3723_v16  ;;  %v595_v16 = vld [vmem:[%s6979_s1 + $0x11d0] sm:$0xff]  ;;  %v700_v4 = vld [vmem:[%s6979_s1 + $0x1518] sm:$0xff] }
 0x18e   :  { %2004 = vmatprep.mubr.f32.mxu1 %v3764_v29  ;;  %2011 = vmatprep.subr.mxu0 %v600_v46  ;;  %v723_v29 = vld [vmem:[%s6979_s1 + $0x15d0] sm:$0xff]  ;;  %v568_v9 = vld [vmem:[%s6979_s1 + $0x10f8] sm:$0xff] }
 0x18f   :  { %2082 = vmatprep.subr.mxu1 %v728_v38  ;;  %2005 = vmatmul.mubr.f32.vlgmr.msra.gmra.mxu1 %v3738_v21  ;;  %v591_v21 = vld [vmem:[%s6979_s1 + $0x11b0] sm:$0xff]  ;;  %v696_v10 = vld [vmem:[%s6979_s1 + $0x14f8] sm:$0xff] }
 0x190   :  { %2012 = vmatpush1.msra.mxu0 %v599_v39  ;;  %2083 = vmatpush1.msra.mxu1 %v727_v40  ;;  %v564_v15 = vld [vmem:[%s6979_s1 + $0x10d8] sm:$0xff]  ;;  %v563_v18 = vld [vmem:[%s6979_s1 + $0x10d0] sm:$0xff] }
 0x191   :  { %2013 = vmatprep.subr.mxu0 %v596_v26  ;;  %2084 = vmatprep.subr.mxu1 %v724_v45  ;;  %v692_v17 = vld [vmem:[%s6979_s1 + $0x14d8] sm:$0xff]  ;;  %v691_v20 = vld [vmem:[%s6979_s1 + $0x14d0] sm:$0xff] }
 0x192   :  { %2014 = vmatpush1.msra.mxu0 %v595_v16  ;;  %2085 = vmatpush1.msra.mxu1 %v723_v29  ;;  %v560_v24 = vld [vmem:[%s6979_s1 + $0x10b8] sm:$0xff]  ;;  %v559_v27 = vld [vmem:[%s6979_s1 + $0x10b0] sm:$0xff] }
 0x193   :  { %2015 = vmatprep.subr.mxu0 %v592_v44  ;;  %2086 = vmatprep.subr.mxu1 %v720_v47  ;;  %v688_v25 = vld [vmem:[%s6979_s1 + $0x14b8] sm:$0xff]  ;;  %v687_v28 = vld [vmem:[%s6979_s1 + $0x14b0] sm:$0xff] }
 0x194   :  { %2016 = vmatpush1.msra.mxu0 %v591_v21  ;;  %2087 = vmatpush1.msra.mxu1 %v719_v49  ;;  %v556_v32 = vld [vmem:[%s6979_s1 + $0x1098] sm:$0xff]  ;;  %v555_v34 = vld [vmem:[%s6979_s1 + $0x1090] sm:$0xff] }
 0x195   :  { %2017 = vmatprep.subr.mxu0 %v588_v50  ;;  %2088 = vmatprep.subr.mxu1 %v716_v8  ;;  %v684_v33 = vld [vmem:[%s6979_s1 + $0x1498] sm:$0xff]  ;;  %v683_v35 = vld [vmem:[%s6979_s1 + $0x1490] sm:$0xff] }
 0x196   :  { %2018 = vmatpush1.msra.mxu0 %v587_v51  ;;  %2089 = vmatpush1.msra.mxu1 %v715_v62  ;;  %v552_v46 = vld [vmem:[%s6979_s1 + $0x1078] sm:$0xff]  ;;  %v551_v39 = vld [vmem:[%s6979_s1 + $0x1070] sm:$0xff] }
 0x197   :  { %2019 = vmatprep.subr.mxu0 %v584_v11  ;;  %2090 = vmatprep.subr.mxu1 %v712_v53  ;;  %v680_v38 = vld [vmem:[%s6979_s1 + $0x1478] sm:$0xff]  ;;  %v679_v40 = vld [vmem:[%s6979_s1 + $0x1470] sm:$0xff] }
 0x198   :  { %2020 = vmatpush1.msra.mxu0 %v583_v55  ;;  %2091 = vmatpush1.msra.mxu1 %v711_v3  ;;  %v548_v26 = vld [vmem:[%s6979_s1 + $0x1058] sm:$0xff]  ;;  %v547_v16 = vld [vmem:[%s6979_s1 + $0x1050] sm:$0xff] }
 0x199   :  { %2021 = vmatprep.subr.mxu0 %v580_v56  ;;  %2092 = vmatprep.subr.mxu1 %v708_v58  ;;  %v676_v45 = vld [vmem:[%s6979_s1 + $0x1458] sm:$0xff]  ;;  %v675_v29 = vld [vmem:[%s6979_s1 + $0x1450] sm:$0xff] }
 0x19a   :  { %2022 = vmatpush1.msra.mxu0 %v579_v59  ;;  %2093 = vmatpush1.msra.mxu1 %v707_v60  ;;  %v544_v44 = vld [vmem:[%s6979_s1 + $0x1038] sm:$0xff]  ;;  %v543_v21 = vld [vmem:[%s6979_s1 + $0x1030] sm:$0xff] }
 0x19b   :  { %2023 = vmatprep.subr.mxu0 %v576_v61  ;;  %2094 = vmatprep.subr.mxu1 %v704_v63  ;;  %v672_v47 = vld [vmem:[%s6979_s1 + $0x1438] sm:$0xff]  ;;  %v671_v49 = vld [vmem:[%s6979_s1 + $0x1430] sm:$0xff] }
 0x19c   :  { %2024 = vmatpush1.msra.mxu0 %v575_v0  ;;  %2095 = vmatpush1.msra.mxu1 %v703_v1  ;;  %v540_v50 = vld [vmem:[%s6979_s1 + $0x1018] sm:$0xff]  ;;  %v539_v51 = vld [vmem:[%s6979_s1 + $0x1010] sm:$0xff] }
 0x19d   :  { %2025 = vmatprep.subr.mxu0 %v572_v2  ;;  %2096 = vmatprep.subr.mxu1 %v700_v4  ;;  %v668_v8 = vld [vmem:[%s6979_s1 + $0x1418] sm:$0xff]  ;;  %v667_v62 = vld [vmem:[%s6979_s1 + $0x1410] sm:$0xff] }
 0x19e   :  { %2026 = vmatpush1.msra.mxu0 %v571_v5  ;;  %2097 = vmatpush1.msra.mxu1 %v699_v6  ;;  %v664_v11 = vld [vmem:[%s6979_s1 + $0x13f8] sm:$0xff]  ;;  %v663_v55 = vld [vmem:[%s6979_s1 + $0x13f0] sm:$0xff] }
 0x19f   :  { %2027 = vmatprep.subr.mxu0 %v568_v9  ;;  %2098 = vmatprep.subr.mxu1 %v696_v10  ;;  %v792_v53 = vld [vmem:[%s6979_s1 + $0x17f8] sm:$0xff]  ;;  %v791_v3 = vld [vmem:[%s6979_s1 + $0x17f0] sm:$0xff] }
 0x1a0   :  { %2028 = vmatpush1.msra.mxu0 %v567_v12  ;;  %2099 = vmatpush1.msra.mxu1 %v695_v14  ;;  %v660_v56 = vld [vmem:[%s6979_s1 + $0x13d8] sm:$0xff]  ;;  %v659_v59 = vld [vmem:[%s6979_s1 + $0x13d0] sm:$0xff] }
 0x1a1   :  { %2029 = vmatprep.subr.mxu0 %v564_v15  ;;  %2100 = vmatprep.subr.mxu1 %v692_v17  ;;  %v788_v58 = vld [vmem:[%s6979_s1 + $0x17d8] sm:$0xff]  ;;  %v787_v60 = vld [vmem:[%s6979_s1 + $0x17d0] sm:$0xff] }
 0x1a2   :  { %2030 = vmatpush1.msra.mxu0 %v563_v18  ;;  %2101 = vmatpush1.msra.mxu1 %v691_v20  ;;  %v656_v61 = vld [vmem:[%s6979_s1 + $0x13b8] sm:$0xff]  ;;  %v655_v0 = vld [vmem:[%s6979_s1 + $0x13b0] sm:$0xff] }
 0x1a3   :  { %2031 = vmatprep.subr.mxu0 %v560_v24  ;;  %2102 = vmatprep.subr.mxu1 %v688_v25  ;;  %v784_v63 = vld [vmem:[%s6979_s1 + $0x17b8] sm:$0xff]  ;;  %v783_v1 = vld [vmem:[%s6979_s1 + $0x17b0] sm:$0xff] }
 0x1a4   :  { %2032 = vmatpush1.msra.mxu0 %v559_v27  ;;  %2103 = vmatpush1.msra.mxu1 %v687_v28  ;;  %v652_v2 = vld [vmem:[%s6979_s1 + $0x1398] sm:$0xff]  ;;  %v651_v5 = vld [vmem:[%s6979_s1 + $0x1390] sm:$0xff] }
 0x1a5   :  { %2033 = vmatprep.subr.mxu0 %v556_v32  ;;  %2104 = vmatprep.subr.mxu1 %v684_v33  ;;  %v780_v4 = vld [vmem:[%s6979_s1 + $0x1798] sm:$0xff]  ;;  %v779_v6 = vld [vmem:[%s6979_s1 + $0x1790] sm:$0xff] }
 0x1a6   :  { %2034 = vmatpush1.msra.mxu0 %v555_v34  ;;  %2105 = vmatpush1.msra.mxu1 %v683_v35  ;;  %v648_v9 = vld [vmem:[%s6979_s1 + $0x1378] sm:$0xff]  ;;  %v647_v12 = vld [vmem:[%s6979_s1 + $0x1370] sm:$0xff] }
 0x1a7   :  { %2035 = vmatprep.subr.mxu0 %v552_v46  ;;  %2106 = vmatprep.subr.mxu1 %v680_v38  ;;  %v776_v10 = vld [vmem:[%s6979_s1 + $0x1778] sm:$0xff]  ;;  %v775_v14 = vld [vmem:[%s6979_s1 + $0x1770] sm:$0xff] }
 0x1a8   :  { %2036 = vmatpush1.msra.mxu0 %v551_v39  ;;  %2107 = vmatpush1.msra.mxu1 %v679_v40  ;;  %v644_v15 = vld [vmem:[%s6979_s1 + $0x1358] sm:$0xff]  ;;  %v643_v18 = vld [vmem:[%s6979_s1 + $0x1350] sm:$0xff] }
 0x1a9   :  { %2037 = vmatprep.subr.mxu0 %v548_v26  ;;  %2108 = vmatprep.subr.mxu1 %v676_v45  ;;  %v772_v17 = vld [vmem:[%s6979_s1 + $0x1758] sm:$0xff]  ;;  %v771_v20 = vld [vmem:[%s6979_s1 + $0x1750] sm:$0xff] }
 0x1aa   :  { %2038 = vmatpush1.msra.mxu0 %v547_v16  ;;  %2109 = vmatpush1.msra.mxu1 %v675_v29  ;;  %v640_v24 = vld [vmem:[%s6979_s1 + $0x1338] sm:$0xff]  ;;  %v639_v27 = vld [vmem:[%s6979_s1 + $0x1330] sm:$0xff] }
 0x1ab   :  { %2039 = vmatprep.subr.mxu0 %v544_v44  ;;  %2110 = vmatprep.subr.mxu1 %v672_v47  ;;  %v768_v25 = vld [vmem:[%s6979_s1 + $0x1738] sm:$0xff]  ;;  %v767_v28 = vld [vmem:[%s6979_s1 + $0x1730] sm:$0xff] }
 0x1ac   :  { %2040 = vmatpush1.msra.mxu0 %v543_v21  ;;  %2111 = vmatpush1.msra.mxu1 %v671_v49  ;;  %v636_v32 = vld [vmem:[%s6979_s1 + $0x1318] sm:$0xff]  ;;  %v635_v34 = vld [vmem:[%s6979_s1 + $0x1310] sm:$0xff] }
 0x1ad   :  { %2041 = vmatprep.subr.mxu0 %v540_v50  ;;  %2112 = vmatprep.subr.mxu1 %v668_v8  ;;  %v764_v33 = vld [vmem:[%s6979_s1 + $0x1718] sm:$0xff]  ;;  %v763_v35 = vld [vmem:[%s6979_s1 + $0x1710] sm:$0xff] }
 0x1ae   :  { %2042 = vmatpush1.msra.mxu0 %v539_v51  ;;  %2113 = vmatpush1.msra.mxu1 %v667_v62  ;;  %v632_v46 = vld [vmem:[%s6979_s1 + $0x12f8] sm:$0xff]  ;;  %v631_v39 = vld [vmem:[%s6979_s1 + $0x12f0] sm:$0xff] }
 0x1af   :  { %2043 = vmatprep.subr.mxu0 %v664_v11  ;;  %2114 = vmatprep.subr.mxu1 %v792_v53  ;;  %v760_v38 = vld [vmem:[%s6979_s1 + $0x16f8] sm:$0xff]  ;;  %v759_v40 = vld [vmem:[%s6979_s1 + $0x16f0] sm:$0xff] }
 0x1b0   :  { %2044 = vmatpush2.msra.mxu0 %v663_v55  ;;  %2115 = vmatpush2.msra.mxu1 %v791_v3  ;;  %v628_v26 = vld [vmem:[%s6979_s1 + $0x12d8] sm:$0xff]  ;;  %v627_v16 = vld [vmem:[%s6979_s1 + $0x12d0] sm:$0xff] }
 0x1b1   :  { %2045 = vmatprep.subr.mxu0 %v660_v56  ;;  %2116 = vmatprep.subr.mxu1 %v788_v58  ;;  %v756_v45 = vld [vmem:[%s6979_s1 + $0x16d8] sm:$0xff]  ;;  %v755_v29 = vld [vmem:[%s6979_s1 + $0x16d0] sm:$0xff] }
 0x1b2   :  { %2046 = vmatpush2.msra.mxu0 %v659_v59  ;;  %2117 = vmatpush2.msra.mxu1 %v787_v60  ;;  %v624_v44 = vld [vmem:[%s6979_s1 + $0x12b8] sm:$0xff]  ;;  %v623_v21 = vld [vmem:[%s6979_s1 + $0x12b0] sm:$0xff]  ;;  %v5732_v59 = vpop.f32.mrf.mxu0 }
 0x1b3   :  { %2047 = vmatprep.subr.mxu0 %v656_v61  ;;  %2118 = vmatprep.subr.mxu1 %v784_v63  ;;  %v752_v47 = vld [vmem:[%s6979_s1 + $0x16b8] sm:$0xff]  ;;  %v751_v49 = vld [vmem:[%s6979_s1 + $0x16b0] sm:$0xff] }
 0x1b4   :  { %2048 = vmatpush2.msra.mxu0 %v655_v0  ;;  %2119 = vmatpush2.msra.mxu1 %v783_v1  ;;  %v620_v50 = vld [vmem:[%s6979_s1 + $0x1298] sm:$0xff]  ;;  %v619_v51 = vld [vmem:[%s6979_s1 + $0x1290] sm:$0xff]  ;;  %v5746_v1 = vpop.f32.mrf.mxu1 }
 0x1b5   :  { %2049 = vmatprep.subr.mxu0 %v652_v2  ;;  %2120 = vmatprep.subr.mxu1 %v780_v4  ;;  %v748_v8 = vld [vmem:[%s6979_s1 + $0x1698] sm:$0xff]  ;;  %v747_v62 = vld [vmem:[%s6979_s1 + $0x1690] sm:$0xff] }
 0x1b6   :  { %2050 = vmatpush2.msra.mxu0 %v651_v5  ;;  %2121 = vmatpush2.msra.mxu1 %v779_v6  ;;  %v616_v11 = vld [vmem:[%s6979_s1 + $0x1278] sm:$0xff]  ;;  %v615_v55 = vld [vmem:[%s6979_s1 + $0x1270] sm:$0xff] }
 0x1b7   :  { %2051 = vmatprep.subr.mxu0 %v648_v9  ;;  %2122 = vmatprep.subr.mxu1 %v776_v10  ;;  %v744_v53 = vld [vmem:[%s6979_s1 + $0x1678] sm:$0xff]  ;;  %v743_v3 = vld [vmem:[%s6979_s1 + $0x1670] sm:$0xff] }
 0x1b8   :  { %2052 = vmatpush2.msra.mxu0 %v647_v12  ;;  %2123 = vmatpush2.msra.mxu1 %v775_v14  ;;  %v612_v56 = vld [vmem:[%s6979_s1 + $0x1258] sm:$0xff]  ;;  %v611_v60 = vld [vmem:[%s6979_s1 + $0x1250] sm:$0xff] }
 0x1b9   :  { %2053 = vmatprep.subr.mxu0 %v644_v15  ;;  %2124 = vmatprep.subr.mxu1 %v772_v17  ;;  %v740_v58 = vld [vmem:[%s6979_s1 + $0x1658] sm:$0xff]  ;;  %v739_v61 = vld [vmem:[%s6979_s1 + $0x1650] sm:$0xff] }
 0x1ba   :  { %2054 = vmatpush2.msra.mxu0 %v643_v18  ;;  %2125 = vmatpush2.msra.mxu1 %v771_v20  ;;  %v608_v63 = vld [vmem:[%s6979_s1 + $0x1238] sm:$0xff]  ;;  %v607_v2 = vld [vmem:[%s6979_s1 + $0x1230] sm:$0xff] }
 0x1bb   :  { %2055 = vmatprep.subr.mxu0 %v640_v24  ;;  %2126 = vmatprep.subr.mxu1 %v768_v25  ;;  %v736_v0 = vld [vmem:[%s6979_s1 + $0x1638] sm:$0xff]  ;;  %v735_v4 = vld [vmem:[%s6979_s1 + $0x1630] sm:$0xff] }
 0x1bc   :  { %2056 = vmatpush2.msra.mxu0 %v639_v27  ;;  %2127 = vmatpush2.msra.mxu1 %v767_v28  ;;  %v604_v6 = vld [vmem:[%s6979_s1 + $0x1218] sm:$0xff]  ;;  %v603_v12 = vld [vmem:[%s6979_s1 + $0x1210] sm:$0xff] }
 0x1bd   :  { %2057 = vmatprep.subr.mxu0 %v636_v32  ;;  %2128 = vmatprep.subr.mxu1 %v764_v33  ;;  %v732_v9 = vld [vmem:[%s6979_s1 + $0x1618] sm:$0xff]  ;;  %v731_v15 = vld [vmem:[%s6979_s1 + $0x1610] sm:$0xff] }
 0x1be   :  { %2058 = vmatpush2.msra.mxu0 %v635_v34  ;;  %2129 = vmatpush2.msra.mxu1 %v763_v35  ;;  %v984_v18 = vld [vmem:[%s6979_s1 + $0x1df8] sm:$0xff]  ;;  %v855_v20 = vld [vmem:[%s6979_s1 + $0x19f0] sm:$0xff] }
 0x1bf   :  { %2059 = vmatprep.subr.mxu0 %v632_v46  ;;  %2130 = vmatprep.subr.mxu1 %v760_v38  ;;  %v983_v24 = vld [vmem:[%s6979_s1 + $0x1df0] sm:$0xff]  ;;  %v980_v25 = vld [vmem:[%s6979_s1 + $0x1dd8] sm:$0xff] }
 0x1c0   :  { %2060 = vmatpush2.msra.mxu0 %v631_v39  ;;  %2131 = vmatpush2.msra.mxu1 %v759_v40  ;;  %v848_v27 = vld [vmem:[%s6979_s1 + $0x19b8] sm:$0xff]  ;;  %v975_v32 = vld [vmem:[%s6979_s1 + $0x1db0] sm:$0xff] }
 0x1c1   :  { %2061 = vmatprep.subr.mxu0 %v628_v26  ;;  %2132 = vmatprep.subr.mxu1 %v756_v45  ;;  %v976_v28 = vld [vmem:[%s6979_s1 + $0x1db8] sm:$0xff]  ;;  %v843_v35 = vld [vmem:[%s6979_s1 + $0x1990] sm:$0xff] }
 0x1c2   :  { %2062 = vmatpush2.msra.mxu0 %v627_v16  ;;  %2133 = vmatpush2.msra.mxu1 %v755_v29  ;;  %v844_v33 = vld [vmem:[%s6979_s1 + $0x1998] sm:$0xff]  ;;  %v971_v46 = vld [vmem:[%s6979_s1 + $0x1d90] sm:$0xff] }
 0x1c3   :  { %2063 = vmatprep.subr.mxu0 %v624_v44  ;;  %2134 = vmatprep.subr.mxu1 %v752_v47  ;;  %v972_v34 = vld [vmem:[%s6979_s1 + $0x1d98] sm:$0xff]  ;;  %v839_v40 = vld [vmem:[%s6979_s1 + $0x1970] sm:$0xff] }
 0x1c4   :  { %2064 = vmatpush2.msra.mxu0 %v623_v21  ;;  %2135 = vmatpush2.msra.mxu1 %v751_v49  ;;  %v840_v38 = vld [vmem:[%s6979_s1 + $0x1978] sm:$0xff]  ;;  %v967_v26 = vld [vmem:[%s6979_s1 + $0x1d70] sm:$0xff] }
 0x1c5   :  { %2065 = vmatprep.subr.mxu0 %v620_v50  ;;  %2136 = vmatprep.subr.mxu1 %v748_v8  ;;  %v968_v39 = vld [vmem:[%s6979_s1 + $0x1d78] sm:$0xff]  ;;  %v835_v29 = vld [vmem:[%s6979_s1 + $0x1950] sm:$0xff] }
 0x1c6   :  { %2066 = vmatpush2.msra.mxu0 %v619_v51  ;;  %2137 = vmatpush2.msra.mxu1 %v747_v62  ;;  %v836_v45 = vld [vmem:[%s6979_s1 + $0x1958] sm:$0xff]  ;;  %v963_v44 = vld [vmem:[%s6979_s1 + $0x1d50] sm:$0xff] }
 0x1c7   :  { %2067 = vmatprep.subr.mxu0 %v616_v11  ;;  %2138 = vmatprep.subr.mxu1 %v744_v53  ;;  %v964_v16 = vld [vmem:[%s6979_s1 + $0x1d58] sm:$0xff]  ;;  %v831_v49 = vld [vmem:[%s6979_s1 + $0x1930] sm:$0xff] }
 0x1c8   :  { %2068 = vmatpush2.msra.mxu0 %v615_v55  ;;  %2139 = vmatpush2.msra.mxu1 %v743_v3  ;;  %v832_v47 = vld [vmem:[%s6979_s1 + $0x1938] sm:$0xff]  ;;  %v959_v50 = vld [vmem:[%s6979_s1 + $0x1d30] sm:$0xff] }
 0x1c9   :  { %2069 = vmatprep.subr.mxu0 %v612_v56  ;;  %2140 = vmatprep.subr.mxu1 %v740_v58  ;;  %v1651_v5 = vpop.f32.mrf.mxu0  ;;  %v960_v21 = vld [vmem:[%s6979_s1 + $0x1d38] sm:$0xff]  ;;  %v827_v62 = vld [vmem:[%s6979_s1 + $0x1910] sm:$0xff] }
 0x1ca   :  { %2070 = vmatpush2.msra.mxu0 %v611_v60  ;;  %2141 = vmatpush2.msra.mxu1 %v739_v61  ;;  %v1652_v10 = vadd.f32 %v1651_v5, %v5372_v37  ;;  %v856_v37 = vld [vmem:[%s6979_s1 + $0x19f8] sm:$0xff]  ;;  %v955_v11 = vld [vmem:[%s6979_s1 + $0x1d10] sm:$0xff] }
 0x1cb   :  { %2071 = vmatprep.subr.mxu0 %v608_v63  ;;  %2142 = vmatprep.subr.mxu1 %v736_v0  ;;  %v1722_v14 = vpop.f32.mrf.mxu1  ;;  %v828_v8 = vld [vmem:[%s6979_s1 + $0x1918] sm:$0xff]  ;;  %v823_v3 = vld [vmem:[%s6979_s1 + $0x18f0] sm:$0xff] }
 0x1cc   :  { %2072 = vmatpush2.msra.mxu0 %v607_v2  ;;  %2143 = vmatpush2.msra.mxu1 %v735_v4  ;;  %v5767_v17 = vadd.f32 %v1722_v14, %v1652_v10  ;;  %v956_v51 = vld [vmem:[%s6979_s1 + $0x1d18] sm:$0xff]  ;;  %v951_v56 = vld [vmem:[%s6979_s1 + $0x1cf0] sm:$0xff] }
 0x1cd   :  { %2073 = vmatprep.subr.mxu0 %v604_v6  ;;  %2144 = vmatprep.subr.mxu1 %v732_v9  ;;  %v824_v53 = vld [vmem:[%s6979_s1 + $0x18f8] sm:$0xff]  ;;  %v819_v61 = vld [vmem:[%s6979_s1 + $0x18d0] sm:$0xff] }
 0x1ce   :  { %2074 = vmatpush2.msra.mxu0 %v603_v12  ;;  %2075 = vmatprep.mubr.f32.mxu0 %v4159_v54  ;;  %v852_v54 = vld [vmem:[%s6979_s1 + $0x19d8] sm:$0xff]  ;;  %v947_v63 = vld [vmem:[%s6979_s1 + $0x1cd0] sm:$0xff] }
 0x1cf   :  { %2145 = vmatpush2.msra.mxu1 %v731_v15  ;;  %2076 = vmatmul.mubr.f32.vlgmr.msra.gmra.mxu0 %v4128_v43  ;;  %v851_v43 = vld [vmem:[%s6979_s1 + $0x19d0] sm:$0xff]  ;;  %v952_v55 = vld [vmem:[%s6979_s1 + $0x1cf8] sm:$0xff] }
 0x1d0   :  { %2146 = vmatprep.mubr.f32.mxu1 %v4169_v57  ;;  %2153 = vmatprep.subr.mxu0 %v856_v37  ;;  %v979_v57 = vld [vmem:[%s6979_s1 + $0x1dd0] sm:$0xff]  ;;  %v820_v58 = vld [vmem:[%s6979_s1 + $0x18d8] sm:$0xff] }
 0x1d1   :  { %2224 = vmatprep.subr.mxu1 %v984_v18  ;;  %2147 = vmatmul.mubr.f32.vlgmr.msra.gmra.mxu1 %v4143_v48  ;;  %v847_v48 = vld [vmem:[%s6979_s1 + $0x19b0] sm:$0xff]  ;;  %v948_v60 = vld [vmem:[%s6979_s1 + $0x1cd8] sm:$0xff] }
 0x1d2   :  { %2154 = vmatpush1.msra.mxu0 %v855_v20  ;;  %2225 = vmatpush1.msra.mxu1 %v983_v24  ;;  %v816_v0 = vld [vmem:[%s6979_s1 + $0x18b8] sm:$0xff]  ;;  %v815_v4 = vld [vmem:[%s6979_s1 + $0x18b0] sm:$0xff] }
 0x1d3   :  { %2155 = vmatprep.subr.mxu0 %v852_v54  ;;  %2226 = vmatprep.subr.mxu1 %v980_v25  ;;  %v944_v2 = vld [vmem:[%s6979_s1 + $0x1cb8] sm:$0xff]  ;;  %v943_v5 = vld [vmem:[%s6979_s1 + $0x1cb0] sm:$0xff] }
 0x1d4   :  { %2156 = vmatpush1.msra.mxu0 %v851_v43  ;;  %2227 = vmatpush1.msra.mxu1 %v979_v57  ;;  %v812_v6 = vld [vmem:[%s6979_s1 + $0x1898] sm:$0xff]  ;;  %v811_v10 = vld [vmem:[%s6979_s1 + $0x1890] sm:$0xff] }
 0x1d5   :  { %2157 = vmatprep.subr.mxu0 %v848_v27  ;;  %2228 = vmatprep.subr.mxu1 %v976_v28  ;;  %v940_v9 = vld [vmem:[%s6979_s1 + $0x1c98] sm:$0xff]  ;;  %v939_v12 = vld [vmem:[%s6979_s1 + $0x1c90] sm:$0xff] }
 0x1d6   :  { %2158 = vmatpush1.msra.mxu0 %v847_v48  ;;  %2229 = vmatpush1.msra.mxu1 %v975_v32  ;;  %v808_v14 = vld [vmem:[%s6979_s1 + $0x1878] sm:$0xff]  ;;  %v807_v37 = vld [vmem:[%s6979_s1 + $0x1870] sm:$0xff] }
 0x1d7   :  { %2159 = vmatprep.subr.mxu0 %v844_v33  ;;  %2230 = vmatprep.subr.mxu1 %v972_v34  ;;  %v936_v15 = vld [vmem:[%s6979_s1 + $0x1c78] sm:$0xff]  ;;  %v935_v18 = vld [vmem:[%s6979_s1 + $0x1c70] sm:$0xff] }
 0x1d8   :  { %2160 = vmatpush1.msra.mxu0 %v843_v35  ;;  %2231 = vmatpush1.msra.mxu1 %v971_v46  ;;  %v804_v20 = vld [vmem:[%s6979_s1 + $0x1858] sm:$0xff]  ;;  %v803_v54 = vld [vmem:[%s6979_s1 + $0x1850] sm:$0xff] }
 0x1d9   :  { %2161 = vmatprep.subr.mxu0 %v840_v38  ;;  %2232 = vmatprep.subr.mxu1 %v968_v39  ;;  %v932_v24 = vld [vmem:[%s6979_s1 + $0x1c58] sm:$0xff]  ;;  %v931_v25 = vld [vmem:[%s6979_s1 + $0x1c50] sm:$0xff] }
 0x1da   :  { %2162 = vmatpush1.msra.mxu0 %v839_v40  ;;  %2233 = vmatpush1.msra.mxu1 %v967_v26  ;;  %v800_v43 = vld [vmem:[%s6979_s1 + $0x1838] sm:$0xff]  ;;  %v799_v27 = vld [vmem:[%s6979_s1 + $0x1830] sm:$0xff] }
 0x1db   :  { %2163 = vmatprep.subr.mxu0 %v836_v45  ;;  %2234 = vmatprep.subr.mxu1 %v964_v16  ;;  %v928_v57 = vld [vmem:[%s6979_s1 + $0x1c38] sm:$0xff]  ;;  %v927_v28 = vld [vmem:[%s6979_s1 + $0x1c30] sm:$0xff] }
 0x1dc   :  { %2164 = vmatpush1.msra.mxu0 %v835_v29  ;;  %2235 = vmatpush1.msra.mxu1 %v963_v44  ;;  %v796_v48 = vld [vmem:[%s6979_s1 + $0x1818] sm:$0xff]  ;;  %v795_v33 = vld [vmem:[%s6979_s1 + $0x1810] sm:$0xff] }
 0x1dd   :  { %2165 = vmatprep.subr.mxu0 %v832_v47  ;;  %2236 = vmatprep.subr.mxu1 %v960_v21  ;;  %v924_v32 = vld [vmem:[%s6979_s1 + $0x1c18] sm:$0xff]  ;;  %v923_v34 = vld [vmem:[%s6979_s1 + $0x1c10] sm:$0xff]  ;;  %v1057_v47 = vsub.s32 1, %v3261_v41 }
 0x1de   :  { %2166 = vmatpush1.msra.mxu0 %v831_v49  ;;  %2237 = vmatpush1.msra.mxu1 %v959_v50  ;;  %v920_v35 = vld [vmem:[%s6979_s1 + $0x1bf8] sm:$0xff]  ;;  %v919_v38 = vld [vmem:[%s6979_s1 + $0x1bf0] sm:$0xff] }
 0x1df   :  { %2167 = vmatprep.subr.mxu0 %v828_v8  ;;  %2238 = vmatprep.subr.mxu1 %v956_v51  ;;  %v1048_v46 = vld [vmem:[%s6979_s1 + $0x1ff8] sm:$0xff]  ;;  %v1047_v39 = vld [vmem:[%s6979_s1 + $0x1ff0] sm:$0xff] }
 0x1e0   :  { %2168 = vmatpush1.msra.mxu0 %v827_v62  ;;  %2239 = vmatpush1.msra.mxu1 %v955_v11  ;;  %v916_v40 = vld [vmem:[%s6979_s1 + $0x1bd8] sm:$0xff]  ;;  %v915_v45 = vld [vmem:[%s6979_s1 + $0x1bd0] sm:$0xff] }
 0x1e1   :  { %2169 = vmatprep.subr.mxu0 %v824_v53  ;;  %2240 = vmatprep.subr.mxu1 %v952_v55  ;;  %v1044_v26 = vld [vmem:[%s6979_s1 + $0x1fd8] sm:$0xff]  ;;  %v1043_v16 = vld [vmem:[%s6979_s1 + $0x1fd0] sm:$0xff]  ;;  %v6023_v55 = vld [vmem:[%s6980_s2] sm:$0xf] }
 0x1e2   :  { %2170 = vmatpush1.msra.mxu0 %v823_v3  ;;  %2241 = vmatpush1.msra.mxu1 %v951_v56  ;;  %v912_v29 = vld [vmem:[%s6979_s1 + $0x1bb8] sm:$0xff]  ;;  %v911_v21 = vld [vmem:[%s6979_s1 + $0x1bb0] sm:$0xff]  ;;  %v1058_v3 = vrot.slane %v6023_v55, %v1057_v47 }
 0x1e3   :  { %2171 = vmatprep.subr.mxu0 %v820_v58  ;;  %2242 = vmatprep.subr.mxu1 %v948_v60  ;;  %v1040_v44 = vld [vmem:[%s6979_s1 + $0x1fb8] sm:$0xff]  ;;  %v1039_v49 = vld [vmem:[%s6979_s1 + $0x1fb0] sm:$0xff] }
 0x1e4   :  { %2172 = vmatpush1.msra.mxu0 %v819_v61  ;;  %2243 = vmatpush1.msra.mxu1 %v947_v63  ;;  %v908_v50 = vld [vmem:[%s6979_s1 + $0x1b98] sm:$0xff]  ;;  %v907_v51 = vld [vmem:[%s6979_s1 + $0x1b90] sm:$0xff] }
 0x1e5   :  { %2173 = vmatprep.subr.mxu0 %v816_v0  ;;  %2244 = vmatprep.subr.mxu1 %v944_v2  ;;  %v1036_v8 = vld [vmem:[%s6979_s1 + $0x1f98] sm:$0xff]  ;;  %v1035_v62 = vld [vmem:[%s6979_s1 + $0x1f90] sm:$0xff] }
 0x1e6   :  { %2174 = vmatpush1.msra.mxu0 %v815_v4  ;;  %2245 = vmatpush1.msra.mxu1 %v943_v5  ;;  %v904_v11 = vld [vmem:[%s6979_s1 + $0x1b78] sm:$0xff]  ;;  %v903_v56 = vld [vmem:[%s6979_s1 + $0x1b70] sm:$0xff]  ;;  %v1228_v5 = vadd.f32 %v4942_v23, %v1058_v3  ;;  %v1724_v3 = vpop.f32.mrf.mxu1 }
 0x1e7   :  { %2175 = vmatprep.subr.mxu0 %v812_v6  ;;  %2246 = vmatprep.subr.mxu1 %v940_v9  ;;  %v1032_v53 = vld [vmem:[%s6979_s1 + $0x1f78] sm:$0xff]  ;;  %v1031_v58 = vld [vmem:[%s6979_s1 + $0x1f70] sm:$0xff] }
 0x1e8   :  { %2176 = vmatpush1.msra.mxu0 %v811_v10  ;;  %2247 = vmatpush1.msra.mxu1 %v939_v12  ;;  %v900_v60 = vld [vmem:[%s6979_s1 + $0x1b58] sm:$0xff]  ;;  %v899_v63 = vld [vmem:[%s6979_s1 + $0x1b50] sm:$0xff] }
 0x1e9   :  { %2177 = vmatprep.subr.mxu0 %v808_v14  ;;  %2248 = vmatprep.subr.mxu1 %v936_v15  ;;  %v1028_v61 = vld [vmem:[%s6979_s1 + $0x1f58] sm:$0xff]  ;;  %v1027_v0 = vld [vmem:[%s6979_s1 + $0x1f50] sm:$0xff] }
 0x1ea   :  { %2178 = vmatpush1.msra.mxu0 %v807_v37  ;;  %2249 = vmatpush1.msra.mxu1 %v935_v18  ;;  %v896_v2 = vld [vmem:[%s6979_s1 + $0x1b38] sm:$0xff]  ;;  %v895_v6 = vld [vmem:[%s6979_s1 + $0x1b30] sm:$0xff]  ;;  %v1299_v18 = vadd.f32 %v4956_v31, %v1228_v5  ;;  %v2344_v5 = vld [vmem:[%s6981_s3 + $0x188] sm:$0xff] }
 0x1eb   :  { %2179 = vmatprep.subr.mxu0 %v804_v20  ;;  %2250 = vmatprep.subr.mxu1 %v932_v24  ;;  %v1024_v4 = vld [vmem:[%s6979_s1 + $0x1f38] sm:$0xff]  ;;  %v1023_v9 = vld [vmem:[%s6979_s1 + $0x1f30] sm:$0xff] }
 0x1ec   :  { %2180 = vmatpush1.msra.mxu0 %v803_v54  ;;  %2251 = vmatpush1.msra.mxu1 %v931_v25  ;;  %v892_v10 = vld [vmem:[%s6979_s1 + $0x1b18] sm:$0xff]  ;;  %v891_v12 = vld [vmem:[%s6979_s1 + $0x1b10] sm:$0xff]  ;;  %v1370_v25 = vadd.f32 %v5337_v13, %v1299_v18  ;;  %v2468_v18 = vld [vmem:[%s6981_s3 + $0x568] sm:$0xff] }
 0x1ed   :  { %2181 = vmatprep.subr.mxu0 %v800_v43  ;;  %2252 = vmatprep.subr.mxu1 %v928_v57  ;;  %v1020_v23 = vld [vmem:[%s6979_s1 + $0x1f18] sm:$0xff]  ;;  %v1019_v14 = vld [vmem:[%s6979_s1 + $0x1f10] sm:$0xff] }
 0x1ee   :  { %2182 = vmatpush1.msra.mxu0 %v799_v27  ;;  %2253 = vmatpush1.msra.mxu1 %v927_v28  ;;  %v888_v15 = vld [vmem:[%s6979_s1 + $0x1af8] sm:$0xff]  ;;  %v887_v20 = vld [vmem:[%s6979_s1 + $0x1af0] sm:$0xff] }
 0x1ef   :  { %2183 = vmatprep.subr.mxu0 %v796_v48  ;;  %2254 = vmatprep.subr.mxu1 %v924_v32  ;;  %v1016_v37 = vld [vmem:[%s6979_s1 + $0x1ef8] sm:$0xff]  ;;  %v1015_v24 = vld [vmem:[%s6979_s1 + $0x1ef0] sm:$0xff] }
 0x1f0   :  { %2184 = vmatpush1.msra.mxu0 %v795_v33  ;;  %2255 = vmatpush1.msra.mxu1 %v923_v34  ;;  %v884_v54 = vld [vmem:[%s6979_s1 + $0x1ad8] sm:$0xff]  ;;  %v883_v43 = vld [vmem:[%s6979_s1 + $0x1ad0] sm:$0xff]  ;;  %v1441_v34 = vadd.f32 %v5351_v19, %v1370_v25  ;;  %v2331_v25 = vld [vmem:[%s6981_s3 + $0x120] sm:$0xff] }
 0x1f1   :  { %2185 = vmatprep.subr.mxu0 %v920_v35  ;;  %2256 = vmatprep.subr.mxu1 %v1048_v46  ;;  %v1012_v31 = vld [vmem:[%s6979_s1 + $0x1ed8] sm:$0xff]  ;;  %v1011_v57 = vld [vmem:[%s6979_s1 + $0x1ed0] sm:$0xff] }
 0x1f2   :  { %2186 = vmatpush2.msra.mxu0 %v919_v38  ;;  %2257 = vmatpush2.msra.mxu1 %v1047_v39  ;;  %v880_v27 = vld [vmem:[%s6979_s1 + $0x1ab8] sm:$0xff]  ;;  %v879_v28 = vld [vmem:[%s6979_s1 + $0x1ab0] sm:$0xff]  ;;  %v1512_v39 = vadd.f32 %v5732_v59, %v1441_v34  ;;  %v2455_v34 = vld [vmem:[%s6981_s3 + $0x500] sm:$0xff] }
 0x1f3   :  { %2187 = vmatprep.subr.mxu0 %v916_v40  ;;  %2258 = vmatprep.subr.mxu1 %v1044_v26  ;;  %v1008_v13 = vld [vmem:[%s6979_s1 + $0x1eb8] sm:$0xff]  ;;  %v1007_v48 = vld [vmem:[%s6979_s1 + $0x1eb0] sm:$0xff] }
 0x1f4   :  { %2188 = vmatpush2.msra.mxu0 %v915_v45  ;;  %2259 = vmatpush2.msra.mxu1 %v1043_v16  ;;  %v876_v32 = vld [vmem:[%s6979_s1 + $0x1a98] sm:$0xff]  ;;  %v875_v35 = vld [vmem:[%s6979_s1 + $0x1a90] sm:$0xff] }
 0x1f5   :  { %2189 = vmatprep.subr.mxu0 %v912_v29  ;;  %2260 = vmatprep.subr.mxu1 %v1040_v44  ;;  %v1004_v33 = vld [vmem:[%s6979_s1 + $0x1e98] sm:$0xff]  ;;  %v1003_v46 = vld [vmem:[%s6979_s1 + $0x1e90] sm:$0xff]  ;;  %v1653_v44 = vpop.f32.mrf.mxu0 }
 0x1f6   :  { %2190 = vmatpush2.msra.mxu0 %v911_v21  ;;  %2261 = vmatpush2.msra.mxu1 %v1039_v49  ;;  %v872_v38 = vld [vmem:[%s6979_s1 + $0x1a78] sm:$0xff]  ;;  %v871_v40 = vld [vmem:[%s6979_s1 + $0x1a70] sm:$0xff] }
 0x1f7   :  { %2191 = vmatprep.subr.mxu0 %v908_v50  ;;  %2262 = vmatprep.subr.mxu1 %v1036_v8  ;;  %v1000_v19 = vld [vmem:[%s6979_s1 + $0x1e78] sm:$0xff]  ;;  %v999_v26 = vld [vmem:[%s6979_s1 + $0x1e70] sm:$0xff]  ;;  %v1583_v50 = vadd.f32 %v5746_v1, %v1512_v39  ;;  %v2316_v39 = vld [vmem:[%s6981_s3 + $0xa8] sm:$0xff] }
 0x1f8   :  { %2192 = vmatpush2.msra.mxu0 %v907_v51  ;;  %2263 = vmatpush2.msra.mxu1 %v1035_v62  ;;  %v868_v45 = vld [vmem:[%s6979_s1 + $0x1a58] sm:$0xff]  ;;  %v867_v16 = vld [vmem:[%s6979_s1 + $0x1a50] sm:$0xff] }
 0x1f9   :  { %2193 = vmatprep.subr.mxu0 %v904_v11  ;;  %2264 = vmatprep.subr.mxu1 %v1032_v53  ;;  %v996_v59 = vld [vmem:[%s6979_s1 + $0x1e58] sm:$0xff]  ;;  %v995_v29 = vld [vmem:[%s6979_s1 + $0x1e50] sm:$0xff]  ;;  %v1654_v11 = vadd.f32 %v1653_v44, %v1583_v50  ;;  %v2443_v44 = vld [vmem:[%s6981_s3 + $0x4a0] sm:$0xff] }
 0x1fa   :  { %2194 = vmatpush2.msra.mxu0 %v903_v56  ;;  %2265 = vmatpush2.msra.mxu1 %v1031_v58  ;;  %v864_v21 = vld [vmem:[%s6979_s1 + $0x1a38] sm:$0xff]  ;;  %v863_v8 = vld [vmem:[%s6979_s1 + $0x1a30] sm:$0xff]  ;;  %v2356_v58 = vld [vmem:[%s6981_s3 + $0x1e8] sm:$0xff] }
 0x1fb   :  { %2195 = vmatprep.subr.mxu0 %v900_v60  ;;  %2266 = vmatprep.subr.mxu1 %v1028_v61  ;;  %v992_v49 = vld [vmem:[%s6979_s1 + $0x1e38] sm:$0xff]  ;;  %v991_v51 = vld [vmem:[%s6979_s1 + $0x1e30] sm:$0xff]  ;;  %v6176_v60 = vadd.f32 %v1724_v3, %v1654_v11  ;;  %v2355_v61 = vld [vmem:[%s6981_s3 + $0x1e0] sm:$0xff] }
 0x1fc   :  { %2196 = vmatpush2.msra.mxu0 %v899_v63  ;;  %2267 = vmatpush2.msra.mxu1 %v1027_v0  ;;  %v860_v62 = vld [vmem:[%s6979_s1 + $0x1a18] sm:$0xff]  ;;  %v859_v53 = vld [vmem:[%s6979_s1 + $0x1a10] sm:$0xff]  ;;  %v2351_v63 = vld [vmem:[%s6981_s3 + $0x1c0] sm:$0xff] }
 0x1fd   :  { %2197 = vmatprep.subr.mxu0 %v896_v2  ;;  %2268 = vmatprep.subr.mxu1 %v1024_v4  ;;  %v988_v1 = vld [vmem:[%s6979_s1 + $0x1e18] sm:$0xff]  ;;  %v987_v56 = vld [vmem:[%s6979_s1 + $0x1e10] sm:$0xff]  ;;  %v2480_v0 = vld [vmem:[%s6981_s3 + $0x5c8] sm:$0xff] }
 0x1fe   :  { %2198 = vmatpush2.msra.mxu0 %v895_v6  ;;  %2269 = vmatpush2.msra.mxu1 %v1023_v9  ;;  %v2347_v2 = vld [vmem:[%s6981_s3 + $0x1a0] sm:$0xff]  ;;  %v2476_v6 = vld [vmem:[%s6981_s3 + $0x5a8] sm:$0xff] }
 0x1ff   :  { %2199 = vmatprep.subr.mxu0 %v892_v10  ;;  %2270 = vmatprep.subr.mxu1 %v1020_v23  ;;  %v2479_v4 = vld [vmem:[%s6981_s3 + $0x5c0] sm:$0xff]  ;;  %v2340_v23 = vld [vmem:[%s6981_s3 + $0x168] sm:$0xff] }
 0x200   :  { %2200 = vmatpush2.msra.mxu0 %v891_v12  ;;  %2271 = vmatpush2.msra.mxu1 %v1019_v14  ;;  %v2343_v9 = vld [vmem:[%s6981_s3 + $0x180] sm:$0xff]  ;;  %v2472_v12 = vld [vmem:[%s6981_s3 + $0x588] sm:$0xff] }
 0x201   :  { %2201 = vmatprep.subr.mxu0 %v888_v15  ;;  %2272 = vmatprep.subr.mxu1 %v1016_v37  ;;  %v2475_v10 = vld [vmem:[%s6981_s3 + $0x5a0] sm:$0xff]  ;;  %v2336_v37 = vld [vmem:[%s6981_s3 + $0x148] sm:$0xff] }
 0x202   :  { %2202 = vmatpush2.msra.mxu0 %v887_v20  ;;  %2273 = vmatpush2.msra.mxu1 %v1015_v24  ;;  %v2339_v14 = vld [vmem:[%s6981_s3 + $0x160] sm:$0xff]  ;;  %v2432_v3 = vld [vmem:[%s6981_s3 + $0x448] sm:$0xff] }
 0x203   :  { %2203 = vmatprep.subr.mxu0 %v884_v54  ;;  %2274 = vmatprep.subr.mxu1 %v1012_v31  ;;  %v2471_v15 = vld [vmem:[%s6981_s3 + $0x580] sm:$0xff]  ;;  %v2332_v54 = vld [vmem:[%s6981_s3 + $0x128] sm:$0xff] }
 0x204   :  { %2204 = vmatpush2.msra.mxu0 %v883_v43  ;;  %2275 = vmatpush2.msra.mxu1 %v1011_v57  ;;  %v2335_v20 = vld [vmem:[%s6981_s3 + $0x140] sm:$0xff]  ;;  %v2464_v31 = vld [vmem:[%s6981_s3 + $0x548] sm:$0xff] }
 0x205   :  { %2205 = vmatprep.subr.mxu0 %v880_v27  ;;  %2276 = vmatprep.subr.mxu1 %v1008_v13  ;;  %v2467_v24 = vld [vmem:[%s6981_s3 + $0x560] sm:$0xff]  ;;  %v2328_v57 = vld [vmem:[%s6981_s3 + $0x108] sm:$0xff] }
 0x206   :  { %2206 = vmatpush2.msra.mxu0 %v879_v28  ;;  %2277 = vmatpush2.msra.mxu1 %v1007_v48  ;;  %v2463_v43 = vld [vmem:[%s6981_s3 + $0x540] sm:$0xff]  ;;  %v2460_v27 = vld [vmem:[%s6981_s3 + $0x528] sm:$0xff] }
 0x207   :  { %2207 = vmatprep.subr.mxu0 %v876_v32  ;;  %2278 = vmatprep.subr.mxu1 %v1004_v33  ;;  %v2327_v13 = vld [vmem:[%s6981_s3 + $0x100] sm:$0xff]  ;;  %v2324_v48 = vld [vmem:[%s6981_s3 + $0xe8] sm:$0xff] }
 0x208   :  { %2208 = vmatpush2.msra.mxu0 %v875_v35  ;;  %2279 = vmatpush2.msra.mxu1 %v1003_v46  ;;  %v2459_v28 = vld [vmem:[%s6981_s3 + $0x520] sm:$0xff]  ;;  %v2456_v32 = vld [vmem:[%s6981_s3 + $0x508] sm:$0xff] }
 0x209   :  { %2209 = vmatprep.subr.mxu0 %v872_v38  ;;  %2280 = vmatprep.subr.mxu1 %v1000_v19  ;;  %v2323_v33 = vld [vmem:[%s6981_s3 + $0xe0] sm:$0xff]  ;;  %v2320_v35 = vld [vmem:[%s6981_s3 + $0xc8] sm:$0xff] }
 0x20a   :  { %2210 = vmatpush2.msra.mxu0 %v871_v40  ;;  %2281 = vmatpush2.msra.mxu1 %v999_v26  ;;  %v2452_v46 = vld [vmem:[%s6981_s3 + $0x4e8] sm:$0xff]  ;;  %v2319_v38 = vld [vmem:[%s6981_s3 + $0xc0] sm:$0xff] }
 0x20b   :  { %2211 = vmatprep.subr.mxu0 %v868_v45  ;;  %2282 = vmatprep.subr.mxu1 %v996_v59  ;;  %v2451_v19 = vld [vmem:[%s6981_s3 + $0x4e0] sm:$0xff]  ;;  %v2448_v40 = vld [vmem:[%s6981_s3 + $0x4c8] sm:$0xff] }
 0x20c   :  { %2212 = vmatpush2.msra.mxu0 %v867_v16  ;;  %2283 = vmatpush2.msra.mxu1 %v995_v29  ;;  %v2315_v26 = vld [vmem:[%s6981_s3 + $0xa0] sm:$0xff]  ;;  %v2312_v59 = vld [vmem:[%s6981_s3 + $0x88] sm:$0xff] }
 0x20d   :  { %2213 = vmatprep.subr.mxu0 %v864_v21  ;;  %2284 = vmatprep.subr.mxu1 %v992_v49  ;;  %v2447_v45 = vld [vmem:[%s6981_s3 + $0x4c0] sm:$0xff]  ;;  %v2444_v16 = vld [vmem:[%s6981_s3 + $0x4a8] sm:$0xff] }
 0x20e   :  { %2214 = vmatpush2.msra.mxu0 %v863_v8  ;;  %2285 = vmatpush2.msra.mxu1 %v991_v51  ;;  %v2311_v29 = vld [vmem:[%s6981_s3 + $0x80] sm:$0xff]  ;;  %v2308_v21 = vld [vmem:[%s6981_s3 + $0x68] sm:$0xff] }
 0x20f   :  { %2215 = vmatprep.subr.mxu0 %v860_v62  ;;  %2286 = vmatprep.subr.mxu1 %v988_v1  ;;  %v2440_v49 = vld [vmem:[%s6981_s3 + $0x488] sm:$0xff]  ;;  %v2307_v50 = vld [vmem:[%s6981_s3 + $0x60] sm:$0xff] }
 0x210   :  { %2216 = vmatpush2.msra.mxu0 %v859_v53  ;;  %2217 = vmatprep.mubr.f32.mxu0 %v4570_v36  ;;  %v2352_v36 = vld [vmem:[%s6981_s3 + $0x1c8] sm:$0xff]  ;;  %v2439_v8 = vld [vmem:[%s6981_s3 + $0x480] sm:$0xff] }
 0x211   :  { %2287 = vmatpush2.msra.mxu1 %v987_v56  ;;  %2288 = vmatprep.mubr.f32.mxu1 %v4580_v42  ;;  %v2348_v42 = vld [vmem:[%s6981_s3 + $0x1a8] sm:$0xff]  ;;  %v2303_v1 = vld [vmem:[%s6981_s3 + $0x40] sm:$0xff] }
 0x212   :  { %2218 = vmatmul.mubr.f32.vlgmr.msra.gmra.mxu0 %v4537_v22  ;;  %2289 = vmatmul.mubr.f32.vlgmr.msra.gmra.mxu1 %v4554_v30  ;;  %v2484_v22 = vld [vmem:[%s6981_s3 + $0x5e8] sm:$0xff]  ;;  %v2483_v30 = vld [vmem:[%s6981_s3 + $0x5e0] sm:$0xff] }
 0x213   :  { %2573 = vmatprep.subr.mxu0 %v2356_v58  ;;  %2637 = vmatprep.mubr.f32.mxu0 %v6176_v60  ;;  %v2304_v51 = vld [vmem:[%s6981_s3 + $0x48] sm:$0xff]  ;;  %v2435_v11 = vld [vmem:[%s6981_s3 + $0x460] sm:$0xff] }
 0x214   :  { %2574 = vmatpush1.msra.mxu0 %v2355_v61  ;;  %2644 = vmatprep.subr.mxu1 %v2484_v22  ;;  %v2436_v62 = vld [vmem:[%s6981_s3 + $0x468] sm:$0xff]  ;;  %v2299_v56 = vld [vmem:[%s6981_s3 + $0x20] sm:$0xff] }
 0x215   :  { %2575 = vmatprep.subr.mxu0 %v2352_v36  ;;  %2645 = vmatpush1.msra.mxu1 %v2483_v30  ;;  %v2300_v53 = vld [vmem:[%s6981_s3 + $0x28] sm:$0xff]  ;;  %v2431_v58 = vld [vmem:[%s6981_s3 + $0x440] sm:$0xff] }
 0x216   :  { %2576 = vmatpush1.msra.mxu0 %v2351_v63  ;;  %2646 = vmatprep.subr.mxu1 %v2480_v0  ;;  %v2296_v61 = vld [vmem:[%s6981_s3 + $0x8] sm:$0xff]  ;;  %v2295_v63 = vld [vmem:[%s6981_s3] sm:$0xff] }
 0x217   :  { %2577 = vmatprep.subr.mxu0 %v2348_v42  ;;  %2647 = vmatpush1.msra.mxu1 %v2479_v4  ;;  %v2428_v36 = vld [vmem:[%s6981_s3 + $0x428] sm:$0xff]  ;;  %v2427_v42 = vld [vmem:[%s6981_s3 + $0x420] sm:$0xff] }
 0x218   :  { %2578 = vmatpush1.msra.mxu0 %v2347_v2  ;;  %2648 = vmatprep.subr.mxu1 %v2476_v6  ;;  %v2420_v22 = vld [vmem:[%s6981_s3 + $0x3e8] sm:$0xff]  ;;  %v2419_v0 = vld [vmem:[%s6981_s3 + $0x3e0] sm:$0xff] }
 0x219   :  { %2579 = vmatprep.subr.mxu0 %v2344_v5  ;;  %2649 = vmatpush1.msra.mxu1 %v2475_v10  ;;  %v2424_v30 = vld [vmem:[%s6981_s3 + $0x408] sm:$0xff]  ;;  %v2423_v2 = vld [vmem:[%s6981_s3 + $0x400] sm:$0xff] }
 0x21a   :  { %2580 = vmatpush1.msra.mxu0 %v2343_v9  ;;  %2650 = vmatprep.subr.mxu1 %v2472_v12  ;;  %v2416_v4 = vld [vmem:[%s6981_s3 + $0x3c8] sm:$0xff]  ;;  %v2415_v6 = vld [vmem:[%s6981_s3 + $0x3c0] sm:$0xff] }
 0x21b   :  { %2581 = vmatprep.subr.mxu0 %v2340_v23  ;;  %2651 = vmatpush1.msra.mxu1 %v2471_v15  ;;  %v2548_v5 = vld [vmem:[%s6981_s3 + $0x7e8] sm:$0xff]  ;;  %v2547_v9 = vld [vmem:[%s6981_s3 + $0x7e0] sm:$0xff] }
 0x21c   :  { %2582 = vmatpush1.msra.mxu0 %v2339_v14  ;;  %2652 = vmatprep.subr.mxu1 %v2468_v18  ;;  %v2412_v10 = vld [vmem:[%s6981_s3 + $0x3a8] sm:$0xff]  ;;  %v2411_v12 = vld [vmem:[%s6981_s3 + $0x3a0] sm:$0xff] }
 0x21d   :  { %2583 = vmatprep.subr.mxu0 %v2336_v37  ;;  %2653 = vmatpush1.msra.mxu1 %v2467_v24  ;;  %v2544_v23 = vld [vmem:[%s6981_s3 + $0x7c8] sm:$0xff]  ;;  %v2543_v14 = vld [vmem:[%s6981_s3 + $0x7c0] sm:$0xff] }
 0x21e   :  { %2584 = vmatpush1.msra.mxu0 %v2335_v20  ;;  %2654 = vmatprep.subr.mxu1 %v2464_v31  ;;  %v2408_v15 = vld [vmem:[%s6981_s3 + $0x388] sm:$0xff]  ;;  %v2407_v18 = vld [vmem:[%s6981_s3 + $0x380] sm:$0xff] }
 0x21f   :  { %2585 = vmatprep.subr.mxu0 %v2332_v54  ;;  %2655 = vmatpush1.msra.mxu1 %v2463_v43  ;;  %v2540_v37 = vld [vmem:[%s6981_s3 + $0x7a8] sm:$0xff]  ;;  %v2539_v20 = vld [vmem:[%s6981_s3 + $0x7a0] sm:$0xff] }
 0x220   :  { %2586 = vmatpush1.msra.mxu0 %v2331_v25  ;;  %2656 = vmatprep.subr.mxu1 %v2460_v27  ;;  %v2404_v24 = vld [vmem:[%s6981_s3 + $0x368] sm:$0xff]  ;;  %v2403_v31 = vld [vmem:[%s6981_s3 + $0x360] sm:$0xff] }
 0x221   :  { %2587 = vmatprep.subr.mxu0 %v2328_v57  ;;  %2657 = vmatpush1.msra.mxu1 %v2459_v28  ;;  %v2536_v54 = vld [vmem:[%s6981_s3 + $0x788] sm:$0xff]  ;;  %v2535_v25 = vld [vmem:[%s6981_s3 + $0x780] sm:$0xff] }
 0x222   :  { %2588 = vmatpush1.msra.mxu0 %v2327_v13  ;;  %2658 = vmatprep.subr.mxu1 %v2456_v32  ;;  %v2400_v43 = vld [vmem:[%s6981_s3 + $0x348] sm:$0xff]  ;;  %v2399_v27 = vld [vmem:[%s6981_s3 + $0x340] sm:$0xff] }
 0x223   :  { %2589 = vmatprep.subr.mxu0 %v2324_v48  ;;  %2659 = vmatpush1.msra.mxu1 %v2455_v34  ;;  %v2532_v57 = vld [vmem:[%s6981_s3 + $0x768] sm:$0xff]  ;;  %v2531_v13 = vld [vmem:[%s6981_s3 + $0x760] sm:$0xff] }
 0x224   :  { %2590 = vmatpush1.msra.mxu0 %v2323_v33  ;;  %2660 = vmatprep.subr.mxu1 %v2452_v46  ;;  %v2396_v28 = vld [vmem:[%s6981_s3 + $0x328] sm:$0xff]  ;;  %v2395_v32 = vld [vmem:[%s6981_s3 + $0x320] sm:$0xff] }
 0x225   :  { %2591 = vmatprep.subr.mxu0 %v2320_v35  ;;  %2661 = vmatpush1.msra.mxu1 %v2451_v19  ;;  %v2528_v48 = vld [vmem:[%s6981_s3 + $0x748] sm:$0xff]  ;;  %v2527_v33 = vld [vmem:[%s6981_s3 + $0x740] sm:$0xff] }
 0x226   :  { %2592 = vmatpush1.msra.mxu0 %v2319_v38  ;;  %2662 = vmatprep.subr.mxu1 %v2448_v40  ;;  %v2392_v34 = vld [vmem:[%s6981_s3 + $0x308] sm:$0xff]  ;;  %v2391_v46 = vld [vmem:[%s6981_s3 + $0x300] sm:$0xff] }
 0x227   :  { %2593 = vmatprep.subr.mxu0 %v2316_v39  ;;  %2663 = vmatpush1.msra.mxu1 %v2447_v45  ;;  %v2524_v35 = vld [vmem:[%s6981_s3 + $0x728] sm:$0xff]  ;;  %v2523_v38 = vld [vmem:[%s6981_s3 + $0x720] sm:$0xff] }
 0x228   :  { %2594 = vmatpush1.msra.mxu0 %v2315_v26  ;;  %2664 = vmatprep.subr.mxu1 %v2444_v16  ;;  %v2388_v19 = vld [vmem:[%s6981_s3 + $0x2e8] sm:$0xff]  ;;  %v2387_v40 = vld [vmem:[%s6981_s3 + $0x2e0] sm:$0xff] }
 0x229   :  { %2595 = vmatprep.subr.mxu0 %v2312_v59  ;;  %2665 = vmatpush1.msra.mxu1 %v2443_v44  ;;  %v2520_v39 = vld [vmem:[%s6981_s3 + $0x708] sm:$0xff]  ;;  %v2519_v26 = vld [vmem:[%s6981_s3 + $0x700] sm:$0xff] }
 0x22a   :  { %2596 = vmatpush1.msra.mxu0 %v2311_v29  ;;  %2666 = vmatprep.subr.mxu1 %v2440_v49  ;;  %v2384_v45 = vld [vmem:[%s6981_s3 + $0x2c8] sm:$0xff]  ;;  %v2383_v16 = vld [vmem:[%s6981_s3 + $0x2c0] sm:$0xff] }
 0x22b   :  { %2597 = vmatprep.subr.mxu0 %v2308_v21  ;;  %2667 = vmatpush1.msra.mxu1 %v2439_v8  ;;  %v2516_v59 = vld [vmem:[%s6981_s3 + $0x6e8] sm:$0xff]  ;;  %v2515_v29 = vld [vmem:[%s6981_s3 + $0x6e0] sm:$0xff] }
 0x22c   :  { %2598 = vmatpush1.msra.mxu0 %v2307_v50  ;;  %2668 = vmatprep.subr.mxu1 %v2436_v62  ;;  %v2380_v44 = vld [vmem:[%s6981_s3 + $0x2a8] sm:$0xff]  ;;  %v2379_v49 = vld [vmem:[%s6981_s3 + $0x2a0] sm:$0xff] }
 0x22d   :  { %2599 = vmatprep.subr.mxu0 %v2304_v51  ;;  %2669 = vmatpush1.msra.mxu1 %v2435_v11  ;;  %v2512_v21 = vld [vmem:[%s6981_s3 + $0x6c8] sm:$0xff]  ;;  %v2511_v50 = vld [vmem:[%s6981_s3 + $0x6c0] sm:$0xff] }
 0x22e   :  { %2600 = vmatpush1.msra.mxu0 %v2303_v1  ;;  %2670 = vmatprep.subr.mxu1 %v2432_v3  ;;  %v2376_v8 = vld [vmem:[%s6981_s3 + $0x288] sm:$0xff]  ;;  %v2375_v62 = vld [vmem:[%s6981_s3 + $0x280] sm:$0xff] }
 0x22f   :  { %2601 = vmatprep.subr.mxu0 %v2300_v53  ;;  %2671 = vmatpush1.msra.mxu1 %v2431_v58  ;;  %v2508_v51 = vld [vmem:[%s6981_s3 + $0x6a8] sm:$0xff]  ;;  %v2507_v1 = vld [vmem:[%s6981_s3 + $0x6a0] sm:$0xff] }
 0x230   :  { %2602 = vmatpush1.msra.mxu0 %v2299_v56  ;;  %2672 = vmatprep.subr.mxu1 %v2428_v36  ;;  %v2372_v11 = vld [vmem:[%s6981_s3 + $0x268] sm:$0xff]  ;;  %v2371_v3 = vld [vmem:[%s6981_s3 + $0x260] sm:$0xff] }
 0x231   :  { %2603 = vmatprep.subr.mxu0 %v2296_v61  ;;  %2673 = vmatpush1.msra.mxu1 %v2427_v42  ;;  %v2504_v53 = vld [vmem:[%s6981_s3 + $0x688] sm:$0xff]  ;;  %v2503_v56 = vld [vmem:[%s6981_s3 + $0x680] sm:$0xff] }
 0x232   :  { %2604 = vmatpush1.msra.mxu0 %v2295_v63  ;;  %2674 = vmatprep.subr.mxu1 %v2424_v30  ;;  %v2368_v58 = vld [vmem:[%s6981_s3 + $0x248] sm:$0xff]  ;;  %v2367_v36 = vld [vmem:[%s6981_s3 + $0x240] sm:$0xff] }
 0x233   :  { %2605 = vmatprep.subr.mxu0 %v2420_v22  ;;  %2675 = vmatpush1.msra.mxu1 %v2423_v2  ;;  %v2500_v61 = vld [vmem:[%s6981_s3 + $0x668] sm:$0xff]  ;;  %v2363_v42 = vld [vmem:[%s6981_s3 + $0x220] sm:$0xff]  ;;  %v2357_v2 = vld [vmem:[%s6981_s3 + $0x1f0] sm:$0xff] }
 0x234   :  { %2606 = vmatpush2.msra.mxu0 %v2419_v0  ;;  %2676 = vmatprep.subr.mxu1 %v2548_v5  ;;  %v2364_v63 = vld [vmem:[%s6981_s3 + $0x228] sm:$0xff]  ;;  %v2359_v30 = vld [vmem:[%s6981_s3 + $0x200] sm:$0xff]  ;;  %v2358_v0 = vld [vmem:[%s6981_s3 + $0x1f8] sm:$0xff] }
 0x235   :  { %2607 = vmatprep.subr.mxu0 %v2416_v4  ;;  %2677 = vmatpush2.msra.mxu1 %v2547_v9  ;;  %v2360_v22 = vld [vmem:[%s6981_s3 + $0x208] sm:$0xff]  ;;  %v2354_v4 = vld [vmem:[%s6981_s3 + $0x1d8] sm:$0xff]  ;;  %v2499_v5 = vld [vmem:[%s6981_s3 + $0x660] sm:$0xff] }
 0x236   :  { %2608 = vmatpush2.msra.mxu0 %v2415_v6  ;;  %2678 = vmatprep.subr.mxu1 %v2544_v23  ;;  %v2353_v6 = vld [vmem:[%s6981_s3 + $0x1d0] sm:$0xff]  ;;  %v2496_v9 = vld [vmem:[%s6981_s3 + $0x648] sm:$0xff]  ;;  %v2495_v23 = vld [vmem:[%s6981_s3 + $0x640] sm:$0xff] }
 0x237   :  { %2609 = vmatprep.subr.mxu0 %v2412_v10  ;;  %2679 = vmatpush2.msra.mxu1 %v2543_v14  ;;  %v2350_v10 = vld [vmem:[%s6981_s3 + $0x1b8] sm:$0xff]  ;;  %v2492_v14 = vld [vmem:[%s6981_s3 + $0x628] sm:$0xff] }
 0x238   :  { %2610 = vmatpush2.msra.mxu0 %v2411_v12  ;;  %2680 = vmatprep.subr.mxu1 %v2540_v37  ;;  %v2349_v12 = vld [vmem:[%s6981_s3 + $0x1b0] sm:$0xff] }
 0x239   :  { %2611 = vmatprep.subr.mxu0 %v2408_v15  ;;  %2681 = vmatpush2.msra.mxu1 %v2539_v20  ;;  %v2491_v15 = vld [vmem:[%s6981_s3 + $0x620] sm:$0xff]  ;;  %v2345_v37 = vld [vmem:[%s6981_s3 + $0x190] sm:$0xff]  ;;  %v2342_v20 = vld [vmem:[%s6981_s3 + $0x178] sm:$0xff] }
 0x23a   :  { %2612 = vmatpush2.msra.mxu0 %v2407_v18  ;;  %2682 = vmatprep.subr.mxu1 %v2536_v54  ;;  %v2488_v18 = vld [vmem:[%s6981_s3 + $0x608] sm:$0xff]  ;;  %v2341_v54 = vld [vmem:[%s6981_s3 + $0x170] sm:$0xff] }
 0x23b   :  { %2613 = vmatprep.subr.mxu0 %v2404_v24  ;;  %2683 = vmatpush2.msra.mxu1 %v2535_v25  ;;  %v2487_v24 = vld [vmem:[%s6981_s3 + $0x600] sm:$0xff]  ;;  %v2338_v25 = vld [vmem:[%s6981_s3 + $0x158] sm:$0xff] }
 0x23c   :  { %2614 = vmatpush2.msra.mxu0 %v2403_v31  ;;  %2684 = vmatprep.subr.mxu1 %v2532_v57  ;;  %v2486_v31 = vld [vmem:[%s6981_s3 + $0x5f8] sm:$0xff] }
 0x23d   :  { %2615 = vmatprep.subr.mxu0 %v2400_v43  ;;  %2685 = vmatpush2.msra.mxu1 %v2531_v13  ;;  %v2337_v43 = vld [vmem:[%s6981_s3 + $0x150] sm:$0xff]  ;;  %v2334_v57 = vld [vmem:[%s6981_s3 + $0x138] sm:$0xff] }
 0x23e   :  { %2616 = vmatpush2.msra.mxu0 %v2399_v27  ;;  %2686 = vmatprep.subr.mxu1 %v2528_v48  ;;  %v2333_v27 = vld [vmem:[%s6981_s3 + $0x130] sm:$0xff]  ;;  %v2330_v13 = vld [vmem:[%s6981_s3 + $0x118] sm:$0xff] }
 0x23f   :  { %2617 = vmatprep.subr.mxu0 %v2396_v28  ;;  %2687 = vmatpush2.msra.mxu1 %v2527_v33  ;;  %v2329_v28 = vld [vmem:[%s6981_s3 + $0x110] sm:$0xff]  ;;  %v2326_v48 = vld [vmem:[%s6981_s3 + $0xf8] sm:$0xff] }
 0x240   :  { %2618 = vmatpush2.msra.mxu0 %v2395_v32  ;;  %2688 = vmatprep.subr.mxu1 %v2524_v35  ;;  %v2325_v32 = vld [vmem:[%s6981_s3 + $0xf0] sm:$0xff]  ;;  %v2322_v33 = vld [vmem:[%s6981_s3 + $0xd8] sm:$0xff] }
 0x241   :  { %2619 = vmatprep.subr.mxu0 %v2392_v34  ;;  %2689 = vmatpush2.msra.mxu1 %v2523_v38  ;;  %v2321_v34 = vld [vmem:[%s6981_s3 + $0xd0] sm:$0xff]  ;;  %v2318_v35 = vld [vmem:[%s6981_s3 + $0xb8] sm:$0xff] }
 0x242   :  { %2620 = vmatpush2.msra.mxu0 %v2391_v46  ;;  %2690 = vmatprep.subr.mxu1 %v2520_v39  ;;  %v2317_v46 = vld [vmem:[%s6981_s3 + $0xb0] sm:$0xff]  ;;  %v2314_v38 = vld [vmem:[%s6981_s3 + $0x98] sm:$0xff] }
 0x243   :  { %2621 = vmatprep.subr.mxu0 %v2388_v19  ;;  %2691 = vmatpush2.msra.mxu1 %v2519_v26  ;;  %v2313_v19 = vld [vmem:[%s6981_s3 + $0x90] sm:$0xff]  ;;  %v2310_v39 = vld [vmem:[%s6981_s3 + $0x78] sm:$0xff] }
 0x244   :  { %2622 = vmatpush2.msra.mxu0 %v2387_v40  ;;  %2692 = vmatprep.subr.mxu1 %v2516_v59  ;;  %v2309_v40 = vld [vmem:[%s6981_s3 + $0x70] sm:$0xff]  ;;  %v2306_v26 = vld [vmem:[%s6981_s3 + $0x58] sm:$0xff] }
 0x245   :  { %2623 = vmatprep.subr.mxu0 %v2384_v45  ;;  %2693 = vmatpush2.msra.mxu1 %v2515_v29  ;;  %v2305_v45 = vld [vmem:[%s6981_s3 + $0x50] sm:$0xff]  ;;  %v2302_v59 = vld [vmem:[%s6981_s3 + $0x38] sm:$0xff] }
 0x246   :  { %2624 = vmatpush2.msra.mxu0 %v2383_v16  ;;  %2694 = vmatprep.subr.mxu1 %v2512_v21  ;;  %v2301_v16 = vld [vmem:[%s6981_s3 + $0x30] sm:$0xff]  ;;  %v2298_v29 = vld [vmem:[%s6981_s3 + $0x18] sm:$0xff] }
 0x247   :  { %2625 = vmatprep.subr.mxu0 %v2380_v44  ;;  %2695 = vmatpush2.msra.mxu1 %v2511_v50  ;;  %v2297_v44 = vld [vmem:[%s6981_s3 + $0x10] sm:$0xff]  ;;  %v2422_v21 = vld [vmem:[%s6981_s3 + $0x3f8] sm:$0xff] }
 0x248   :  { %2626 = vmatpush2.msra.mxu0 %v2379_v49  ;;  %2696 = vmatprep.subr.mxu1 %v2508_v51  ;;  %v2421_v49 = vld [vmem:[%s6981_s3 + $0x3f0] sm:$0xff]  ;;  %v2418_v50 = vld [vmem:[%s6981_s3 + $0x3d8] sm:$0xff] }
 0x249   :  { %2627 = vmatprep.subr.mxu0 %v2376_v8  ;;  %2697 = vmatpush2.msra.mxu1 %v2507_v1  ;;  %v2417_v8 = vld [vmem:[%s6981_s3 + $0x3d0] sm:$0xff]  ;;  %v2414_v51 = vld [vmem:[%s6981_s3 + $0x3b8] sm:$0xff] }
 0x24a   :  { %2628 = vmatpush2.msra.mxu0 %v2375_v62  ;;  %2698 = vmatprep.subr.mxu1 %v2504_v53  ;;  %v2413_v62 = vld [vmem:[%s6981_s3 + $0x3b0] sm:$0xff]  ;;  %v2410_v1 = vld [vmem:[%s6981_s3 + $0x398] sm:$0xff] }
 0x24b   :  { %2629 = vmatprep.subr.mxu0 %v2372_v11  ;;  %2699 = vmatpush2.msra.mxu1 %v2503_v56  ;;  %v2409_v11 = vld [vmem:[%s6981_s3 + $0x390] sm:$0xff]  ;;  %v2406_v53 = vld [vmem:[%s6981_s3 + $0x378] sm:$0xff] }
 0x24c   :  { %2630 = vmatpush2.msra.mxu0 %v2371_v3  ;;  %2700 = vmatprep.subr.mxu1 %v2500_v61  ;;  %v2405_v3 = vld [vmem:[%s6981_s3 + $0x370] sm:$0xff]  ;;  %v2402_v56 = vld [vmem:[%s6981_s3 + $0x358] sm:$0xff] }
 0x24d   :  { %2631 = vmatprep.subr.mxu0 %v2368_v58  ;;  %2701 = vmatpush2.msra.mxu1 %v2499_v5  ;;  %v2401_v58 = vld [vmem:[%s6981_s3 + $0x350] sm:$0xff]  ;;  %v2398_v61 = vld [vmem:[%s6981_s3 + $0x338] sm:$0xff] }
 0x24e   :  { %2632 = vmatpush2.msra.mxu0 %v2367_v36  ;;  %2702 = vmatprep.subr.mxu1 %v2496_v9  ;;  %v2397_v36 = vld [vmem:[%s6981_s3 + $0x330] sm:$0xff] }
 0x24f   :  { %2633 = vmatprep.subr.mxu0 %v2364_v63  ;;  %2703 = vmatpush2.msra.mxu1 %v2495_v23  ;;  %v2394_v63 = vld [vmem:[%s6981_s3 + $0x318] sm:$0xff]  ;;  %v2381_v5 = vld [vmem:[%s6981_s3 + $0x2b0] sm:$0xff] }
 0x250   :  { %2634 = vmatpush2.msra.mxu0 %v2363_v42  ;;  %2704 = vmatprep.subr.mxu1 %v2492_v14  ;;  %v2393_v42 = vld [vmem:[%s6981_s3 + $0x310] sm:$0xff] }
 0x251   :  { %2635 = vmatprep.subr.mxu0 %v2360_v22  ;;  %2705 = vmatpush2.msra.mxu1 %v2491_v15  ;;  %v2390_v22 = vld [vmem:[%s6981_s3 + $0x2f8] sm:$0xff]  ;;  %v2377_v9 = vld [vmem:[%s6981_s3 + $0x290] sm:$0xff] }
 0x252   :  { %2636 = vmatpush2.msra.mxu0 %v2359_v30  ;;  %2706 = vmatprep.subr.mxu1 %v2488_v18  ;;  %v2389_v30 = vld [vmem:[%s6981_s3 + $0x2f0] sm:$0xff] }
 0x253   :  { %2638 = vmatmul.mubr.f32.vlgmr.msra.gmra.mxu0 %v5767_v17  ;;  %2715 = vmatprep.subr.mxu0 %v2358_v0  ;;  %v2386_v0 = vld [vmem:[%s6981_s3 + $0x2d8] sm:$0xff]  ;;  %v2373_v23 = vld [vmem:[%s6981_s3 + $0x270] sm:$0xff] }
 0x254   :  { %2716 = vmatpush1.msra.mxu0 %v2357_v2  ;;  %2779 = vmatprep.mubr.f32.mxu0 %v6176_v60  ;;  %v2346_v60 = vld [vmem:[%s6981_s3 + $0x198] sm:$0xff]  ;;  %v2385_v2 = vld [vmem:[%s6981_s3 + $0x2d0] sm:$0xff] }
 0x255   :  { %2717 = vmatprep.subr.mxu0 %v2354_v4  ;;  %2707 = vmatpush2.msra.mxu1 %v2487_v24  ;;  %v2382_v4 = vld [vmem:[%s6981_s3 + $0x2b8] sm:$0xff]  ;;  %v2369_v14 = vld [vmem:[%s6981_s3 + $0x250] sm:$0xff]  ;;  %v1065_v24 = vsub.s32 3, %v3261_v41 }
 0x256   :  { %2718 = vmatpush1.msra.mxu0 %v2353_v6  ;;  %2786 = vmatprep.subr.mxu1 %v2486_v31  ;;  %v2378_v6 = vld [vmem:[%s6981_s3 + $0x298] sm:$0xff]  ;;  %v2365_v15 = vld [vmem:[%s6981_s3 + $0x230] sm:$0xff] }
 0x257   :  { %2719 = vmatprep.subr.mxu0 %v2350_v10  ;;  %v2374_v10 = vld [vmem:[%s6981_s3 + $0x278] sm:$0xff]  ;;  %v2361_v18 = vld [vmem:[%s6981_s3 + $0x210] sm:$0xff] }
 0x258   :  { %2720 = vmatpush1.msra.mxu0 %v2349_v12  ;;  %v2370_v12 = vld [vmem:[%s6981_s3 + $0x258] sm:$0xff] }
 0x259   :  { %2721 = vmatprep.subr.mxu0 %v2346_v60  ;;  %v2366_v60 = vld [vmem:[%s6981_s3 + $0x238] sm:$0xff] }
 0x25a   :  { %2722 = vmatpush1.msra.mxu0 %v2345_v37  ;;  %v2362_v37 = vld [vmem:[%s6981_s3 + $0x218] sm:$0xff] }
 0x25b   :  { %2723 = vmatprep.subr.mxu0 %v2342_v20  ;;  %v1061_v20 = vsub.s32 2, %v3261_v41 }
 0x25c   :  { %2724 = vmatpush1.msra.mxu0 %v2341_v54  ;;  %v1793_v54 = vpop.f32.mrf.mxu0 }
 0x25d   :  { %2725 = vmatprep.subr.mxu0 %v2338_v25  ;;  %v1062_v31 = vrot.slane %v6023_v55, %v1061_v20  ;;  %v1066_v25 = vrot.slane %v6023_v55, %v1065_v24 }
 0x25e   :  { %2726 = vmatpush1.msra.mxu0 %v2337_v43  ;;  %v1864_v43 = vpop.f32.mrf.mxu1 }
 0x25f   :  { %2727 = vmatprep.subr.mxu0 %v2334_v57  ;;  %v1795_v57 = vpop.f32.mrf.mxu0 }
 0x260   :  { %2728 = vmatpush1.msra.mxu0 %v2333_v27  ;;  %v1794_v27 = vadd.f32 %v1793_v54, %v1062_v31  ;;  %v2437_v54 = vld [vmem:[%s6981_s3 + $0x470] sm:$0xff]  ;;  %v2434_v31 = vld [vmem:[%s6981_s3 + $0x458] sm:$0xff] }
 0x261   :  { %2729 = vmatprep.subr.mxu0 %v2330_v13  ;;  %v1935_v13 = vpop.f32.mrf.mxu0 }
 0x262   :  { %2730 = vmatpush1.msra.mxu0 %v2329_v28  ;;  %v1796_v28 = vadd.f32 %v1795_v57, %v1066_v25  ;;  %v2433_v25 = vld [vmem:[%s6981_s3 + $0x450] sm:$0xff] }
 0x263   :  { %2731 = vmatprep.subr.mxu0 %v2326_v48  ;;  %v1866_v48 = vpop.f32.mrf.mxu1  ;;  %v2429_v57 = vld [vmem:[%s6981_s3 + $0x430] sm:$0xff] }
 0x264   :  { %2732 = vmatpush1.msra.mxu0 %v2325_v32 }
 0x265   :  { %2733 = vmatprep.subr.mxu0 %v2322_v33  ;;  %v2006_v32 = vpop.f32.mrf.mxu1  ;;  %v1937_v33 = vpop.f32.mrf.mxu0 }
 0x266   :  { %2734 = vmatpush1.msra.mxu0 %v2321_v34  ;;  %v1867_v34 = vadd.f32 %v1866_v48, %v1796_v28  ;;  %v2550_v28 = vld [vmem:[%s6981_s3 + $0x7f8] sm:$0xff]  ;;  %v2549_v48 = vld [vmem:[%s6981_s3 + $0x7f0] sm:$0xff] }
 0x267   :  { %2735 = vmatprep.subr.mxu0 %v2318_v35 }
 0x268   :  { %2736 = vmatpush1.msra.mxu0 %v2317_v46 }
 0x269   :  { %2737 = vmatprep.subr.mxu0 %v2314_v38  ;;  %v1938_v38 = vadd.f32 %v1937_v33, %v1867_v34  ;;  %v2542_v33 = vld [vmem:[%s6981_s3 + $0x7b8] sm:$0xff]  ;;  %v2541_v34 = vld [vmem:[%s6981_s3 + $0x7b0] sm:$0xff] }
 0x26a   :  { %2738 = vmatpush1.msra.mxu0 %v2313_v19  ;;  %v2008_v19 = vpop.f32.mrf.mxu1 }
 0x26b   :  { %2739 = vmatprep.subr.mxu0 %v2310_v39 }
 0x26c   :  { %2740 = vmatpush1.msra.mxu0 %v2309_v40 }
 0x26d   :  { %2741 = vmatprep.subr.mxu0 %v2306_v26 }
 0x26e   :  { %2742 = vmatpush1.msra.mxu0 %v2305_v45  ;;  %v2009_v45 = vadd.f32 %v2008_v19, %v1938_v38  ;;  %v2534_v38 = vld [vmem:[%s6981_s3 + $0x778] sm:$0xff]  ;;  %v2533_v19 = vld [vmem:[%s6981_s3 + $0x770] sm:$0xff] }
 0x26f   :  { %2743 = vmatprep.subr.mxu0 %v2302_v59 }
 0x270   :  { %2744 = vmatpush1.msra.mxu0 %v2301_v16 }
 0x271   :  { %2745 = vmatprep.subr.mxu0 %v2298_v29 }
 0x272   :  { %2746 = vmatpush1.msra.mxu0 %v2297_v44 }
 0x273   :  { %2747 = vmatprep.subr.mxu0 %v2422_v21 }
 0x274   :  { %2748 = vmatpush2.msra.mxu0 %v2421_v49 }
 0x275   :  { %2749 = vmatprep.subr.mxu0 %v2418_v50 }
 0x276   :  { %2750 = vmatpush2.msra.mxu0 %v2417_v8 }
 0x277   :  { %2751 = vmatprep.subr.mxu0 %v2414_v51 }
 0x278   :  { %2752 = vmatpush2.msra.mxu0 %v2413_v62 }
 0x279   :  { %2753 = vmatprep.subr.mxu0 %v2410_v1 }
 0x27a   :  { %2754 = vmatpush2.msra.mxu0 %v2409_v11 }
 0x27b   :  { %2755 = vmatprep.subr.mxu0 %v2406_v53  ;;  %v2485_v53 = vld [vmem:[%s6981_s3 + $0x5f0] sm:$0xff] }
 0x27c   :  { %2756 = vmatpush2.msra.mxu0 %v2405_v3  ;;  %v2482_v3 = vld [vmem:[%s6981_s3 + $0x5d8] sm:$0xff] }
 0x27d   :  { %2757 = vmatprep.subr.mxu0 %v2402_v56  ;;  %v2481_v56 = vld [vmem:[%s6981_s3 + $0x5d0] sm:$0xff] }
 0x27e   :  { %2758 = vmatpush2.msra.mxu0 %v2401_v58  ;;  %v2478_v58 = vld [vmem:[%s6981_s3 + $0x5b8] sm:$0xff] }
 0x27f   :  { %2759 = vmatprep.subr.mxu0 %v2398_v61  ;;  %v2477_v61 = vld [vmem:[%s6981_s3 + $0x5b0] sm:$0xff] }
 0x280   :  { %2760 = vmatpush2.msra.mxu0 %v2397_v36  ;;  %v2474_v36 = vld [vmem:[%s6981_s3 + $0x598] sm:$0xff] }
 0x281   :  { %2761 = vmatprep.subr.mxu0 %v2394_v63  ;;  %v2473_v63 = vld [vmem:[%s6981_s3 + $0x590] sm:$0xff] }
 0x282   :  { %2762 = vmatpush2.msra.mxu0 %v2393_v42  ;;  %v2470_v42 = vld [vmem:[%s6981_s3 + $0x578] sm:$0xff] }
 0x283   :  { %2763 = vmatprep.subr.mxu0 %v2390_v22  ;;  %v2469_v22 = vld [vmem:[%s6981_s3 + $0x570] sm:$0xff] }
 0x284   :  { %2764 = vmatpush2.msra.mxu0 %v2389_v30  ;;  %v2466_v30 = vld [vmem:[%s6981_s3 + $0x558] sm:$0xff] }
 0x285   :  { %2765 = vmatprep.subr.mxu0 %v2386_v0  ;;  %v2465_v0 = vld [vmem:[%s6981_s3 + $0x550] sm:$0xff] }
 0x286   :  { %2766 = vmatpush2.msra.mxu0 %v2385_v2  ;;  %v2462_v2 = vld [vmem:[%s6981_s3 + $0x538] sm:$0xff] }
 0x287   :  { %2767 = vmatprep.subr.mxu0 %v2382_v4  ;;  %v2461_v4 = vld [vmem:[%s6981_s3 + $0x530] sm:$0xff] }
 0x288   :  { %2768 = vmatpush2.msra.mxu0 %v2381_v5  ;;  %v2458_v5 = vld [vmem:[%s6981_s3 + $0x518] sm:$0xff] }
 0x289   :  { %2769 = vmatprep.subr.mxu0 %v2378_v6  ;;  %v2457_v6 = vld [vmem:[%s6981_s3 + $0x510] sm:$0xff] }
 0x28a   :  { %2770 = vmatpush2.msra.mxu0 %v2377_v9  ;;  %v2454_v9 = vld [vmem:[%s6981_s3 + $0x4f8] sm:$0xff] }
 0x28b   :  { %2771 = vmatprep.subr.mxu0 %v2374_v10  ;;  %v2453_v10 = vld [vmem:[%s6981_s3 + $0x4f0] sm:$0xff] }
 0x28c   :  { %2772 = vmatpush2.msra.mxu0 %v2373_v23  ;;  %v2450_v23 = vld [vmem:[%s6981_s3 + $0x4d8] sm:$0xff] }
 0x28d   :  { %2773 = vmatprep.subr.mxu0 %v2370_v12  ;;  %v2449_v12 = vld [vmem:[%s6981_s3 + $0x4d0] sm:$0xff] }
 0x28e   :  { %2774 = vmatpush2.msra.mxu0 %v2369_v14  ;;  %v2446_v14 = vld [vmem:[%s6981_s3 + $0x4b8] sm:$0xff] }
 0x28f   :  { %2775 = vmatprep.subr.mxu0 %v2366_v60  ;;  %v2077_v46 = vpop.f32.mrf.mxu0  ;;  %v2445_v60 = vld [vmem:[%s6981_s3 + $0x4b0] sm:$0xff] }
 0x290   :  { %2776 = vmatpush2.msra.mxu0 %v2365_v15  ;;  %v2442_v15 = vld [vmem:[%s6981_s3 + $0x498] sm:$0xff] }
 0x291   :  { %2777 = vmatprep.subr.mxu0 %v2362_v37  ;;  %v2148_v40 = vpop.f32.mrf.mxu1  ;;  %v2079_v26 = vpop.f32.mrf.mxu0  ;;  %v2441_v37 = vld [vmem:[%s6981_s3 + $0x490] sm:$0xff] }
 0x292   :  { %2778 = vmatpush2.msra.mxu0 %v2361_v18  ;;  %v2080_v55 = vadd.f32 %v2079_v26, %v2009_v45  ;;  %v2438_v18 = vld [vmem:[%s6981_s3 + $0x478] sm:$0xff]  ;;  %v2525_v45 = vld [vmem:[%s6981_s3 + $0x730] sm:$0xff] }
 0x293   :  { %2780 = vmatmul.mubr.f32.vlgmr.msra.gmra.mxu0 %v5767_v17  ;;  %v1865_v17 = vadd.f32 %v1864_v43, %v1794_v27  ;;  %v2150_v16 = vpop.f32.mrf.mxu1  ;;  %v2430_v43 = vld [vmem:[%s6981_s3 + $0x438] sm:$0xff] }
 0x294   :  { %v2151_v49 = vadd.f32 %v2150_v16, %v2080_v55  ;;  %v2426_v27 = vld [vmem:[%s6981_s3 + $0x418] sm:$0xff]  ;;  %v2521_v55 = vld [vmem:[%s6981_s3 + $0x710] sm:$0xff] }
 0x295   :  { %v1936_v35 = vadd.f32 %v1935_v13, %v1865_v17  ;;  %v2425_v13 = vld [vmem:[%s6981_s3 + $0x410] sm:$0xff]  ;;  %v2546_v17 = vld [vmem:[%s6981_s3 + $0x7d8] sm:$0xff] }
 0x296   :  { %v2526_v26 = vld [vmem:[%s6981_s3 + $0x738] sm:$0xff] }
 0x297   :  { %v2007_v39 = vadd.f32 %v2006_v32, %v1936_v35  ;;  %v2545_v32 = vld [vmem:[%s6981_s3 + $0x7d0] sm:$0xff]  ;;  %v2538_v35 = vld [vmem:[%s6981_s3 + $0x798] sm:$0xff] }
 0x298   :  { %v2518_v16 = vld [vmem:[%s6981_s3 + $0x6f8] sm:$0xff] }
 0x299   :  { %v2078_v59 = vadd.f32 %v2077_v46, %v2007_v39  ;;  %v2537_v46 = vld [vmem:[%s6981_s3 + $0x790] sm:$0xff]  ;;  %v2530_v39 = vld [vmem:[%s6981_s3 + $0x758] sm:$0xff] }
 0x29b   :  { %v2149_v29 = vadd.f32 %v2148_v40, %v2078_v59  ;;  %v2529_v40 = vld [vmem:[%s6981_s3 + $0x750] sm:$0xff]  ;;  %v2522_v59 = vld [vmem:[%s6981_s3 + $0x718] sm:$0xff] }
 0x2d2   :  { %v2219_v44 = vpop.f32.mrf.mxu0  ;;  %v2290_v21 = vpop.f32.mrf.mxu1 }
 0x2d3   :  { %v2220_v50 = vadd.f32 %v2219_v44, %v2149_v29  ;;  %v2517_v29 = vld [vmem:[%s6981_s3 + $0x6f0] sm:$0xff]  ;;  %v2514_v44 = vld [vmem:[%s6981_s3 + $0x6d8] sm:$0xff] }
 0x2d4   :  { %v2221_v8 = vpop.f32.mrf.mxu0  ;;  %v2292_v62 = vpop.f32.mrf.mxu1 }
 0x2d5   :  { %v2222_v51 = vadd.f32 %v2221_v8, %v2151_v49  ;;  %v6769_v11 = vadd.f32 %v2290_v21, %v2220_v50  ;;  %v2513_v21 = vld [vmem:[%s6981_s3 + $0x6d0] sm:$0xff]  ;;  %v2510_v49 = vld [vmem:[%s6981_s3 + $0x6b8] sm:$0xff] }
 0x2d6   :  { %v2509_v50 = vld [vmem:[%s6981_s3 + $0x6b0] sm:$0xff]  ;;  %v2506_v8 = vld [vmem:[%s6981_s3 + $0x698] sm:$0xff] }
 0x2d7   :  { %v2293_v1 = vadd.f32 %v2292_v62, %v2222_v51  ;;  %v2505_v51 = vld [vmem:[%s6981_s3 + $0x690] sm:$0xff]  ;;  %v2502_v62 = vld [vmem:[%s6981_s3 + $0x678] sm:$0xff] }
 0x2d9   :  { %2708 = vmatprep.mubr.f32.mxu1 %v2293_v1 }
 0x2da   :  { %2709 = vmatmul.mubr.f32.vlgmr.msra.gmra.mxu1 %v6769_v11 }
 0x2db   :  { %2787 = vmatpush1.msra.mxu1 %v2485_v53  ;;  %2850 = vmatprep.mubr.f32.mxu1 %v2293_v1  ;;  %v2501_v1 = vld [vmem:[%s6981_s3 + $0x670] sm:$0xff]  ;;  %v2498_v53 = vld [vmem:[%s6981_s3 + $0x658] sm:$0xff] }
 0x2dc   :  { %2788 = vmatprep.subr.mxu1 %v2482_v3  ;;  %v2497_v3 = vld [vmem:[%s6981_s3 + $0x650] sm:$0xff] }
 0x2dd   :  { %2789 = vmatpush1.msra.mxu1 %v2481_v56  ;;  %v2494_v56 = vld [vmem:[%s6981_s3 + $0x638] sm:$0xff] }
 0x2de   :  { %2790 = vmatprep.subr.mxu1 %v2478_v58  ;;  %v2493_v58 = vld [vmem:[%s6981_s3 + $0x630] sm:$0xff] }
 0x2df   :  { %2791 = vmatpush1.msra.mxu1 %v2477_v61  ;;  %v2490_v61 = vld [vmem:[%s6981_s3 + $0x618] sm:$0xff] }
 0x2e0   :  { %2792 = vmatprep.subr.mxu1 %v2474_v36  ;;  %v2489_v36 = vld [vmem:[%s6981_s3 + $0x610] sm:$0xff]  ;;  %s2924_s3 = smov [#allocation2]  }
 0x2e1   :  { %2793 = vmatpush1.msra.mxu1 %v2473_v63 }
 0x2e2   :  { %2794 = vmatprep.subr.mxu1 %v2470_v42  ;;  %v2551_v42 = vld [vmem:[%s6982_s4] sm:$0xf]  ;;  %s2886_s4 = sshll.u32 %s2924_s3, 4  ;;  %s2887_s4 = int_to_ptr.vmem [resolvable:$true] %s2886_s4 }
 0x2e3   :  { %2795 = vmatpush1.msra.mxu1 %v2469_v22  ;;  %s2901_s0 = scalar_lea.vmem %s2887_s4, 128  ;;  %p2906_p1 = scmp.lt.s32.totalorder %s2887_s4, %s2887_s4 }
 0x2e4   :  { %2796 = vmatprep.subr.mxu1 %v2466_v30  ;;  %p2902_p0 = scmp.ne.s32.totalorder %s2887_s4, %s2901_s0  ;;  %p2907_p2 = scmp.lt.s32.totalorder %s2901_s0, %s2901_s0 }
 0x2e5   :  { %2797 = vmatpush1.msra.mxu1 %v2465_v0  ;;  %v2560_v0 = vrot.slane %v2551_v42, %v1057_v47 }
 0x2e6   :  { %2798 = vmatprep.subr.mxu1 %v2462_v2  ;;  %p2908_p3 = por %p2907_p2, %p2906_p1 }
 0x2e7   :  { %2799 = vmatpush1.msra.mxu1 %v2461_v4  ;;  %v2556_v4 = vrot.slane %v2551_v42, %v1053_v7 }
 0x2e8   :  { %2800 = vmatprep.subr.mxu1 %v2458_v5  ;;  %p2909_p4 = pnand %p2908_p3, %p2902_p0 }
 0x2e9   :  { %2801 = vmatpush1.msra.mxu1 %v2457_v6 }
 0x2ea   :  { %2802 = vmatprep.subr.mxu1 %v2454_v9  ;;  %v2564_v9 = vrot.slane %v2551_v42, %v1061_v20 }
 0x2eb   :  { %2803 = vmatpush1.msra.mxu1 %v2453_v10 }
 0x2ec   :  { %2804 = vmatprep.subr.mxu1 %v2450_v23 }
 0x2ed   :  { %2805 = vmatpush1.msra.mxu1 %v2449_v12 }
 0x2ee   :  { %2806 = vmatprep.subr.mxu1 %v2446_v14 }
 0x2ef   :  { %2807 = vmatpush1.msra.mxu1 %v2445_v60 }
 0x2f0   :  { %2808 = vmatprep.subr.mxu1 %v2442_v15 }
 0x2f1   :  { %2809 = vmatpush1.msra.mxu1 %v2441_v37 }
 0x2f2   :  { %2810 = vmatprep.subr.mxu1 %v2438_v18 }
 0x2f3   :  { %2811 = vmatpush1.msra.mxu1 %v2437_v54 }
 0x2f4   :  { %2812 = vmatprep.subr.mxu1 %v2434_v31 }
 0x2f5   :  { %2813 = vmatpush1.msra.mxu1 %v2433_v25 }
 0x2f6   :  { %2814 = vmatprep.subr.mxu1 %v2430_v43 }
 0x2f7   :  { %2815 = vmatpush1.msra.mxu1 %v2429_v57 }
 0x2f8   :  { %2816 = vmatprep.subr.mxu1 %v2426_v27 }
 0x2f9   :  { %2817 = vmatpush1.msra.mxu1 %v2425_v13 }
 0x2fa   :  { %2818 = vmatprep.subr.mxu1 %v2550_v28 }
 0x2fb   :  { %2819 = vmatpush2.msra.mxu1 %v2549_v48 }
 0x2fc   :  { %2820 = vmatprep.subr.mxu1 %v2546_v17 }
 0x2fd   :  { %2821 = vmatpush2.msra.mxu1 %v2545_v32 }
 0x2fe   :  { %2822 = vmatprep.subr.mxu1 %v2542_v33 }
 0x2ff   :  { %2823 = vmatpush2.msra.mxu1 %v2541_v34 }
 0x300   :  { %2824 = vmatprep.subr.mxu1 %v2538_v35 }
 0x301   :  { %2825 = vmatpush2.msra.mxu1 %v2537_v46 }
 0x302   :  { %2826 = vmatprep.subr.mxu1 %v2534_v38 }
 0x303   :  { %2827 = vmatpush2.msra.mxu1 %v2533_v19 }
 0x304   :  { %2828 = vmatprep.subr.mxu1 %v2530_v39 }
 0x305   :  { %2829 = vmatpush2.msra.mxu1 %v2529_v40 }
 0x306   :  { %2830 = vmatprep.subr.mxu1 %v2526_v26 }
 0x307   :  { %2831 = vmatpush2.msra.mxu1 %v2525_v45 }
 0x308   :  { %2832 = vmatprep.subr.mxu1 %v2522_v59 }
 0x309   :  { %2833 = vmatpush2.msra.mxu1 %v2521_v55 }
 0x30a   :  { %2834 = vmatprep.subr.mxu1 %v2518_v16 }
 0x30b   :  { %2835 = vmatpush2.msra.mxu1 %v2517_v29 }
 0x30c   :  { %2836 = vmatprep.subr.mxu1 %v2514_v44 }
 0x30d   :  { %2837 = vmatpush2.msra.mxu1 %v2513_v21 }
 0x30e   :  { %2838 = vmatprep.subr.mxu1 %v2510_v49 }
 0x30f   :  { %2839 = vmatpush2.msra.mxu1 %v2509_v50 }
 0x310   :  { %2840 = vmatprep.subr.mxu1 %v2506_v8 }
 0x311   :  { %2841 = vmatpush2.msra.mxu1 %v2505_v51 }
 0x312   :  { %2842 = vmatprep.subr.mxu1 %v2502_v62 }
 0x313   :  { %2843 = vmatpush2.msra.mxu1 %v2501_v1  ;;  %v2639_v63 = vpop.f32.mrf.mxu0 }
 0x314   :  { %2844 = vmatprep.subr.mxu1 %v2498_v53  ;;  %v2640_v23 = vadd.f32 %v2639_v63, %v2556_v4 }
 0x315   :  { %2845 = vmatpush2.msra.mxu1 %v2497_v3  ;;  %v2641_v22 = vpop.f32.mrf.mxu0 }
 0x316   :  { %2846 = vmatprep.subr.mxu1 %v2494_v56  ;;  %v2642_v6 = vadd.f32 %v2641_v22, %v2560_v0 }
 0x317   :  { %2847 = vmatpush2.msra.mxu1 %v2493_v58 }
 0x318   :  { %2848 = vmatprep.subr.mxu1 %v2490_v61 }
 0x319   :  { %2849 = vmatpush2.msra.mxu1 %v2489_v36 }
 0x31a   :  { %2851 = vmatmul.mubr.f32.vlgmr.msra.gmra.mxu1 %v6769_v11  ;;  %v2568_v11 = vrot.slane %v2551_v42, %v1065_v24 }
 0x353   :  { %v2781_v2 = vpop.f32.mrf.mxu0 }
 0x354   :  { %v2782_v60 = vadd.f32 %v2781_v2, %v2564_v9 }
 0x355   :  { %v2783_v10 = vpop.f32.mrf.mxu0 }
 0x356   :  { %v2784_v15 = vadd.f32 %v2783_v10, %v2568_v11 }
 0x39a   :  { %v2710_v30 = vpop.f32.mrf.mxu1 }
 0x39b   :  { %v2711_v37 = vadd.f32 %v2710_v30, %v2640_v23 }
 0x39c   :  { %v2712_v5 = vpop.f32.mrf.mxu1 }
 0x39d   :  { %v2713_v12 = vadd.f32 %v2712_v5, %v2642_v6 }
 0x39f   :  { %v2861_v18 = vcombine.low %v2711_v37, %v2713_v12 }
 0x3a1   :  { %v2869_v25 = vrot.slane %v2861_v18, %v3291_v52 }
 0x3da   :  { %v2852_v14 = vpop.f32.mrf.mxu1 }
 0x3db   :  { %v2853_v54 = vadd.f32 %v2852_v14, %v2782_v60 }
 0x3dc   :  { %v2854_v47 = vpop.f32.mrf.mxu1 }
 0x3dd   :  { %v2855_v31 = vadd.f32 %v2854_v47, %v2784_v15 }
 0x3df   :  { %v2862_v7 = vcombine.low %v2853_v54, %v2855_v31 }
 0x3e1   :  { %v2876_v20 = vrot.slane %v2862_v7, %v3291_v52 }
 0x3e3   :  { %v2877_v41 = vcombine.low %v2869_v25, %v2876_v20 }
 0x3e5   :  { %2879 = vst [vmem:[#allocation2] sm:$0xff] %v2877_v41 }
 0x3e6   :  { %2912 = shalt.err (!%p2909_p4)
}
 0x3e7   :  { %2889 = dma.vmem_to_hbm [thread:$0]  %s2887_s4, 128, %s6983_s5, [#allocation3]  }
 0x3e8   :  { %2921 = dma.done.wait [#allocation3], 128  }
 0x3e9   :  { %2922 = vsyncadd [#allocation3], 4294967168 }
 0x3ea   :  { %2893 = vsyncpa [#allocation3], 1 }

</bundles_post_ra>
